<compile_context>
chip_gen: v7x
topology: tpu7x:2x2x1
jax: 0.10.0
libtpu: 0.0.40
codegen_flags: <defaults>
</compile_context>

<pallas_src>
import functools

import numpy as np
import jax
import jax.numpy as jnp
from jax.experimental import pallas as pl
from jax.experimental.pallas import tpu as pltpu

IN_EPS = 1e-5
LEAKY_SLOPE = 0.2
VMEM_LIMIT = 48 * 1024 * 1024  # < 64 MiB physical VMEM on v7x; fine on v5e/v6e
KSIZE, STRIDE, PAD = 4, 2, 1   # every main-module conv is 4x4 / stride 2 / pad 1


# ---------------------------------------------------------------------------
# Pallas kernels
# ---------------------------------------------------------------------------
def conv_in_lrelu_kernel(p_ref, w_ref, gb_ref, o_ref, acc_ref, *, n_batch, s_out):
    """Fused Conv (im2col matmul, bf16 MXU, K-split) + InstanceNorm + LeakyReLU.

    grid = (c_out // c_tile, K // k_tile); K axis is the inner reduction axis.
    p_ref  : (N*S, k_tile)      bf16 im2col patch slab (whole batch)
    w_ref  : (k_tile, c_tile)   bf16 weight slab
    gb_ref : (2, c_tile)        f32  [gamma; beta]
    o_ref  : (N, S, c_tile)     bf16 output tile (resident across K axis)
    acc_ref: (N*S, c_tile)      f32  VMEM accumulator scratch
    """
    k_idx = pl.program_id(1)

    @pl.when(k_idx == 0)
    def _():
        acc_ref[...] = jnp.zeros_like(acc_ref)

    acc_ref[...] += jnp.dot(p_ref[...], w_ref[...],
                            preferred_element_type=jnp.float32)

    @pl.when(k_idx == pl.num_programs(1) - 1)
    def _():
        tc = acc_ref.shape[1]
        conv = acc_ref[...].reshape(n_batch, s_out, tc)
        mean = jnp.mean(conv, axis=1, keepdims=True)                    # (N,1,TC)
        var = jnp.mean(conv * conv, axis=1, keepdims=True) - mean * mean
        var = jnp.maximum(var, 0.0)                                     # avoid NaN
        a = gb_ref[0:1, :] * jax.lax.rsqrt(var + IN_EPS)                # (N,1,TC)
        b = gb_ref[1:2, :] - mean * a                                   # (N,1,TC)
        y = conv * a + b
        y = jnp.where(y >= 0.0, y, LEAKY_SLOPE * y)
        o_ref[...] = y.astype(o_ref.dtype)


def conv_in_lrelu_final_kernel(p_ref, w_ref, gb_ref, wf_ref, o_ref, acc_ref,
                               *, n_batch, s_out):
    """Last main layer fused with the spatial part of the final 4x4 valid conv.

    Emits out[n, c] = sum_s leakyrelu(IN(conv))[n, s, c] * wf[s, c]; the model
    output is then just a lane-sum over C plus the final bias (XLA glue).
    p_ref  : (N*S, k_tile) bf16      w_ref : (k_tile, c_tile) bf16
    gb_ref : (2, c_tile)   f32       wf_ref: (S, c_tile)      f32
    o_ref  : (N, c_tile)   f32       acc_ref: (N*S, c_tile)   f32 scratch
    """
    k_idx = pl.program_id(1)

    @pl.when(k_idx == 0)
    def _():
        acc_ref[...] = jnp.zeros_like(acc_ref)

    acc_ref[...] += jnp.dot(p_ref[...], w_ref[...],
                            preferred_element_type=jnp.float32)

    @pl.when(k_idx == pl.num_programs(1) - 1)
    def _():
        tc = acc_ref.shape[1]
        conv = acc_ref[...].reshape(n_batch, s_out, tc)
        mean = jnp.mean(conv, axis=1, keepdims=True)
        var = jnp.mean(conv * conv, axis=1, keepdims=True) - mean * mean
        var = jnp.maximum(var, 0.0)
        a = gb_ref[0:1, :] * jax.lax.rsqrt(var + IN_EPS)
        b = gb_ref[1:2, :] - mean * a
        y = conv * a + b
        y = jnp.where(y >= 0.0, y, LEAKY_SLOPE * y)                     # (N,S,TC)
        o_ref[...] = jnp.sum(y * wf_ref[...], axis=1)                   # (N,TC)


# ---------------------------------------------------------------------------
# Wrappers (plain-JAX glue + pallas_call)
# ---------------------------------------------------------------------------
def im2col_nhwc(x, k, stride, pad):
    """x: (N, H, W, C) -> patches (N*Ho*Wo, k*k*C), inner order (kh, kw, c)."""
    x = jnp.pad(x, ((0, 0), (pad, pad), (pad, pad), (0, 0)))
    n, h, w, c = x.shape
    ho = (h - k) // stride + 1
    wo = (w - k) // stride + 1
    taps = []
    for kh in range(k):
        for kw in range(k):
            taps.append(x[:, kh:kh + stride * ho:stride, kw:kw + stride * wo:stride, :])
    p = jnp.stack(taps, axis=3)                   # (N, Ho, Wo, k*k, C)
    return p.reshape(n * ho * wo, k * k * c), ho, wo


def _choose_tiles(k_dim, c_out, c_tile, k_tile):
    if c_tile is None:
        # channel grid extent >= 2 so v7x's two TCs both get work; tiles stay
        # lane-dense (>= 128).  Cost on single-TC v5e/v6e: one ~0.35 us step.
        c_tile = max(128, c_out // 2)
    c_tile = min(c_tile, c_out)
    k_tile = min(k_tile, k_dim)
    assert c_out % c_tile == 0 and k_dim % k_tile == 0
    return c_tile, k_tile


def conv_in_lrelu_layer(patches, w_mat, gb, *, n_batch, s_out,
                        c_tile=None, k_tile=2048, out_dtype=jnp.bfloat16):
    """patches: (N*S, K) bf16; w_mat: (K, C_out) bf16; gb: (2, C_out) f32."""
    ns, k_dim = patches.shape
    c_out = w_mat.shape[1]
    c_tile, k_tile = _choose_tiles(k_dim, c_out, c_tile, k_tile)
    kernel = functools.partial(conv_in_lrelu_kernel, n_batch=n_batch, s_out=s_out)
    return pl.pallas_call(
        kernel,
        out_shape=jax.ShapeDtypeStruct((n_batch, s_out, c_out), out_dtype),
        grid_spec=pltpu.PrefetchScalarGridSpec(
            num_scalar_prefetch=0,
            grid=(c_out // c_tile, k_dim // k_tile),
            in_specs=[
                pl.BlockSpec((ns, k_tile), lambda c, kk: (0, kk)),
                pl.BlockSpec((k_tile, c_tile), lambda c, kk: (kk, c)),
                pl.BlockSpec((2, c_tile), lambda c, kk: (0, c)),
            ],
            out_specs=pl.BlockSpec((n_batch, s_out, c_tile), lambda c, kk: (0, 0, c)),
            scratch_shapes=[pltpu.VMEM((ns, c_tile), jnp.float32)],
        ),
        compiler_params=pltpu.CompilerParams(
            dimension_semantics=("parallel", "arbitrary"),
            vmem_limit_bytes=VMEM_LIMIT,
        ),
    )(patches, w_mat, gb)


def conv_in_lrelu_final_layer(patches, w_mat, gb, wf_r, *, n_batch, s_out,
                              c_tile=None, k_tile=2048):
    """Last main layer + spatial reduction of the final conv. Returns (N, C_out) f32."""
    ns, k_dim = patches.shape
    c_out = w_mat.shape[1]
    c_tile, k_tile = _choose_tiles(k_dim, c_out, c_tile, k_tile)
    kernel = functools.partial(conv_in_lrelu_final_kernel, n_batch=n_batch, s_out=s_out)
    return pl.pallas_call(
        kernel,
        out_shape=jax.ShapeDtypeStruct((n_batch, c_out), jnp.float32),
        grid_spec=pltpu.PrefetchScalarGridSpec(
            num_scalar_prefetch=0,
            grid=(c_out // c_tile, k_dim // k_tile),
            in_specs=[
                pl.BlockSpec((ns, k_tile), lambda c, kk: (0, kk)),
                pl.BlockSpec((k_tile, c_tile), lambda c, kk: (kk, c)),
                pl.BlockSpec((2, c_tile), lambda c, kk: (0, c)),
                pl.BlockSpec((s_out, c_tile), lambda c, kk: (0, c)),
            ],
            out_specs=pl.BlockSpec((n_batch, c_tile), lambda c, kk: (0, c)),
            scratch_shapes=[pltpu.VMEM((ns, c_tile), jnp.float32)],
        ),
        compiler_params=pltpu.CompilerParams(
            dimension_semantics=("parallel", "arbitrary"),
            vmem_limit_bytes=VMEM_LIMIT,
        ),
    )(patches, w_mat, gb, wf_r)


# ---------------------------------------------------------------------------
# One-time weight packing (hoisted out of the jitted forward)
# ---------------------------------------------------------------------------
def pack_params(params):
    """Pre-pack conv weights to (K, C_out) bf16, stack gamma/beta, flatten the
    final 4x4 conv.  Layer-1 C_in is padded to a multiple of 8 so K is a full
    multiple of 128 lanes.  Run once; pass the result into the jitted forward."""
    packed_layers = []
    for i, (w, _b, g, beta) in enumerate(params["layers"]):
        c_out, c_in, k, _ = w.shape
        if c_in % 8 != 0:
            pad_c = 8 - c_in % 8
            w = jnp.pad(w, ((0, 0), (0, pad_c), (0, 0), (0, 0)))
            c_in += pad_c
        # (kh, kw, c_in) inner order, matching im2col_nhwc
        w_mat = w.transpose(2, 3, 1, 0).reshape(k * k * c_in, c_out).astype(jnp.bfloat16)
        gb = jnp.stack([g, beta], axis=0).astype(jnp.float32)
        packed_layers.append((w_mat, gb))
    wf, bf = params["final"]
    kf = wf.shape[-1]
    # (s, c) with s = kh*kf + kw, matching the im2col spatial flattening
    wf_r = wf[0].transpose(1, 2, 0).reshape(kf * kf, wf.shape[1]).astype(jnp.float32)
    return {"layers": packed_layers, "final": (wf_r, bf.astype(jnp.float32))}


# ---------------------------------------------------------------------------
# Forward pass (jitted; consumes pre-packed params)
# ---------------------------------------------------------------------------
def wgan_discriminator_forward(x_nchw, packed):
    """x_nchw: (N, C_in, R, R) -> (N, 1, 1, 1)."""
    n = x_nchw.shape[0]
    h = jnp.transpose(x_nchw, (0, 2, 3, 1)).astype(jnp.bfloat16)   # NHWC once, bf16
    layers = packed["layers"]

    # all main layers except the last (conv bias is a no-op before InstanceNorm)
    for (w_mat, gb) in layers[:-1]:
        k_dim, c_out = w_mat.shape
        c_in_packed = k_dim // (KSIZE * KSIZE)
        if h.shape[-1] < c_in_packed:                               # layer-1 C_in pad
            h = jnp.pad(h, ((0, 0), (0, 0), (0, 0), (0, c_in_packed - h.shape[-1])))
        patches, ho, wo = im2col_nhwc(h, KSIZE, STRIDE, PAD)
        out = conv_in_lrelu_layer(patches, w_mat, gb, n_batch=n, s_out=ho * wo)
        h = out.reshape(n, ho, wo, c_out)                           # bf16, channels-last

    # last main layer (-> 4x4 x 1024) fused with the final Conv2d(1024,1,4,1,0)
    w_mat, gb = layers[-1]
    c_out = w_mat.shape[1]
    patches, ho, wo = im2col_nhwc(h, KSIZE, STRIDE, PAD)
    wf_r, bf = packed["final"]
    # fusion validity: the final valid 4x4 conv must cover the whole last map
    assert wf_r.shape == (ho * wo, c_out), (wf_r.shape, ho, wo, c_out)
    partial = conv_in_lrelu_final_layer(patches, w_mat, gb, wf_r,
                                        n_batch=n, s_out=ho * wo)   # (N, C_out) f32
    scores = jnp.sum(partial, axis=1) + bf                          # tiny lane-sum
    return scores.reshape(n, 1, 1, 1)


# ---------------------------------------------------------------------------
# Pure-JAX reference (mirrors the PyTorch module, full f32)
# ---------------------------------------------------------------------------
def ref_forward(x, params):
    def conv(x, w, b, stride, pad):
        y = jax.lax.conv_general_dilated(
            x, w, (stride, stride), [(pad, pad), (pad, pad)],
            dimension_numbers=("NCHW", "OIHW", "NCHW"),
            precision=jax.lax.Precision.HIGHEST)
        return y + b.reshape(1, -1, 1, 1)

    def inorm(x, g, beta):
        mean = jnp.mean(x, axis=(2, 3), keepdims=True)
        var = jnp.mean((x - mean) ** 2, axis=(2, 3), keepdims=True)
        xhat = (x - mean) * jax.lax.rsqrt(var + IN_EPS)
        return xhat * g.reshape(1, -1, 1, 1) + beta.reshape(1, -1, 1, 1)

    def lrelu(x):
        return jnp.where(x >= 0.0, x, LEAKY_SLOPE * x)

    h = x
    for (w, b, g, beta) in params["layers"]:
        h = lrelu(inorm(conv(h, w, b, 2, 1), g, beta))
    wf, bf = params["final"]
    return conv(h, wf, bf, 1, 0)


# ---------------------------------------------------------------------------
# Deterministic parameter init (matches nn.Conv2d / nn.InstanceNorm2d shapes)
# ---------------------------------------------------------------------------
def init_params(key, input_channels):
    def conv_init(k, c_out, c_in, ksz):
        k1, k2 = jax.random.split(k)
        fan_in = c_in * ksz * ksz
        bound = 1.0 / np.sqrt(fan_in)
        w = jax.random.uniform(k1, (c_out, c_in, ksz, ksz), jnp.float32, -bound, bound)
        b = jax.random.uniform(k2, (c_out,), jnp.float32, -bound, bound)
        return w, b

    keys = jax.random.split(key, 8)
    layers = []
    chans = [(input_channels, 256), (256, 512), (512, 1024)]
    for i, (cin, cout) in enumerate(chans):
        w, b = conv_init(keys[2 * i], cout, cin, 4)
        g = 1.0 + 0.1 * jax.random.normal(jax.random.fold_in(keys[2 * i + 1], 0), (cout,), jnp.float32)
        beta = 0.1 * jax.random.normal(jax.random.fold_in(keys[2 * i + 1], 1), (cout,), jnp.float32)
        layers.append((w, b, g, beta))
    wf, bf = conv_init(keys[6], 1, 1024, 4)
    return {"layers": layers, "final": (wf, bf)}


if __name__ == "__main__":
    batch = 2
    input_channels = 4
    input_resolution = 32  # module asserts resolution >= 32; 32 -> no extra layers

    key = jax.random.PRNGKey(0)
    kx, kp = jax.random.split(key)
    x = jax.random.normal(kx, (batch, input_channels, input_resolution, input_resolution),
                          dtype=jnp.float32)
    params = init_params(kp, input_channels)

    packed = pack_params(params)                 # one-time, outside the jitted forward
    fwd = jax.jit(wgan_discriminator_forward)
    out = jax.block_until_ready(fwd(x, packed))
    assert out.shape == (batch, 1, 1, 1), out.shape

    ref = jax.block_until_ready(ref_forward(x, params))
    # bf16 matmul operands / bf16 inter-layer activations vs the f32
    # HIGHEST-precision reference -> loose-ish tolerance.
    np.testing.assert_allclose(np.asarray(out), np.asarray(ref), rtol=5e-2, atol=5e-2)

    print("KERNEL_OK")
</pallas_src>

<mosaic_0001>
module attributes {stable_mosaic.version = 11 : i64} {
  func.func @conv_in_lrelu_kernel(%arg0: i32, %arg1: i32, %arg2: memref<512x128xbf16, #tpu.memory_space<vmem>>, %arg3: memref<128x128xbf16, #tpu.memory_space<vmem>>, %arg4: memref<2x128xf32, #tpu.memory_space<vmem>>, %arg5: memref<2x256x128xbf16, #tpu.memory_space<vmem>>, %arg6: memref<512x128xf32, #tpu.memory_space<vmem>>) attributes {dimension_semantics = [#tpu.dimension_semantics<parallel>, #tpu.dimension_semantics<arbitrary>], iteration_bounds = array<i64: 2, 1>, scalar_prefetch = 0 : i64, scratch_operands = 1 : i64, tpu.core_type = #tpu.core_type<tc>, window_params = [{transform_indices = @transform_0, window_bounds = array<i64: 512, 128>}, {transform_indices = @transform_1, window_bounds = array<i64: 128, 128>}, {transform_indices = @transform_2, window_bounds = array<i64: 2, 128>}, {transform_indices = @transform_3, window_bounds = array<i64: 2, 256, 128>}]} {
    %c0_i32 = arith.constant 0 : i32
    %0 = arith.cmpi eq, %arg1, %c0_i32 : i32
    %1 = arith.extui %0 : i1 to i32
    %c0_i32_0 = arith.constant 0 : i32
    %2 = arith.cmpi ne, %1, %c0_i32_0 : i32
    scf.if %2 {
      %cst_10 = arith.constant 0.000000e+00 : f32
      %12 = vector.broadcast %cst_10 : f32 to vector<512x128xf32>
      %c0_11 = arith.constant 0 : index
      %c0_12 = arith.constant 0 : index
      %13 = vector.load %arg6[%c0_11, %c0_12] : memref<512x128xf32, #tpu.memory_space<vmem>>, vector<512x128xf32>
      tpu.vector_store %arg6[%c0_11, %c0_12], %12 {strides = array<i32>} : memref<512x128xf32, #tpu.memory_space<vmem>>, vector<512x128xf32>,
    } else {
    }
    %c0 = arith.constant 0 : index
    %c0_1 = arith.constant 0 : index
    %3 = vector.load %arg6[%c0, %c0_1] : memref<512x128xf32, #tpu.memory_space<vmem>>, vector<512x128xf32>
    %c0_2 = arith.constant 0 : index
    %c0_3 = arith.constant 0 : index
    %4 = vector.load %arg2[%c0_2, %c0_3] : memref<512x128xbf16, #tpu.memory_space<vmem>>, vector<512x128xbf16>
    %c0_4 = arith.constant 0 : index
    %c0_5 = arith.constant 0 : index
    %5 = vector.load %arg3[%c0_4, %c0_5] : memref<128x128xbf16, #tpu.memory_space<vmem>>, vector<128x128xbf16>
    %cst = arith.constant dense<0.000000e+00> : vector<512x128xf32>
    %6 = tpu.matmul %4, %5, %cst {dimension_numbers = #tpu.dot_dimension_numbers<[1], [0], [0], [1], [0, 0, 1, 1], [], []>} : vector<512x128xbf16>, vector<128x128xbf16>, vector<512x128xf32> -> vector<512x128xf32>
    %7 = arith.addf %3, %6 : vector<512x128xf32>
    %c0_6 = arith.constant 0 : index
    %c0_7 = arith.constant 0 : index
    %8 = vector.load %arg6[%c0_6, %c0_7] : memref<512x128xf32, #tpu.memory_space<vmem>>, vector<512x128xf32>
    tpu.vector_store %arg6[%c0_6, %c0_7], %7 {strides = array<i32>} : memref<512x128xf32, #tpu.memory_space<vmem>>, vector<512x128xf32>,
    %c0_i32_8 = arith.constant 0 : i32
    %9 = arith.cmpi eq, %arg1, %c0_i32_8 : i32
    %10 = arith.extui %9 : i1 to i32
    %c0_i32_9 = arith.constant 0 : i32
    %11 = arith.cmpi ne, %10, %c0_i32_9 : i32
    scf.if %11 {
      %c0_10 = arith.constant 0 : index
      %c0_11 = arith.constant 0 : index
      %12 = vector.load %arg6[%c0_10, %c0_11] : memref<512x128xf32, #tpu.memory_space<vmem>>, vector<512x128xf32>
      %13 = vector.shape_cast %12 : vector<512x128xf32> to vector<2x256x128xf32>
      %cst_12 = arith.constant dense<0.000000e+00> : vector<2x128xf32>
      %14 = vector.multi_reduction <add>, %13, %cst_12 [1] : vector<2x256x128xf32> to vector<2x128xf32>
      %15 = vector.shape_cast %14 : vector<2x128xf32> to vector<2x1x128xf32>
      %cst_13 = arith.constant 2.560000e+02 : f32
      %16 = vector.broadcast %cst_13 : f32 to vector<2x1x128xf32>
      %17 = arith.divf %15, %16 : vector<2x1x128xf32>
      %18 = arith.mulf %13, %13 : vector<2x256x128xf32>
      %cst_14 = arith.constant dense<0.000000e+00> : vector<2x128xf32>
      %19 = vector.multi_reduction <add>, %18, %cst_14 [1] : vector<2x256x128xf32> to vector<2x128xf32>
      %20 = vector.shape_cast %19 : vector<2x128xf32> to vector<2x1x128xf32>
      %cst_15 = arith.constant 2.560000e+02 : f32
      %21 = vector.broadcast %cst_15 : f32 to vector<2x1x128xf32>
      %22 = arith.divf %20, %21 : vector<2x1x128xf32>
      %23 = arith.mulf %17, %17 : vector<2x1x128xf32>
      %24 = arith.subf %22, %23 : vector<2x1x128xf32>
      %cst_16 = arith.constant 0.000000e+00 : f32
      %25 = vector.broadcast %cst_16 : f32 to vector<2x1x128xf32>
      %26 = arith.maximumf %24, %25 : vector<2x1x128xf32>
      %c0_17 = arith.constant 0 : index
      %c0_18 = arith.constant 0 : index
      %27 = vector.load %arg4[%c0_17, %c0_18] : memref<2x128xf32, #tpu.memory_space<vmem>>, vector<1x128xf32>
      %cst_19 = arith.constant 9.99999974E-6 : f32
      %28 = vector.broadcast %cst_19 : f32 to vector<2x1x128xf32>
      %29 = arith.addf %26, %28 : vector<2x1x128xf32>
      %30 = math.rsqrt %29 : vector<2x1x128xf32>
      %31 = vector.shape_cast %27 : vector<1x128xf32> to vector<1x1x128xf32>
      %32 = vector.broadcast %31 : vector<1x1x128xf32> to vector<2x1x128xf32>
      %33 = arith.mulf %32, %30 : vector<2x1x128xf32>
      %c1 = arith.constant 1 : index
      %c0_20 = arith.constant 0 : index
      %34 = vector.load %arg4[%c1, %c0_20] : memref<2x128xf32, #tpu.memory_space<vmem>>, vector<1x128xf32>
      %35 = arith.mulf %17, %33 : vector<2x1x128xf32>
      %36 = vector.shape_cast %34 : vector<1x128xf32> to vector<1x1x128xf32>
      %37 = vector.broadcast %36 : vector<1x1x128xf32> to vector<2x1x128xf32>
      %38 = arith.subf %37, %35 : vector<2x1x128xf32>
      %39 = vector.broadcast %33 : vector<2x1x128xf32> to vector<2x256x128xf32>
      %40 = arith.mulf %13, %39 : vector<2x256x128xf32>
      %41 = vector.broadcast %38 : vector<2x1x128xf32> to vector<2x256x128xf32>
      %42 = arith.addf %40, %41 : vector<2x256x128xf32>
      %cst_21 = arith.constant 0.000000e+00 : f32
      %43 = vector.broadcast %cst_21 : f32 to vector<2x256x128xf32>
      %44 = arith.cmpf oge, %42, %43 : vector<2x256x128xf32>
      %cst_22 = arith.constant 2.000000e-01 : f32
      %45 = vector.broadcast %cst_22 : f32 to vector<2x256x128xf32>
      %46 = arith.mulf %45, %42 : vector<2x256x128xf32>
      %47 = arith.select %44, %42, %46 : vector<2x256x128xi1>, vector<2x256x128xf32>
      %48 = arith.truncf %47 : vector<2x256x128xf32> to vector<2x256x128xbf16>
      %c0_23 = arith.constant 0 : index
      %c0_24 = arith.constant 0 : index
      %c0_25 = arith.constant 0 : index
      %49 = vector.load %arg5[%c0_23, %c0_24, %c0_25] : memref<2x256x128xbf16, #tpu.memory_space<vmem>>, vector<2x256x128xbf16>
      tpu.vector_store %arg5[%c0_23, %c0_24, %c0_25], %48 {strides = array<i32>} : memref<2x256x128xbf16, #tpu.memory_space<vmem>>, vector<2x256x128xbf16>,
    } else {
    }
    return
  }
  func.func @transform_0(%arg0: i32, %arg1: i32) -> (i32, i32) {
    %c0_i32 = arith.constant 0 : i32
    %c0_i32_0 = arith.constant 0 : i32
    return %c0_i32, %arg1 : i32, i32
  }
  func.func @transform_1(%arg0: i32, %arg1: i32) -> (i32, i32) {
    %c0_i32 = arith.constant 0 : i32
    return %arg1, %arg0 : i32, i32
  }
  func.func @transform_2(%arg0: i32, %arg1: i32) -> (i32, i32) {
    %c0_i32 = arith.constant 0 : i32
    %c0_i32_0 = arith.constant 0 : i32
    return %c0_i32, %arg0 : i32, i32
  }
  func.func @transform_3(%arg0: i32, %arg1: i32) -> (i32, i32, i32) {
    %c0_i32 = arith.constant 0 : i32
    %c0_i32_0 = arith.constant 0 : i32
    %c0_i32_1 = arith.constant 0 : i32
    return %c0_i32, %c0_i32_0, %arg0 : i32, i32, i32
  }
}

module attributes {stable_mosaic.version = 11 : i64} {
  func.func @conv_in_lrelu_kernel(%arg0: i32, %arg1: i32, %arg2: memref<128x2048xbf16, #tpu.memory_space<vmem>>, %arg3: memref<2048x256xbf16, #tpu.memory_space<vmem>>, %arg4: memref<2x256xf32, #tpu.memory_space<vmem>>, %arg5: memref<2x64x256xbf16, #tpu.memory_space<vmem>>, %arg6: memref<128x256xf32, #tpu.memory_space<vmem>>) attributes {dimension_semantics = [#tpu.dimension_semantics<parallel>, #tpu.dimension_semantics<arbitrary>], iteration_bounds = array<i64: 2, 2>, scalar_prefetch = 0 : i64, scratch_operands = 1 : i64, tpu.core_type = #tpu.core_type<tc>, window_params = [{transform_indices = @transform_0, window_bounds = array<i64: 128, 2048>}, {transform_indices = @transform_1, window_bounds = array<i64: 2048, 256>}, {transform_indices = @transform_2, window_bounds = array<i64: 2, 256>}, {transform_indices = @transform_3, window_bounds = array<i64: 2, 64, 256>}]} {
    %c0_i32 = arith.constant 0 : i32
    %0 = arith.cmpi eq, %arg1, %c0_i32 : i32
    %1 = arith.extui %0 : i1 to i32
    %c0_i32_0 = arith.constant 0 : i32
    %2 = arith.cmpi ne, %1, %c0_i32_0 : i32
    scf.if %2 {
      %cst_9 = arith.constant 0.000000e+00 : f32
      %12 = vector.broadcast %cst_9 : f32 to vector<128x256xf32>
      %c0_10 = arith.constant 0 : index
      %c0_11 = arith.constant 0 : index
      %13 = vector.load %arg6[%c0_10, %c0_11] : memref<128x256xf32, #tpu.memory_space<vmem>>, vector<128x256xf32>
      tpu.vector_store %arg6[%c0_10, %c0_11], %12 {strides = array<i32>} : memref<128x256xf32, #tpu.memory_space<vmem>>, vector<128x256xf32>,
    } else {
    }
    %c0 = arith.constant 0 : index
    %c0_1 = arith.constant 0 : index
    %3 = vector.load %arg6[%c0, %c0_1] : memref<128x256xf32, #tpu.memory_space<vmem>>, vector<128x256xf32>
    %c0_2 = arith.constant 0 : index
    %c0_3 = arith.constant 0 : index
    %4 = vector.load %arg2[%c0_2, %c0_3] : memref<128x2048xbf16, #tpu.memory_space<vmem>>, vector<128x2048xbf16>
    %c0_4 = arith.constant 0 : index
    %c0_5 = arith.constant 0 : index
    %5 = vector.load %arg3[%c0_4, %c0_5] : memref<2048x256xbf16, #tpu.memory_space<vmem>>, vector<2048x256xbf16>
    %cst = arith.constant dense<0.000000e+00> : vector<128x256xf32>
    %6 = tpu.matmul %4, %5, %cst {dimension_numbers = #tpu.dot_dimension_numbers<[1], [0], [0], [1], [0, 0, 1, 1], [], []>} : vector<128x2048xbf16>, vector<2048x256xbf16>, vector<128x256xf32> -> vector<128x256xf32>
    %7 = arith.addf %3, %6 : vector<128x256xf32>
    %c0_6 = arith.constant 0 : index
    %c0_7 = arith.constant 0 : index
    %8 = vector.load %arg6[%c0_6, %c0_7] : memref<128x256xf32, #tpu.memory_space<vmem>>, vector<128x256xf32>
    tpu.vector_store %arg6[%c0_6, %c0_7], %7 {strides = array<i32>} : memref<128x256xf32, #tpu.memory_space<vmem>>, vector<128x256xf32>,
    %c1_i32 = arith.constant 1 : i32
    %9 = arith.cmpi eq, %arg1, %c1_i32 : i32
    %10 = arith.extui %9 : i1 to i32
    %c0_i32_8 = arith.constant 0 : i32
    %11 = arith.cmpi ne, %10, %c0_i32_8 : i32
    scf.if %11 {
      %c0_9 = arith.constant 0 : index
      %c0_10 = arith.constant 0 : index
      %12 = vector.load %arg6[%c0_9, %c0_10] : memref<128x256xf32, #tpu.memory_space<vmem>>, vector<128x256xf32>
      %13 = vector.shape_cast %12 : vector<128x256xf32> to vector<2x64x256xf32>
      %cst_11 = arith.constant dense<0.000000e+00> : vector<2x256xf32>
      %14 = vector.multi_reduction <add>, %13, %cst_11 [1] : vector<2x64x256xf32> to vector<2x256xf32>
      %15 = vector.shape_cast %14 : vector<2x256xf32> to vector<2x1x256xf32>
      %cst_12 = arith.constant 6.400000e+01 : f32
      %16 = vector.broadcast %cst_12 : f32 to vector<2x1x256xf32>
      %17 = arith.divf %15, %16 : vector<2x1x256xf32>
      %18 = arith.mulf %13, %13 : vector<2x64x256xf32>
      %cst_13 = arith.constant dense<0.000000e+00> : vector<2x256xf32>
      %19 = vector.multi_reduction <add>, %18, %cst_13 [1] : vector<2x64x256xf32> to vector<2x256xf32>
      %20 = vector.shape_cast %19 : vector<2x256xf32> to vector<2x1x256xf32>
      %cst_14 = arith.constant 6.400000e+01 : f32
      %21 = vector.broadcast %cst_14 : f32 to vector<2x1x256xf32>
      %22 = arith.divf %20, %21 : vector<2x1x256xf32>
      %23 = arith.mulf %17, %17 : vector<2x1x256xf32>
      %24 = arith.subf %22, %23 : vector<2x1x256xf32>
      %cst_15 = arith.constant 0.000000e+00 : f32
      %25 = vector.broadcast %cst_15 : f32 to vector<2x1x256xf32>
      %26 = arith.maximumf %24, %25 : vector<2x1x256xf32>
      %c0_16 = arith.constant 0 : index
      %c0_17 = arith.constant 0 : index
      %27 = vector.load %arg4[%c0_16, %c0_17] : memref<2x256xf32, #tpu.memory_space<vmem>>, vector<1x256xf32>
      %cst_18 = arith.constant 9.99999974E-6 : f32
      %28 = vector.broadcast %cst_18 : f32 to vector<2x1x256xf32>
      %29 = arith.addf %26, %28 : vector<2x1x256xf32>
      %30 = math.rsqrt %29 : vector<2x1x256xf32>
      %31 = vector.shape_cast %27 : vector<1x256xf32> to vector<1x1x256xf32>
      %32 = vector.broadcast %31 : vector<1x1x256xf32> to vector<2x1x256xf32>
      %33 = arith.mulf %32, %30 : vector<2x1x256xf32>
      %c1 = arith.constant 1 : index
      %c0_19 = arith.constant 0 : index
      %34 = vector.load %arg4[%c1, %c0_19] : memref<2x256xf32, #tpu.memory_space<vmem>>, vector<1x256xf32>
      %35 = arith.mulf %17, %33 : vector<2x1x256xf32>
      %36 = vector.shape_cast %34 : vector<1x256xf32> to vector<1x1x256xf32>
      %37 = vector.broadcast %36 : vector<1x1x256xf32> to vector<2x1x256xf32>
      %38 = arith.subf %37, %35 : vector<2x1x256xf32>
      %39 = vector.broadcast %33 : vector<2x1x256xf32> to vector<2x64x256xf32>
      %40 = arith.mulf %13, %39 : vector<2x64x256xf32>
      %41 = vector.broadcast %38 : vector<2x1x256xf32> to vector<2x64x256xf32>
      %42 = arith.addf %40, %41 : vector<2x64x256xf32>
      %cst_20 = arith.constant 0.000000e+00 : f32
      %43 = vector.broadcast %cst_20 : f32 to vector<2x64x256xf32>
      %44 = arith.cmpf oge, %42, %43 : vector<2x64x256xf32>
      %cst_21 = arith.constant 2.000000e-01 : f32
      %45 = vector.broadcast %cst_21 : f32 to vector<2x64x256xf32>
      %46 = arith.mulf %45, %42 : vector<2x64x256xf32>
      %47 = arith.select %44, %42, %46 : vector<2x64x256xi1>, vector<2x64x256xf32>
      %48 = arith.truncf %47 : vector<2x64x256xf32> to vector<2x64x256xbf16>
      %c0_22 = arith.constant 0 : index
      %c0_23 = arith.constant 0 : index
      %c0_24 = arith.constant 0 : index
      %49 = vector.load %arg5[%c0_22, %c0_23, %c0_24] : memref<2x64x256xbf16, #tpu.memory_space<vmem>>, vector<2x64x256xbf16>
      tpu.vector_store %arg5[%c0_22, %c0_23, %c0_24], %48 {strides = array<i32>} : memref<2x64x256xbf16, #tpu.memory_space<vmem>>, vector<2x64x256xbf16>,
    } else {
    }
    return
  }
  func.func @transform_0(%arg0: i32, %arg1: i32) -> (i32, i32) {
    %c0_i32 = arith.constant 0 : i32
    %c0_i32_0 = arith.constant 0 : i32
    return %c0_i32, %arg1 : i32, i32
  }
  func.func @transform_1(%arg0: i32, %arg1: i32) -> (i32, i32) {
    %c0_i32 = arith.constant 0 : i32
    return %arg1, %arg0 : i32, i32
  }
  func.func @transform_2(%arg0: i32, %arg1: i32) -> (i32, i32) {
    %c0_i32 = arith.constant 0 : i32
    %c0_i32_0 = arith.constant 0 : i32
    return %c0_i32, %arg0 : i32, i32
  }
  func.func @transform_3(%arg0: i32, %arg1: i32) -> (i32, i32, i32) {
    %c0_i32 = arith.constant 0 : i32
    %c0_i32_0 = arith.constant 0 : i32
    %c0_i32_1 = arith.constant 0 : i32
    return %c0_i32, %c0_i32_0, %arg0 : i32, i32, i32
  }
}

module attributes {stable_mosaic.version = 11 : i64} {
  func.func @conv_in_lrelu_final_kernel(%arg0: i32, %arg1: i32, %arg2: memref<32x2048xbf16, #tpu.memory_space<vmem>>, %arg3: memref<2048x512xbf16, #tpu.memory_space<vmem>>, %arg4: memref<2x512xf32, #tpu.memory_space<vmem>>, %arg5: memref<16x512xf32, #tpu.memory_space<vmem>>, %arg6: memref<2x512xf32, #tpu.memory_space<vmem>>, %arg7: memref<32x512xf32, #tpu.memory_space<vmem>>) attributes {dimension_semantics = [#tpu.dimension_semantics<parallel>, #tpu.dimension_semantics<arbitrary>], iteration_bounds = array<i64: 2, 4>, scalar_prefetch = 0 : i64, scratch_operands = 1 : i64, tpu.core_type = #tpu.core_type<tc>, window_params = [{transform_indices = @transform_0, window_bounds = array<i64: 32, 2048>}, {transform_indices = @transform_1, window_bounds = array<i64: 2048, 512>}, {transform_indices = @transform_2, window_bounds = array<i64: 2, 512>}, {transform_indices = @transform_3, window_bounds = array<i64: 16, 512>}, {transform_indices = @transform_4, window_bounds = array<i64: 2, 512>}]} {
    %c0_i32 = arith.constant 0 : i32
    %0 = arith.cmpi eq, %arg1, %c0_i32 : i32
    %1 = arith.extui %0 : i1 to i32
    %c0_i32_0 = arith.constant 0 : i32
    %2 = arith.cmpi ne, %1, %c0_i32_0 : i32
    scf.if %2 {
      %cst_9 = arith.constant 0.000000e+00 : f32
      %12 = vector.broadcast %cst_9 : f32 to vector<32x512xf32>
      %c0_10 = arith.constant 0 : index
      %c0_11 = arith.constant 0 : index
      %13 = vector.load %arg7[%c0_10, %c0_11] : memref<32x512xf32, #tpu.memory_space<vmem>>, vector<32x512xf32>
      tpu.vector_store %arg7[%c0_10, %c0_11], %12 {strides = array<i32>} : memref<32x512xf32, #tpu.memory_space<vmem>>, vector<32x512xf32>,
    } else {
    }
    %c0 = arith.constant 0 : index
    %c0_1 = arith.constant 0 : index
    %3 = vector.load %arg7[%c0, %c0_1] : memref<32x512xf32, #tpu.memory_space<vmem>>, vector<32x512xf32>
    %c0_2 = arith.constant 0 : index
    %c0_3 = arith.constant 0 : index
    %4 = vector.load %arg2[%c0_2, %c0_3] : memref<32x2048xbf16, #tpu.memory_space<vmem>>, vector<32x2048xbf16>
    %c0_4 = arith.constant 0 : index
    %c0_5 = arith.constant 0 : index
    %5 = vector.load %arg3[%c0_4, %c0_5] : memref<2048x512xbf16, #tpu.memory_space<vmem>>, vector<2048x512xbf16>
    %cst = arith.constant dense<0.000000e+00> : vector<32x512xf32>
    %6 = tpu.matmul %4, %5, %cst {dimension_numbers = #tpu.dot_dimension_numbers<[1], [0], [0], [1], [0, 0, 1, 1], [], []>} : vector<32x2048xbf16>, vector<2048x512xbf16>, vector<32x512xf32> -> vector<32x512xf32>
    %7 = arith.addf %3, %6 : vector<32x512xf32>
    %c0_6 = arith.constant 0 : index
    %c0_7 = arith.constant 0 : index
    %8 = vector.load %arg7[%c0_6, %c0_7] : memref<32x512xf32, #tpu.memory_space<vmem>>, vector<32x512xf32>
    tpu.vector_store %arg7[%c0_6, %c0_7], %7 {strides = array<i32>} : memref<32x512xf32, #tpu.memory_space<vmem>>, vector<32x512xf32>,
    %c3_i32 = arith.constant 3 : i32
    %9 = arith.cmpi eq, %arg1, %c3_i32 : i32
    %10 = arith.extui %9 : i1 to i32
    %c0_i32_8 = arith.constant 0 : i32
    %11 = arith.cmpi ne, %10, %c0_i32_8 : i32
    scf.if %11 {
      %c0_9 = arith.constant 0 : index
      %c0_10 = arith.constant 0 : index
      %12 = vector.load %arg7[%c0_9, %c0_10] : memref<32x512xf32, #tpu.memory_space<vmem>>, vector<32x512xf32>
      %13 = vector.shape_cast %12 : vector<32x512xf32> to vector<2x16x512xf32>
      %cst_11 = arith.constant dense<0.000000e+00> : vector<2x512xf32>
      %14 = vector.multi_reduction <add>, %13, %cst_11 [1] : vector<2x16x512xf32> to vector<2x512xf32>
      %15 = vector.shape_cast %14 : vector<2x512xf32> to vector<2x1x512xf32>
      %cst_12 = arith.constant 1.600000e+01 : f32
      %16 = vector.broadcast %cst_12 : f32 to vector<2x1x512xf32>
      %17 = arith.divf %15, %16 : vector<2x1x512xf32>
      %18 = arith.mulf %13, %13 : vector<2x16x512xf32>
      %cst_13 = arith.constant dense<0.000000e+00> : vector<2x512xf32>
      %19 = vector.multi_reduction <add>, %18, %cst_13 [1] : vector<2x16x512xf32> to vector<2x512xf32>
      %20 = vector.shape_cast %19 : vector<2x512xf32> to vector<2x1x512xf32>
      %cst_14 = arith.constant 1.600000e+01 : f32
      %21 = vector.broadcast %cst_14 : f32 to vector<2x1x512xf32>
      %22 = arith.divf %20, %21 : vector<2x1x512xf32>
      %23 = arith.mulf %17, %17 : vector<2x1x512xf32>
      %24 = arith.subf %22, %23 : vector<2x1x512xf32>
      %cst_15 = arith.constant 0.000000e+00 : f32
      %25 = vector.broadcast %cst_15 : f32 to vector<2x1x512xf32>
      %26 = arith.maximumf %24, %25 : vector<2x1x512xf32>
      %c0_16 = arith.constant 0 : index
      %c0_17 = arith.constant 0 : index
      %27 = vector.load %arg4[%c0_16, %c0_17] : memref<2x512xf32, #tpu.memory_space<vmem>>, vector<1x512xf32>
      %cst_18 = arith.constant 9.99999974E-6 : f32
      %28 = vector.broadcast %cst_18 : f32 to vector<2x1x512xf32>
      %29 = arith.addf %26, %28 : vector<2x1x512xf32>
      %30 = math.rsqrt %29 : vector<2x1x512xf32>
      %31 = vector.shape_cast %27 : vector<1x512xf32> to vector<1x1x512xf32>
      %32 = vector.broadcast %31 : vector<1x1x512xf32> to vector<2x1x512xf32>
      %33 = arith.mulf %32, %30 : vector<2x1x512xf32>
      %c1 = arith.constant 1 : index
      %c0_19 = arith.constant 0 : index
      %34 = vector.load %arg4[%c1, %c0_19] : memref<2x512xf32, #tpu.memory_space<vmem>>, vector<1x512xf32>
      %35 = arith.mulf %17, %33 : vector<2x1x512xf32>
      %36 = vector.shape_cast %34 : vector<1x512xf32> to vector<1x1x512xf32>
      %37 = vector.broadcast %36 : vector<1x1x512xf32> to vector<2x1x512xf32>
      %38 = arith.subf %37, %35 : vector<2x1x512xf32>
      %39 = vector.broadcast %33 : vector<2x1x512xf32> to vector<2x16x512xf32>
      %40 = arith.mulf %13, %39 : vector<2x16x512xf32>
      %41 = vector.broadcast %38 : vector<2x1x512xf32> to vector<2x16x512xf32>
      %42 = arith.addf %40, %41 : vector<2x16x512xf32>
      %cst_20 = arith.constant 0.000000e+00 : f32
      %43 = vector.broadcast %cst_20 : f32 to vector<2x16x512xf32>
      %44 = arith.cmpf oge, %42, %43 : vector<2x16x512xf32>
      %cst_21 = arith.constant 2.000000e-01 : f32
      %45 = vector.broadcast %cst_21 : f32 to vector<2x16x512xf32>
      %46 = arith.mulf %45, %42 : vector<2x16x512xf32>
      %47 = arith.select %44, %42, %46 : vector<2x16x512xi1>, vector<2x16x512xf32>
      %c0_22 = arith.constant 0 : index
      %c0_23 = arith.constant 0 : index
      %48 = vector.load %arg5[%c0_22, %c0_23] : memref<16x512xf32, #tpu.memory_space<vmem>>, vector<16x512xf32>
      %49 = vector.shape_cast %48 : vector<16x512xf32> to vector<1x16x512xf32>
      %50 = vector.broadcast %49 : vector<1x16x512xf32> to vector<2x16x512xf32>
      %51 = arith.mulf %47, %50 : vector<2x16x512xf32>
      %cst_24 = arith.constant dense<0.000000e+00> : vector<2x512xf32>
      %52 = vector.multi_reduction <add>, %51, %cst_24 [1] : vector<2x16x512xf32> to vector<2x512xf32>
      %c0_25 = arith.constant 0 : index
      %c0_26 = arith.constant 0 : index
      %53 = vector.load %arg6[%c0_25, %c0_26] : memref<2x512xf32, #tpu.memory_space<vmem>>, vector<2x512xf32>
      tpu.vector_store %arg6[%c0_25, %c0_26], %52 {strides = array<i32>} : memref<2x512xf32, #tpu.memory_space<vmem>>, vector<2x512xf32>,
    } else {
    }
    return
  }
  func.func @transform_0(%arg0: i32, %arg1: i32) -> (i32, i32) {
    %c0_i32 = arith.constant 0 : i32
    %c0_i32_0 = arith.constant 0 : i32
    return %c0_i32, %arg1 : i32, i32
  }
  func.func @transform_1(%arg0: i32, %arg1: i32) -> (i32, i32) {
    %c0_i32 = arith.constant 0 : i32
    return %arg1, %arg0 : i32, i32
  }
  func.func @transform_2(%arg0: i32, %arg1: i32) -> (i32, i32) {
    %c0_i32 = arith.constant 0 : i32
    %c0_i32_0 = arith.constant 0 : i32
    return %c0_i32, %arg0 : i32, i32
  }
  func.func @transform_3(%arg0: i32, %arg1: i32) -> (i32, i32) {
    %c0_i32 = arith.constant 0 : i32
    %c0_i32_0 = arith.constant 0 : i32
    return %c0_i32, %arg0 : i32, i32
  }
  func.func @transform_4(%arg0: i32, %arg1: i32) -> (i32, i32) {
    %c0_i32 = arith.constant 0 : i32
    %c0_i32_0 = arith.constant 0 : i32
    return %c0_i32, %arg0 : i32, i32
  }
}

</mosaic_0001>

<bundles_post_ra>
// kernel: wgan_discriminator_forward.3
= control target key start
LH: loop header
LB: loop body
LE: loop exit
PB: predicated region body
PF: predicated region fallthrough
CT: control target
= control target key end

     0   :  { %s4717_s0 = inlined_call_operand.hbm [shape: bf16[512,128], index: 0, kind: input, shape index: {}]   ;;  %s4718_s1 = inlined_call_operand.hbm [shape: bf16[128,256], index: 1, kind: input, shape index: {}]   ;;  %s4719_s2 = inlined_call_operand.hbm [shape: f32[2,256], index: 2, kind: input, shape index: {}]   ;;  %s4720_s3 = inlined_call_operand.hbm [shape: bf16[2,256,256], index: 3, kind: output, shape index: {}]  }
   0x1   :  { %4787 = sst [smem:[#allocation59_spill]] %s4718_s1 }
   0x2   :  { %8 = vsyncpa [#allocation4], 0 }
   0x3   :  { %9 = vsyncpa [#allocation7], 0 }
   0x4   :  { %11 = vsyncpa [#allocation7 + $0x1], 0 }
   0x5   :  { %12 = vsyncpa [#allocation5], 0 }
   0x6   :  { %14 = vsyncpa [#allocation5 + $0x1], 0  ;;  %s3067_s12 = smov 0   ;;  %s3069_s13 = smov 0  }
   0x7   :  { %s3071_s14 = smov 0   ;;  %s3073_s15 = smov 0  }
   0x8   :  { %s3075_s16 = smov 0   ;;  %s3077_s17 = smov 0  }
   0x9 LB: > { %s32_s18 = sadd.s32 1, %s3031_s16  ;;  %s67_s19 = sadd.s32 1, %s3023_s14  ;;  %s3035_s17 = sphi %s3077_s17, %s20_s17   ;;  %s3031_s16 = sphi %s3075_s16, %s5012_s16   ;;  %s3027_s15 = sphi %s3073_s15, %s5011_s15   ;;  %s3023_s14 = sphi %s3071_s14, %s5010_s14   ;;  %s3019_s13 = sphi %s3069_s13, %s5009_s13   ;;  %s3015_s12 = sphi %s3067_s12, %s5008_s12  }
   0xa   : > { %p34_p0 = scmp.ge.s32.totalorder %s32_s18, 2  ;;  %p74_p1 = scmp.ne.s32.totalorder %s3023_s14, %s3019_s13 }
   0xb   : > { %p75_p2 = scmp.eq.s32.totalorder %s3035_s17, 0  ;;  %p2759_p6 = scmp.lt.s32.totalorder %s3035_s17, 2 }
   0xc   : > { %s5014_s18 = smov (%p34_p0, %s32_s18), 0  ;;  %s171_s22 = sand.u32 1, %s3035_s17  }
   0xd   : > { %p3107_p3 = por %p75_p2, %p74_p1  ;;  %s63_s21 = ssub.s32 %s3031_s16, %s5014_s18 }
   0xe   : > { %p65_p5 = scmp.eq.s32.totalorder %s63_s21, 0  ;;  %s173_s23 = sand.u32 1, %s3023_s14  }
   0xf   : > { %s2225_s25 = sshll.u32 %s173_s23, 6  ;;  %s2226_s26 = sshll.u32 %s3031_s16, 6 }
  0x10   : > { %s3118_s24 = scalar_select %p65_p5, %s3023_s14, %s67_s19  }
  0x11   : > { %s4789_s1 = sld [smem:[#allocation59_spill]]  ;;  %s175_s30 = scalar_lea.vmem [#allocation6], %s2225_s25 }
  0x12   : > { %s184_s4 = sshll.u32 %s175_s30, 4  ;;  %p3132_p7 = pnand %p2759_p6, %p3107_p3  ;;  %s3128_s4 = int_to_ptr.vmem [resolvable:$true] %s184_s4 }
  0x13   : > { %s3136_s6 = scalar_lea.sflag [#allocation7], %s171_s22 }
  0x14   : > { %p2863_p9 = pneg %p3132_p7 }
  0x17   : > { %s3126_s29 = scalar_lea.hbm %s4789_s1, %s2226_s26  ;;  %s2866_s10 = scalar_lea.hbm %s4789_s1, 2048 }
  0x18   : > { %s2861_s7 = scalar_lea.hbm %s3126_s29, 1024  ;;  %p2867_p12 = scmp.lt.u32.totalorder %s3126_s29, %s4789_s1 }
  0x19   : > { %p2862_p8 = scmp.ne.s32.totalorder %s3126_s29, %s2861_s7  ;;  %p2868_p13 = scmp.lt.u32.totalorder %s2866_s10, %s2861_s7 }
  0x1a   : > { %p2870_p2 = scmp.lt.u32.totalorder %s2861_s7, %s3126_s29 }
  0x1b   : > { %p2864_p10 = pnand %p2863_p9, %p2862_p8  ;;  %p2869_p0 = por %p2868_p13, %p2867_p12 }
  0x1d   : > { %p2865_p11 = pneg %p2864_p10  ;;  %p2871_p3 = por %p2870_p2, %p2869_p0 }
  0x1f   : > { %p2872_p5 = pnand %p2871_p3, %p2865_p11 }
  0x21   : > { %2875 = shalt.err (!%p2872_p5)
}
  0x22   : > { %s2876_s20 = scalar_lea.vmem %s3128_s4, 1024  ;;  %s3037_s21 = smov [#allocation6]  }
  0x23   : > { %p2877_p6 = scmp.ne.s32.totalorder %s3128_s4, %s2876_s20  ;;  %s2881_s22 = sshll.u32 %s3037_s21, 4  ;;  %s2882_s22 = int_to_ptr.vmem [resolvable:$false] %s2881_s22 }
  0x24   : > { %s2883_s25 = scalar_lea.vmem %s2882_s22, 2048  ;;  %p2884_p4 = scmp.lt.s32.totalorder %s3128_s4, %s2882_s22 }
  0x25   : > { %p2879_p8 = pnand %p2877_p6, %p2863_p9  ;;  %p2885_p12 = scmp.lt.s32.totalorder %s2883_s25, %s2876_s20 }
  0x27   : > { %p2880_p10 = pneg %p2879_p8  ;;  %p2886_p13 = por %p2885_p12, %p2884_p4 }
  0x29   : > { %p2887_p0 = pnand %p2886_p13, %p2880_p10 }
  0x2b   : > { %2890 = shalt.err (!%p2887_p0)
}
  0x2c   : > { %s3038_s26 = smov 128   ;;  %s4721_s27 = smov 64  }
  0x2d   : > { %s4722_s28 = smov 4   ;;  %s3167_s30 = sadd.s32 4294967295, %s3035_s17  }
  0x2e   : > { %2750 = dma.hbm_to_vmem [thread:$0]  (!%p3132_p7), %s3126_s29, 1024, %s3128_s4, %s3136_s6, %s3038_s26, %s4721_s27, %s4722_s28  }
  0x2f   : > { %s2221_s7 = sadd.s32 4294967294, %s3035_s17   ;;  %p80_p4 = scmp.ne.s32.totalorder %s3019_s13, %s3015_s12 }
  0x30   : > { %p4723_p11 = scmp.eq.s32.totalorder %s3167_s30, 0  ;;  %p130_p2 = scmp.eq.s32.totalorder %s3167_s30, 1 }
  0x31   : > { %p136_p3 = scmp.eq.s32.totalorder %s2221_s7, 1  ;;  %p2222_p6 = scmp.ge.s32.totalorder %s3035_s17, 1 }
  0x32   : > { %p3176_p5 = por %p4723_p11, %p80_p4  ;;  %p3184_p8 = por %p130_p2, %p74_p1 }
  0x33   : > { %p3188_p10 = por %p136_p3, %p80_p4  ;;  %p143_p12 = scmp.lt.s32.totalorder %s3035_s17, 3 }
  0x34   : > { %s4791_s8 = scalar_select %p3176_p5, 1, 0 }
  0x35   : > { %s4792_s29 = scalar_select %p3184_p8, 1, 0 }
  0x36   : > { %s4793_s4 = scalar_select %p3188_p10, 1, 0 }
  0x37   : > { %s2227_s9 = sshll.u32 %s173_s23, 1  ;;  %p3195_p13 = pnand %p2222_p6, %p143_p12 }
  0x38   : > { %s3041_s11 = smov [#allocation3]   ;;  %s2228_s20 = sshll.u32 %s3031_s16, 5 }
  0x39   : > { %s4794_s10 = scalar_select %p3195_p13, 1, 0 }
  0x3a   : > { %s157_s19 = sshll.u32 %s3041_s11, 4  ;;  %p2743_p1 = pneg %p3195_p13  ;;  %s3199_s19 = int_to_ptr.vmem [resolvable:$true] %s157_s19 }
  0x3b   : > { %s3207_s25 = scalar_lea.hbm %s4719_s2, %s2228_s20  ;;  %s198_s23 = scalar_lea.vmem [#allocation8], %s2227_s9 }
  0x3c   : > { %s205_s26 = sshll.u32 %s198_s23, 4  ;;  %p3211_p0 = pnand %p2743_p1, %p4723_p11  ;;  %s206_s26 = int_to_ptr.vmem [resolvable:$true] %s205_s26 }
  0x3d   : > { %s2891_s11 = scalar_lea.hbm %s3207_s25, 32  ;;  %s2896_s22 = scalar_lea.hbm %s4719_s2, 64 }
  0x3e   : > { %s4795_s7 = scalar_select %p3211_p0, 1, 0 }
  0x3f   : > { %p2892_p4 = scmp.ne.s32.totalorder %s3207_s25, %s2891_s11  ;;  %p2897_p6 = scmp.lt.u32.totalorder %s3207_s25, %s4719_s2 }
  0x40   : > { %p2898_p12 = scmp.lt.u32.totalorder %s2896_s22, %s2891_s11  ;;  %p2900_p11 = scmp.lt.u32.totalorder %s2891_s11, %s3207_s25 }
  0x41   : > { %p2894_p2 = pnand %p2892_p4, %p2863_p9 }
  0x42   : > { %p2899_p1 = por %p2898_p12, %p2897_p6 }
  0x43   : > { %p2895_p3 = pneg %p2894_p2 }
  0x44   : > { %p2901_p10 = por %p2900_p11, %p2899_p1 }
  0x46   : > { %p2902_p8 = pnand %p2901_p10, %p2895_p3 }
  0x48   : > { %2905 = shalt.err (!%p2902_p8)
}
  0x49   : > { %s2906_s9 = scalar_lea.vmem %s206_s26, 32  ;;  %s3042_s23 = smov [#allocation8]  }
  0x4a   : > { %p2907_p5 = scmp.ne.s32.totalorder %s206_s26, %s2906_s9  ;;  %s2911_s20 = sshll.u32 %s3042_s23, 4  ;;  %s2912_s20 = int_to_ptr.vmem [resolvable:$false] %s2911_s20 }
  0x4b   : > { %s2913_s21 = scalar_lea.vmem %s2912_s20, 64  ;;  %p2914_p13 = scmp.lt.s32.totalorder %s206_s26, %s2912_s20 }
  0x4c   : > { %p2909_p4 = pnand %p2907_p5, %p2863_p9  ;;  %p2915_p0 = scmp.lt.s32.totalorder %s2913_s21, %s2906_s9 }
  0x4e   : > { %p2910_p2 = pneg %p2909_p4  ;;  %p2916_p6 = por %p2915_p0, %p2914_p13 }
  0x50   : > { %p2917_p12 = pnand %p2916_p6, %p2910_p2 }
  0x52   : > { %2920 = shalt.err (!%p2917_p12)
}
  0x53   : > { %2753 = dma.hbm_to_vmem [thread:$0]  (!%p3132_p7), %s3207_s25, 32, %s206_s26, %s3136_s6  }
  0x54   : > { %s2921_s11 = scalar_lea.hbm %s4717_s0, 4096  ;;  %p4796_p11 = scmp.ne.s32.totalorder %s4795_s7, 0 }
  0x55   : > { %p2922_p9 = scmp.ne.s32.totalorder %s4717_s0, %s2921_s11  ;;  %p2928_p13 = scmp.lt.u32.totalorder %s2921_s11, %s4717_s0 }
  0x56   : > { %p2923_p5 = pneg %p4796_p11 }
  0x58   : > { %p2924_p8 = pnand %p2923_p5, %p2922_p9 }
  0x5a   : > { %p2925_p10 = pneg %p2924_p8 }
  0x5c   : > { %p2930_p0 = pnand %p2928_p13, %p2925_p10 }
  0x5e   : > { %2933 = shalt.err (!%p2930_p0)
}
  0x5f   : > { %s2934_s5 = scalar_lea.vmem %s3199_s19, 4096  ;;  %p2942_p4 = scmp.lt.s32.totalorder %s3199_s19, %s3199_s19 }
  0x60   : > { %p2935_p7 = scmp.ne.s32.totalorder %s3199_s19, %s2934_s5  ;;  %p2943_p2 = scmp.lt.s32.totalorder %s2934_s5, %s2934_s5 }
  0x62   : > { %p2937_p3 = pnand %p2935_p7, %p2923_p5  ;;  %p2944_p6 = por %p2943_p2, %p2942_p4 }
  0x64   : > { %p2938_p1 = pneg %p2937_p3 }
  0x66   : > { %p2945_p12 = pnand %p2944_p6, %p2938_p1 }
  0x68   : > { %2948 = shalt.err (!%p2945_p12)
}
  0x69   : > { %s4797_s1 = smov 4   ;;  %s4798_s6 = smov 64  }
  0x6a   : > { %2746 = dma.hbm_to_vmem [thread:$0]  (!%p4796_p11), %s4717_s0, 4096, %s3199_s19, [#allocation4], %s4798_s6, %s4798_s6, %s4797_s1  }
  0x6b   : > { %p4799_p9 = scmp.ne.s32.totalorder %s4794_s10, 0 }
  0x6d   : > { %214 = sbr.rel (%p4799_p9) target bundleno = 592 (0x250), region = 32 }
  0x74   : > { %p4800_p5 = scmp.eq.s32.totalorder %s3167_s30, 0 }
  0x76   : > { %3002 = dma.done.wait (%p4800_p5), [#allocation4], 4096   ;;  %p4801_p8 = pmov %p4800_p5 }
  0x77   : > { %s220_s7 = sand.u32 1, %s3167_s30   ;;  %s3267_s20 = sand.u32 1, %s3019_s13  }
  0x78   : > { %3004 = vsyncadd (%p4801_p8), [#allocation4], 4294963200  ;;  %s2231_s21 = sshll.u32 %s3267_s20, 6  ;;  %s221_s27 = scalar_lea.sflag [#allocation7], %s220_s7 }
  0x79   : > { %s3270_s28 = scalar_lea.vmem [#allocation6], %s2231_s21  ;;  %p4802_p11 = scmp.ne.s32.totalorder %s4791_s8, 0 }
  0x7b   : > { %3006 = dma.done.wait (%p4802_p11), %s221_s27, 1056  }
  0x7c   : > { %3008 = vsyncadd (%p4802_p11), %s221_s27, 4294966240  ;;  %v2817_v0 = vld [vmem:[%s3270_s28] sm:$0xff]   ;;  %v2818_v1 = vld [vmem:[%s3270_s28 + $0x8] sm:$0xff]   ;;  %s2232_s30 = sshll.u32 %s3267_s20, 1  ;;  %s2233_s10 = sshll.u32 %s3267_s20, 8 }
  0x7d   : > { %2637 = vmatprep.subr.bf16.mxu0 %v2817_v0  ;;  %2717 = vmatprep.subr.bf16.mxu1 %v2817_v0  ;;  %v2819_v2 = vld [vmem:[%s3270_s28 + $0x10] sm:$0xff]   ;;  %v2820_v3 = vld [vmem:[%s3270_s28 + $0x18] sm:$0xff]   ;;  %v2825_v4 = vld [vmem:[#allocation3] sm:$0xff]   ;;  %s233_s8 = scalar_lea.vmem [#allocation8], %s2232_s30  ;;  %s3704_s19 = scalar_lea.vmem [#allocation9], %s2233_s10 }
  0x7e   : > { %2638 = vmatpush3.bf16.msra.mxu0 %v2817_v0  ;;  %2725 = vmatpush3.bf16.msra.mxu1 %v2817_v0  ;;  %v2826_v5 = vld [vmem:[#allocation3 + $0x80] sm:$0xff]   ;;  %v2822_v7 = vld [vmem:[%s3270_s28 + $0x28] sm:$0xff]   ;;  %v2823_v8 = vld [vmem:[%s3270_s28 + $0x30] sm:$0xff]   ;;  %s2339_s11 = sshll.u32 %s3027_s15, 6  ;;  %s2103_s15 = sshll.u32 %s3704_s19, 4  ;;  %s4657_s15 = int_to_ptr.vmem [resolvable:$true] %s2103_s15 }
  0x7f   : > { %2639 = vmatprep.subr.bf16.mxu0 %v2818_v1  ;;  %2718 = vmatprep.subr.bf16.mxu1 %v2818_v1  ;;  %v2821_v6 = vld [vmem:[%s3270_s28 + $0x20] sm:$0xff]   ;;  %v2824_v9 = vld [vmem:[%s3270_s28 + $0x38] sm:$0xff]   ;;  %v2827_v10 = vld [vmem:[#allocation3 + $0x8] sm:$0xff]   ;;  %s4643_s23 = scalar_lea.hbm %s4720_s3, %s2339_s11  ;;  %s2091_s5 = scalar_lea.sflag [#allocation5], %s3267_s20 }
  0x80   : > { %2653 = vmatprep.mubr.bf16.mxu0 %v2825_v4  ;;  %2685 = vmatprep.mubr.bf16.mxu1 %v2826_v5  ;;  %v2828_v11 = vld [vmem:[#allocation3 + $0x88] sm:$0xff]   ;;  %v2829_v12 = vld [vmem:[#allocation3 + $0x10] sm:$0xff]   ;;  %v2831_v14 = vld [vmem:[#allocation3 + $0x18] sm:$0xff]   ;;  %s2949_s1 = scalar_lea.vmem %s4657_s15, 4096  ;;  %p5005_p13 = scmp.ne.s32.totalorder %s4792_s29, 0 }
  0x81   : > { %v2830_v13 = vld [vmem:[#allocation3 + $0x90] sm:$0xff]   ;;  %v2832_v15 = vld [vmem:[#allocation3 + $0x98] sm:$0xff]   ;;  %v2833_v16 = vld [vmem:[#allocation3 + $0x20] sm:$0xff]   ;;  %p2950_p10 = scmp.ne.s32.totalorder %s4657_s15, %s2949_s1  ;;  %s3043_s6 = smov [#allocation9]  }
  0x82   : > { %2640 = vmatpush3.bf16.msra.mxu0 %v2818_v1  ;;  %2726 = vmatpush3.bf16.msra.mxu1 %v2818_v1  ;;  %v2834_v17 = vld [vmem:[#allocation3 + $0xa0] sm:$0xff]   ;;  %v2835_v18 = vld [vmem:[#allocation3 + $0x28] sm:$0xff]   ;;  %v2837_v20 = vld [vmem:[#allocation3 + $0x30] sm:$0xff]   ;;  %s2953_s25 = sshll.u32 %s3043_s6, 4  ;;  %s2954_s25 = int_to_ptr.vmem [resolvable:$false] %s2953_s25 }
  0x83   : > { %2641 = vmatprep.subr.bf16.mxu0 %v2819_v2  ;;  %2719 = vmatprep.subr.bf16.mxu1 %v2819_v2  ;;  %v2836_v19 = vld [vmem:[#allocation3 + $0xa8] sm:$0xff]   ;;  %v2838_v21 = vld [vmem:[#allocation3 + $0xb0] sm:$0xff]   ;;  %v2839_v22 = vld [vmem:[#allocation3 + $0x38] sm:$0xff]   ;;  %p2951_p0 = pnand %p2950_p10, %p5005_p13  ;;  %s2955_s26 = scalar_lea.vmem %s2954_s25, 8192 }
  0x84   : > { %v2840_v23 = vld [vmem:[#allocation3 + $0xb8] sm:$0xff]   ;;  %v2841_v24 = vld [vmem:[#allocation3 + $0x40] sm:$0xff]   ;;  %v2843_v26 = vld [vmem:[#allocation3 + $0x48] sm:$0xff]   ;;  %p2956_p3 = scmp.lt.s32.totalorder %s4657_s15, %s2954_s25  ;;  %p2957_p1 = scmp.lt.s32.totalorder %s2955_s26, %s2949_s1 }
  0x85   : > { %v2842_v25 = vld [vmem:[#allocation3 + $0xc0] sm:$0xff]   ;;  %v2844_v27 = vld [vmem:[#allocation3 + $0xc8] sm:$0xff]   ;;  %v2845_v28 = vld [vmem:[#allocation3 + $0x50] sm:$0xff]   ;;  %p2952_p7 = pneg %p2951_p0 }
  0x86   : > { %2642 = vmatpush3.bf16.msra.mxu0 %v2819_v2  ;;  %2727 = vmatpush3.bf16.msra.mxu1 %v2819_v2  ;;  %v2846_v29 = vld [vmem:[#allocation3 + $0xd0] sm:$0xff]   ;;  %v2847_v30 = vld [vmem:[#allocation3 + $0x58] sm:$0xff]   ;;  %v2849_v32 = vld [vmem:[#allocation3 + $0x60] sm:$0xff]   ;;  %p2958_p4 = por %p2957_p1, %p2956_p3 }
  0x87   : > { %2643 = vmatprep.subr.bf16.mxu0 %v2820_v3  ;;  %2720 = vmatprep.subr.bf16.mxu1 %v2820_v3  ;;  %v2848_v31 = vld [vmem:[#allocation3 + $0xd8] sm:$0xff]   ;;  %v2850_v33 = vld [vmem:[#allocation3 + $0xe0] sm:$0xff]   ;;  %v2851_v34 = vld [vmem:[#allocation3 + $0x68] sm:$0xff]  }
  0x88   : > { %v2852_v35 = vld [vmem:[#allocation3 + $0xe8] sm:$0xff]   ;;  %v2853_v36 = vld [vmem:[#allocation3 + $0x70] sm:$0xff]   ;;  %v2855_v38 = vld [vmem:[#allocation3 + $0x78] sm:$0xff]   ;;  %p2959_p2 = pnand %p2958_p4, %p2952_p7 }
  0x89   : > { %v2854_v37 = vld [vmem:[#allocation3 + $0xf0] sm:$0xff]   ;;  %v2856_v39 = vld [vmem:[#allocation3 + $0xf8] sm:$0xff]  }
  0x8a   : > { %2644 = vmatpush3.bf16.msra.mxu0 %v2820_v3  ;;  %2728 = vmatpush3.bf16.msra.mxu1 %v2820_v3 }
  0x8b   : > { %2645 = vmatprep.subr.bf16.mxu0 %v2821_v6  ;;  %2721 = vmatprep.subr.bf16.mxu1 %v2821_v6 }
  0x8e   : > { %2646 = vmatpush3.bf16.msra.mxu0 %v2821_v6  ;;  %2729 = vmatpush3.bf16.msra.mxu1 %v2821_v6 }
  0x8f   : > { %2647 = vmatprep.subr.bf16.mxu0 %v2822_v7  ;;  %2722 = vmatprep.subr.bf16.mxu1 %v2822_v7 }
  0x92   : > { %2648 = vmatpush3.bf16.msra.mxu0 %v2822_v7  ;;  %2730 = vmatpush3.bf16.msra.mxu1 %v2822_v7 }
  0x93   : > { %2649 = vmatprep.subr.bf16.mxu0 %v2823_v8  ;;  %2723 = vmatprep.subr.bf16.mxu1 %v2823_v8 }
  0x96   : > { %2650 = vmatpush3.bf16.msra.mxu0 %v2823_v8  ;;  %2731 = vmatpush3.bf16.msra.mxu1 %v2823_v8 }
  0x97   : > { %2651 = vmatprep.subr.bf16.mxu0 %v2824_v9  ;;  %2724 = vmatprep.subr.bf16.mxu1 %v2824_v9 }
  0x9a   : > { %2652 = vmatpush3.bf16.msra.mxu0 %v2824_v9  ;;  %2732 = vmatpush3.bf16.msra.mxu1 %v2824_v9 }
  0x9d   : > { %2654 = vmatmul.mubr.bf16.vlgmr.msra.gmra.mrb[0].mxu0 %v2827_v10  ;;  %2686 = vmatmul.mubr.bf16.vlgmr.msra.gmra.mrb[0].mxu1 %v2828_v11 }
  0x9e   : > { %2657 = vmatprep.mubr.bf16.mxu0 %v2829_v12  ;;  %2689 = vmatprep.mubr.bf16.mxu1 %v2830_v13 }
  0xa5   : > { %2658 = vmatmul.mubr.bf16.gmra.mrb[4].mxu0 %v2831_v14  ;;  %2690 = vmatmul.mubr.bf16.gmra.mrb[4].mxu1 %v2832_v15 }
  0xa6   : > { %2661 = vmatprep.mubr.bf16.mxu0 %v2833_v16  ;;  %2693 = vmatprep.mubr.bf16.mxu1 %v2834_v17 }
  0xad   : > { %2662 = vmatmul.mubr.bf16.gmra.mrb[8].mxu0 %v2835_v18  ;;  %2694 = vmatmul.mubr.bf16.gmra.mrb[8].mxu1 %v2836_v19 }
  0xae   : > { %2665 = vmatprep.mubr.bf16.mxu0 %v2837_v20  ;;  %2697 = vmatprep.mubr.bf16.mxu1 %v2838_v21 }
  0xb5   : > { %2666 = vmatmul.mubr.bf16.gmra.mrb[12].mxu0 %v2839_v22  ;;  %2698 = vmatmul.mubr.bf16.gmra.mrb[12].mxu1 %v2840_v23 }
  0xb6   : > { %2669 = vmatprep.mubr.bf16.mxu0 %v2841_v24  ;;  %2701 = vmatprep.mubr.bf16.mxu1 %v2842_v25 }
  0xbd   : > { %2670 = vmatmul.mubr.bf16.gmra.mrb[16].mxu0 %v2843_v26  ;;  %2702 = vmatmul.mubr.bf16.gmra.mrb[16].mxu1 %v2844_v27 }
  0xbe   : > { %2673 = vmatprep.mubr.bf16.mxu0 %v2845_v28  ;;  %2705 = vmatprep.mubr.bf16.mxu1 %v2846_v29 }
  0xc5   : > { %2674 = vmatmul.mubr.bf16.gmra.mrb[20].mxu0 %v2847_v30  ;;  %2706 = vmatmul.mubr.bf16.gmra.mrb[20].mxu1 %v2848_v31 }
  0xc6   : > { %2677 = vmatprep.mubr.bf16.mxu0 %v2849_v32  ;;  %2709 = vmatprep.mubr.bf16.mxu1 %v2850_v33 }
  0xcd   : > { %2678 = vmatmul.mubr.bf16.gmra.mrb[24].mxu0 %v2851_v34  ;;  %2710 = vmatmul.mubr.bf16.gmra.mrb[24].mxu1 %v2852_v35 }
  0xce   : > { %2681 = vmatprep.mubr.bf16.mxu0 %v2853_v36  ;;  %2713 = vmatprep.mubr.bf16.mxu1 %v2854_v37 }
  0xd5   : > { %2682 = vmatmul.mubr.bf16.gmra.mrb[28].mxu0 %v2855_v38  ;;  %2714 = vmatmul.mubr.bf16.gmra.mrb[28].mxu1 %v2856_v39 }
 0x170   : > { %v3284_v40 = vpop.f32.mrb[0].mxu0  ;;  %v3286_v41 = vpop.f32.mrb[0].mxu1 }
 0x171   : > { %v3288_v42 = vpop.f32.mrb[1].mxu0  ;;  %v3290_v43 = vpop.f32.mrb[1].mxu1  ;;  %v1278_v54 = vmul.f32 %v3284_v40, %v3284_v40  ;;  %v1310_v55 = vmul.f32 %v3286_v41, %v3286_v41 }
 0x172   : > { %v3292_v44 = vpop.f32.mrb[2].mxu0  ;;  %v3294_v45 = vpop.f32.mrb[2].mxu1  ;;  %v1276_v46 = vmul.f32 %v3288_v42, %v3288_v42  ;;  %v1308_v47 = vmul.f32 %v3290_v43, %v3290_v43 }
 0x173   : > { %4803 = vst [vmem:[#allocation13_spill] sm:$0xff] %v3294_v45  ;;  %v3300_v48 = vpop.f32.mrb[3].mxu0  ;;  %v3302_v49 = vpop.f32.mrb[3].mxu1  ;;  %v1279_v60 = vmul.f32 %v3292_v44, %v3292_v44  ;;  %v1311_v3 = vmul.f32 %v3294_v45, %v3294_v45 }
 0x174   : > { %v1199_v50 = vadd.f32 %v3300_v48, %v3288_v42  ;;  %v1277_v51 = vmul.f32 %v3300_v48, %v3300_v48  ;;  %v1236_v52 = vadd.f32 %v3302_v49, %v3290_v43  ;;  %v1309_v53 = vmul.f32 %v3302_v49, %v3302_v49 }
 0x176   : > { %v1200_v56 = vadd.f32 %v3284_v40, %v1199_v50  ;;  %v1340_v57 = vadd.f32 %v1277_v51, %v1276_v46  ;;  %v1237_v58 = vadd.f32 %v3286_v41, %v1236_v52  ;;  %v1377_v59 = vadd.f32 %v1309_v53, %v1308_v47 }
 0x178   : > { %v1341_v61 = vadd.f32 %v1340_v57, %v1278_v54  ;;  %v1378_v62 = vadd.f32 %v1377_v59, %v1310_v55  ;;  %v3320_v63 = vpop.f32.mrb[4].mxu0  ;;  %v3322_v0 = vpop.f32.mrb[4].mxu1  ;;  %v1201_v1 = vadd.f32 %v3292_v44, %v1200_v56  ;;  %v1238_v2 = vadd.f32 %v3294_v45, %v1237_v58 }
 0x179   : > { %4804 = vst [vmem:[#allocation14_spill] sm:$0xff] %v3322_v0  ;;  %v3328_v4 = vpop.f32.mrb[5].mxu0  ;;  %v3330_v5 = vpop.f32.mrb[5].mxu1  ;;  %v1282_v22 = vmul.f32 %v3320_v63, %v3320_v63  ;;  %v1314_v26 = vmul.f32 %v3322_v0, %v3322_v0 }
 0x17a   : > { %4805 = vst [vmem:[#allocation15_spill] sm:$0xff] %v3330_v5  ;;  %v1202_v6 = vadd.f32 %v1201_v1, %v3328_v4  ;;  %v1280_v7 = vmul.f32 %v3328_v4, %v3328_v4  ;;  %v1342_v8 = vadd.f32 %v1341_v61, %v1279_v60  ;;  %v1239_v9 = vadd.f32 %v1238_v2, %v3330_v5  ;;  %v3336_v10 = vpop.f32.mrb[6].mxu0  ;;  %v3338_v11 = vpop.f32.mrb[6].mxu1 }
 0x17b   : > { %4806 = vst [vmem:[#allocation16_spill] sm:$0xff] %v3338_v11  ;;  %v1312_v12 = vmul.f32 %v3330_v5, %v3330_v5  ;;  %v1379_v13 = vadd.f32 %v1378_v62, %v1311_v3  ;;  %v3342_v14 = vpop.f32.mrb[7].mxu0  ;;  %v3344_v15 = vpop.f32.mrb[7].mxu1  ;;  %v1283_v28 = vmul.f32 %v3336_v10, %v3336_v10  ;;  %v1315_v34 = vmul.f32 %v3338_v11, %v3338_v11 }
 0x17c   : > { %4807 = vst [vmem:[#allocation17_spill] sm:$0xff] %v3344_v15  ;;  %v1343_v16 = vadd.f32 %v1342_v8, %v1280_v7  ;;  %v1203_v17 = vadd.f32 %v1202_v6, %v3342_v14  ;;  %v1281_v18 = vmul.f32 %v3342_v14, %v3342_v14  ;;  %v1240_v19 = vadd.f32 %v1239_v9, %v3344_v15 }
 0x17d   : > { %v1380_v20 = vadd.f32 %v1379_v13, %v1312_v12  ;;  %v1313_v21 = vmul.f32 %v3344_v15, %v3344_v15 }
 0x17e   : > { %v1204_v23 = vadd.f32 %v3320_v63, %v1203_v17  ;;  %v1344_v24 = vadd.f32 %v1343_v16, %v1281_v18  ;;  %v1241_v25 = vadd.f32 %v3322_v0, %v1240_v19 }
 0x17f   : > { %v1381_v27 = vadd.f32 %v1380_v20, %v1313_v21 }
 0x180   : > { %v1345_v29 = vadd.f32 %v1344_v24, %v1282_v22  ;;  %v3360_v30 = vpop.f32.mrb[8].mxu0  ;;  %v3362_v31 = vpop.f32.mrb[8].mxu1  ;;  %v1205_v32 = vadd.f32 %v3336_v10, %v1204_v23  ;;  %v1242_v33 = vadd.f32 %v3338_v11, %v1241_v25 }
 0x181   : > { %4808 = vst [vmem:[#allocation18_spill] sm:$0xff] %v3362_v31  ;;  %v1382_v35 = vadd.f32 %v1381_v27, %v1314_v26  ;;  %v3368_v36 = vpop.f32.mrb[9].mxu0  ;;  %v3370_v37 = vpop.f32.mrb[9].mxu1  ;;  %v1286_v62 = vmul.f32 %v3360_v30, %v3360_v30  ;;  %v1318_v6 = vmul.f32 %v3362_v31, %v3362_v31 }
 0x182   : > { %4809 = vst [vmem:[#allocation19_spill] sm:$0xff] %v3370_v37  ;;  %v1206_v38 = vadd.f32 %v1205_v32, %v3368_v36  ;;  %v1284_v39 = vmul.f32 %v3368_v36, %v3368_v36  ;;  %v1346_v46 = vadd.f32 %v1345_v29, %v1283_v28  ;;  %v1243_v47 = vadd.f32 %v1242_v33, %v3370_v37  ;;  %v3376_v50 = vpop.f32.mrb[10].mxu0  ;;  %v3378_v51 = vpop.f32.mrb[10].mxu1 }
 0x183   : > { %4810 = vst [vmem:[#allocation20_spill] sm:$0xff] %v3378_v51  ;;  %v1316_v52 = vmul.f32 %v3370_v37, %v3370_v37  ;;  %v1383_v53 = vadd.f32 %v1382_v35, %v1315_v34  ;;  %v3382_v54 = vpop.f32.mrb[11].mxu0  ;;  %v3384_v55 = vpop.f32.mrb[11].mxu1  ;;  %v1287_v8 = vmul.f32 %v3376_v50, %v3376_v50  ;;  %v1319_v18 = vmul.f32 %v3378_v51, %v3378_v51 }
 0x184   : > { %4811 = vst [vmem:[#allocation21_spill] sm:$0xff] %v3384_v55  ;;  %v1347_v56 = vadd.f32 %v1346_v46, %v1284_v39  ;;  %v1207_v57 = vadd.f32 %v1206_v38, %v3382_v54  ;;  %v1285_v58 = vmul.f32 %v3382_v54, %v3382_v54  ;;  %v1244_v59 = vadd.f32 %v1243_v47, %v3384_v55 }
 0x185   : > { %v1384_v60 = vadd.f32 %v1383_v53, %v1316_v52  ;;  %v1317_v61 = vmul.f32 %v3384_v55, %v3384_v55 }
 0x186   : > { %v1208_v1 = vadd.f32 %v3360_v30, %v1207_v57  ;;  %v1348_v2 = vadd.f32 %v1347_v56, %v1285_v58  ;;  %v1245_v3 = vadd.f32 %v3362_v31, %v1244_v59 }
 0x187   : > { %v1385_v7 = vadd.f32 %v1384_v60, %v1317_v61 }
 0x188   : > { %v1349_v9 = vadd.f32 %v1348_v2, %v1286_v62  ;;  %v3400_v12 = vpop.f32.mrb[12].mxu0  ;;  %v3402_v13 = vpop.f32.mrb[12].mxu1  ;;  %v1209_v16 = vadd.f32 %v3376_v50, %v1208_v1  ;;  %v1246_v17 = vadd.f32 %v3378_v51, %v1245_v3 }
 0x189   : > { %4812 = vst [vmem:[#allocation22_spill] sm:$0xff] %v3402_v13  ;;  %v1386_v19 = vadd.f32 %v1385_v7, %v1318_v6  ;;  %v3408_v20 = vpop.f32.mrb[13].mxu0  ;;  %v3410_v21 = vpop.f32.mrb[13].mxu1  ;;  %v1290_v52 = vmul.f32 %v3400_v12, %v3400_v12  ;;  %v1322_v58 = vmul.f32 %v3402_v13, %v3402_v13 }
 0x18a   : > { %4813 = vst [vmem:[#allocation23_spill] sm:$0xff] %v3410_v21  ;;  %v1210_v22 = vadd.f32 %v1209_v16, %v3408_v20  ;;  %v1288_v23 = vmul.f32 %v3408_v20, %v3408_v20  ;;  %v1350_v24 = vadd.f32 %v1349_v9, %v1287_v8  ;;  %v1247_v25 = vadd.f32 %v1246_v17, %v3410_v21  ;;  %v3416_v26 = vpop.f32.mrb[14].mxu0  ;;  %v3418_v27 = vpop.f32.mrb[14].mxu1 }
 0x18b   : > { %4814 = vst [vmem:[#allocation24_spill] sm:$0xff] %v3418_v27  ;;  %v1320_v28 = vmul.f32 %v3410_v21, %v3410_v21  ;;  %v1387_v29 = vadd.f32 %v1386_v19, %v1319_v18  ;;  %v3422_v32 = vpop.f32.mrb[15].mxu0  ;;  %v3424_v33 = vpop.f32.mrb[15].mxu1  ;;  %v1291_v60 = vmul.f32 %v3416_v26, %v3416_v26  ;;  %v1323_v6 = vmul.f32 %v3418_v27, %v3418_v27 }
 0x18c   : > { %4815 = vst [vmem:[#allocation25_spill] sm:$0xff] %v3424_v33  ;;  %v1351_v34 = vadd.f32 %v1350_v24, %v1288_v23  ;;  %v1211_v35 = vadd.f32 %v1210_v22, %v3422_v32  ;;  %v1289_v38 = vmul.f32 %v3422_v32, %v3422_v32  ;;  %v1248_v39 = vadd.f32 %v1247_v25, %v3424_v33 }
 0x18d   : > { %v1388_v46 = vadd.f32 %v1387_v29, %v1320_v28  ;;  %v1321_v47 = vmul.f32 %v3424_v33, %v3424_v33 }
 0x18e   : > { %v1212_v53 = vadd.f32 %v3400_v12, %v1211_v35  ;;  %v1352_v56 = vadd.f32 %v1351_v34, %v1289_v38  ;;  %v1249_v57 = vadd.f32 %v3402_v13, %v1248_v39 }
 0x18f   : > { %v1389_v59 = vadd.f32 %v1388_v46, %v1321_v47 }
 0x190   : > { %v1353_v61 = vadd.f32 %v1352_v56, %v1290_v52  ;;  %v3440_v62 = vpop.f32.mrb[16].mxu0  ;;  %v3442_v1 = vpop.f32.mrb[16].mxu1  ;;  %v1213_v2 = vadd.f32 %v3416_v26, %v1212_v53  ;;  %v1250_v3 = vadd.f32 %v3418_v27, %v1249_v57 }
 0x191   : > { %4816 = vst [vmem:[#allocation26_spill] sm:$0xff] %v3442_v1  ;;  %v1390_v7 = vadd.f32 %v1389_v59, %v1322_v58  ;;  %v3448_v8 = vpop.f32.mrb[17].mxu0  ;;  %v3450_v9 = vpop.f32.mrb[17].mxu1  ;;  %v1294_v52 = vmul.f32 %v3440_v62, %v3440_v62  ;;  %v1326_v58 = vmul.f32 %v3442_v1, %v3442_v1 }
 0x192   : > { %4817 = vst [vmem:[#allocation27_spill] sm:$0xff] %v3450_v9  ;;  %v1214_v16 = vadd.f32 %v1213_v2, %v3448_v8  ;;  %v1292_v17 = vmul.f32 %v3448_v8, %v3448_v8  ;;  %v1354_v18 = vadd.f32 %v1353_v61, %v1291_v60  ;;  %v1251_v19 = vadd.f32 %v1250_v3, %v3450_v9  ;;  %v3456_v22 = vpop.f32.mrb[18].mxu0  ;;  %v3458_v23 = vpop.f32.mrb[18].mxu1 }
 0x193   : > { %4818 = vst [vmem:[#allocation28_spill] sm:$0xff] %v3458_v23  ;;  %v1324_v24 = vmul.f32 %v3450_v9, %v3450_v9  ;;  %v1391_v25 = vadd.f32 %v1390_v7, %v1323_v6  ;;  %v3462_v28 = vpop.f32.mrb[19].mxu0  ;;  %v3464_v29 = vpop.f32.mrb[19].mxu1  ;;  %v1295_v60 = vmul.f32 %v3456_v22, %v3456_v22 }
 0x194   : > { %4819 = vst [vmem:[#allocation29_spill] sm:$0xff] %v3464_v29  ;;  %v1355_v34 = vadd.f32 %v1354_v18, %v1292_v17  ;;  %v1215_v35 = vadd.f32 %v1214_v16, %v3462_v28  ;;  %v1293_v38 = vmul.f32 %v3462_v28, %v3462_v28  ;;  %v1252_v39 = vadd.f32 %v1251_v19, %v3464_v29 }
 0x195   : > { %v1392_v46 = vadd.f32 %v1391_v25, %v1324_v24  ;;  %v1325_v47 = vmul.f32 %v3464_v29, %v3464_v29  ;;  %v1327_v16 = vmul.f32 %v3458_v23, %v3458_v23 }
 0x196   : > { %v1216_v53 = vadd.f32 %v3440_v62, %v1215_v35  ;;  %v1356_v56 = vadd.f32 %v1355_v34, %v1293_v38  ;;  %v1253_v57 = vadd.f32 %v3442_v1, %v1252_v39 }
 0x197   : > { %v1393_v59 = vadd.f32 %v1392_v46, %v1325_v47 }
 0x198   : > { %v1357_v61 = vadd.f32 %v1356_v56, %v1294_v52  ;;  %v3480_v2 = vpop.f32.mrb[20].mxu0  ;;  %v3482_v3 = vpop.f32.mrb[20].mxu1  ;;  %v1217_v6 = vadd.f32 %v3456_v22, %v1216_v53  ;;  %v1254_v7 = vadd.f32 %v3458_v23, %v1253_v57 }
 0x199   : > { %4820 = vst [vmem:[#allocation30_spill] sm:$0xff] %v3482_v3  ;;  %v1394_v17 = vadd.f32 %v1393_v59, %v1326_v58  ;;  %v3488_v18 = vpop.f32.mrb[21].mxu0  ;;  %v3490_v19 = vpop.f32.mrb[21].mxu1 }
 0x19a   : > { %4821 = vst [vmem:[#allocation31_spill] sm:$0xff] %v3490_v19  ;;  %v1218_v24 = vadd.f32 %v1217_v6, %v3488_v18  ;;  %v1296_v25 = vmul.f32 %v3488_v18, %v3488_v18  ;;  %v1358_v34 = vadd.f32 %v1357_v61, %v1295_v60  ;;  %v1255_v35 = vadd.f32 %v1254_v7, %v3490_v19  ;;  %v3496_v38 = vpop.f32.mrb[22].mxu0  ;;  %v3498_v39 = vpop.f32.mrb[22].mxu1 }
 0x19b   : > { %4822 = vst [vmem:[#allocation32_spill] sm:$0xff] %v3498_v39  ;;  %v1328_v46 = vmul.f32 %v3490_v19, %v3490_v19  ;;  %v1395_v47 = vadd.f32 %v1394_v17, %v1327_v16  ;;  %v3502_v52 = vpop.f32.mrb[23].mxu0  ;;  %v3504_v53 = vpop.f32.mrb[23].mxu1  ;;  %v1298_v6 = vmul.f32 %v3480_v2, %v3480_v2 }
 0x19c   : > { %4823 = vst [vmem:[#allocation33_spill] sm:$0xff] %v3504_v53  ;;  %v1359_v56 = vadd.f32 %v1358_v34, %v1296_v25  ;;  %v1219_v57 = vadd.f32 %v1218_v24, %v3502_v52  ;;  %v1297_v58 = vmul.f32 %v3502_v52, %v3502_v52  ;;  %v1256_v59 = vadd.f32 %v1255_v35, %v3504_v53 }
 0x19d   : > { %v1396_v60 = vadd.f32 %v1395_v47, %v1328_v46  ;;  %v1329_v61 = vmul.f32 %v3504_v53, %v3504_v53  ;;  %v1330_v24 = vmul.f32 %v3482_v3, %v3482_v3  ;;  %v1299_v34 = vmul.f32 %v3496_v38, %v3496_v38 }
 0x19e   : > { %v1220_v7 = vadd.f32 %v3480_v2, %v1219_v57  ;;  %v1360_v16 = vadd.f32 %v1359_v56, %v1297_v58  ;;  %v1257_v17 = vadd.f32 %v3482_v3, %v1256_v59  ;;  %v1331_v56 = vmul.f32 %v3498_v39, %v3498_v39 }
 0x19f   : > { %v1397_v25 = vadd.f32 %v1396_v60, %v1329_v61 }
 0x1a0   : > { %v1361_v35 = vadd.f32 %v1360_v16, %v1298_v6  ;;  %v3520_v46 = vpop.f32.mrb[24].mxu0  ;;  %v3522_v47 = vpop.f32.mrb[24].mxu1  ;;  %v1221_v53 = vadd.f32 %v3496_v38, %v1220_v7  ;;  %v1258_v19 = vadd.f32 %v3498_v39, %v1257_v17 }
 0x1a1   : > { %4824 = vst [vmem:[#allocation34_spill] sm:$0xff] %v3522_v47  ;;  %v1398_v57 = vadd.f32 %v1397_v25, %v1330_v24  ;;  %v3528_v58 = vpop.f32.mrb[25].mxu0  ;;  %v3530_v59 = vpop.f32.mrb[25].mxu1 }
 0x1a2   : > { %4825 = vst [vmem:[#allocation35_spill] sm:$0xff] %v3530_v59  ;;  %v1222_v60 = vadd.f32 %v1221_v53, %v3528_v58  ;;  %v1300_v61 = vmul.f32 %v3528_v58, %v3528_v58  ;;  %v1362_v6 = vadd.f32 %v1361_v35, %v1299_v34  ;;  %v1259_v16 = vadd.f32 %v1258_v19, %v3530_v59  ;;  %v3536_v3 = vpop.f32.mrb[26].mxu0  ;;  %v3538_v7 = vpop.f32.mrb[26].mxu1 }
 0x1a3   : > { %4826 = vst [vmem:[#allocation36_spill] sm:$0xff] %v3538_v7  ;;  %v1332_v17 = vmul.f32 %v3530_v59, %v3530_v59  ;;  %v1399_v24 = vadd.f32 %v1398_v57, %v1331_v56  ;;  %v3542_v25 = vpop.f32.mrb[27].mxu0  ;;  %v3544_v39 = vpop.f32.mrb[27].mxu1  ;;  %v1302_v59 = vmul.f32 %v3520_v46, %v3520_v46 }
 0x1a4   : > { %4827 = vst [vmem:[#allocation37_spill] sm:$0xff] %v3544_v39  ;;  %v1363_v23 = vadd.f32 %v1362_v6, %v1300_v61  ;;  %v1223_v53 = vadd.f32 %v1222_v60, %v3542_v25  ;;  %v1301_v34 = vmul.f32 %v3542_v25, %v3542_v25  ;;  %v1260_v19 = vadd.f32 %v1259_v16, %v3544_v39 }
 0x1a5   : > { %v1400_v35 = vadd.f32 %v1399_v24, %v1332_v17  ;;  %v1333_v1 = vmul.f32 %v3544_v39, %v3544_v39  ;;  %v1334_v60 = vmul.f32 %v3522_v47, %v3522_v47  ;;  %v1303_v6 = vmul.f32 %v3536_v3, %v3536_v3 }
 0x1a6   : > { %v1224_v56 = vadd.f32 %v3520_v46, %v1223_v53  ;;  %v1364_v57 = vadd.f32 %v1363_v23, %v1301_v34  ;;  %v1261_v29 = vadd.f32 %v3522_v47, %v1260_v19  ;;  %v1335_v23 = vmul.f32 %v3538_v7, %v3538_v7 }
 0x1a7   : > { %v1401_v61 = vadd.f32 %v1400_v35, %v1333_v1 }
 0x1a8   : > { %v1365_v16 = vadd.f32 %v1364_v57, %v1302_v59  ;;  %v3560_v17 = vpop.f32.mrb[28].mxu0  ;;  %v3562_v24 = vpop.f32.mrb[28].mxu1  ;;  %v1225_v39 = vadd.f32 %v3536_v3, %v1224_v56  ;;  %v1262_v9 = vadd.f32 %v3538_v7, %v1261_v29 }
 0x1a9   : > { %4828 = vst [vmem:[#allocation38_spill] sm:$0xff] %v3562_v24  ;;  %v1402_v53 = vadd.f32 %v1401_v61, %v1334_v60  ;;  %v3568_v34 = vpop.f32.mrb[29].mxu0  ;;  %v3570_v19 = vpop.f32.mrb[29].mxu1  ;;  %v1306_v33 = vmul.f32 %v3560_v17, %v3560_v17 }
 0x1aa   : > { %v1226_v1 = vadd.f32 %v1225_v39, %v3568_v34  ;;  %v1304_v59 = vmul.f32 %v3568_v34, %v3568_v34  ;;  %v1366_v35 = vadd.f32 %v1365_v16, %v1303_v6  ;;  %v1263_v57 = vadd.f32 %v1262_v9, %v3570_v19  ;;  %v3576_v47 = vpop.f32.mrb[30].mxu0  ;;  %v3578_v56 = vpop.f32.mrb[30].mxu1 }
 0x1ab   : > { %4829 = vst [vmem:[#allocation39_spill] sm:$0xff] %v3578_v56  ;;  %v1336_v29 = vmul.f32 %v3570_v19, %v3570_v19  ;;  %v1403_v60 = vadd.f32 %v1402_v53, %v1335_v23  ;;  %v3582_v61 = vpop.f32.mrb[31].mxu0  ;;  %v3584_v7 = vpop.f32.mrb[31].mxu1  ;;  %v1339_v51 = vmul.f32 %v3578_v56, %v3578_v56 }
 0x1ac   : > { %v1367_v27 = vadd.f32 %v1366_v35, %v1304_v59  ;;  %v1227_v39 = vadd.f32 %v1226_v1, %v3582_v61  ;;  %v1305_v6 = vmul.f32 %v3582_v61, %v3582_v61  ;;  %v1264_v9 = vadd.f32 %v1263_v57, %v3584_v7 }
 0x1ad   : > { %v1404_v16 = vadd.f32 %v1403_v60, %v1336_v29  ;;  %v1337_v13 = vmul.f32 %v3584_v7, %v3584_v7  ;;  %v1338_v1 = vmul.f32 %v3562_v24, %v3562_v24  ;;  %v1307_v35 = vmul.f32 %v3576_v47, %v3576_v47 }
 0x1ae   : > { %v1228_v23 = vadd.f32 %v3560_v17, %v1227_v39  ;;  %v1368_v53 = vadd.f32 %v1367_v27, %v1305_v6  ;;  %v1265_v21 = vadd.f32 %v3562_v24, %v1264_v9 }
 0x1af   : > { %v1405_v59 = vadd.f32 %v1404_v16, %v1337_v13 }
 0x1b0   : > { %v1229_v57 = vadd.f32 %v3576_v47, %v1228_v23  ;;  %v1369_v29 = vadd.f32 %v1368_v53, %v1306_v33  ;;  %v1266_v60 = vadd.f32 %v3578_v56, %v1265_v21 }
 0x1b1   : > { %v1406_v31 = vadd.f32 %v1405_v59, %v1338_v1 }
 0x1b2   : > { %v1230_v39 = vrot.slane %v1229_v57, 4  ;;  %v1370_v27 = vadd.f32 %v1369_v29, %v1307_v35  ;;  %v1267_v6 = vrot.slane %v1266_v60, 4 }
 0x1b3   : > { %v1407_v9 = vadd.f32 %v1406_v31, %v1339_v51 }
 0x1b4   : > { %v1231_v55 = vadd.f32 %v1230_v39, %v1229_v57  ;;  %v1371_v37 = vrot.slane %v1370_v27, 4  ;;  %v1268_v24 = vadd.f32 %v1267_v6, %v1266_v60 }
 0x1b5   : > { %v1408_v13 = vrot.slane %v1407_v9, 4 }
 0x1b6   : > { %v1232_v16 = vrot.slane %v1231_v55, 2  ;;  %v1372_v11 = vadd.f32 %v1371_v37, %v1370_v27  ;;  %v1269_v0 = vrot.slane %v1268_v24, 2 }
 0x1b7   : > { %v1409_v15 = vadd.f32 %v1408_v13, %v1407_v9 }
 0x1b8   : > { %v1233_v23 = vadd.f32 %v1232_v16, %v1231_v55  ;;  %v1373_v33 = vrot.slane %v1372_v11, 2  ;;  %v1270_v53 = vadd.f32 %v1269_v0, %v1268_v24 }
 0x1b9   : > { %v1410_v21 = vrot.slane %v1409_v15, 2 }
 0x1ba   : > { %v1234_v5 = vrot.slane %v1233_v23, 1  ;;  %v1374_v45 = vadd.f32 %v1373_v33, %v1372_v11  ;;  %v1271_v56 = vrot.slane %v1270_v53, 1 }
 0x1bb   : > { %v1411_v1 = vadd.f32 %v1410_v21, %v1409_v15  ;;  %v1429_v21 = vld [vmem:[%s233_s8 + $0x1] sm:$0x1] }
 0x1bc   : > { %v1235_v59 = vadd.f32 %v1234_v5, %v1233_v23  ;;  %v1375_v35 = vrot.slane %v1374_v45, 1  ;;  %v1272_v29 = vadd.f32 %v1271_v56, %v1270_v53  ;;  %v1434_v5 = vlaneseq }
 0x1bd   : > { %v1412_v31 = vrot.slane %v1411_v1, 1 }
 0x1be   : > { %v1274_v51 = vmul.f32 0.00390625, %v1235_v59  ;;  %v1376_v57 = vadd.f32 %v1375_v35, %v1374_v45  ;;  %v1275_v60 = vmul.f32 0.00390625, %v1272_v29  ;;  %v1435_v15 = vshrl.u32 %v1434_v5, 7  ;;  %v1422_v45 = vld [vmem:[%s233_s8] sm:$0x1] }
 0x1bf   : > { %v1413_v39 = vadd.f32 %v1412_v31, %v1411_v1 }
 0x1c0   : > { %v1414_v37 = vmul.f32 0.00390625, %v1376_v57  ;;  %v1416_v27 = vmul.f32 %v1274_v51, %v1274_v51  ;;  %v1417_v6 = vmul.f32 %v1275_v60, %v1275_v60  ;;  %v1436_v56 = vsub.s32 0, %v1435_v15 }
 0x1c1   : > { %v1415_v55 = vmul.f32 0.00390625, %v1413_v39 }
 0x1c2   : > { %v1418_v9 = vsub.f32 %v1414_v37, %v1416_v27 }
 0x1c3   : > { %v1419_v0 = vsub.f32 %v1415_v55, %v1417_v6 }
 0x1c4   : > { %v1420_v24 = vmax.f32 %v1418_v9, 0.0 }
 0x1c5   : > { %v1421_v13 = vmax.f32 %v1419_v0, 0.0 }
 0x1c6   : > { %v1423_v11 = vadd.f32 1e-05, %v1420_v24 }
 0x1c7   : > { %v1424_v16 = vadd.f32 1e-05, %v1421_v13 }
 0x1c8   : > { %2857 = vrsqrt.f32 %v1423_v11 }
 0x1c9   : > { %2859 = vrsqrt.f32 %v1424_v16 }
 0x1d2   : > { %v2858_v23 = vpop.eup %2857 }
 0x1d3   : > { %v2860_v33 = vpop.eup %2859  ;;  %v1427_v53 = vmul.f32 %v2858_v23, %v1422_v45  ;;  %v4831_v23 = vld [vmem:[#allocation15_spill] sm:$0xff] }
 0x1d4   : > { %v1428_v1 = vmul.f32 %v2860_v33, %v1422_v45  ;;  %v4830_v45 = vld [vmem:[#allocation13_spill] sm:$0xff] }
 0x1d5   : > { %v1430_v59 = vmul.f32 %v1427_v53, %v1274_v51  ;;  %v1437_v35 = vrot.slane %v1427_v53, %v1436_v56  ;;  %v4834_v53 = vld [vmem:[#allocation16_spill] sm:$0xff] }
 0x1d6   : > { %v1431_v29 = vmul.f32 %v1428_v1, %v1275_v60  ;;  %v3605_v31 = vrot.slane %v1428_v1, %v1436_v56 }
 0x1d7   : > { %v1432_v57 = vsub.f32 %v1429_v21, %v1430_v59  ;;  %v1470_v39 = vmul.f32 %v1437_v35, %v3568_v34  ;;  %v1471_v37 = vmul.f32 %v1437_v35, %v3582_v61  ;;  %v3610_v27 = vmul.f32 %v1437_v35, %v3288_v42 }
 0x1d8   : > { %v3613_v6 = vmul.f32 %v1437_v35, %v3300_v48  ;;  %v3616_v55 = vmul.f32 %v3284_v40, %v1437_v35  ;;  %v3619_v51 = vmul.f32 %v3292_v44, %v1437_v35  ;;  %v3622_v60 = vmul.f32 %v1437_v35, %v3328_v4 }
 0x1d9   : > { %v3624_v9 = vrot.slane %v1432_v57, %v1436_v56  ;;  %v3627_v34 = vmul.f32 %v1437_v35, %v3342_v14  ;;  %v3630_v42 = vmul.f32 %v3320_v63, %v1437_v35  ;;  %v3633_v48 = vmul.f32 %v3336_v10, %v1437_v35 }
 0x1da   : > { %v3636_v40 = vmul.f32 %v1437_v35, %v3368_v36  ;;  %v3639_v44 = vmul.f32 %v1437_v35, %v3382_v54  ;;  %v3642_v4 = vmul.f32 %v3360_v30, %v1437_v35  ;;  %v3645_v61 = vmul.f32 %v3376_v50, %v1437_v35 }
 0x1db   : > { %v1542_v14 = vadd.f32 %v3624_v9, %v1470_v39  ;;  %v1543_v63 = vadd.f32 %v3624_v9, %v1471_v37  ;;  %v3650_v0 = vmul.f32 %v1437_v35, %v3408_v20  ;;  %v3653_v10 = vmul.f32 %v1437_v35, %v3422_v32  ;;  %v4837_v39 = vld [vmem:[#allocation18_spill] sm:$0xff] }
 0x1dc   : > { %v3657_v36 = vmul.f32 %v3400_v12, %v1437_v35  ;;  %v3660_v30 = vmul.f32 %v3416_v26, %v1437_v35  ;;  %v3663_v50 = vmul.f32 %v1437_v35, %v3448_v8  ;;  %v3666_v54 = vmul.f32 %v1437_v35, %v3462_v28 }
 0x1dd   : > { %vm1606_vm0 = vcmp.ge.f32.partialorder %v1542_v14, 0.0  ;;  %vm1607_vm1 = vcmp.ge.f32.partialorder %v1543_v63, 0.0  ;;  %v1670_v20 = vmul.f32 0.2, %v1542_v14  ;;  %v1671_v24 = vmul.f32 0.2, %v1543_v63 }
 0x1de   : > { %v3669_v32 = vmul.f32 %v3440_v62, %v1437_v35  ;;  %v3672_v13 = vmul.f32 %v3456_v22, %v1437_v35  ;;  %v3675_v12 = vmul.f32 %v1437_v35, %v3488_v18  ;;  %v3678_v26 = vmul.f32 %v1437_v35, %v3502_v52 }
 0x1df   : > { %v1734_v8 = vsel %vm1606_vm0, %v1542_v14, %v1670_v20  ;;  %v1735_v11 = vsel %vm1607_vm1, %v1543_v63, %v1671_v24  ;;  %v3681_v28 = vmul.f32 %v3480_v2, %v1437_v35  ;;  %v3684_v16 = vmul.f32 %v3496_v38, %v1437_v35  ;;  %v4838_v14 = vld [vmem:[#allocation20_spill] sm:$0xff]  ;;  %v4839_v20 = vld [vmem:[#allocation23_spill] sm:$0xff] }
 0x1e0   : > { %v2479_v5 = vpack.c.bf16 %v1735_v11, %v1734_v8  ;;  %v3687_v62 = vmul.f32 %v1437_v35, %v3528_v58  ;;  %v3690_v22 = vmul.f32 %v1437_v35, %v3542_v25  ;;  %v3693_v18 = vmul.f32 %v3520_v46, %v1437_v35  ;;  %v4841_v8 = vld [vmem:[#allocation25_spill] sm:$0xff] }
 0x1e1   : > { %v3696_v52 = vmul.f32 %v3536_v3, %v1437_v35  ;;  %v3699_v15 = vmul.f32 %v3560_v17, %v1437_v35  ;;  %v3702_v2 = vmul.f32 %v3576_v47, %v1437_v35  ;;  %v1433_v38 = vsub.f32 %v1429_v21, %v1431_v29  ;;  %v4835_v21 = vld [vmem:[#allocation19_spill] sm:$0xff]  ;;  %v4836_v29 = vld [vmem:[#allocation21_spill] sm:$0xff] }
 0x1e2   : > { %2579 = vst [vmem:[%s3704_s19 + $0x70] sm:$0xff] %v2479_v5   ;;  %v1502_v58 = vmul.f32 %v3605_v31, %v3570_v19  ;;  %v1503_v46 = vmul.f32 %v3605_v31, %v3584_v7  ;;  %v3713_v3 = vmul.f32 %v3605_v31, %v3290_v43  ;;  %v3717_v25 = vmul.f32 %v3605_v31, %v3302_v49  ;;  %v4832_v43 = vld [vmem:[#allocation17_spill] sm:$0xff]  ;;  %v4833_v49 = vld [vmem:[#allocation14_spill] sm:$0xff] }
 0x1e3   : > { %v3719_v47 = vrot.slane %v1433_v38, %v1436_v56  ;;  %v3723_v17 = vmul.f32 %v3286_v41, %v3605_v31  ;;  %v3727_v19 = vmul.f32 %v4830_v45, %v3605_v31  ;;  %v3731_v7 = vmul.f32 %v3605_v31, %v4831_v23  ;;  %v4843_v5 = vld [vmem:[#allocation22_spill] sm:$0xff]  ;;  %v4845_v45 = vld [vmem:[#allocation24_spill] sm:$0xff] }
 0x1e4   : > { %v3735_v33 = vmul.f32 %v3605_v31, %v4832_v43  ;;  %v3739_v56 = vmul.f32 %v4833_v49, %v3605_v31  ;;  %v3743_v41 = vmul.f32 %v4834_v53, %v3605_v31  ;;  %v3747_v1 = vmul.f32 %v3605_v31, %v4835_v21  ;;  %v4847_v43 = vld [vmem:[#allocation27_spill] sm:$0xff]  ;;  %v4849_v53 = vld [vmem:[#allocation29_spill] sm:$0xff] }
 0x1e5   : > { %v1574_v59 = vadd.f32 %v3719_v47, %v1502_v58  ;;  %v1575_v35 = vadd.f32 %v3719_v47, %v1503_v46  ;;  %v3753_v57 = vmul.f32 %v3605_v31, %v4836_v29  ;;  %v3757_v37 = vmul.f32 %v4837_v39, %v3605_v31  ;;  %v4851_v29 = vld [vmem:[#allocation26_spill] sm:$0xff] }
 0x1e6   : > { %v3761_v63 = vmul.f32 %v4838_v14, %v3605_v31  ;;  %v3765_v24 = vmul.f32 %v3605_v31, %v4839_v20  ;;  %v3769_v11 = vmul.f32 %v3605_v31, %v4841_v8  ;;  %v3773_v38 = vmul.f32 %v4843_v5, %v3605_v31  ;;  %v4853_v8 = vld [vmem:[#allocation28_spill] sm:$0xff] }
 0x1e7   : > { %vm1638_vm2 = vcmp.ge.f32.partialorder %v1574_v59, 0.0  ;;  %vm1639_vm3 = vcmp.ge.f32.partialorder %v1575_v35, 0.0  ;;  %v1702_v58 = vmul.f32 0.2, %v1574_v59  ;;  %v1703_v46 = vmul.f32 0.2, %v1575_v35 }
 0x1e8   : > { %4840 = vst [vmem:[#allocation13_spill] sm:$0xff] %v3765_v24  ;;  %4842 = vst [vmem:[#allocation15_spill] sm:$0xff] %v3769_v11  ;;  %v3777_v23 = vmul.f32 %v4845_v45, %v3605_v31  ;;  %v3781_v49 = vmul.f32 %v3605_v31, %v4847_v43  ;;  %v3785_v21 = vmul.f32 %v3605_v31, %v4849_v53  ;;  %v4854_v45 = vld [vmem:[#allocation31_spill] sm:$0xff]  ;;  %v4855_v11 = vld [vmem:[#allocation33_spill] sm:$0xff] }
 0x1e9   : > { %4844 = vst [vmem:[#allocation17_spill] sm:$0xff] %v3773_v38  ;;  %v3789_v39 = vmul.f32 %v4851_v29, %v3605_v31  ;;  %v1766_v14 = vsel %vm1638_vm2, %v1574_v59, %v1702_v58  ;;  %v1767_v20 = vsel %vm1639_vm3, %v1575_v35, %v1703_v46  ;;  %v1493_v5 = vmul.f32 %v4853_v8, %v3605_v31  ;;  %v4858_v29 = vld [vmem:[#allocation35_spill] sm:$0xff]  ;;  %v4859_v35 = vld [vmem:[#allocation37_spill] sm:$0xff]  ;;  %v4860_v46 = vld [vmem:[#allocation34_spill] sm:$0xff] }
 0x1ea   : > { %4846 = vst [vmem:[#allocation14_spill] sm:$0xff] %v3777_v23  ;;  %4848 = vst [vmem:[#allocation16_spill] sm:$0xff] %v3781_v49  ;;  %v1494_v23 = vmul.f32 %v3605_v31, %v4854_v45  ;;  %v2559_v38 = vpack.c.bf16 %v1767_v20, %v1766_v14  ;;  %v1495_v43 = vmul.f32 %v3605_v31, %v4855_v11  ;;  %v4856_v49 = vld [vmem:[#allocation30_spill] sm:$0xff]  ;;  %v4861_v14 = vld [vmem:[#allocation36_spill] sm:$0xff] }
 0x1eb   : > { %4850 = vst [vmem:[#allocation19_spill] sm:$0xff] %v3785_v21  ;;  %4852 = vst [vmem:[#allocation21_spill] sm:$0xff] %v3789_v39  ;;  %v1496_v53 = vmul.f32 %v4856_v49, %v3605_v31  ;;  %v4857_v21 = vld [vmem:[#allocation32_spill] sm:$0xff]  ;;  %v1498_v59 = vmul.f32 %v3605_v31, %v4858_v29  ;;  %v1499_v58 = vmul.f32 %v3605_v31, %v4859_v35  ;;  %v4862_v11 = vld [vmem:[#allocation38_spill] sm:$0xff] }
 0x1ec   : > { %v1497_v24 = vmul.f32 %v4857_v21, %v3605_v31  ;;  %v1500_v8 = vmul.f32 %v4860_v46, %v3605_v31  ;;  %v1501_v20 = vmul.f32 %v4861_v14, %v3605_v31  ;;  %2595 = vst [vmem:[%s3704_s19 + $0xf0] sm:$0xff] %v2559_v38   ;;  %v1504_v45 = vmul.f32 %v4862_v11, %v3605_v31  ;;  %v4863_v49 = vld [vmem:[#allocation39_spill] sm:$0xff] }
 0x1ed   : > { %v1505_v39 = vmul.f32 %v4863_v49, %v3605_v31  ;;  %v3816_v21 = vadd.f32 %v3624_v9, %v3610_v27  ;;  %v3820_v29 = vadd.f32 %v3624_v9, %v3613_v6  ;;  %v3824_v35 = vadd.f32 %v3624_v9, %v3616_v55 }
 0x1ee   : > { %v3828_v38 = vadd.f32 %v3624_v9, %v3619_v51  ;;  %v3832_v46 = vadd.f32 %v3624_v9, %v3622_v60  ;;  %v3836_v31 = vadd.f32 %v3624_v9, %v3627_v34  ;;  %v3840_v27 = vadd.f32 %v3624_v9, %v3630_v42 }
 0x1ef   : > { %v3844_v6 = vadd.f32 %v3624_v9, %v3633_v48  ;;  %v3848_v55 = vadd.f32 %v3624_v9, %v3636_v40  ;;  %v3852_v51 = vadd.f32 %v3624_v9, %v3639_v44  ;;  %v3856_v60 = vadd.f32 %v3624_v9, %v3642_v4 }
 0x1f0   : > { %v3860_v34 = vadd.f32 %v3624_v9, %v3645_v61  ;;  %v3864_v42 = vadd.f32 %v3624_v9, %v3650_v0  ;;  %v3868_v48 = vadd.f32 %v3624_v9, %v3653_v10  ;;  %v3872_v40 = vadd.f32 %v3624_v9, %v3657_v36  ;;  %v4870_v14 = vld [vmem:[#allocation17_spill] sm:$0xff] }
 0x1f1   : > { %v3876_v44 = vadd.f32 %v3624_v9, %v3660_v30  ;;  %v3880_v4 = vadd.f32 %v3624_v9, %v3663_v50  ;;  %v3884_v61 = vadd.f32 %v3624_v9, %v3666_v54  ;;  %v3888_v0 = vadd.f32 %v3624_v9, %v3669_v32  ;;  %v4871_v11 = vld [vmem:[#allocation14_spill] sm:$0xff]  ;;  %v4873_v49 = vld [vmem:[#allocation16_spill] sm:$0xff] }
 0x1f2   : > { %v3892_v10 = vadd.f32 %v3624_v9, %v3672_v13  ;;  %v3896_v36 = vadd.f32 %v3624_v9, %v3675_v12  ;;  %v3900_v30 = vadd.f32 %v3624_v9, %v3678_v26  ;;  %v3904_v50 = vadd.f32 %v3624_v9, %v3681_v28 }
 0x1f3   : > { %v3908_v54 = vadd.f32 %v3624_v9, %v3684_v16  ;;  %v3912_v32 = vadd.f32 %v3624_v9, %v3687_v62  ;;  %v3916_v13 = vadd.f32 %v3624_v9, %v3690_v22  ;;  %v3920_v12 = vadd.f32 %v3624_v9, %v3693_v18 }
 0x1f4   : > { %v3924_v26 = vadd.f32 %v3624_v9, %v3696_v52  ;;  %v3928_v28 = vadd.f32 %v3624_v9, %v3699_v15  ;;  %v3932_v16 = vadd.f32 %v3624_v9, %v3702_v2  ;;  %v3936_v62 = vadd.f32 %v3719_v47, %v3713_v3 }
 0x1f5   : > { %v3940_v22 = vadd.f32 %v3719_v47, %v3717_v25  ;;  %v3944_v18 = vadd.f32 %v3719_v47, %v3723_v17  ;;  %v3948_v52 = vadd.f32 %v3719_v47, %v3727_v19  ;;  %v3952_v9 = vadd.f32 %v3719_v47, %v3731_v7 }
 0x1f6   : > { %v3956_v15 = vadd.f32 %v3719_v47, %v3735_v33  ;;  %v3960_v2 = vadd.f32 %v3719_v47, %v3739_v56  ;;  %v3964_v3 = vadd.f32 %v3719_v47, %v3743_v41  ;;  %v3968_v25 = vadd.f32 %v3719_v47, %v3747_v1  ;;  %v4866_v33 = vld [vmem:[#allocation13_spill] sm:$0xff]  ;;  %v4868_v41 = vld [vmem:[#allocation15_spill] sm:$0xff] }
 0x1f7   : > { %v3972_v17 = vadd.f32 %v3719_v47, %v3753_v57  ;;  %v3976_v19 = vadd.f32 %v3719_v47, %v3757_v37  ;;  %v3980_v7 = vadd.f32 %v3719_v47, %v3761_v63  ;;  %v3984_v56 = vadd.f32 %v3719_v47, %v4866_v33 }
 0x1f8   : > { %4864 = vst [vmem:[#allocation18_spill] sm:$0xff] %v3960_v2  ;;  %v3988_v1 = vadd.f32 %v3719_v47, %v4868_v41  ;;  %v3992_v57 = vadd.f32 %v3719_v47, %v4870_v14  ;;  %v3996_v37 = vadd.f32 %v3719_v47, %v4871_v11  ;;  %v4000_v63 = vadd.f32 %v3719_v47, %v4873_v49 }
 0x1f9   : > { %4865 = vst [vmem:[#allocation20_spill] sm:$0xff] %v3980_v7  ;;  %4867 = vst [vmem:[#allocation23_spill] sm:$0xff] %v3984_v56  ;;  %v4875_v7 = vld [vmem:[#allocation19_spill] sm:$0xff]  ;;  %v4877_v56 = vld [vmem:[#allocation21_spill] sm:$0xff]  ;;  %v4014_v14 = vadd.f32 %v3719_v47, %v1494_v23  ;;  %v4017_v11 = vadd.f32 %v3719_v47, %v1495_v43  ;;  %v4020_v49 = vadd.f32 %v3719_v47, %v1496_v53  ;;  %vm1578_vm4 = vcmp.ge.f32.partialorder %v3816_v21, 0.0 }
 0x1fa   : > { %4869 = vst [vmem:[#allocation25_spill] sm:$0xff] %v3988_v1  ;;  %4872 = vst [vmem:[#allocation22_spill] sm:$0xff] %v3996_v37  ;;  %v4004_v33 = vadd.f32 %v3719_v47, %v4875_v7  ;;  %v4008_v41 = vadd.f32 %v3719_v47, %v4877_v56  ;;  %v4011_v1 = vadd.f32 %v3719_v47, %v1493_v5  ;;  %vm1579_vm5 = vcmp.ge.f32.partialorder %v3820_v29, 0.0 }
 0x1fb   : > { %4874 = vst [vmem:[#allocation24_spill] sm:$0xff] %v4000_v63  ;;  %4880 = vst [vmem:[#allocation28_spill] sm:$0xff] %v4014_v14  ;;  %v4023_v63 = vadd.f32 %v3719_v47, %v1497_v24  ;;  %v4026_v7 = vadd.f32 %v3719_v47, %v1498_v59  ;;  %v4029_v56 = vadd.f32 %v3719_v47, %v1499_v58  ;;  %vm1580_vm6 = vcmp.ge.f32.partialorder %v3824_v35, 0.0 }
 0x1fc   : > { %4876 = vst [vmem:[#allocation27_spill] sm:$0xff] %v4004_v33  ;;  %4878 = vst [vmem:[#allocation29_spill] sm:$0xff] %v4008_v41  ;;  %v4032_v5 = vadd.f32 %v3719_v47, %v1500_v8  ;;  %v4035_v23 = vadd.f32 %v3719_v47, %v1501_v20  ;;  %v4038_v43 = vadd.f32 %v3719_v47, %v1504_v45  ;;  %vm1581_vm7 = vcmp.ge.f32.partialorder %v3828_v38, 0.0 }
 0x1fd   : > { %4879 = vst [vmem:[#allocation26_spill] sm:$0xff] %v4011_v1  ;;  %4881 = vst [vmem:[#allocation31_spill] sm:$0xff] %v4017_v11  ;;  %v4041_v53 = vadd.f32 %v3719_v47, %v1505_v39  ;;  %vm1582_vm8 = vcmp.ge.f32.partialorder %v3832_v46, 0.0  ;;  %vm1583_vm9 = vcmp.ge.f32.partialorder %v3836_v31, 0.0  ;;  %vm1584_vm10 = vcmp.ge.f32.partialorder %v3840_v27, 0.0 }
 0x1fe   : > { %4882 = vst [vmem:[#allocation33_spill] sm:$0xff] %v4020_v49  ;;  %4883 = vst [vmem:[#allocation30_spill] sm:$0xff] %v4023_v63  ;;  %vm1585_vm11 = vcmp.ge.f32.partialorder %v3844_v6, 0.0  ;;  %vm1586_vm12 = vcmp.ge.f32.partialorder %v3848_v55, 0.0  ;;  %vm1587_vm13 = vcmp.ge.f32.partialorder %v3852_v51, 0.0  ;;  %vm1588_vm14 = vcmp.ge.f32.partialorder %v3856_v60, 0.0 }
 0x1ff   : > { %4884 = vst [vmem:[#allocation32_spill] sm:$0xff] %v4026_v7  ;;  %4885 = vst [vmem:[#allocation35_spill] sm:$0xff] %v4029_v56  ;;  %v1642_v47 = vmul.f32 0.2, %v3816_v21  ;;  %v1643_v24 = vmul.f32 0.2, %v3820_v29 }
 0x200   : > { %4886 = vst [vmem:[#allocation37_spill] sm:$0xff] %v4032_v5  ;;  %4887 = vst [vmem:[#allocation34_spill] sm:$0xff] %v4035_v23  ;;  %v1644_v39 = vmul.f32 0.2, %v3824_v35  ;;  %v1645_v59 = vmul.f32 0.2, %v3828_v38 }
 0x201   : > { %4888 = vst [vmem:[#allocation36_spill] sm:$0xff] %v4038_v43  ;;  %4889 = vst [vmem:[#allocation38_spill] sm:$0xff] %v4041_v53  ;;  %v1646_v58 = vmul.f32 0.2, %v3832_v46  ;;  %vm1589_vm15 = vcmp.ge.f32.partialorder %v3860_v34, 0.0  ;;  %v4066_v53 = vsel %vm1578_vm4, %v3816_v21, %v1642_v47  ;;  %vm1590_vm0 = vcmp.ge.f32.partialorder %v3864_v42, 0.0 }
 0x202   : > { %v1647_v8 = vmul.f32 0.2, %v3836_v31  ;;  %v1648_v20 = vmul.f32 0.2, %v3840_v27  ;;  %v1649_v45 = vmul.f32 0.2, %v3844_v6  ;;  %v4075_v56 = vsel %vm1579_vm5, %v3820_v29, %v1643_v24 }
 0x203   : > { %4890 = vst [vmem:[#allocation39_spill] sm:$0xff] %v4066_v53  ;;  %v1650_v43 = vmul.f32 0.2, %v3848_v55  ;;  %v1651_v23 = vmul.f32 0.2, %v3852_v51  ;;  %4891 = vst [vmem:[#allocation13_spill] sm:$0xff] %v4075_v56  ;;  %v4090_v53 = vsel %vm1580_vm6, %v3824_v35, %v1644_v39  ;;  %v4105_v63 = vsel %vm1581_vm7, %v3828_v38, %v1645_v59 }
 0x204   : > { %v1652_v5 = vmul.f32 0.2, %v3856_v60  ;;  %vm1591_vm1 = vcmp.ge.f32.partialorder %v3868_v48, 0.0  ;;  %v4079_v7 = vmul.f32 0.2, %v3860_v34  ;;  %4892 = vst [vmem:[#allocation15_spill] sm:$0xff] %v4090_v53 }
 0x205   : > { %v4082_v21 = vmul.f32 0.2, %v3864_v42  ;;  %v4085_v47 = vmul.f32 0.2, %v3868_v48  ;;  %vm1592_vm2 = vcmp.ge.f32.partialorder %v3872_v40, 0.0  ;;  %4894 = vst [vmem:[#allocation14_spill] sm:$0xff] %v4105_v63 }
 0x206   : > { %v4094_v29 = vmul.f32 0.2, %v3872_v40  ;;  %v4097_v24 = vmul.f32 0.2, %v3876_v44  ;;  %v4100_v56 = vmul.f32 0.2, %v3880_v4 }
 0x207   : > { %vm1593_vm3 = vcmp.ge.f32.partialorder %v3876_v44, 0.0  ;;  %v4109_v35 = vmul.f32 0.2, %v3884_v61  ;;  %v4112_v39 = vmul.f32 0.2, %v3888_v0  ;;  %vm1594_vm4 = vcmp.ge.f32.partialorder %v3880_v4, 0.0 }
 0x208   : > { %4893 = vst [vmem:[#allocation17_spill] sm:$0xff] %v4100_v56  ;;  %v4115_v53 = vmul.f32 0.2, %v3892_v10  ;;  %v4120_v56 = vsel %vm1582_vm8, %v3832_v46, %v1646_v58  ;;  %v4124_v38 = vmul.f32 0.2, %v3896_v36  ;;  %vm1595_vm5 = vcmp.ge.f32.partialorder %v3884_v61, 0.0 }
 0x209   : > { %4896 = vst [vmem:[#allocation19_spill] sm:$0xff] %v4120_v56  ;;  %v4127_v59 = vmul.f32 0.2, %v3900_v30  ;;  %v4130_v63 = vmul.f32 0.2, %v3904_v50  ;;  %vm1596_vm6 = vcmp.ge.f32.partialorder %v3888_v0, 0.0 }
 0x20a   : > { %4895 = vst [vmem:[#allocation16_spill] sm:$0xff] %v4115_v53  ;;  %v4135_v53 = vsel %vm1583_vm9, %v3836_v31, %v1647_v8  ;;  %v4139_v46 = vmul.f32 0.2, %v3908_v54  ;;  %v4142_v58 = vmul.f32 0.2, %v3912_v32  ;;  %vm1599_vm9 = vcmp.ge.f32.partialorder %v3900_v30, 0.0 }
 0x20b   : > { %4897 = vst [vmem:[#allocation21_spill] sm:$0xff] %v4130_v63  ;;  %4898 = vst [vmem:[#allocation40_spill] sm:$0xff] %v4135_v53  ;;  %v4145_v56 = vmul.f32 0.2, %v3916_v13  ;;  %v4150_v63 = vsel %vm1584_vm10, %v3840_v27, %v1648_v20  ;;  %v4156_v31 = vmul.f32 0.2, %v3920_v12  ;;  %v4167_v27 = vsel %vm1585_vm11, %v3844_v6, %v1649_v45 }
 0x20c   : > { %4899 = vst [vmem:[#allocation41_spill] sm:$0xff] %v4150_v63  ;;  %v4159_v8 = vmul.f32 0.2, %v3924_v26  ;;  %v4162_v53 = vmul.f32 0.2, %v3928_v28  ;;  %4901 = vst [vmem:[#allocation43_spill] sm:$0xff] %v4167_v27  ;;  %v4185_v6 = vsel %vm1586_vm12, %v3848_v55, %v1650_v43  ;;  %v4203_v55 = vsel %vm1587_vm13, %v3852_v51, %v1651_v23 }
 0x20d   : > { %v4174_v20 = vmul.f32 0.2, %v3932_v16  ;;  %v4177_v63 = vmul.f32 0.2, %v3936_v62  ;;  %4903 = vst [vmem:[#allocation45_spill] sm:$0xff] %v4185_v6  ;;  %vm1603_vm11 = vcmp.ge.f32.partialorder %v3916_v13, 0.0  ;;  %v4221_v51 = vsel %vm1588_vm14, %v3856_v60, %v1652_v5 }
 0x20e   : > { %4900 = vst [vmem:[#allocation42_spill] sm:$0xff] %v4162_v53  ;;  %v4180_v53 = vmul.f32 0.2, %v3940_v22  ;;  %v4192_v45 = vmul.f32 0.2, %v3944_v18  ;;  %4905 = vst [vmem:[#allocation47_spill] sm:$0xff] %v4203_v55  ;;  %v4240_v60 = vsel %vm1589_vm15, %v3860_v34, %v4079_v7  ;;  %v4259_v34 = vsel %vm1590_vm0, %v3864_v42, %v4082_v21 }
 0x20f   : > { %v4195_v27 = vmul.f32 0.2, %v3948_v52  ;;  %vm1609_vm12 = vcmp.ge.f32.partialorder %v3932_v16, 0.0  ;;  %v4210_v43 = vmul.f32 0.2, %v3956_v15  ;;  %4907 = vst [vmem:[#allocation49_spill] sm:$0xff] %v4221_v51  ;;  %v4278_v42 = vsel %vm1591_vm1, %v3868_v48, %v4085_v47 }
 0x210   : > { %4902 = vst [vmem:[#allocation44_spill] sm:$0xff] %v4180_v53  ;;  %v4198_v53 = vmul.f32 0.2, %v3952_v9  ;;  %v4213_v6 = vmul.f32 0.2, %v3960_v2  ;;  %vm1613_vm13 = vcmp.ge.f32.partialorder %v3948_v52, 0.0  ;;  %v4291_v48 = vsel %vm1592_vm2, %v3872_v40, %v4094_v29 }
 0x211   : > { %v4228_v23 = vmul.f32 0.2, %v3968_v25  ;;  %v4231_v55 = vmul.f32 0.2, %v3972_v17  ;;  %4911 = vst [vmem:[#allocation53_spill] sm:$0xff] %v4240_v60  ;;  %vm1617_vm14 = vcmp.ge.f32.partialorder %v3964_v3, 0.0  ;;  %v4304_v40 = vsel %vm1593_vm3, %v3876_v44, %v4097_v24 }
 0x212   : > { %4904 = vst [vmem:[#allocation46_spill] sm:$0xff] %v4198_v53  ;;  %v4216_v53 = vmul.f32 0.2, %v3964_v3  ;;  %v4912_v5 = vld [vmem:[#allocation20_spill] sm:$0xff]  ;;  %v4266_v7 = vmul.f32 0.2, %v3992_v57 }
 0x213   : > { %4908 = vst [vmem:[#allocation50_spill] sm:$0xff] %v4228_v23  ;;  %4909 = vst [vmem:[#allocation51_spill] sm:$0xff] %v4231_v55  ;;  %v4247_v51 = vmul.f32 0.2, %v4912_v5  ;;  %v4913_v55 = vld [vmem:[#allocation23_spill] sm:$0xff]  ;;  %vm1621_vm15 = vcmp.ge.f32.partialorder %v4912_v5, 0.0 }
 0x214   : > { %4906 = vst [vmem:[#allocation48_spill] sm:$0xff] %v4216_v53  ;;  %v4234_v53 = vmul.f32 0.2, %v3976_v19  ;;  %v4250_v23 = vmul.f32 0.2, %v4913_v55  ;;  %4921 = vst [vmem:[#allocation56_spill] sm:$0xff] %v4278_v42 }
 0x215   : > { %v4269_v60 = vmul.f32 0.2, %v3996_v37  ;;  %vm1625_vm0 = vcmp.ge.f32.partialorder %v3996_v37, 0.0  ;;  %v1691_v21 = vmul.f32 0.2, %v4004_v33  ;;  %4922 = vst [vmem:[#allocation57_spill] sm:$0xff] %v4291_v48 }
 0x216   : > { %4910 = vst [vmem:[#allocation52_spill] sm:$0xff] %v4234_v53  ;;  %4914 = vst [vmem:[#allocation20_spill] sm:$0xff] %v4250_v23  ;;  %v4915_v53 = vld [vmem:[#allocation25_spill] sm:$0xff]  ;;  %vm1629_vm1 = vcmp.ge.f32.partialorder %v4011_v1, 0.0  ;;  %v1694_v47 = vmul.f32 0.2, %v4014_v14 }
 0x217   : > { %v4253_v2 = vmul.f32 0.2, %v4915_v53  ;;  %4917 = vst [vmem:[#allocation25_spill] sm:$0xff] %v4259_v34  ;;  %4918 = vst [vmem:[#allocation54_spill] sm:$0xff] %v4269_v60  ;;  %v1692_v34 = vmul.f32 0.2, %v4008_v41 }
 0x218   : > { %v1695_v42 = vmul.f32 0.2, %v4017_v11  ;;  %v1696_v41 = vmul.f32 0.2, %v4020_v49  ;;  %4923 = vst [vmem:[#allocation58_spill] sm:$0xff] %v4304_v40  ;;  %v4924_v29 = vld [vmem:[#allocation30_spill] sm:$0xff] }
 0x219   : > { %4916 = vst [vmem:[#allocation23_spill] sm:$0xff] %v4253_v2  ;;  %v4919_v2 = vld [vmem:[#allocation24_spill] sm:$0xff]  ;;  %vm1633_vm2 = vcmp.ge.f32.partialorder %v4924_v29, 0.0  ;;  %v4927_v33 = vld [vmem:[#allocation37_spill] sm:$0xff]  ;;  %v1697_v14 = vmul.f32 0.2, %v4924_v29 }
 0x21a   : > { %v4272_v23 = vmul.f32 0.2, %v4919_v2  ;;  %v4925_v48 = vld [vmem:[#allocation32_spill] sm:$0xff]  ;;  %vm1636_vm7 = vcmp.ge.f32.partialorder %v4927_v33, 0.0  ;;  %v4928_v2 = vld [vmem:[#allocation17_spill] sm:$0xff]  ;;  %v4930_v24 = vld [vmem:[#allocation34_spill] sm:$0xff] }
 0x21b   : > { %v1698_v11 = vmul.f32 0.2, %v4925_v48  ;;  %v4317_v44 = vsel %vm1594_vm4, %v3880_v4, %v4928_v2  ;;  %vm1637_vm3 = vcmp.ge.f32.partialorder %v4930_v24, 0.0  ;;  %v4931_v40 = vld [vmem:[#allocation36_spill] sm:$0xff]  ;;  %v4932_v37 = vld [vmem:[#allocation38_spill] sm:$0xff]  ;;  %v4336_v2 = vsel %vm1596_vm6, %v3888_v0, %v4112_v39  ;;  %v4936_v0 = vld [vmem:[#allocation21_spill] sm:$0xff] }
 0x21c   : > { %4920 = vst [vmem:[#allocation55_spill] sm:$0xff] %v4272_v23  ;;  %v1693_v23 = vmul.f32 0.2, %v4011_v1  ;;  %v4926_v1 = vld [vmem:[#allocation35_spill] sm:$0xff]  ;;  %4929 = vst [vmem:[#allocation37_spill] sm:$0xff] %v4317_v44  ;;  %vm1640_vm10 = vcmp.ge.f32.partialorder %v4931_v40, 0.0 }
 0x21d   : > { %v1699_v49 = vmul.f32 0.2, %v4926_v1  ;;  %v1700_v60 = vmul.f32 0.2, %v4927_v33  ;;  %v1701_v29 = vmul.f32 0.2, %v4930_v24  ;;  %v4329_v1 = vsel %vm1595_vm5, %v3884_v61, %v4109_v35 }
 0x21e   : > { %v1704_v48 = vmul.f32 0.2, %v4931_v40  ;;  %v1705_v4 = vmul.f32 0.2, %v4932_v37  ;;  %v4933_v44 = vld [vmem:[#allocation16_spill] sm:$0xff]  ;;  %vm4934_vm4 = vcmp.ge.f32.partialorder %v3892_v10, 0.0  ;;  %v4354_v35 = vsel %vm1599_vm9, %v3900_v30, %v4127_v59 }
 0x21f   : > { %v4342_v24 = vsel %vm4934_vm4, %v3892_v10, %v4933_v44  ;;  %vm4935_vm8 = vcmp.ge.f32.partialorder %v3896_v36, 0.0  ;;  %vm4937_vm5 = vcmp.ge.f32.partialorder %v3904_v50, 0.0  ;;  %vm4938_vm6 = vcmp.ge.f32.partialorder %v3908_v54, 0.0 }
 0x220   : > { %v4348_v61 = vsel %vm4935_vm8, %v3896_v36, %v4124_v38  ;;  %v4360_v39 = vsel %vm4937_vm5, %v3904_v50, %v4936_v0  ;;  %v4366_v10 = vsel %vm4938_vm6, %v3908_v54, %v4139_v46  ;;  %vm4939_vm8 = vcmp.ge.f32.partialorder %v3912_v32, 0.0 }
 0x221   : > { %v4372_v36 = vsel %vm4939_vm8, %v3912_v32, %v4142_v58  ;;  %v4378_v30 = vsel %vm1603_vm11, %v3916_v13, %v4145_v56  ;;  %vm4940_vm9 = vcmp.ge.f32.partialorder %v3920_v12, 0.0  ;;  %vm4941_vm4 = vcmp.ge.f32.partialorder %v3924_v26, 0.0  ;;  %v4942_v32 = vld [vmem:[#allocation42_spill] sm:$0xff] }
 0x222   : > { %v4384_v50 = vsel %vm4940_vm9, %v3920_v12, %v4156_v31  ;;  %v4390_v54 = vsel %vm4941_vm4, %v3924_v26, %v4159_v8  ;;  %vm4943_vm5 = vcmp.ge.f32.partialorder %v3928_v28, 0.0  ;;  %v4402_v13 = vsel %vm1609_vm12, %v3932_v16, %v4174_v20  ;;  %v4945_v26 = vld [vmem:[#allocation44_spill] sm:$0xff] }
 0x223   : > { %v4396_v38 = vsel %vm4943_vm5, %v3928_v28, %v4942_v32  ;;  %vm4944_vm11 = vcmp.ge.f32.partialorder %v3936_v62, 0.0  ;;  %vm4946_vm6 = vcmp.ge.f32.partialorder %v3940_v22, 0.0  ;;  %vm4947_vm8 = vcmp.ge.f32.partialorder %v3944_v18, 0.0  ;;  %v4958_v8 = vld [vmem:[#allocation52_spill] sm:$0xff]  ;;  %v4972_v32 = vld [vmem:[#allocation29_spill] sm:$0xff] }
 0x224   : > { %v4408_v12 = vsel %vm4944_vm11, %v3936_v62, %v4177_v63  ;;  %v4414_v56 = vsel %vm4946_vm6, %v3940_v22, %v4945_v26  ;;  %v4420_v28 = vsel %vm4947_vm8, %v3944_v18, %v4192_v45  ;;  %v4426_v16 = vsel %vm1613_vm13, %v3948_v52, %v4195_v27  ;;  %v4948_v62 = vld [vmem:[#allocation46_spill] sm:$0xff]  ;;  %v4953_v52 = vld [vmem:[#allocation48_spill] sm:$0xff] }
 0x225   : > { %vm4949_vm12 = vcmp.ge.f32.partialorder %v3952_v9, 0.0  ;;  %vm4950_vm9 = vcmp.ge.f32.partialorder %v3956_v15, 0.0  ;;  %v4951_v18 = vld [vmem:[#allocation18_spill] sm:$0xff]  ;;  %v4450_v46 = vsel %vm1617_vm14, %v3964_v3, %v4953_v52  ;;  %vm4955_vm13 = vcmp.ge.f32.partialorder %v3968_v25, 0.0  ;;  %v4977_v52 = vld [vmem:[#allocation31_spill] sm:$0xff] }
 0x226   : > { %v4432_v63 = vsel %vm4949_vm12, %v3952_v9, %v4948_v62  ;;  %v4438_v22 = vsel %vm4950_vm9, %v3956_v15, %v4210_v43  ;;  %vm4952_vm4 = vcmp.ge.f32.partialorder %v4951_v18, 0.0  ;;  %v4954_v9 = vld [vmem:[#allocation50_spill] sm:$0xff]  ;;  %v4956_v15 = vld [vmem:[#allocation51_spill] sm:$0xff]  ;;  %vm4957_vm5 = vcmp.ge.f32.partialorder %v3972_v17, 0.0  ;;  %v4975_v62 = vld [vmem:[#allocation28_spill] sm:$0xff] }
 0x227   : > { %v4444_v59 = vsel %vm4952_vm4, %v4951_v18, %v4213_v6  ;;  %v4456_v58 = vsel %vm4955_vm13, %v3968_v25, %v4954_v9  ;;  %v4462_v31 = vsel %vm4957_vm5, %v3972_v17, %v4956_v15  ;;  %vm4959_vm11 = vcmp.ge.f32.partialorder %v3976_v19, 0.0  ;;  %v4960_v25 = vld [vmem:[#allocation20_spill] sm:$0xff]  ;;  %v4962_v17 = vld [vmem:[#allocation23_spill] sm:$0xff]  ;;  %v4965_v45 = vld [vmem:[#allocation54_spill] sm:$0xff] }
 0x228   : > { %v4468_v27 = vsel %vm4959_vm11, %v3976_v19, %v4958_v8  ;;  %v4474_v3 = vsel %vm1621_vm15, %v4912_v5, %v4247_v51  ;;  %vm4961_vm14 = vcmp.ge.f32.partialorder %v4913_v55, 0.0  ;;  %vm4963_vm6 = vcmp.ge.f32.partialorder %v4915_v53, 0.0  ;;  %v4966_v43 = vld [vmem:[#allocation22_spill] sm:$0xff]  ;;  %v4968_v5 = vld [vmem:[#allocation24_spill] sm:$0xff]  ;;  %v4979_v9 = vld [vmem:[#allocation33_spill] sm:$0xff] }
 0x229   : > { %v4480_v20 = vsel %vm4961_vm14, %v4913_v55, %v4960_v25  ;;  %v4486_v6 = vsel %vm4963_vm6, %v4915_v53, %v4962_v17  ;;  %vm4964_vm8 = vcmp.ge.f32.partialorder %v3992_v57, 0.0  ;;  %v4498_v51 = vsel %vm1625_vm0, %v4966_v43, %v4965_v45  ;;  %v4967_v55 = vld [vmem:[#allocation55_spill] sm:$0xff]  ;;  %v4981_v15 = vld [vmem:[#allocation30_spill] sm:$0xff]  ;;  %v4982_v8 = vld [vmem:[#allocation32_spill] sm:$0xff] }
 0x22a   : > { %v4492_v19 = vsel %vm4964_vm8, %v3992_v57, %v4266_v7  ;;  %vm4969_vm15 = vcmp.ge.f32.partialorder %v4968_v5, 0.0  ;;  %v4970_v53 = vld [vmem:[#allocation27_spill] sm:$0xff]  ;;  %vm4973_vm9 = vcmp.ge.f32.partialorder %v4972_v32, 0.0  ;;  %v4974_v7 = vld [vmem:[#allocation26_spill] sm:$0xff]  ;;  %vm4976_vm0 = vcmp.ge.f32.partialorder %v4975_v62, 0.0 }
 0x22b   : > { %v4504_v44 = vsel %vm4969_vm15, %v4968_v5, %v4967_v55  ;;  %vm4971_vm12 = vcmp.ge.f32.partialorder %v4970_v53, 0.0  ;;  %v4514_v57 = vsel %vm4973_vm9, %v4972_v32, %v1692_v34  ;;  %v4519_v26 = vsel %vm1629_vm1, %v4974_v7, %v1693_v23  ;;  %v4984_v25 = vld [vmem:[#allocation35_spill] sm:$0xff]  ;;  %v4986_v17 = vld [vmem:[#allocation34_spill] sm:$0xff]  ;;  %v4994_v7 = vld [vmem:[#allocation41_spill] sm:$0xff] }
 0x22c   : > { %v4509_v0 = vsel %vm4971_vm12, %v4970_v53, %v1691_v21  ;;  %v4524_v18 = vsel %vm4976_vm0, %v4975_v62, %v1694_v47  ;;  %vm4978_vm4 = vcmp.ge.f32.partialorder %v4977_v52, 0.0  ;;  %vm4980_vm13 = vcmp.ge.f32.partialorder %v4979_v9, 0.0  ;;  %v4988_v45 = vld [vmem:[#allocation39_spill] sm:$0xff]  ;;  %v4991_v55 = vld [vmem:[#allocation14_spill] sm:$0xff] }
 0x22d   : > { %v4529_v21 = vsel %vm4978_vm4, %v4977_v52, %v1695_v42  ;;  %v4534_v34 = vsel %vm4980_vm13, %v4979_v9, %v1696_v41  ;;  %v4539_v23 = vsel %vm1633_vm2, %v4981_v15, %v1697_v14  ;;  %vm4983_vm1 = vcmp.ge.f32.partialorder %v4982_v8, 0.0  ;;  %v4990_v43 = vld [vmem:[#allocation15_spill] sm:$0xff] }
 0x22e   : > { %v4544_v47 = vsel %vm4983_vm1, %v4982_v8, %v1698_v11  ;;  %vm4985_vm5 = vcmp.ge.f32.partialorder %v4984_v25, 0.0  ;;  %v4554_v41 = vsel %vm1636_vm7, %v4927_v33, %v1700_v60  ;;  %v4559_v14 = vsel %vm1637_vm3, %v4986_v17, %v1701_v29  ;;  %v4989_v33 = vld [vmem:[#allocation13_spill] sm:$0xff]  ;;  %v4992_v53 = vld [vmem:[#allocation19_spill] sm:$0xff]  ;;  %v4993_v29 = vld [vmem:[#allocation40_spill] sm:$0xff] }
 0x22f   : > { %v4549_v42 = vsel %vm4985_vm5, %v4984_v25, %v1699_v49  ;;  %v4564_v11 = vsel %vm1640_vm10, %v4931_v40, %v1704_v48  ;;  %vm4987_vm2 = vcmp.ge.f32.partialorder %v4932_v37, 0.0  ;;  %v2409_v60 = vpack.c.bf16 %v4989_v33, %v4988_v45  ;;  %v4995_v62 = vld [vmem:[#allocation43_spill] sm:$0xff]  ;;  %v4996_v48 = vld [vmem:[#allocation45_spill] sm:$0xff]  ;;  %v5001_v25 = vld [vmem:[#allocation56_spill] sm:$0xff] }
 0x230   : > { %v4569_v49 = vsel %vm4987_vm2, %v4932_v37, %v1705_v4  ;;  %v2414_v5 = vpack.c.bf16 %v4991_v55, %v4990_v43  ;;  %v2419_v32 = vpack.c.bf16 %v4993_v29, %v4992_v53  ;;  %v2424_v52 = vpack.c.bf16 %v4995_v62, %v4994_v7  ;;  %v4997_v40 = vld [vmem:[#allocation47_spill] sm:$0xff]  ;;  %v4998_v37 = vld [vmem:[#allocation49_spill] sm:$0xff]  ;;  %v5003_v33 = vld [vmem:[#allocation58_spill] sm:$0xff] }
 0x231   : > { %v2429_v9 = vpack.c.bf16 %v4997_v40, %v4996_v48  ;;  %2410 = vst [vmem:[%s3704_s19] sm:$0xff] %v2409_v60   ;;  %v4999_v4 = vld [vmem:[#allocation53_spill] sm:$0xff]  ;;  %v2454_v60 = vpack.c.bf16 %v4342_v24, %v4336_v2  ;;  %v2459_v29 = vpack.c.bf16 %v4354_v35, %v4348_v61  ;;  %v2464_v7 = vpack.c.bf16 %v4366_v10, %v4360_v39 }
 0x232   : > { %v2434_v15 = vpack.c.bf16 %v4999_v4, %v4998_v37  ;;  %v5000_v8 = vld [vmem:[#allocation25_spill] sm:$0xff]  ;;  %2566 = vst [vmem:[%s3704_s19 + $0x8] sm:$0xff] %v2414_v5   ;;  %2567 = vst [vmem:[%s3704_s19 + $0x10] sm:$0xff] %v2419_v32   ;;  %v2474_v24 = vpack.c.bf16 %v4390_v54, %v4384_v50  ;;  %v2484_v2 = vpack.c.bf16 %v4402_v13, %v4396_v38 }
 0x233   : > { %v2439_v17 = vpack.c.bf16 %v5001_v25, %v5000_v8  ;;  %v5002_v45 = vld [vmem:[#allocation57_spill] sm:$0xff]  ;;  %2568 = vst [vmem:[%s3704_s19 + $0x18] sm:$0xff] %v2424_v52   ;;  %2569 = vst [vmem:[%s3704_s19 + $0x20] sm:$0xff] %v2429_v9   ;;  %v2489_v61 = vpack.c.bf16 %v4414_v56, %v4408_v12  ;;  %v2494_v35 = vpack.c.bf16 %v4426_v16, %v4420_v28 }
 0x234   : > { %v2444_v43 = vpack.c.bf16 %v5003_v33, %v5002_v45  ;;  %v5004_v55 = vld [vmem:[#allocation37_spill] sm:$0xff]  ;;  %2570 = vst [vmem:[%s3704_s19 + $0x28] sm:$0xff] %v2434_v15   ;;  %2574 = vst [vmem:[%s3704_s19 + $0x48] sm:$0xff] %v2454_v60   ;;  %v2499_v39 = vpack.c.bf16 %v4438_v22, %v4432_v63  ;;  %v2504_v10 = vpack.c.bf16 %v4450_v46, %v4444_v59 }
 0x235   : > { %v2449_v53 = vpack.c.bf16 %v4329_v1, %v5004_v55  ;;  %v2469_v1 = vpack.c.bf16 %v4378_v30, %v4372_v36  ;;  %2571 = vst [vmem:[%s3704_s19 + $0x30] sm:$0xff] %v2439_v17   ;;  %2575 = vst [vmem:[%s3704_s19 + $0x50] sm:$0xff] %v2459_v29   ;;  %v2509_v36 = vpack.c.bf16 %v4462_v31, %v4456_v58 }
 0x236   : > { %2572 = vst [vmem:[%s3704_s19 + $0x38] sm:$0xff] %v2444_v43   ;;  %2576 = vst [vmem:[%s3704_s19 + $0x58] sm:$0xff] %v2464_v7   ;;  %v2514_v30 = vpack.c.bf16 %v4474_v3, %v4468_v27  ;;  %v2519_v50 = vpack.c.bf16 %v4486_v6, %v4480_v20  ;;  %v2524_v54 = vpack.c.bf16 %v4498_v51, %v4492_v19 }
 0x237   : > { %2573 = vst [vmem:[%s3704_s19 + $0x40] sm:$0xff] %v2449_v53   ;;  %2577 = vst [vmem:[%s3704_s19 + $0x60] sm:$0xff] %v2469_v1   ;;  %v2529_v38 = vpack.c.bf16 %v4509_v0, %v4504_v44  ;;  %v2534_v13 = vpack.c.bf16 %v4519_v26, %v4514_v57  ;;  %v2539_v12 = vpack.c.bf16 %v4529_v21, %v4524_v18 }
 0x238   : > { %2578 = vst [vmem:[%s3704_s19 + $0x68] sm:$0xff] %v2474_v24   ;;  %2580 = vst [vmem:[%s3704_s19 + $0x78] sm:$0xff] %v2484_v2   ;;  %v2544_v56 = vpack.c.bf16 %v4539_v23, %v4534_v34  ;;  %v2549_v28 = vpack.c.bf16 %v4549_v42, %v4544_v47  ;;  %v2554_v16 = vpack.c.bf16 %v4559_v14, %v4554_v41 }
 0x239   : > { %2581 = vst [vmem:[%s3704_s19 + $0x80] sm:$0xff] %v2489_v61   ;;  %2582 = vst [vmem:[%s3704_s19 + $0x88] sm:$0xff] %v2494_v35   ;;  %v2564_v63 = vpack.c.bf16 %v4569_v49, %v4564_v11 }
 0x23a   : > { %2583 = vst [vmem:[%s3704_s19 + $0x90] sm:$0xff] %v2499_v39   ;;  %2584 = vst [vmem:[%s3704_s19 + $0x98] sm:$0xff] %v2504_v10  }
 0x23b   : > { %2585 = vst [vmem:[%s3704_s19 + $0xa0] sm:$0xff] %v2509_v36   ;;  %2586 = vst [vmem:[%s3704_s19 + $0xa8] sm:$0xff] %v2514_v30  }
 0x23c   : > { %2587 = vst [vmem:[%s3704_s19 + $0xb0] sm:$0xff] %v2519_v50   ;;  %2588 = vst [vmem:[%s3704_s19 + $0xb8] sm:$0xff] %v2524_v54  }
 0x23d   : > { %2589 = vst [vmem:[%s3704_s19 + $0xc0] sm:$0xff] %v2529_v38   ;;  %2590 = vst [vmem:[%s3704_s19 + $0xc8] sm:$0xff] %v2534_v13  }
 0x23e   : > { %2591 = vst [vmem:[%s3704_s19 + $0xd0] sm:$0xff] %v2539_v12   ;;  %2592 = vst [vmem:[%s3704_s19 + $0xd8] sm:$0xff] %v2544_v56  }
 0x23f   : > { %2593 = vst [vmem:[%s3704_s19 + $0xe0] sm:$0xff] %v2549_v28   ;;  %2594 = vst [vmem:[%s3704_s19 + $0xe8] sm:$0xff] %v2554_v16  }
 0x240   : > { %2596 = vst [vmem:[%s3704_s19 + $0xf8] sm:$0xff] %v2564_v63  }
 0x241   : > { %2962 = shalt.err (!%p2959_p2)
}
 0x242   : > { %s2963_s7 = scalar_lea.hbm %s4643_s23, 4096  ;;  %s2967_s28 = scalar_lea.hbm %s4720_s3, 8192 }
 0x243   : > { %p2964_p6 = scmp.ne.s32.totalorder %s4643_s23, %s2963_s7  ;;  %p2968_p5 = scmp.lt.u32.totalorder %s4643_s23, %s4720_s3 }
 0x244   : > { %p2969_p8 = scmp.lt.u32.totalorder %s2967_s28, %s2963_s7  ;;  %p2971_p10 = scmp.lt.u32.totalorder %s2963_s7, %s4643_s23 }
 0x245   : > { %p2965_p12 = pnand %p2964_p6, %p5005_p13 }
 0x246   : > { %p2970_p11 = por %p2969_p8, %p2968_p5 }
 0x247   : > { %p2966_p9 = pneg %p2965_p12 }
 0x248   : > { %p2972_p0 = por %p2971_p10, %p2970_p11 }
 0x24a   : > { %p2973_p7 = pnand %p2972_p0, %p2966_p9 }
 0x24c   : > { %2976 = shalt.err (!%p2973_p7)
}
 0x24d   : > { %s3044_s10 = smov 64   ;;  %s3045_s19 = smov 128  }
 0x24e   : > { %s3046_s11 = smov 4  }
 0x24f   : > { %2741 = dma.vmem_to_hbm [thread:$0]  (%p5005_p13), %s4657_s15, 4096, %s4643_s23, %s2091_s5, %s3044_s10, %s3045_s19, %s3046_s11  }
 0x250 PF: > { %s2118_s22 = sand.u32 1, %s3015_s12   ;;  %p5006_p3 = scmp.ne.s32.totalorder %s4793_s4, 0 }
 0x251   : > { %p5007_p1 = scmp.ge.s32.totalorder %s3035_s17, 2  ;;  %s2119_s9 = scalar_lea.sflag [#allocation5], %s2118_s22 }
 0x253   : > { %p2755_p4 = pnand %p5007_p1, %p5006_p3 }
 0x255   : > { %3010 = dma.done.wait (!%p2755_p4), %s2119_s9, 4096  }
 0x256   : > { %3012 = vsyncadd (!%p2755_p4), %s2119_s9, 4294963200  ;;  %s20_s17 = sadd.s32 1, %s3035_s17   ;;  %s5008_s12 = smov %s3019_s13 }
 0x257   : > { %p17_p2 = scmp.ge.s32.totalorder %s20_s17, 4   ;;  %s5009_s13 = smov %s3023_s14 }
 0x258   : > { %s5010_s14 = smov %s3118_s24  ;;  %s5011_s15 = smov %s3031_s16 }
 0x259   : > { %s5012_s16 = smov %s5014_s18  ;;  %19 = sbr.rel (!%p17_p2) target bundleno = 9 (0x9), region = 102 }
 0x260   :  { %2124 = vsyncpa [#allocation4], 1 }
 0x261   :  { %2126 = vsyncpa [#allocation4 + $0x1], 1 }
 0x262   :  { %2127 = vsyncpa [#allocation7], 1 }
 0x263   :  { %2129 = vsyncpa [#allocation7 + $0x1], 1 }
 0x264   :  { %2130 = vsyncpa [#allocation5], 1 }
 0x265   :  { %2132 = vsyncpa [#allocation5 + $0x1], 1 }

// kernel: wgan_discriminator_forward.4
= control target key start
LH: loop header
LB: loop body
LE: loop exit
PB: predicated region body
PF: predicated region fallthrough
CT: control target
= control target key end

     0   :  { %s6976_s0 = inlined_call_operand.hbm [shape: bf16[128,4096], index: 0, kind: input, shape index: {}]   ;;  %s6977_s1 = inlined_call_operand.hbm [shape: bf16[4096,512], index: 1, kind: input, shape index: {}]   ;;  %s6978_s2 = inlined_call_operand.hbm [shape: f32[2,512], index: 2, kind: input, shape index: {}]   ;;  %s6979_s3 = inlined_call_operand.hbm [shape: bf16[2,64,512], index: 3, kind: output, shape index: {}]  }
   0x1   :  { %6992 = sst [smem:[#allocation21_spill]] %s6976_s0 }
   0x2   :  { %6993 = sst [smem:[#allocation22_spill]] %s6977_s1 }
   0x3   :  { %6994 = sst [smem:[#allocation23_spill]] %s6978_s2 }
   0x4   :  { %6995 = sst [smem:[#allocation24_spill]] %s6979_s3 }
   0x5   :  { %8 = vsyncpa [#allocation4], 0 }
   0x6   :  { %10 = vsyncpa [#allocation4 + $0x1], 0 }
   0x7   :  { %11 = vsyncpa [#allocation7], 0 }
   0x8   :  { %13 = vsyncpa [#allocation7 + $0x1], 0 }
   0x9   :  { %14 = vsyncpa [#allocation5], 0 }
   0xa   :  { %16 = vsyncpa [#allocation5 + $0x1], 0  ;;  %s5862_s12 = smov 0   ;;  %s5864_s13 = smov 0  }
   0xb   :  { %s5866_s14 = smov 0   ;;  %s5868_s15 = smov 0  }
   0xc   :  { %s5870_s16 = smov 0   ;;  %s5872_s17 = smov 0  }
   0xd   :  { %s5874_s18 = smov 0   ;;  %s5876_s19 = smov 0  }
   0xe   :  { %s5878_s20 = smov 0   ;;  %s5880_s21 = smov 0  }
   0xf   :  { %s5882_s22 = smov 0   ;;  %s5884_s23 = smov 0  }
  0x10   :  { %s5886_s24 = smov 0   ;;  %s5888_s25 = smov 0  }
  0x11 LB: > { %6996 = sst [smem:[#allocation14_spill]] %s5773_s12  ;;  %s31_s26 = sadd.s32 1, %s5817_s23  ;;  %s5825_s25 = sphi %s5888_s25, %s22_s25   ;;  %s5821_s24 = sphi %s5886_s24, %s7040_s24   ;;  %s5817_s23 = sphi %s5884_s23, %s7051_s23   ;;  %s5813_s22 = sphi %s5882_s22, %s7038_s22   ;;  %s5809_s21 = sphi %s5880_s21, %s7050_s21   ;;  %s5805_s20 = sphi %s5878_s20, %s7049_s20   ;;  %s5801_s19 = sphi %s5876_s19, %s7048_s19   ;;  %s5797_s18 = sphi %s5874_s18, %s7047_s18   ;;  %s5793_s17 = sphi %s5872_s17, %s7046_s17   ;;  %s5789_s16 = sphi %s5870_s16, %s7045_s16   ;;  %s5785_s15 = sphi %s5868_s15, %s7044_s15   ;;  %s5781_s14 = sphi %s5866_s14, %s7043_s14   ;;  %s5777_s13 = sphi %s5864_s13, %s7042_s13   ;;  %s5773_s12 = sphi %s5862_s12, %s7041_s12  }
  0x12   : > { %6997 = sst [smem:[#allocation15_spill]] %s5785_s15  ;;  %s34_s27 = sadd.s32 1, %s5821_s24 }
  0x13   : > { %6998 = sst [smem:[#allocation16_spill]] %s5809_s21  ;;  %p32_p0 = scmp.ge.s32.totalorder %s31_s26, 2 }
  0x14   : > { %6999 = sst [smem:[#allocation17_spill]] %s5813_s22  ;;  %p6985_p1 = scmp.eq.s32.totalorder %s5825_s25, 0 }
  0x15   : > { %7000 = sst [smem:[#allocation18_spill]] %s5821_s24  ;;  %s69_s28 = sadd.s32 1, %s5793_s17 }
  0x16   : > { %p76_p2 = scmp.ne.s32.totalorder %s5793_s17, %s5789_s16  ;;  %s7053_s26 = smov (%p32_p0, %s31_s26), 0 }
  0x17   : > { %7001 = sst [smem:[#allocation19_spill]] %s7053_s26  ;;  %s7055_s27 = smov (!%p32_p0, %s34_s27), %s5821_s24 }
  0x18   : > { %s5943_s29 = ssub.s32 %s5817_s23, %s7053_s26  ;;  %p5947_p3 = por %p76_p2, %p6985_p1 }
  0x19   : > { %p36_p4 = scmp.ge.s32.totalorder %s7055_s27, 2  ;;  %p6984_p7 = scmp.lt.s32.totalorder %s5825_s25, 4 }
  0x1a   : > { %s4798_s4 = sshll.u32 %s5817_s23, 10  ;;  %s179_s6 = sand.u32 1, %s5825_s25  }
  0x1b   : > { %s7057_s27 = smov (%p36_p4, %s7055_s27), 0  ;;  %s181_s8 = sand.u32 1, %s5793_s17  }
  0x1c   : > { %7003 = sst [smem:[#allocation20_spill]] %s7057_s27  ;;  %s5960_s5 = ssub.s32 %s5821_s24, %s7057_s27 }
  0x1d   : > { %s66_s7 = sor.u32 %s5960_s5, %s5943_s29  ;;  %s4377_s9 = sshll.u32 %s181_s8, 11 }
  0x1e   : > { %p67_p8 = scmp.eq.s32.totalorder %s66_s7, 0  ;;  %s4379_s10 = sshll.u32 %s5821_s24, 1 }
  0x1f   : > { %s190_s26 = sadd.s32 %s4798_s4, %s4379_s10  ;;  %s183_s22 = scalar_lea.vmem [#allocation6], %s4377_s9 }
  0x20   : > { %s5968_s11 = scalar_select %p67_p8, %s5793_s17, %s69_s28  }
  0x21   : > { %s4381_s3 = sshll.u32 %s190_s26, 6  ;;  %s193_s21 = sshll.u32 %s183_s22, 4  ;;  %s5977_s21 = int_to_ptr.vmem [resolvable:$true] %s193_s21 }
  0x22   : > { %s7004_s1 = sld [smem:[#allocation22_spill]]  ;;  %p5983_p9 = pnand %p6984_p7, %p5947_p3 }
  0x23   : > { %p4385_p10 = scmp.ge.s32.totalorder %s5825_s25, 1  ;;  %s5988_s22 = scalar_lea.sflag [#allocation7], %s179_s6 }
  0x24   : > { %p5583_p12 = pneg %p5983_p9 }
  0x28   : > { %s5975_s15 = scalar_lea.hbm %s7004_s1, %s4381_s3  ;;  %s5586_s26 = scalar_lea.hbm %s7004_s1, 131072 }
  0x29   : > { %s5581_s2 = scalar_lea.hbm %s5975_s15, 32768  ;;  %p5587_p2 = scmp.lt.u32.totalorder %s5975_s15, %s7004_s1 }
  0x2a   : > { %p5582_p11 = scmp.ne.s32.totalorder %s5975_s15, %s5581_s2  ;;  %p5588_p3 = scmp.lt.u32.totalorder %s5586_s26, %s5581_s2 }
  0x2b   : > { %p5590_p8 = scmp.lt.u32.totalorder %s5581_s2, %s5975_s15 }
  0x2c   : > { %p5584_p13 = pnand %p5583_p12, %p5582_p11  ;;  %p5589_p4 = por %p5588_p3, %p5587_p2 }
  0x2e   : > { %p5585_p0 = pneg %p5584_p13  ;;  %p5591_p6 = por %p5590_p8, %p5589_p4 }
  0x30   : > { %p5592_p7 = pnand %p5591_p6, %p5585_p0 }
  0x32   : > { %5595 = shalt.err (!%p5592_p7)
}
  0x33   : > { %s5596_s6 = scalar_lea.vmem %s5977_s21, 32768  ;;  %s5827_s8 = smov [#allocation6]  }
  0x34   : > { %p5597_p11 = scmp.ne.s32.totalorder %s5977_s21, %s5596_s6  ;;  %s5601_s9 = sshll.u32 %s5827_s8, 4  ;;  %s5602_s9 = int_to_ptr.vmem [resolvable:$false] %s5601_s9 }
  0x35   : > { %s5603_s10 = scalar_lea.vmem %s5602_s9, 65536  ;;  %p5604_p5 = scmp.lt.s32.totalorder %s5977_s21, %s5602_s9 }
  0x36   : > { %p5599_p13 = pnand %p5597_p11, %p5583_p12  ;;  %p5605_p2 = scmp.lt.s32.totalorder %s5603_s10, %s5596_s6 }
  0x38   : > { %p5600_p1 = pneg %p5599_p13  ;;  %p5606_p3 = por %p5605_p2, %p5604_p5 }
  0x3a   : > { %p5607_p4 = pnand %p5606_p3, %p5600_p1 }
  0x3c   : > { %5610 = shalt.err (!%p5607_p4)
}
  0x3d   : > { %s5828_s2 = smov 256   ;;  %s5829_s3 = smov 128  }
  0x3e   : > { %s5830_s12 = smov 8   ;;  %p220_p1 = scmp.lt.s32.totalorder %s5825_s25, 5 }
  0x3f   : > { %5056 = dma.hbm_to_vmem [thread:$0]  (!%p5983_p9), %s5975_s15, 32768, %s5977_s21, %s5988_s22, %s5828_s2, %s5829_s3, %s5830_s12  }
  0x40   : > { %p6019_p5 = pnand %p4385_p10, %p220_p1  ;;  %s41_s30 = sadd.s32 1, %s5805_s20 }
  0x41   : > { %p48_p6 = scmp.ne.s32.totalorder %s5805_s20, %s5801_s19  ;;  %p7007_p7 = scmp.eq.s32.totalorder %s5943_s29, 0 }
  0x42   : > { %s7006_s26 = scalar_select %p6019_p5, 1, 0 }
  0x43   : > { %s6029_s7 = scalar_select %p7007_p7, %s5805_s20, %s41_s30  }
  0x44   : > { %p7008_p12 = scmp.eq.s32.totalorder %s5825_s25, 0  ;;  %s158_s6 = sand.u32 1, %s5805_s20  }
  0x45   : > { %s7009_s0 = sld [smem:[#allocation21_spill]]  ;;  %s4374_s21 = sshll.u32 %s158_s6, 10 }
  0x46   : > { %p50_p0 = por %p7008_p12, %p48_p6  ;;  %p7010_p9 = scmp.lt.s32.totalorder %s5825_s25, 4 }
  0x47   : > { %s162_s28 = scalar_lea.vmem [#allocation3], %s4374_s21  ;;  %s6051_s2 = scalar_lea.sflag [#allocation4], %s158_s6 }
  0x48   : > { %p6045_p10 = pnand %p7010_p9, %p50_p0  ;;  %s169_s10 = sshll.u32 %s162_s28, 4  ;;  %s6049_s10 = int_to_ptr.vmem [resolvable:$true] %s169_s10 }
  0x4a   : > { %p5613_p13 = pneg %p6045_p10 }
  0x4b   : > { %s6041_s15 = scalar_lea.hbm %s7009_s0, %s4798_s4  ;;  %s5616_s30 = scalar_lea.hbm %s7009_s0, 32768 }
  0x4c   : > { %s5611_s4 = scalar_lea.hbm %s6041_s15, 16384  ;;  %p5617_p4 = scmp.lt.u32.totalorder %s6041_s15, %s7009_s0 }
  0x4d   : > { %p5612_p11 = scmp.ne.s32.totalorder %s6041_s15, %s5611_s4  ;;  %p5618_p1 = scmp.lt.u32.totalorder %s5616_s30, %s5611_s4 }
  0x4e   : > { %p5620_p7 = scmp.lt.u32.totalorder %s5611_s4, %s6041_s15 }
  0x4f   : > { %p5614_p2 = pnand %p5613_p13, %p5612_p11  ;;  %p5619_p6 = por %p5618_p1, %p5617_p4 }
  0x51   : > { %p5615_p3 = pneg %p5614_p2  ;;  %p5621_p12 = por %p5620_p7, %p5619_p6 }
  0x53   : > { %p5622_p0 = pnand %p5621_p12, %p5615_p3 }
  0x55   : > { %5625 = shalt.err (!%p5622_p0)
}
  0x56   : > { %s5626_s6 = scalar_lea.vmem %s6049_s10, 16384  ;;  %s5831_s21 = smov [#allocation3]  }
  0x57   : > { %p5627_p9 = scmp.ne.s32.totalorder %s6049_s10, %s5626_s6  ;;  %s5631_s28 = sshll.u32 %s5831_s21, 4  ;;  %s5632_s28 = int_to_ptr.vmem [resolvable:$false] %s5631_s28 }
  0x58   : > { %s5633_s3 = scalar_lea.vmem %s5632_s28, 32768  ;;  %p5634_p8 = scmp.lt.s32.totalorder %s6049_s10, %s5632_s28 }
  0x59   : > { %p5629_p11 = pnand %p5627_p9, %p5613_p13  ;;  %p5635_p4 = scmp.lt.s32.totalorder %s5633_s3, %s5626_s6 }
  0x5b   : > { %p5630_p2 = pneg %p5629_p11  ;;  %p5636_p1 = por %p5635_p4, %p5634_p8 }
  0x5d   : > { %p5637_p6 = pnand %p5636_p1, %p5630_p2 }
  0x5f   : > { %5640 = shalt.err (!%p5637_p6)
}
  0x60   : > { %s5832_s4 = smov 2048   ;;  %s7012_s12 = sld [smem:[#allocation15_spill]] }
  0x61   : > { %s7013_s30 = sld [smem:[#allocation14_spill]]  ;;  %s5833_s8 = smov 1024  }
  0x62   : > { %s5834_s9 = smov 64   ;;  %s6080_s6 = sadd.s32 4294967295, %s5825_s25  }
  0x63   : > { %5053 = dma.hbm_to_vmem [thread:$0]  (!%p6045_p10), %s6041_s15, 16384, %s6049_s10, %s6051_s2, %s5832_s4, %s5833_s8, %s5834_s9  }
  0x64   : > { %s4371_s21 = sadd.s32 4294967294, %s5825_s25   ;;  %p55_p8 = scmp.eq.s32.totalorder %s6080_s6, 0 }
  0x65   : > { %p93_p13 = scmp.eq.s32.totalorder %s5960_s5, 0  ;;  %s95_s28 = sadd.s32 1, %s5781_s14 }
  0x66   : > { %p102_p3 = scmp.ne.s32.totalorder %s5781_s14, %s5777_s13  ;;  %p7014_p7 = scmp.ne.s32.totalorder %s5801_s19, %s5797_s18 }
  0x67   : > { %p7016_p0 = scmp.ne.s32.totalorder %s5789_s16, %s7012_s12  ;;  %p7018_p10 = scmp.eq.s32.totalorder %s5825_s25, 0 }
  0x68   : > { %p6091_p12 = por %p55_p8, %p7014_p7  ;;  %p108_p2 = scmp.ne.s32.totalorder %s5777_s13, %s7013_s30 }
  0x69   : > { %p6098_p9 = por %p7016_p0, %p55_p8  ;;  %p6107_p11 = por %p102_p3, %p7018_p10 }
  0x6a   : > { %s7015_s3 = scalar_select %p6091_p12, 1, 0 }
  0x6b   : > { %s7017_s29 = scalar_select %p6098_p9, 1, 0 }
  0x6c   : > { %s6103_s15 = scalar_select %p93_p13, %s5781_s14, %s95_s28  }
  0x6d   : > { %p132_p4 = scmp.eq.s32.totalorder %s6080_s6, 3  ;;  %p138_p1 = scmp.eq.s32.totalorder %s4371_s21, 3 }
  0x6e   : > { %p6114_p6 = por %p108_p2, %p55_p8  ;;  %s205_s5 = sand.u32 1, %s5781_s14  }
  0x6f   : > { %p6119_p7 = por %p132_p4, %p102_p3  ;;  %p6123_p13 = por %p138_p1, %p108_p2 }
  0x70   : > { %s7020_s18 = scalar_select %p6114_p6, 1, 0 }
  0x71   : > { %s7021_s2 = scalar_select %p6119_p7, 1, 0 }
  0x72   : > { %s7022_s4 = scalar_select %p6123_p13, 1, 0 }
  0x73   : > { %s4382_s12 = sshll.u32 %s205_s5, 2  ;;  %s4800_s8 = sshll.u32 %s5821_s24, 6 }
  0x74   : > { %s7023_s30 = sld [smem:[#allocation23_spill]]  ;;  %s207_s21 = scalar_lea.vmem [#allocation8], %s4382_s12 }
  0x75   : > { %s215_s1 = sshll.u32 %s207_s21, 4  ;;  %p7024_p8 = scmp.lt.s32.totalorder %s5825_s25, 4  ;;  %s216_s1 = int_to_ptr.vmem [resolvable:$true] %s215_s1 }
  0x77   : > { %p6137_p3 = pnand %p7024_p8, %p6107_p11 }
  0x79   : > { %p5643_p10 = pneg %p6137_p3 }
  0x7a   : > { %s6131_s0 = scalar_lea.hbm %s7023_s30, %s4800_s8  ;;  %s5646_s10 = scalar_lea.hbm %s7023_s30, 128 }
  0x7b   : > { %s5641_s5 = scalar_lea.hbm %s6131_s0, 64  ;;  %p5647_p11 = scmp.lt.u32.totalorder %s6131_s0, %s7023_s30 }
  0x7c   : > { %p5642_p0 = scmp.ne.s32.totalorder %s6131_s0, %s5641_s5  ;;  %p5648_p1 = scmp.lt.u32.totalorder %s5646_s10, %s5641_s5 }
  0x7d   : > { %p5650_p13 = scmp.lt.u32.totalorder %s5641_s5, %s6131_s0 }
  0x7e   : > { %p5644_p2 = pnand %p5643_p10, %p5642_p0  ;;  %p5649_p8 = por %p5648_p1, %p5647_p11 }
  0x80   : > { %p5645_p4 = pneg %p5644_p2  ;;  %p5651_p7 = por %p5650_p13, %p5649_p8 }
  0x82   : > { %p5652_p6 = pnand %p5651_p7, %p5645_p4 }
  0x84   : > { %5655 = shalt.err (!%p5652_p6)
}
  0x85   : > { %s5656_s21 = scalar_lea.vmem %s216_s1, 64  ;;  %s5835_s24 = smov [#allocation8]  }
  0x86   : > { %p5657_p9 = scmp.ne.s32.totalorder %s216_s1, %s5656_s21  ;;  %s5661_s8 = sshll.u32 %s5835_s24, 4  ;;  %s5662_s8 = int_to_ptr.vmem [resolvable:$false] %s5661_s8 }
  0x87   : > { %s5663_s12 = scalar_lea.vmem %s5662_s8, 128  ;;  %p5664_p12 = scmp.lt.s32.totalorder %s216_s1, %s5662_s8 }
  0x88   : > { %p5659_p0 = pnand %p5657_p9, %p5643_p10  ;;  %p5665_p5 = scmp.lt.s32.totalorder %s5663_s12, %s5656_s21 }
  0x8a   : > { %p5660_p2 = pneg %p5659_p0  ;;  %p5666_p1 = por %p5665_p5, %p5664_p12 }
  0x8c   : > { %p5667_p11 = pnand %p5666_p1, %p5660_p2 }
  0x8e   : > { %5670 = shalt.err (!%p5667_p11)
}
  0x8f   : > { %5059 = dma.hbm_to_vmem [thread:$0]  (!%p6137_p3), %s6131_s0, 64, %s216_s1, %s5988_s22  }
  0x90   : > { %p7026_p6 = scmp.ne.s32.totalorder %s7006_s26, 0 }
  0x91   : > { %s226_s5 = sand.u32 (!%p7026_p6), 1, %s5801_s19   ;;  %p7027_p9 = scmp.ne.s32.totalorder (!%p7026_p6), %s7015_s3, 0 }
  0x92   : > { %224 = sbr.rel (%p7026_p6) target bundleno = 870 (0x366), region = 32  ;;  %s4386_s10 = sshll.u32 (!%p7026_p6), %s226_s5, 10 }
  0x93   : > { %s227_s24 = scalar_lea.sflag (!%p7026_p6), [#allocation4], %s226_s5  ;;  %s6166_s9 = scalar_lea.vmem (!%p7026_p6), [#allocation3], %s4386_s10 }
  0x99   : > { %5756 = dma.done.wait (%p7027_p9), %s227_s24, 16384  }
  0x9a   : > { %5758 = vsyncadd (%p7027_p9), %s227_s24, 4294950912  ;;  %s235_s27 = sand.u32 1, %s6080_s6   ;;  %s237_s0 = sand.u32 1, %s5789_s16  }
  0x9b   : > { %s4387_s1 = sshll.u32 %s237_s0, 11  ;;  %s236_s22 = scalar_lea.sflag [#allocation7], %s235_s27 }
  0x9c   : > { %s6174_s26 = scalar_lea.vmem [#allocation6], %s4387_s1  ;;  %p7028_p5 = scmp.ne.s32.totalorder %s7017_s29, 0 }
  0x9e   : > { %5760 = dma.done.wait (%p7028_p5), %s236_s22, 32768  }
  0x9f   : > { %5762 = vsyncadd (%p7028_p5), %s236_s22, 4294934528  ;;  %s6181_s28 = sand.u32 1, %s5777_s13   ;;  %p7029_p12 = scmp.ne.s32.totalorder %s7020_s18, 0 }
  0xa0   : > { %s4388_s3 = sshll.u32 %s6181_s28, 2 }
  0xa1   : > { %s6184_s21 = scalar_lea.vmem [#allocation8], %s4388_s3 }
  0xa2   : > { %5764 = dma.done.wait (%p7029_p12), %s236_s22, 64  }
  0xa3   : > { %5766 = vsyncadd (%p7029_p12), %s236_s22, 4294967232  ;;  %s4389_s6 = sshll.u32 %s6181_s28, 7  ;;  %s7030_s12 = sld [smem:[#allocation16_spill]] }
  0xa4   : > { %s6191_s8 = scalar_lea.vmem [#allocation9], %s4389_s6 }
  0xa9   : > { %p4390_p7 = scmp.ne.s32.totalorder %s7030_s12, 0 }
  0xaa   : > { %v5836_v0 = vmov (!%p4390_p7), 0.0  }
  0xab   : > { %289 = sbr.rel (%p4390_p7) target bundleno = 187 (0xbb), region = 48  ;;  %290 = vst [vmem:[#allocation2] sm:$0xff] (!%p4390_p7), %v5836_v0  ;;  %291 = vst [vmem:[#allocation2 + $0x8] sm:$0xff] (!%p4390_p7), %v5836_v0 }
  0xac   : > { %292 = vst [vmem:[#allocation2 + $0x10] sm:$0xff] (!%p4390_p7), %v5836_v0  ;;  %293 = vst [vmem:[#allocation2 + $0x18] sm:$0xff] (!%p4390_p7), %v5836_v0 }
  0xad   : > { %294 = vst [vmem:[#allocation2 + $0x20] sm:$0xff] (!%p4390_p7), %v5836_v0  ;;  %295 = vst [vmem:[#allocation2 + $0x28] sm:$0xff] (!%p4390_p7), %v5836_v0 }
  0xae   : > { %296 = vst [vmem:[#allocation2 + $0x30] sm:$0xff] (!%p4390_p7), %v5836_v0  ;;  %297 = vst [vmem:[#allocation2 + $0x38] sm:$0xff] (!%p4390_p7), %v5836_v0 }
  0xaf   : > { %298 = vst [vmem:[#allocation2 + $0x40] sm:$0xff] (!%p4390_p7), %v5836_v0  ;;  %299 = vst [vmem:[#allocation2 + $0x48] sm:$0xff] (!%p4390_p7), %v5836_v0 }
  0xb0   : > { %300 = vst [vmem:[#allocation2 + $0x50] sm:$0xff] (!%p4390_p7), %v5836_v0  ;;  %301 = vst [vmem:[#allocation2 + $0x58] sm:$0xff] (!%p4390_p7), %v5836_v0 }
  0xb1   : > { %302 = vst [vmem:[#allocation2 + $0x60] sm:$0xff] (!%p4390_p7), %v5836_v0  ;;  %303 = vst [vmem:[#allocation2 + $0x68] sm:$0xff] (!%p4390_p7), %v5836_v0 }
  0xb2   : > { %304 = vst [vmem:[#allocation2 + $0x70] sm:$0xff] %v5836_v0  ;;  %305 = vst [vmem:[#allocation2 + $0x78] sm:$0xff] %v5836_v0 }
  0xb3   : > { %306 = vst [vmem:[#allocation2 + $0x80] sm:$0xff] %v5836_v0  ;;  %307 = vst [vmem:[#allocation2 + $0x88] sm:$0xff] %v5836_v0 }
  0xb4   : > { %308 = vst [vmem:[#allocation2 + $0x90] sm:$0xff] %v5836_v0  ;;  %309 = vst [vmem:[#allocation2 + $0x98] sm:$0xff] %v5836_v0 }
  0xb5   : > { %310 = vst [vmem:[#allocation2 + $0xa0] sm:$0xff] %v5836_v0  ;;  %311 = vst [vmem:[#allocation2 + $0xa8] sm:$0xff] %v5836_v0 }
  0xb6   : > { %312 = vst [vmem:[#allocation2 + $0xb0] sm:$0xff] %v5836_v0  ;;  %313 = vst [vmem:[#allocation2 + $0xb8] sm:$0xff] %v5836_v0 }
  0xb7   : > { %314 = vst [vmem:[#allocation2 + $0xc0] sm:$0xff] %v5836_v0  ;;  %315 = vst [vmem:[#allocation2 + $0xc8] sm:$0xff] %v5836_v0 }
  0xb8   : > { %316 = vst [vmem:[#allocation2 + $0xd0] sm:$0xff] %v5836_v0  ;;  %317 = vst [vmem:[#allocation2 + $0xd8] sm:$0xff] %v5836_v0 }
  0xb9   : > { %318 = vst [vmem:[#allocation2 + $0xe0] sm:$0xff] %v5836_v0  ;;  %319 = vst [vmem:[#allocation2 + $0xe8] sm:$0xff] %v5836_v0 }
  0xba   : > { %320 = vst [vmem:[#allocation2 + $0xf0] sm:$0xff] %v5836_v0  ;;  %321 = vst [vmem:[#allocation2 + $0xf8] sm:$0xff] %v5836_v0 }
  0xbb PF: > { %v5189_v1 = vld [vmem:[%s6174_s26 + $0x4] ss:$8 sps:$4 sm:$0xff]   ;;  %v5193_v3 = vld [vmem:[%s6174_s26] ss:$8 sps:$4 sm:$0xff]   ;;  %v5195_v5 = vld [vmem:[%s6174_s26 + $0x14] ss:$8 sps:$4 sm:$0xff]  }
  0xbc   : > { %v5191_v2 = vld [vmem:[%s6174_s26 + $0x404] ss:$8 sps:$4 sm:$0xff]   ;;  %2658 = vmatprep.subr.bf16.mxu1 %v5189_v1  ;;  %v5194_v4 = vld [vmem:[%s6174_s26 + $0x400] ss:$8 sps:$4 sm:$0xff]   ;;  %v5197_v6 = vld [vmem:[%s6174_s26 + $0x414] ss:$8 sps:$4 sm:$0xff]  }
  0xbd   : > { %3110 = vmatprep.subr.bf16.mxu0 %v5191_v2  ;;  %2659 = vmatpush1.bf16.msra.mxu1 %v5193_v3  ;;  %v5199_v7 = vld [vmem:[%s6174_s26 + $0x10] ss:$8 sps:$4 sm:$0xff]   ;;  %v5201_v9 = vld [vmem:[%s6174_s26 + $0x24] ss:$8 sps:$4 sm:$0xff]   ;;  %v5205_v11 = vld [vmem:[%s6174_s26 + $0x20] ss:$8 sps:$4 sm:$0xff]  }
  0xbe   : > { %3111 = vmatpush1.bf16.msra.mxu0 %v5194_v4  ;;  %2660 = vmatprep.subr.bf16.mxu1 %v5195_v5  ;;  %v5200_v8 = vld [vmem:[%s6174_s26 + $0x410] ss:$8 sps:$4 sm:$0xff]   ;;  %v5203_v10 = vld [vmem:[%s6174_s26 + $0x424] ss:$8 sps:$4 sm:$0xff]   ;;  %v5206_v12 = vld [vmem:[%s6174_s26 + $0x420] ss:$8 sps:$4 sm:$0xff]  }
  0xbf   : > { %3112 = vmatprep.subr.bf16.mxu0 %v5197_v6  ;;  %v5207_v13 = vld [vmem:[%s6174_s26 + $0x34] ss:$8 sps:$4 sm:$0xff]   ;;  %v5211_v15 = vld [vmem:[%s6174_s26 + $0x30] ss:$8 sps:$4 sm:$0xff]   ;;  %v5213_v17 = vld [vmem:[%s6174_s26 + $0x44] ss:$8 sps:$4 sm:$0xff]  }
  0xc0   : > { %v5209_v14 = vld [vmem:[%s6174_s26 + $0x434] ss:$8 sps:$4 sm:$0xff]   ;;  %v5212_v16 = vld [vmem:[%s6174_s26 + $0x430] ss:$8 sps:$4 sm:$0xff]   ;;  %v5215_v18 = vld [vmem:[%s6174_s26 + $0x444] ss:$8 sps:$4 sm:$0xff]  }
  0xc1   : > { %2661 = vmatpush1.bf16.msra.mxu1 %v5199_v7  ;;  %v5217_v19 = vld [vmem:[%s6174_s26 + $0x40] ss:$8 sps:$4 sm:$0xff]   ;;  %v5219_v21 = vld [vmem:[%s6174_s26 + $0x54] ss:$8 sps:$4 sm:$0xff]   ;;  %v5223_v23 = vld [vmem:[%s6174_s26 + $0x50] ss:$8 sps:$4 sm:$0xff]  }
  0xc2   : > { %3113 = vmatpush1.bf16.msra.mxu0 %v5200_v8  ;;  %2662 = vmatprep.subr.bf16.mxu1 %v5201_v9  ;;  %v5218_v20 = vld [vmem:[%s6174_s26 + $0x440] ss:$8 sps:$4 sm:$0xff]   ;;  %v5221_v22 = vld [vmem:[%s6174_s26 + $0x454] ss:$8 sps:$4 sm:$0xff]   ;;  %v5224_v24 = vld [vmem:[%s6174_s26 + $0x450] ss:$8 sps:$4 sm:$0xff]  }
  0xc3   : > { %3114 = vmatprep.subr.bf16.mxu0 %v5203_v10  ;;  %v5225_v25 = vld [vmem:[%s6174_s26 + $0x64] ss:$8 sps:$4 sm:$0xff]   ;;  %v5229_v27 = vld [vmem:[%s6174_s26 + $0x60] ss:$8 sps:$4 sm:$0xff]   ;;  %v5231_v29 = vld [vmem:[%s6174_s26 + $0x74] ss:$8 sps:$4 sm:$0xff]  }
  0xc4   : > { %v5227_v26 = vld [vmem:[%s6174_s26 + $0x464] ss:$8 sps:$4 sm:$0xff]   ;;  %v5230_v28 = vld [vmem:[%s6174_s26 + $0x460] ss:$8 sps:$4 sm:$0xff]   ;;  %v5233_v30 = vld [vmem:[%s6174_s26 + $0x474] ss:$8 sps:$4 sm:$0xff]  }
  0xc5   : > { %2663 = vmatpush1.bf16.msra.mxu1 %v5205_v11  ;;  %v5235_v31 = vld [vmem:[%s6174_s26 + $0x70] ss:$8 sps:$4 sm:$0xff]   ;;  %v5237_v33 = vld [vmem:[%s6174_s26 + $0x84] ss:$8 sps:$4 sm:$0xff]   ;;  %v5241_v35 = vld [vmem:[%s6174_s26 + $0x80] ss:$8 sps:$4 sm:$0xff]  }
  0xc6   : > { %3115 = vmatpush1.bf16.msra.mxu0 %v5206_v12  ;;  %2664 = vmatprep.subr.bf16.mxu1 %v5207_v13  ;;  %v5236_v32 = vld [vmem:[%s6174_s26 + $0x470] ss:$8 sps:$4 sm:$0xff]   ;;  %v5239_v34 = vld [vmem:[%s6174_s26 + $0x484] ss:$8 sps:$4 sm:$0xff]   ;;  %v5242_v36 = vld [vmem:[%s6174_s26 + $0x480] ss:$8 sps:$4 sm:$0xff]  }
  0xc7   : > { %3116 = vmatprep.subr.bf16.mxu0 %v5209_v14  ;;  %v5243_v37 = vld [vmem:[%s6174_s26 + $0x94] ss:$8 sps:$4 sm:$0xff]   ;;  %v5247_v39 = vld [vmem:[%s6174_s26 + $0x90] ss:$8 sps:$4 sm:$0xff]   ;;  %v5249_v41 = vld [vmem:[%s6174_s26 + $0xa4] ss:$8 sps:$4 sm:$0xff]  }
  0xc8   : > { %v5245_v38 = vld [vmem:[%s6174_s26 + $0x494] ss:$8 sps:$4 sm:$0xff]   ;;  %v5248_v40 = vld [vmem:[%s6174_s26 + $0x490] ss:$8 sps:$4 sm:$0xff]   ;;  %v5251_v42 = vld [vmem:[%s6174_s26 + $0x4a4] ss:$8 sps:$4 sm:$0xff]  }
  0xc9   : > { %2665 = vmatpush1.bf16.msra.mxu1 %v5211_v15  ;;  %v5253_v43 = vld [vmem:[%s6174_s26 + $0xa0] ss:$8 sps:$4 sm:$0xff]   ;;  %v5255_v45 = vld [vmem:[%s6174_s26 + $0xb4] ss:$8 sps:$4 sm:$0xff]   ;;  %v5259_v47 = vld [vmem:[%s6174_s26 + $0xb0] ss:$8 sps:$4 sm:$0xff]  }
  0xca   : > { %3117 = vmatpush1.bf16.msra.mxu0 %v5212_v16  ;;  %2666 = vmatprep.subr.bf16.mxu1 %v5213_v17  ;;  %v5254_v44 = vld [vmem:[%s6174_s26 + $0x4a0] ss:$8 sps:$4 sm:$0xff]   ;;  %v5257_v46 = vld [vmem:[%s6174_s26 + $0x4b4] ss:$8 sps:$4 sm:$0xff]   ;;  %v5260_v48 = vld [vmem:[%s6174_s26 + $0x4b0] ss:$8 sps:$4 sm:$0xff]  }
  0xcb   : > { %3118 = vmatprep.subr.bf16.mxu0 %v5215_v18  ;;  %v354_v49 = vld [vmem:[%s6166_s9] sm:$0xff]  ;;  %v5267_v59 = vld [vmem:[%s6174_s26 + $0xd4] ss:$8 sps:$4 sm:$0xff]   ;;  %v5271_v61 = vld [vmem:[%s6174_s26 + $0xd0] ss:$8 sps:$4 sm:$0xff]   ;;  %s7031_s29 = sld [smem:[#allocation16_spill]] }
  0xcc   : > { %v362_v50 = vld [vmem:[%s6166_s9 + $0x40] sm:$0xff]  ;;  %v5269_v60 = vld [vmem:[%s6174_s26 + $0x4d4] ss:$8 sps:$4 sm:$0xff]   ;;  %v5272_v62 = vld [vmem:[%s6174_s26 + $0x4d0] ss:$8 sps:$4 sm:$0xff]  }
  0xcd   : > { %2667 = vmatpush1.bf16.msra.mxu1 %v5217_v19  ;;  %v358_v51 = vld [vmem:[%s6166_s9 + $0x20] sm:$0xff]  ;;  %v4392_v54 = vcombine.high %v354_v49, %v362_v50  ;;  %v5279_v3 = vld [vmem:[%s6174_s26 + $0xf4] ss:$8 sps:$4 sm:$0xff]   ;;  %v5283_v5 = vld [vmem:[%s6174_s26 + $0xf0] ss:$8 sps:$4 sm:$0xff]   ;;  %v4391_v12 = vcombine.low %v354_v49, %v362_v50 }
  0xce   : > { %3119 = vmatpush1.bf16.msra.mxu0 %v5218_v20  ;;  %2668 = vmatprep.subr.bf16.mxu1 %v5219_v21  ;;  %v366_v52 = vld [vmem:[%s6166_s9 + $0x60] sm:$0xff]  ;;  %v5281_v4 = vld [vmem:[%s6174_s26 + $0x4f4] ss:$8 sps:$4 sm:$0xff]   ;;  %v5284_v6 = vld [vmem:[%s6174_s26 + $0x4f0] ss:$8 sps:$4 sm:$0xff]  }
  0xcf   : > { %3120 = vmatprep.subr.bf16.mxu0 %v5221_v22  ;;  %v5261_v53 = vld [vmem:[%s6174_s26 + $0xc4] ss:$8 sps:$4 sm:$0xff]   ;;  %v4400_v56 = vcombine.high %v358_v51, %v366_v52  ;;  %2690 = vmatprep.mubr.bf16.mxu1 %v4392_v54  ;;  %v5265_v57 = vld [vmem:[%s6174_s26 + $0xc0] ss:$8 sps:$4 sm:$0xff]   ;;  %v4399_v13 = vcombine.low %v358_v51, %v366_v52  ;;  %v5293_v17 = vld [vmem:[%s6174_s26 + $0x114] ss:$8 sps:$4 sm:$0xff]  }
  0xd0   : > { %v5263_v55 = vld [vmem:[%s6174_s26 + $0x4c4] ss:$8 sps:$4 sm:$0xff]   ;;  %v5266_v58 = vld [vmem:[%s6174_s26 + $0x4c0] ss:$8 sps:$4 sm:$0xff]   ;;  %v5296_v18 = vld [vmem:[%s6174_s26 + $0x514] ss:$8 sps:$4 sm:$0xff]  }
  0xd1   : > { %2669 = vmatpush1.bf16.msra.mxu1 %v5223_v23  ;;  %3142 = vmatprep.mubr.bf16.mxu0 %v4400_v56  ;;  %v5273_v63 = vld [vmem:[%s6174_s26 + $0xe4] ss:$8 sps:$4 sm:$0xff]   ;;  %v5277_v1 = vld [vmem:[%s6174_s26 + $0xe0] ss:$8 sps:$4 sm:$0xff]   ;;  %v5291_v21 = vld [vmem:[%s6174_s26 + $0x110] ss:$8 sps:$4 sm:$0xff]  }
  0xd2   : > { %3121 = vmatpush1.bf16.msra.mxu0 %v5224_v24  ;;  %2670 = vmatprep.subr.bf16.mxu1 %v5225_v25  ;;  %v5275_v0 = vld [vmem:[%s6174_s26 + $0x4e4] ss:$8 sps:$4 sm:$0xff]   ;;  %v5278_v2 = vld [vmem:[%s6174_s26 + $0x4e0] ss:$8 sps:$4 sm:$0xff]   ;;  %v5294_v22 = vld [vmem:[%s6174_s26 + $0x510] ss:$8 sps:$4 sm:$0xff]  }
  0xd3   : > { %3122 = vmatprep.subr.bf16.mxu0 %v5227_v26  ;;  %v5287_v7 = vld [vmem:[%s6174_s26 + $0x104] ss:$8 sps:$4 sm:$0xff]   ;;  %v5285_v9 = vld [vmem:[%s6174_s26 + $0x100] ss:$8 sps:$4 sm:$0xff]   ;;  %v5317_v49 = vld [vmem:[%s6174_s26 + $0x154] ss:$8 sps:$4 sm:$0xff]  }
  0xd4   : > { %v5290_v8 = vld [vmem:[%s6174_s26 + $0x504] ss:$8 sps:$4 sm:$0xff]   ;;  %v5288_v10 = vld [vmem:[%s6174_s26 + $0x500] ss:$8 sps:$4 sm:$0xff]   ;;  %v5320_v50 = vld [vmem:[%s6174_s26 + $0x554] ss:$8 sps:$4 sm:$0xff]  }
  0xd5   : > { %2671 = vmatpush1.bf16.msra.mxu1 %v5229_v27  ;;  %v370_v11 = vld [vmem:[%s6166_s9 + $0x80] sm:$0xff]  ;;  %v5318_v54 = vld [vmem:[%s6174_s26 + $0x550] ss:$8 sps:$4 sm:$0xff]   ;;  %p4775_p13 = scmp.ne.s32.totalorder %s7031_s29, 1 }
  0xd6   : > { %3123 = vmatpush1.bf16.msra.mxu0 %v5230_v28  ;;  %2672 = vmatprep.subr.bf16.mxu1 %v5231_v29  ;;  %v378_v14 = vld [vmem:[%s6166_s9 + $0xc0] sm:$0xff] }
  0xd7   : > { %3124 = vmatprep.subr.bf16.mxu0 %v5233_v30  ;;  %v374_v15 = vld [vmem:[%s6166_s9 + $0xa0] sm:$0xff]  ;;  %v4408_v19 = vcombine.high %v370_v11, %v378_v14  ;;  %v4407_v29 = vcombine.low %v370_v11, %v378_v14 }
  0xd8   : > { %v382_v16 = vld [vmem:[%s6166_s9 + $0xe0] sm:$0xff] }
  0xd9   : > { %2673 = vmatpush1.bf16.msra.mxu1 %v5235_v31  ;;  %v4416_v20 = vcombine.high %v374_v15, %v382_v16  ;;  %v5299_v23 = vld [vmem:[%s6174_s26 + $0x124] ss:$8 sps:$4 sm:$0xff]   ;;  %v5297_v25 = vld [vmem:[%s6174_s26 + $0x120] ss:$8 sps:$4 sm:$0xff]   ;;  %v4415_v30 = vcombine.low %v374_v15, %v382_v16 }
  0xda   : > { %3125 = vmatpush1.bf16.msra.mxu0 %v5236_v32  ;;  %2674 = vmatprep.subr.bf16.mxu1 %v5237_v33  ;;  %v5302_v24 = vld [vmem:[%s6174_s26 + $0x524] ss:$8 sps:$4 sm:$0xff]   ;;  %v5300_v26 = vld [vmem:[%s6174_s26 + $0x520] ss:$8 sps:$4 sm:$0xff]   ;;  %v5305_v33 = vld [vmem:[%s6174_s26 + $0x134] ss:$8 sps:$4 sm:$0xff]  }
  0xdb   : > { %3126 = vmatprep.subr.bf16.mxu0 %v5239_v34  ;;  %v386_v27 = vld [vmem:[%s6166_s9 + $0x100] sm:$0xff]  ;;  %v5308_v34 = vld [vmem:[%s6174_s26 + $0x534] ss:$8 sps:$4 sm:$0xff]  }
  0xdc   : > { %v394_v28 = vld [vmem:[%s6166_s9 + $0x140] sm:$0xff] }
  0xdd   : > { %2675 = vmatpush1.bf16.msra.mxu1 %v5241_v35  ;;  %v390_v31 = vld [vmem:[%s6166_s9 + $0x120] sm:$0xff]  ;;  %v4424_v35 = vcombine.high %v386_v27, %v394_v28 }
  0xde   : > { %3127 = vmatpush1.bf16.msra.mxu0 %v5242_v36  ;;  %2676 = vmatprep.subr.bf16.mxu1 %v5243_v37  ;;  %v398_v32 = vld [vmem:[%s6166_s9 + $0x160] sm:$0xff]  ;;  %v5303_v37 = vld [vmem:[%s6174_s26 + $0x130] ss:$8 sps:$4 sm:$0xff]  }
  0xdf   : > { %3128 = vmatprep.subr.bf16.mxu0 %v5245_v38  ;;  %v4432_v36 = vcombine.high %v390_v31, %v398_v32  ;;  %v5306_v38 = vld [vmem:[%s6174_s26 + $0x530] ss:$8 sps:$4 sm:$0xff]   ;;  %v5326_v56 = vld [vmem:[%s6174_s26 + $0x564] ss:$8 sps:$4 sm:$0xff]   ;;  %v5333_v15 = vld [vmem:[%s6174_s26 + $0x180] ss:$8 sps:$4 sm:$0xff]  }
  0xe0   : > { %v446_v14 = vld [vmem:[%s6166_s9 + $0x2e0] sm:$0xff] }
  0xe1   : > { %2677 = vmatpush1.bf16.msra.mxu1 %v5247_v39  ;;  %v5311_v39 = vld [vmem:[%s6174_s26 + $0x144] ss:$8 sps:$4 sm:$0xff]   ;;  %v5336_v16 = vld [vmem:[%s6174_s26 + $0x580] ss:$8 sps:$4 sm:$0xff]  }
  0xe2   : > { %3129 = vmatpush1.bf16.msra.mxu0 %v5248_v40  ;;  %2678 = vmatprep.subr.bf16.mxu1 %v5249_v41  ;;  %v5314_v40 = vld [vmem:[%s6174_s26 + $0x544] ss:$8 sps:$4 sm:$0xff]   ;;  %v5309_v41 = vld [vmem:[%s6174_s26 + $0x140] ss:$8 sps:$4 sm:$0xff]  }
  0xe3   : > { %3130 = vmatprep.subr.bf16.mxu0 %v5251_v42  ;;  %v5312_v42 = vld [vmem:[%s6174_s26 + $0x540] ss:$8 sps:$4 sm:$0xff]  }
  0xe5   : > { %2679 = vmatpush1.bf16.msra.mxu1 %v5253_v43  ;;  %v402_v43 = vld [vmem:[%s6166_s9 + $0x180] sm:$0xff] }
  0xe6   : > { %3131 = vmatpush1.bf16.msra.mxu0 %v5254_v44  ;;  %2680 = vmatprep.subr.bf16.mxu1 %v5255_v45  ;;  %v410_v44 = vld [vmem:[%s6166_s9 + $0x1c0] sm:$0xff]  ;;  %v4423_v45 = vcombine.low %v386_v27, %v394_v28 }
  0xe7   : > { %3132 = vmatprep.subr.bf16.mxu0 %v5257_v46  ;;  %v4431_v46 = vcombine.low %v390_v31, %v398_v32  ;;  %v4440_v51 = vcombine.high %v402_v43, %v410_v44  ;;  %v450_v27 = vld [vmem:[%s6166_s9 + $0x300] sm:$0xff] }
  0xe8   : > { %v454_v31 = vld [vmem:[%s6166_s9 + $0x320] sm:$0xff] }
  0xe9   : > { %2681 = vmatpush1.bf16.msra.mxu1 %v5259_v47  ;;  %v406_v47 = vld [vmem:[%s6166_s9 + $0x1a0] sm:$0xff] }
  0xea   : > { %3133 = vmatpush1.bf16.msra.mxu0 %v5260_v48  ;;  %2682 = vmatprep.subr.bf16.mxu1 %v5261_v53  ;;  %v414_v48 = vld [vmem:[%s6166_s9 + $0x1e0] sm:$0xff]  ;;  %v5315_v53 = vld [vmem:[%s6174_s26 + $0x150] ss:$8 sps:$4 sm:$0xff]  }
  0xeb   : > { %3134 = vmatprep.subr.bf16.mxu0 %v5263_v55  ;;  %v4448_v52 = vcombine.high %v406_v47, %v414_v48  ;;  %v5323_v55 = vld [vmem:[%s6174_s26 + $0x164] ss:$8 sps:$4 sm:$0xff]  }
  0xec   : > { %v462_v32 = vld [vmem:[%s6166_s9 + $0x360] sm:$0xff] }
  0xed   : > { %2683 = vmatpush1.bf16.msra.mxu1 %v5265_v57  ;;  %v5321_v57 = vld [vmem:[%s6174_s26 + $0x160] ss:$8 sps:$4 sm:$0xff]  }
  0xee   : > { %3135 = vmatpush1.bf16.msra.mxu0 %v5266_v58  ;;  %2684 = vmatprep.subr.bf16.mxu1 %v5267_v59  ;;  %v418_v58 = vld [vmem:[%s6166_s9 + $0x200] sm:$0xff] }
  0xef   : > { %3136 = vmatprep.subr.bf16.mxu0 %v5269_v60  ;;  %v426_v59 = vld [vmem:[%s6166_s9 + $0x240] sm:$0xff]  ;;  %v4439_v60 = vcombine.low %v402_v43, %v410_v44 }
  0xf0   : > { %v4455_v11 = vcombine.low %v418_v58, %v426_v59  ;;  %v466_v43 = vld [vmem:[%s6166_s9 + $0x380] sm:$0xff] }
  0xf1   : > { %2685 = vmatpush1.bf16.msra.mxu1 %v5271_v61  ;;  %v4447_v61 = vcombine.low %v406_v47, %v414_v48  ;;  %v474_v44 = vld [vmem:[%s6166_s9 + $0x3c0] sm:$0xff] }
  0xf2   : > { %3137 = vmatpush1.bf16.msra.mxu0 %v5272_v62  ;;  %2686 = vmatprep.subr.bf16.mxu1 %v5273_v63  ;;  %v422_v62 = vld [vmem:[%s6166_s9 + $0x220] sm:$0xff] }
  0xf3   : > { %3138 = vmatprep.subr.bf16.mxu0 %v5275_v0  ;;  %v430_v63 = vld [vmem:[%s6166_s9 + $0x260] sm:$0xff] }
  0xf4   : > { %v5324_v0 = vld [vmem:[%s6174_s26 + $0x560] ss:$8 sps:$4 sm:$0xff]  }
  0xf5   : > { %2687 = vmatpush1.bf16.msra.mxu1 %v5277_v1  ;;  %v5329_v1 = vld [vmem:[%s6174_s26 + $0x174] ss:$8 sps:$4 sm:$0xff]   ;;  %v470_v47 = vld [vmem:[%s6166_s9 + $0x3a0] sm:$0xff] }
  0xf6   : > { %3139 = vmatpush1.bf16.msra.mxu0 %v5278_v2  ;;  %2688 = vmatprep.subr.bf16.mxu1 %v5279_v3  ;;  %v5332_v2 = vld [vmem:[%s6174_s26 + $0x574] ss:$8 sps:$4 sm:$0xff]   ;;  %v4456_v3 = vcombine.high %v418_v58, %v426_v59  ;;  %v478_v48 = vld [vmem:[%s6166_s9 + $0x3e0] sm:$0xff]  ;;  %v355_v59 = vld [vmem:[%s6166_s9 + $0x8] sm:$0xff] }
  0xf7   : > { %3140 = vmatprep.subr.bf16.mxu0 %v5281_v4  ;;  %v4464_v4 = vcombine.high %v422_v62, %v430_v63  ;;  %v5372_v58 = vld [vmem:[%s6174_s26 + $0x5e0] ss:$8 sps:$4 sm:$0xff]  }
  0xf9   : > { %2689 = vmatpush1.bf16.msra.mxu1 %v5283_v5  ;;  %v5327_v5 = vld [vmem:[%s6174_s26 + $0x170] ss:$8 sps:$4 sm:$0xff]  }
  0xfa   : > { %3141 = vmatpush1.bf16.msra.mxu0 %v5284_v6  ;;  %2771 = vmatprep.subr.bf16.mxu1 %v5287_v7  ;;  %v5330_v6 = vld [vmem:[%s6174_s26 + $0x570] ss:$8 sps:$4 sm:$0xff]   ;;  %v5335_v7 = vld [vmem:[%s6174_s26 + $0x184] ss:$8 sps:$4 sm:$0xff]  }
  0xfb   : > { %3223 = vmatprep.subr.bf16.mxu0 %v5290_v8  ;;  %v5338_v8 = vld [vmem:[%s6174_s26 + $0x584] ss:$8 sps:$4 sm:$0xff]  }
  0xfc   : > { %2691 = vmatmul.mubr.bf16.vlgmr.msra.gmra.mrb[0].mxu1 %v4391_v12  ;;  %v4463_v12 = vcombine.low %v422_v62, %v430_v63  ;;  %v4511_v62 = vcombine.low %v470_v47, %v478_v48  ;;  %v359_v63 = vld [vmem:[%s6166_s9 + $0x28] sm:$0xff] }
  0xfd   : > { %3143 = vmatmul.mubr.bf16.vlgmr.msra.gmra.mrb[0].mxu0 %v4399_v13  ;;  %2772 = vmatpush1.bf16.msra.mxu1 %v5285_v9  ;;  %v434_v9 = vld [vmem:[%s6166_s9 + $0x280] sm:$0xff] }
  0xfe   : > { %3224 = vmatpush1.bf16.msra.mxu0 %v5288_v10  ;;  %2773 = vmatprep.subr.bf16.mxu1 %v5293_v17  ;;  %v442_v10 = vld [vmem:[%s6166_s9 + $0x2c0] sm:$0xff]  ;;  %v5341_v17 = vld [vmem:[%s6174_s26 + $0x194] ss:$8 sps:$4 sm:$0xff]  }
  0xff   : > { %3225 = vmatprep.subr.bf16.mxu0 %v5296_v18  ;;  %2700 = vmatprep.mubr.bf16.mxu1 %v4408_v19  ;;  %v438_v13 = vld [vmem:[%s6166_s9 + $0x2a0] sm:$0xff]  ;;  %v5344_v18 = vld [vmem:[%s6174_s26 + $0x594] ss:$8 sps:$4 sm:$0xff]   ;;  %v4472_v19 = vcombine.high %v434_v9, %v442_v10  ;;  %v4471_v28 = vcombine.low %v434_v9, %v442_v10  ;;  %v371_v10 = vld [vmem:[%s6166_s9 + $0x88] sm:$0xff] }
 0x100   : > { %3152 = vmatprep.mubr.bf16.mxu0 %v4416_v20  ;;  %v4480_v20 = vcombine.high %v438_v13, %v446_v14  ;;  %v5381_v9 = vld [vmem:[%s6174_s26 + $0x200] ss:$8 sps:$4 sm:$0xff]  }
 0x101   : > { %2774 = vmatpush1.bf16.msra.mxu1 %v5291_v21  ;;  %v5339_v21 = vld [vmem:[%s6174_s26 + $0x190] ss:$8 sps:$4 sm:$0xff]  }
 0x102   : > { %3226 = vmatpush1.bf16.msra.mxu0 %v5294_v22  ;;  %2775 = vmatprep.subr.bf16.mxu1 %v5299_v23  ;;  %v5342_v22 = vld [vmem:[%s6174_s26 + $0x590] ss:$8 sps:$4 sm:$0xff]   ;;  %v5347_v23 = vld [vmem:[%s6174_s26 + $0x1a4] ss:$8 sps:$4 sm:$0xff]  }
 0x103   : > { %3227 = vmatprep.subr.bf16.mxu0 %v5302_v24  ;;  %v5350_v24 = vld [vmem:[%s6174_s26 + $0x5a4] ss:$8 sps:$4 sm:$0xff]  }
 0x104   : > { %2701 = vmatmul.mubr.bf16.gmra.mrb[4].mxu1 %v4407_v29  ;;  %v4479_v29 = vcombine.low %v438_v13, %v446_v14  ;;  %v375_v14 = vld [vmem:[%s6166_s9 + $0xa8] sm:$0xff] }
 0x105   : > { %3153 = vmatmul.mubr.bf16.gmra.mrb[4].mxu0 %v4415_v30  ;;  %2776 = vmatpush1.bf16.msra.mxu1 %v5297_v25  ;;  %v5345_v25 = vld [vmem:[%s6174_s26 + $0x1a0] ss:$8 sps:$4 sm:$0xff]  }
 0x106   : > { %3228 = vmatpush1.bf16.msra.mxu0 %v5300_v26  ;;  %2777 = vmatprep.subr.bf16.mxu1 %v5305_v33  ;;  %v5348_v26 = vld [vmem:[%s6174_s26 + $0x5a0] ss:$8 sps:$4 sm:$0xff]   ;;  %v5353_v33 = vld [vmem:[%s6174_s26 + $0x1b4] ss:$8 sps:$4 sm:$0xff]  }
 0x107   : > { %3229 = vmatprep.subr.bf16.mxu0 %v5308_v34  ;;  %2710 = vmatprep.mubr.bf16.mxu1 %v4424_v35  ;;  %v458_v30 = vld [vmem:[%s6166_s9 + $0x340] sm:$0xff]  ;;  %v5356_v34 = vld [vmem:[%s6174_s26 + $0x5b4] ss:$8 sps:$4 sm:$0xff]  }
 0x108   : > { %3162 = vmatprep.mubr.bf16.mxu0 %v4432_v36  ;;  %v4488_v35 = vcombine.high %v450_v27, %v458_v30  ;;  %v4496_v36 = vcombine.high %v454_v31, %v462_v32 }
 0x109   : > { %2778 = vmatpush1.bf16.msra.mxu1 %v5303_v37  ;;  %v5351_v37 = vld [vmem:[%s6174_s26 + $0x1b0] ss:$8 sps:$4 sm:$0xff]  }
 0x10a   : > { %3230 = vmatpush1.bf16.msra.mxu0 %v5306_v38  ;;  %2779 = vmatprep.subr.bf16.mxu1 %v5311_v39  ;;  %v5354_v38 = vld [vmem:[%s6174_s26 + $0x5b0] ss:$8 sps:$4 sm:$0xff]   ;;  %v5359_v39 = vld [vmem:[%s6174_s26 + $0x1c4] ss:$8 sps:$4 sm:$0xff]  }
 0x10b   : > { %3231 = vmatprep.subr.bf16.mxu0 %v5314_v40  ;;  %v5362_v40 = vld [vmem:[%s6174_s26 + $0x5c4] ss:$8 sps:$4 sm:$0xff]  }
 0x10c   : > { %2711 = vmatmul.mubr.bf16.gmra.mrb[8].mxu1 %v4423_v45  ;;  %v4487_v45 = vcombine.low %v450_v27, %v458_v30  ;;  %v399_v30 = vld [vmem:[%s6166_s9 + $0x168] sm:$0xff] }
 0x10d   : > { %3163 = vmatmul.mubr.bf16.gmra.mrb[8].mxu0 %v4431_v46  ;;  %2780 = vmatpush1.bf16.msra.mxu1 %v5309_v41  ;;  %v5357_v41 = vld [vmem:[%s6174_s26 + $0x1c0] ss:$8 sps:$4 sm:$0xff]   ;;  %v4495_v46 = vcombine.low %v454_v31, %v462_v32 }
 0x10e   : > { %3232 = vmatpush1.bf16.msra.mxu0 %v5312_v42  ;;  %2781 = vmatprep.subr.bf16.mxu1 %v5317_v49  ;;  %v5360_v42 = vld [vmem:[%s6174_s26 + $0x5c0] ss:$8 sps:$4 sm:$0xff]   ;;  %v5365_v49 = vld [vmem:[%s6174_s26 + $0x1d4] ss:$8 sps:$4 sm:$0xff]  }
 0x10f   : > { %3233 = vmatprep.subr.bf16.mxu0 %v5320_v50  ;;  %2720 = vmatprep.mubr.bf16.mxu1 %v4440_v51  ;;  %v5368_v50 = vld [vmem:[%s6174_s26 + $0x5d4] ss:$8 sps:$4 sm:$0xff]   ;;  %v4504_v51 = vcombine.high %v466_v43, %v474_v44  ;;  %v5393_v31 = vld [vmem:[%s6174_s26 + $0x220] ss:$8 sps:$4 sm:$0xff]  }
 0x110   : > { %3172 = vmatprep.mubr.bf16.mxu0 %v4448_v52  ;;  %v4512_v52 = vcombine.high %v470_v47, %v478_v48  ;;  %v5396_v32 = vld [vmem:[%s6174_s26 + $0x620] ss:$8 sps:$4 sm:$0xff]  }
 0x111   : > { %2782 = vmatpush1.bf16.msra.mxu1 %v5315_v53  ;;  %v5363_v53 = vld [vmem:[%s6174_s26 + $0x1d0] ss:$8 sps:$4 sm:$0xff]   ;;  %v407_v47 = vld [vmem:[%s6166_s9 + $0x1a8] sm:$0xff] }
 0x112   : > { %3234 = vmatpush1.bf16.msra.mxu0 %v5318_v54  ;;  %2783 = vmatprep.subr.bf16.mxu1 %v5323_v55  ;;  %v5366_v54 = vld [vmem:[%s6174_s26 + $0x5d0] ss:$8 sps:$4 sm:$0xff]   ;;  %v5371_v55 = vld [vmem:[%s6174_s26 + $0x1e4] ss:$8 sps:$4 sm:$0xff]  }
 0x113   : > { %3235 = vmatprep.subr.bf16.mxu0 %v5326_v56  ;;  %v5374_v56 = vld [vmem:[%s6174_s26 + $0x5e4] ss:$8 sps:$4 sm:$0xff]  }
 0x114   : > { %2721 = vmatmul.mubr.bf16.gmra.mrb[12].mxu1 %v4439_v60  ;;  %v363_v60 = vld [vmem:[%s6166_s9 + $0x48] sm:$0xff] }
 0x115   : > { %3173 = vmatmul.mubr.bf16.gmra.mrb[12].mxu0 %v4447_v61  ;;  %2784 = vmatpush1.bf16.msra.mxu1 %v5321_v57  ;;  %v5369_v57 = vld [vmem:[%s6174_s26 + $0x1e0] ss:$8 sps:$4 sm:$0xff]   ;;  %v4503_v61 = vcombine.low %v466_v43, %v474_v44 }
 0x116   : > { %3236 = vmatpush1.bf16.msra.mxu0 %v5324_v0  ;;  %2785 = vmatprep.subr.bf16.mxu1 %v5329_v1  ;;  %v367_v0 = vld [vmem:[%s6166_s9 + $0x68] sm:$0xff]  ;;  %v5377_v1 = vld [vmem:[%s6174_s26 + $0x1f4] ss:$8 sps:$4 sm:$0xff]  }
 0x117   : > { %3237 = vmatprep.subr.bf16.mxu0 %v5332_v2  ;;  %2730 = vmatprep.mubr.bf16.mxu1 %v4456_v3  ;;  %v5380_v2 = vld [vmem:[%s6174_s26 + $0x5f4] ss:$8 sps:$4 sm:$0xff]   ;;  %v4394_v3 = vcombine.high %v355_v59, %v363_v60  ;;  %v4401_v13 = vcombine.low %v359_v63, %v367_v0  ;;  %v403_v43 = vld [vmem:[%s6166_s9 + $0x188] sm:$0xff] }
 0x118   : > { %3182 = vmatprep.mubr.bf16.mxu0 %v4464_v4  ;;  %v4402_v4 = vcombine.high %v359_v63, %v367_v0  ;;  %v415_v48 = vld [vmem:[%s6166_s9 + $0x1e8] sm:$0xff] }
 0x119   : > { %2786 = vmatpush1.bf16.msra.mxu1 %v5327_v5  ;;  %v5375_v5 = vld [vmem:[%s6174_s26 + $0x1f0] ss:$8 sps:$4 sm:$0xff]   ;;  %v423_v63 = vld [vmem:[%s6166_s9 + $0x228] sm:$0xff] }
 0x11a   : > { %3238 = vmatpush1.bf16.msra.mxu0 %v5330_v6  ;;  %2787 = vmatprep.subr.bf16.mxu1 %v5335_v7  ;;  %v5378_v6 = vld [vmem:[%s6174_s26 + $0x5f0] ss:$8 sps:$4 sm:$0xff]   ;;  %v5383_v7 = vld [vmem:[%s6174_s26 + $0x204] ss:$8 sps:$4 sm:$0xff]  }
 0x11b   : > { %3239 = vmatprep.subr.bf16.mxu0 %v5338_v8  ;;  %v5386_v8 = vld [vmem:[%s6174_s26 + $0x604] ss:$8 sps:$4 sm:$0xff]  }
 0x11c   : > { %2731 = vmatmul.mubr.bf16.gmra.mrb[16].mxu1 %v4455_v11  ;;  %v379_v11 = vld [vmem:[%s6166_s9 + $0xc8] sm:$0xff] }
 0x11d   : > { %3183 = vmatmul.mubr.bf16.gmra.mrb[16].mxu0 %v4463_v12  ;;  %2788 = vmatpush1.bf16.msra.mxu1 %v5333_v15  ;;  %v4393_v12 = vcombine.low %v355_v59, %v363_v60  ;;  %v383_v15 = vld [vmem:[%s6166_s9 + $0xe8] sm:$0xff]  ;;  %v4409_v27 = vcombine.low %v371_v10, %v379_v11 }
 0x11e   : > { %3240 = vmatpush1.bf16.msra.mxu0 %v5336_v16  ;;  %2789 = vmatprep.subr.bf16.mxu1 %v5341_v17  ;;  %v5384_v16 = vld [vmem:[%s6174_s26 + $0x600] ss:$8 sps:$4 sm:$0xff]   ;;  %v5389_v17 = vld [vmem:[%s6174_s26 + $0x214] ss:$8 sps:$4 sm:$0xff]  }
 0x11f   : > { %3241 = vmatprep.subr.bf16.mxu0 %v5344_v18  ;;  %2740 = vmatprep.mubr.bf16.mxu1 %v4472_v19  ;;  %v5392_v18 = vld [vmem:[%s6174_s26 + $0x614] ss:$8 sps:$4 sm:$0xff]   ;;  %v4410_v19 = vcombine.high %v371_v10, %v379_v11  ;;  %v419_v59 = vld [vmem:[%s6166_s9 + $0x208] sm:$0xff] }
 0x120   : > { %3192 = vmatprep.mubr.bf16.mxu0 %v4480_v20  ;;  %v4418_v20 = vcombine.high %v375_v14, %v383_v15  ;;  %v427_v60 = vld [vmem:[%s6166_s9 + $0x248] sm:$0xff] }
 0x121   : > { %2790 = vmatpush1.bf16.msra.mxu1 %v5339_v21  ;;  %v5387_v21 = vld [vmem:[%s6174_s26 + $0x210] ss:$8 sps:$4 sm:$0xff]   ;;  %v431_v0 = vld [vmem:[%s6166_s9 + $0x268] sm:$0xff] }
 0x122   : > { %3242 = vmatpush1.bf16.msra.mxu0 %v5342_v22  ;;  %2791 = vmatprep.subr.bf16.mxu1 %v5347_v23  ;;  %v5390_v22 = vld [vmem:[%s6174_s26 + $0x610] ss:$8 sps:$4 sm:$0xff]   ;;  %v5395_v23 = vld [vmem:[%s6174_s26 + $0x224] ss:$8 sps:$4 sm:$0xff]   ;;  %v5432_v10 = vld [vmem:[%s6174_s26 + $0x680] ss:$8 sps:$4 sm:$0xff]  }
 0x123   : > { %3243 = vmatprep.subr.bf16.mxu0 %v5350_v24  ;;  %v5398_v24 = vld [vmem:[%s6174_s26 + $0x624] ss:$8 sps:$4 sm:$0xff]  }
 0x124   : > { %2741 = vmatmul.mubr.bf16.gmra.mrb[20].mxu1 %v4471_v28  ;;  %v4417_v28 = vcombine.low %v375_v14, %v383_v15  ;;  %v435_v11 = vld [vmem:[%s6166_s9 + $0x288] sm:$0xff]  ;;  %v4465_v14 = vcombine.low %v423_v63, %v431_v0 }
 0x125   : > { %3193 = vmatmul.mubr.bf16.gmra.mrb[20].mxu0 %v4479_v29  ;;  %2792 = vmatpush1.bf16.msra.mxu1 %v5345_v25  ;;  %v387_v25 = vld [vmem:[%s6166_s9 + $0x108] sm:$0xff] }
 0x126   : > { %3244 = vmatpush1.bf16.msra.mxu0 %v5348_v26  ;;  %2793 = vmatprep.subr.bf16.mxu1 %v5353_v33  ;;  %v395_v26 = vld [vmem:[%s6166_s9 + $0x148] sm:$0xff]  ;;  %v5401_v33 = vld [vmem:[%s6174_s26 + $0x234] ss:$8 sps:$4 sm:$0xff]  }
 0x127   : > { %3245 = vmatprep.subr.bf16.mxu0 %v5356_v34  ;;  %2750 = vmatprep.mubr.bf16.mxu1 %v4488_v35  ;;  %v391_v29 = vld [vmem:[%s6166_s9 + $0x128] sm:$0xff]  ;;  %v5404_v34 = vld [vmem:[%s6174_s26 + $0x634] ss:$8 sps:$4 sm:$0xff]   ;;  %v4426_v35 = vcombine.high %v387_v25, %v395_v26  ;;  %v4425_v44 = vcombine.low %v387_v25, %v395_v26 }
 0x128   : > { %3202 = vmatprep.mubr.bf16.mxu0 %v4496_v36  ;;  %v4434_v36 = vcombine.high %v391_v29, %v399_v30  ;;  %v439_v15 = vld [vmem:[%s6166_s9 + $0x2a8] sm:$0xff] }
 0x129   : > { %2794 = vmatpush1.bf16.msra.mxu1 %v5351_v37  ;;  %v5399_v37 = vld [vmem:[%s6174_s26 + $0x230] ss:$8 sps:$4 sm:$0xff]   ;;  %v5441_v25 = vld [vmem:[%s6174_s26 + $0x2a0] ss:$8 sps:$4 sm:$0xff]  }
 0x12a   : > { %3246 = vmatpush1.bf16.msra.mxu0 %v5354_v38  ;;  %2795 = vmatprep.subr.bf16.mxu1 %v5359_v39  ;;  %v5402_v38 = vld [vmem:[%s6174_s26 + $0x630] ss:$8 sps:$4 sm:$0xff]   ;;  %v5407_v39 = vld [vmem:[%s6174_s26 + $0x244] ss:$8 sps:$4 sm:$0xff]  }
 0x12b   : > { %3247 = vmatprep.subr.bf16.mxu0 %v5362_v40  ;;  %v5410_v40 = vld [vmem:[%s6174_s26 + $0x644] ss:$8 sps:$4 sm:$0xff]  }
 0x12c   : > { %2751 = vmatmul.mubr.bf16.gmra.mrb[24].mxu1 %v4487_v45  ;;  %v4433_v45 = vcombine.low %v391_v29, %v399_v30  ;;  %v451_v26 = vld [vmem:[%s6166_s9 + $0x308] sm:$0xff] }
 0x12d   : > { %3203 = vmatmul.mubr.bf16.gmra.mrb[24].mxu0 %v4495_v46  ;;  %2796 = vmatpush1.bf16.msra.mxu1 %v5357_v41  ;;  %v5405_v41 = vld [vmem:[%s6174_s26 + $0x240] ss:$8 sps:$4 sm:$0xff]  }
 0x12e   : > { %3248 = vmatpush1.bf16.msra.mxu0 %v5360_v42  ;;  %2797 = vmatprep.subr.bf16.mxu1 %v5365_v49  ;;  %v5408_v42 = vld [vmem:[%s6174_s26 + $0x640] ss:$8 sps:$4 sm:$0xff]   ;;  %v5413_v49 = vld [vmem:[%s6174_s26 + $0x254] ss:$8 sps:$4 sm:$0xff]  }
 0x12f   : > { %3249 = vmatprep.subr.bf16.mxu0 %v5368_v50  ;;  %2760 = vmatprep.mubr.bf16.mxu1 %v4504_v51  ;;  %v411_v46 = vld [vmem:[%s6166_s9 + $0x1c8] sm:$0xff]  ;;  %v5416_v50 = vld [vmem:[%s6174_s26 + $0x654] ss:$8 sps:$4 sm:$0xff]  }
 0x130   : > { %3212 = vmatprep.mubr.bf16.mxu0 %v4512_v52  ;;  %v4442_v51 = vcombine.high %v403_v43, %v411_v46  ;;  %v4450_v52 = vcombine.high %v407_v47, %v415_v48  ;;  %v455_v30 = vld [vmem:[%s6166_s9 + $0x328] sm:$0xff] }
 0x131   : > { %2798 = vmatpush1.bf16.msra.mxu1 %v5363_v53  ;;  %v5411_v53 = vld [vmem:[%s6174_s26 + $0x250] ss:$8 sps:$4 sm:$0xff]  }
 0x132   : > { %3250 = vmatpush1.bf16.msra.mxu0 %v5366_v54  ;;  %2799 = vmatprep.subr.bf16.mxu1 %v5371_v55  ;;  %v5414_v54 = vld [vmem:[%s6174_s26 + $0x650] ss:$8 sps:$4 sm:$0xff]   ;;  %v5419_v55 = vld [vmem:[%s6174_s26 + $0x264] ss:$8 sps:$4 sm:$0xff]  }
 0x133   : > { %3251 = vmatprep.subr.bf16.mxu0 %v5374_v56  ;;  %v5422_v56 = vld [vmem:[%s6174_s26 + $0x664] ss:$8 sps:$4 sm:$0xff]  }
 0x134   : > { %2761 = vmatmul.mubr.bf16.gmra.mrb[28].mxu1 %v4503_v61  ;;  %v4441_v61 = vcombine.low %v403_v43, %v411_v46  ;;  %v479_v46 = vld [vmem:[%s6166_s9 + $0x3e8] sm:$0xff] }
 0x135   : > { %3213 = vmatmul.mubr.bf16.gmra.mrb[28].mxu0 %v4511_v62  ;;  %2800 = vmatpush1.bf16.msra.mxu1 %v5369_v57  ;;  %v5417_v57 = vld [vmem:[%s6174_s26 + $0x260] ss:$8 sps:$4 sm:$0xff]   ;;  %v4449_v62 = vcombine.low %v407_v47, %v415_v48 }
 0x136   : > { %3252 = vmatpush1.bf16.msra.mxu0 %v5372_v58  ;;  %2801 = vmatprep.subr.bf16.mxu1 %v5377_v1  ;;  %v5420_v58 = vld [vmem:[%s6174_s26 + $0x660] ss:$8 sps:$4 sm:$0xff]   ;;  %v5425_v1 = vld [vmem:[%s6174_s26 + $0x274] ss:$8 sps:$4 sm:$0xff]  }
 0x137   : > { %3253 = vmatprep.subr.bf16.mxu0 %v5380_v2  ;;  %2803 = vmatprep.mubr.bf16.mxu1 %v4394_v3  ;;  %v5428_v2 = vld [vmem:[%s6174_s26 + $0x674] ss:$8 sps:$4 sm:$0xff]   ;;  %v4458_v3 = vcombine.high %v419_v59, %v427_v60  ;;  %v5453_v47 = vld [vmem:[%s6174_s26 + $0x2c0] ss:$8 sps:$4 sm:$0xff]  }
 0x138   : > { %3255 = vmatprep.mubr.bf16.mxu0 %v4402_v4  ;;  %v4466_v4 = vcombine.high %v423_v63, %v431_v0  ;;  %v5456_v48 = vld [vmem:[%s6174_s26 + $0x6c0] ss:$8 sps:$4 sm:$0xff]   ;;  %v360_v63 = vld [vmem:[%s6166_s9 + $0x30] sm:$0xff] }
 0x139   : > { %2802 = vmatpush1.bf16.msra.mxu1 %v5375_v5  ;;  %v5423_v5 = vld [vmem:[%s6174_s26 + $0x270] ss:$8 sps:$4 sm:$0xff]  }
 0x13a   : > { %3254 = vmatpush1.bf16.msra.mxu0 %v5378_v6  ;;  %2884 = vmatprep.subr.bf16.mxu1 %v5383_v7  ;;  %v5426_v6 = vld [vmem:[%s6174_s26 + $0x670] ss:$8 sps:$4 sm:$0xff]   ;;  %v5431_v7 = vld [vmem:[%s6174_s26 + $0x284] ss:$8 sps:$4 sm:$0xff]  }
 0x13b   : > { %3336 = vmatprep.subr.bf16.mxu0 %v5386_v8  ;;  %v5434_v8 = vld [vmem:[%s6174_s26 + $0x684] ss:$8 sps:$4 sm:$0xff]   ;;  %v368_v0 = vld [vmem:[%s6166_s9 + $0x70] sm:$0xff] }
 0x13c   : > { %2804 = vmatmul.mubr.bf16.vlgmr.msra.gmra.mrb[0].mxu1 %v4393_v12  ;;  %v443_v12 = vld [vmem:[%s6166_s9 + $0x2c8] sm:$0xff] }
 0x13d   : > { %3256 = vmatmul.mubr.bf16.vlgmr.msra.gmra.mrb[0].mxu0 %v4401_v13  ;;  %2885 = vmatpush1.bf16.msra.mxu1 %v5381_v9  ;;  %v5429_v9 = vld [vmem:[%s6174_s26 + $0x280] ss:$8 sps:$4 sm:$0xff]   ;;  %v4457_v13 = vcombine.low %v419_v59, %v427_v60  ;;  %v356_v59 = vld [vmem:[%s6166_s9 + $0x10] sm:$0xff] }
 0x13e   : > { %3337 = vmatpush1.bf16.msra.mxu0 %v5384_v16  ;;  %2886 = vmatprep.subr.bf16.mxu1 %v5389_v17  ;;  %v447_v16 = vld [vmem:[%s6166_s9 + $0x2e8] sm:$0xff]  ;;  %v5437_v17 = vld [vmem:[%s6174_s26 + $0x294] ss:$8 sps:$4 sm:$0xff]  }
 0x13f   : > { %3338 = vmatprep.subr.bf16.mxu0 %v5392_v18  ;;  %2813 = vmatprep.mubr.bf16.mxu1 %v4410_v19  ;;  %v5440_v18 = vld [vmem:[%s6174_s26 + $0x694] ss:$8 sps:$4 sm:$0xff]   ;;  %v4474_v19 = vcombine.high %v435_v11, %v443_v12  ;;  %v4481_v29 = vcombine.low %v439_v15, %v447_v16 }
 0x140   : > { %3265 = vmatprep.mubr.bf16.mxu0 %v4418_v20  ;;  %v4482_v20 = vcombine.high %v439_v15, %v447_v16  ;;  %v376_v15 = vld [vmem:[%s6166_s9 + $0xb0] sm:$0xff] }
 0x141   : > { %2887 = vmatpush1.bf16.msra.mxu1 %v5387_v21  ;;  %v5435_v21 = vld [vmem:[%s6174_s26 + $0x290] ss:$8 sps:$4 sm:$0xff]  }
 0x142   : > { %3339 = vmatpush1.bf16.msra.mxu0 %v5390_v22  ;;  %2888 = vmatprep.subr.bf16.mxu1 %v5395_v23  ;;  %v5438_v22 = vld [vmem:[%s6174_s26 + $0x690] ss:$8 sps:$4 sm:$0xff]   ;;  %v5443_v23 = vld [vmem:[%s6174_s26 + $0x2a4] ss:$8 sps:$4 sm:$0xff]  }
 0x143   : > { %3340 = vmatprep.subr.bf16.mxu0 %v5398_v24  ;;  %v5446_v24 = vld [vmem:[%s6174_s26 + $0x6a4] ss:$8 sps:$4 sm:$0xff]   ;;  %v384_v16 = vld [vmem:[%s6166_s9 + $0xf0] sm:$0xff] }
 0x144   : > { %2814 = vmatmul.mubr.bf16.gmra.mrb[4].mxu1 %v4409_v27  ;;  %v459_v27 = vld [vmem:[%s6166_s9 + $0x348] sm:$0xff] }
 0x145   : > { %3266 = vmatmul.mubr.bf16.gmra.mrb[4].mxu0 %v4417_v28  ;;  %2889 = vmatpush1.bf16.msra.mxu1 %v5393_v31  ;;  %v4473_v28 = vcombine.low %v435_v11, %v443_v12  ;;  %v463_v31 = vld [vmem:[%s6166_s9 + $0x368] sm:$0xff]  ;;  %v4489_v43 = vcombine.low %v451_v26, %v459_v27  ;;  %v372_v11 = vld [vmem:[%s6166_s9 + $0x90] sm:$0xff] }
 0x146   : > { %3341 = vmatpush1.bf16.msra.mxu0 %v5396_v32  ;;  %2890 = vmatprep.subr.bf16.mxu1 %v5401_v33  ;;  %v5444_v32 = vld [vmem:[%s6174_s26 + $0x6a0] ss:$8 sps:$4 sm:$0xff]   ;;  %v5449_v33 = vld [vmem:[%s6174_s26 + $0x2b4] ss:$8 sps:$4 sm:$0xff]  }
 0x147   : > { %3342 = vmatprep.subr.bf16.mxu0 %v5404_v34  ;;  %2823 = vmatprep.mubr.bf16.mxu1 %v4426_v35  ;;  %v5452_v34 = vld [vmem:[%s6174_s26 + $0x6b4] ss:$8 sps:$4 sm:$0xff]   ;;  %v4490_v35 = vcombine.high %v451_v26, %v459_v27  ;;  %v5492_v26 = vld [vmem:[%s6174_s26 + $0x720] ss:$8 sps:$4 sm:$0xff]  }
 0x148   : > { %3275 = vmatprep.mubr.bf16.mxu0 %v4434_v36  ;;  %v4498_v36 = vcombine.high %v455_v30, %v463_v31  ;;  %v380_v12 = vld [vmem:[%s6166_s9 + $0xd0] sm:$0xff] }
 0x149   : > { %2891 = vmatpush1.bf16.msra.mxu1 %v5399_v37  ;;  %v5447_v37 = vld [vmem:[%s6174_s26 + $0x2b0] ss:$8 sps:$4 sm:$0xff]  }
 0x14a   : > { %3343 = vmatpush1.bf16.msra.mxu0 %v5402_v38  ;;  %2892 = vmatprep.subr.bf16.mxu1 %v5407_v39  ;;  %v5450_v38 = vld [vmem:[%s6174_s26 + $0x6b0] ss:$8 sps:$4 sm:$0xff]   ;;  %v5455_v39 = vld [vmem:[%s6174_s26 + $0x2c4] ss:$8 sps:$4 sm:$0xff]  }
 0x14b   : > { %3344 = vmatprep.subr.bf16.mxu0 %v5410_v40  ;;  %v5458_v40 = vld [vmem:[%s6174_s26 + $0x6c4] ss:$8 sps:$4 sm:$0xff]   ;;  %v388_v27 = vld [vmem:[%s6166_s9 + $0x110] sm:$0xff] }
 0x14c   : > { %2824 = vmatmul.mubr.bf16.gmra.mrb[8].mxu1 %v4425_v44  ;;  %v4497_v44 = vcombine.low %v455_v30, %v463_v31  ;;  %v4419_v30 = vcombine.low %v376_v15, %v384_v16  ;;  %v392_v31 = vld [vmem:[%s6166_s9 + $0x130] sm:$0xff] }
 0x14d   : > { %3276 = vmatmul.mubr.bf16.gmra.mrb[8].mxu0 %v4433_v45  ;;  %2893 = vmatpush1.bf16.msra.mxu1 %v5405_v41  ;;  %v467_v41 = vld [vmem:[%s6166_s9 + $0x388] sm:$0xff] }
 0x14e   : > { %3345 = vmatpush1.bf16.msra.mxu0 %v5408_v42  ;;  %2894 = vmatprep.subr.bf16.mxu1 %v5413_v49  ;;  %v475_v42 = vld [vmem:[%s6166_s9 + $0x3c8] sm:$0xff]  ;;  %v5461_v49 = vld [vmem:[%s6174_s26 + $0x2d4] ss:$8 sps:$4 sm:$0xff]  }
 0x14f   : > { %3346 = vmatprep.subr.bf16.mxu0 %v5416_v50  ;;  %2833 = vmatprep.mubr.bf16.mxu1 %v4442_v51  ;;  %v471_v45 = vld [vmem:[%s6166_s9 + $0x3a8] sm:$0xff]  ;;  %v5464_v50 = vld [vmem:[%s6174_s26 + $0x6d4] ss:$8 sps:$4 sm:$0xff]   ;;  %v4506_v51 = vcombine.high %v467_v41, %v475_v42  ;;  %v4505_v60 = vcombine.low %v467_v41, %v475_v42 }
 0x150   : > { %3285 = vmatprep.mubr.bf16.mxu0 %v4450_v52  ;;  %v4514_v52 = vcombine.high %v471_v45, %v479_v46  ;;  %v404_v41 = vld [vmem:[%s6166_s9 + $0x190] sm:$0xff] }
 0x151   : > { %2895 = vmatpush1.bf16.msra.mxu1 %v5411_v53  ;;  %v5459_v53 = vld [vmem:[%s6174_s26 + $0x2d0] ss:$8 sps:$4 sm:$0xff]  }
 0x152   : > { %3347 = vmatpush1.bf16.msra.mxu0 %v5414_v54  ;;  %2896 = vmatprep.subr.bf16.mxu1 %v5419_v55  ;;  %v5462_v54 = vld [vmem:[%s6174_s26 + $0x6d0] ss:$8 sps:$4 sm:$0xff]   ;;  %v5467_v55 = vld [vmem:[%s6174_s26 + $0x2e4] ss:$8 sps:$4 sm:$0xff]  }
 0x153   : > { %3348 = vmatprep.subr.bf16.mxu0 %v5422_v56  ;;  %v5470_v56 = vld [vmem:[%s6174_s26 + $0x6e4] ss:$8 sps:$4 sm:$0xff]  }
 0x154   : > { %2834 = vmatmul.mubr.bf16.gmra.mrb[12].mxu1 %v4441_v61  ;;  %v4513_v61 = vcombine.low %v471_v45, %v479_v46  ;;  %v408_v45 = vld [vmem:[%s6166_s9 + $0x1b0] sm:$0xff] }
 0x155   : > { %3286 = vmatmul.mubr.bf16.gmra.mrb[12].mxu0 %v4449_v62  ;;  %2897 = vmatpush1.bf16.msra.mxu1 %v5417_v57  ;;  %v5465_v57 = vld [vmem:[%s6174_s26 + $0x2e0] ss:$8 sps:$4 sm:$0xff]   ;;  %v364_v62 = vld [vmem:[%s6166_s9 + $0x50] sm:$0xff] }
 0x156   : > { %3349 = vmatpush1.bf16.msra.mxu0 %v5420_v58  ;;  %2898 = vmatprep.subr.bf16.mxu1 %v5425_v1  ;;  %v5468_v58 = vld [vmem:[%s6174_s26 + $0x6e0] ss:$8 sps:$4 sm:$0xff]   ;;  %v5473_v1 = vld [vmem:[%s6174_s26 + $0x2f4] ss:$8 sps:$4 sm:$0xff]  }
 0x157   : > { %3350 = vmatprep.subr.bf16.mxu0 %v5428_v2  ;;  %2843 = vmatprep.mubr.bf16.mxu1 %v4458_v3  ;;  %v5476_v2 = vld [vmem:[%s6174_s26 + $0x6f4] ss:$8 sps:$4 sm:$0xff]   ;;  %v4396_v3 = vcombine.high %v356_v59, %v364_v62 }
 0x158   : > { %3295 = vmatprep.mubr.bf16.mxu0 %v4466_v4  ;;  %v4404_v4 = vcombine.high %v360_v63, %v368_v0  ;;  %v416_v46 = vld [vmem:[%s6166_s9 + $0x1f0] sm:$0xff] }
 0x159   : > { %2899 = vmatpush1.bf16.msra.mxu1 %v5423_v5  ;;  %v5471_v5 = vld [vmem:[%s6174_s26 + $0x2f0] ss:$8 sps:$4 sm:$0xff]  }
 0x15a   : > { %3351 = vmatpush1.bf16.msra.mxu0 %v5426_v6  ;;  %2900 = vmatprep.subr.bf16.mxu1 %v5431_v7  ;;  %v5474_v6 = vld [vmem:[%s6174_s26 + $0x6f0] ss:$8 sps:$4 sm:$0xff]   ;;  %v5479_v7 = vld [vmem:[%s6174_s26 + $0x304] ss:$8 sps:$4 sm:$0xff]  }
 0x15b   : > { %3352 = vmatprep.subr.bf16.mxu0 %v5434_v8  ;;  %v5482_v8 = vld [vmem:[%s6174_s26 + $0x704] ss:$8 sps:$4 sm:$0xff]  }
 0x15c   : > { %2844 = vmatmul.mubr.bf16.gmra.mrb[16].mxu1 %v4457_v13  ;;  %v4395_v13 = vcombine.low %v356_v59, %v364_v62  ;;  %v4451_v59 = vcombine.low %v408_v45, %v416_v46  ;;  %v432_v62 = vld [vmem:[%s6166_s9 + $0x270] sm:$0xff] }
 0x15d   : > { %3296 = vmatmul.mubr.bf16.gmra.mrb[16].mxu0 %v4465_v14  ;;  %2901 = vmatpush1.bf16.msra.mxu1 %v5429_v9  ;;  %v5477_v9 = vld [vmem:[%s6174_s26 + $0x300] ss:$8 sps:$4 sm:$0xff]   ;;  %v4403_v14 = vcombine.low %v360_v63, %v368_v0 }
 0x15e   : > { %3353 = vmatpush1.bf16.msra.mxu0 %v5432_v10  ;;  %2902 = vmatprep.subr.bf16.mxu1 %v5437_v17  ;;  %v5480_v10 = vld [vmem:[%s6174_s26 + $0x700] ss:$8 sps:$4 sm:$0xff]   ;;  %v5485_v17 = vld [vmem:[%s6174_s26 + $0x314] ss:$8 sps:$4 sm:$0xff]  }
 0x15f   : > { %3354 = vmatprep.subr.bf16.mxu0 %v5440_v18  ;;  %2853 = vmatprep.mubr.bf16.mxu1 %v4474_v19  ;;  %v5488_v18 = vld [vmem:[%s6174_s26 + $0x714] ss:$8 sps:$4 sm:$0xff]   ;;  %v4412_v19 = vcombine.high %v372_v11, %v380_v12  ;;  %v5513_v63 = vld [vmem:[%s6174_s26 + $0x360] ss:$8 sps:$4 sm:$0xff]  }
 0x160   : > { %3305 = vmatprep.mubr.bf16.mxu0 %v4482_v20  ;;  %v4420_v20 = vcombine.high %v376_v15, %v384_v16  ;;  %v5516_v0 = vld [vmem:[%s6174_s26 + $0x760] ss:$8 sps:$4 sm:$0xff]  }
 0x161   : > { %2903 = vmatpush1.bf16.msra.mxu1 %v5435_v21  ;;  %v5483_v21 = vld [vmem:[%s6174_s26 + $0x310] ss:$8 sps:$4 sm:$0xff]   ;;  %v5525_v15 = vld [vmem:[%s6174_s26 + $0x380] ss:$8 sps:$4 sm:$0xff]  }
 0x162   : > { %3355 = vmatpush1.bf16.msra.mxu0 %v5438_v22  ;;  %2904 = vmatprep.subr.bf16.mxu1 %v5443_v23  ;;  %v5486_v22 = vld [vmem:[%s6174_s26 + $0x710] ss:$8 sps:$4 sm:$0xff]   ;;  %v5491_v23 = vld [vmem:[%s6174_s26 + $0x324] ss:$8 sps:$4 sm:$0xff]   ;;  %v5528_v16 = vld [vmem:[%s6174_s26 + $0x780] ss:$8 sps:$4 sm:$0xff]  }
 0x163   : > { %3356 = vmatprep.subr.bf16.mxu0 %v5446_v24  ;;  %v5494_v24 = vld [vmem:[%s6174_s26 + $0x724] ss:$8 sps:$4 sm:$0xff]  }
 0x164   : > { %2854 = vmatmul.mubr.bf16.gmra.mrb[20].mxu1 %v4473_v28  ;;  %v396_v28 = vld [vmem:[%s6166_s9 + $0x150] sm:$0xff] }
 0x165   : > { %3306 = vmatmul.mubr.bf16.gmra.mrb[20].mxu0 %v4481_v29  ;;  %2905 = vmatpush1.bf16.msra.mxu1 %v5441_v25  ;;  %v5489_v25 = vld [vmem:[%s6174_s26 + $0x320] ss:$8 sps:$4 sm:$0xff]   ;;  %v4411_v29 = vcombine.low %v372_v11, %v380_v12  ;;  %v4427_v42 = vcombine.low %v388_v27, %v396_v28  ;;  %v444_v12 = vld [vmem:[%s6166_s9 + $0x2d0] sm:$0xff] }
 0x166   : > { %3357 = vmatpush1.bf16.msra.mxu0 %v5444_v32  ;;  %2906 = vmatprep.subr.bf16.mxu1 %v5449_v33  ;;  %v400_v32 = vld [vmem:[%s6166_s9 + $0x170] sm:$0xff] }
 0x167   : > { %3358 = vmatprep.subr.bf16.mxu0 %v5452_v34  ;;  %2863 = vmatprep.mubr.bf16.mxu1 %v4490_v35  ;;  %v5497_v33 = vld [vmem:[%s6174_s26 + $0x334] ss:$8 sps:$4 sm:$0xff]   ;;  %v4428_v35 = vcombine.high %v388_v27, %v396_v28 }
 0x168   : > { %3315 = vmatprep.mubr.bf16.mxu0 %v4498_v36  ;;  %v5500_v34 = vld [vmem:[%s6174_s26 + $0x734] ss:$8 sps:$4 sm:$0xff]   ;;  %v4436_v36 = vcombine.high %v392_v31, %v400_v32 }
 0x169   : > { %2907 = vmatpush1.bf16.msra.mxu1 %v5447_v37  ;;  %v5495_v37 = vld [vmem:[%s6174_s26 + $0x330] ss:$8 sps:$4 sm:$0xff]  }
 0x16a   : > { %3359 = vmatpush1.bf16.msra.mxu0 %v5450_v38  ;;  %2908 = vmatprep.subr.bf16.mxu1 %v5455_v39  ;;  %v5498_v38 = vld [vmem:[%s6174_s26 + $0x730] ss:$8 sps:$4 sm:$0xff]   ;;  %v5503_v39 = vld [vmem:[%s6174_s26 + $0x344] ss:$8 sps:$4 sm:$0xff]  }
 0x16b   : > { %3360 = vmatprep.subr.bf16.mxu0 %v5458_v40  ;;  %v5506_v40 = vld [vmem:[%s6174_s26 + $0x744] ss:$8 sps:$4 sm:$0xff]   ;;  %v460_v28 = vld [vmem:[%s6166_s9 + $0x350] sm:$0xff] }
 0x16c   : > { %2864 = vmatmul.mubr.bf16.gmra.mrb[24].mxu1 %v4489_v43  ;;  %v4435_v43 = vcombine.low %v392_v31, %v400_v32  ;;  %v5537_v31 = vld [vmem:[%s6174_s26 + $0x3a0] ss:$8 sps:$4 sm:$0xff]  }
 0x16d   : > { %3316 = vmatmul.mubr.bf16.gmra.mrb[24].mxu0 %v4497_v44  ;;  %2909 = vmatpush1.bf16.msra.mxu1 %v5453_v47  ;;  %v412_v44 = vld [vmem:[%s6166_s9 + $0x1d0] sm:$0xff]  ;;  %v5501_v47 = vld [vmem:[%s6174_s26 + $0x340] ss:$8 sps:$4 sm:$0xff]  }
 0x16e   : > { %3361 = vmatpush1.bf16.msra.mxu0 %v5456_v48  ;;  %2910 = vmatprep.subr.bf16.mxu1 %v5461_v49  ;;  %v5504_v48 = vld [vmem:[%s6174_s26 + $0x740] ss:$8 sps:$4 sm:$0xff]   ;;  %v5509_v49 = vld [vmem:[%s6174_s26 + $0x354] ss:$8 sps:$4 sm:$0xff]  }
 0x16f   : > { %3362 = vmatprep.subr.bf16.mxu0 %v5464_v50  ;;  %2873 = vmatprep.mubr.bf16.mxu1 %v4506_v51  ;;  %v5512_v50 = vld [vmem:[%s6174_s26 + $0x754] ss:$8 sps:$4 sm:$0xff]   ;;  %v4444_v51 = vcombine.high %v404_v41, %v412_v44  ;;  %v5540_v32 = vld [vmem:[%s6174_s26 + $0x7a0] ss:$8 sps:$4 sm:$0xff]  }
 0x170   : > { %3325 = vmatprep.mubr.bf16.mxu0 %v4514_v52  ;;  %v4452_v52 = vcombine.high %v408_v45, %v416_v46  ;;  %v472_v45 = vld [vmem:[%s6166_s9 + $0x3b0] sm:$0xff] }
 0x171   : > { %2911 = vmatpush1.bf16.msra.mxu1 %v5459_v53  ;;  %v5507_v53 = vld [vmem:[%s6174_s26 + $0x350] ss:$8 sps:$4 sm:$0xff]  }
 0x172   : > { %3363 = vmatpush1.bf16.msra.mxu0 %v5462_v54  ;;  %2912 = vmatprep.subr.bf16.mxu1 %v5467_v55  ;;  %v5510_v54 = vld [vmem:[%s6174_s26 + $0x750] ss:$8 sps:$4 sm:$0xff]   ;;  %v5515_v55 = vld [vmem:[%s6174_s26 + $0x364] ss:$8 sps:$4 sm:$0xff]  }
 0x173   : > { %3364 = vmatprep.subr.bf16.mxu0 %v5470_v56  ;;  %v5518_v56 = vld [vmem:[%s6174_s26 + $0x764] ss:$8 sps:$4 sm:$0xff]   ;;  %v480_v46 = vld [vmem:[%s6166_s9 + $0x3f0] sm:$0xff] }
 0x174   : > { %2874 = vmatmul.mubr.bf16.gmra.mrb[28].mxu1 %v4505_v60  ;;  %v428_v60 = vld [vmem:[%s6166_s9 + $0x250] sm:$0xff] }
 0x175   : > { %3326 = vmatmul.mubr.bf16.gmra.mrb[28].mxu0 %v4513_v61  ;;  %2913 = vmatpush1.bf16.msra.mxu1 %v5465_v57  ;;  %v420_v57 = vld [vmem:[%s6166_s9 + $0x210] sm:$0xff] }
 0x176   : > { %3365 = vmatpush1.bf16.msra.mxu0 %v5468_v58  ;;  %2914 = vmatprep.subr.bf16.mxu1 %v5473_v1  ;;  %v4443_v58 = vcombine.low %v404_v41, %v412_v44  ;;  %v424_v61 = vld [vmem:[%s6166_s9 + $0x230] sm:$0xff] }
 0x177   : > { %3366 = vmatprep.subr.bf16.mxu0 %v5476_v2  ;;  %2916 = vmatprep.mubr.bf16.mxu1 %v4396_v3  ;;  %v5521_v1 = vld [vmem:[%s6174_s26 + $0x374] ss:$8 sps:$4 sm:$0xff]   ;;  %v4460_v3 = vcombine.high %v420_v57, %v428_v60  ;;  %v4467_v11 = vcombine.low %v424_v61, %v432_v62 }
 0x178   : > { %3368 = vmatprep.mubr.bf16.mxu0 %v4404_v4  ;;  %v5524_v2 = vld [vmem:[%s6174_s26 + $0x774] ss:$8 sps:$4 sm:$0xff]   ;;  %v4468_v4 = vcombine.high %v424_v61, %v432_v62 }
 0x179   : > { %2915 = vmatpush1.bf16.msra.mxu1 %v5471_v5  ;;  %v5519_v5 = vld [vmem:[%s6174_s26 + $0x370] ss:$8 sps:$4 sm:$0xff]  }
 0x17a   : > { %3367 = vmatpush1.bf16.msra.mxu0 %v5474_v6  ;;  %2997 = vmatprep.subr.bf16.mxu1 %v5479_v7  ;;  %v5522_v6 = vld [vmem:[%s6174_s26 + $0x770] ss:$8 sps:$4 sm:$0xff]   ;;  %v5527_v7 = vld [vmem:[%s6174_s26 + $0x384] ss:$8 sps:$4 sm:$0xff]  }
 0x17b   : > { %3449 = vmatprep.subr.bf16.mxu0 %v5482_v8  ;;  %v5530_v8 = vld [vmem:[%s6174_s26 + $0x784] ss:$8 sps:$4 sm:$0xff]   ;;  %v468_v41 = vld [vmem:[%s6166_s9 + $0x390] sm:$0xff]  ;;  %v361_v61 = vld [vmem:[%s6166_s9 + $0x38] sm:$0xff] }
 0x17c   : > { %2917 = vmatmul.mubr.bf16.vlgmr.msra.gmra.mrb[0].mxu1 %v4395_v13  ;;  %v440_v13 = vld [vmem:[%s6166_s9 + $0x2b0] sm:$0xff]  ;;  %v369_v62 = vld [vmem:[%s6166_s9 + $0x78] sm:$0xff] }
 0x17d   : > { %3369 = vmatmul.mubr.bf16.vlgmr.msra.gmra.mrb[0].mxu0 %v4403_v14  ;;  %2998 = vmatpush1.bf16.msra.mxu1 %v5477_v9  ;;  %v436_v9 = vld [vmem:[%s6166_s9 + $0x290] sm:$0xff] }
 0x17e   : > { %3450 = vmatpush1.bf16.msra.mxu0 %v5480_v10  ;;  %2999 = vmatprep.subr.bf16.mxu1 %v5485_v17  ;;  %v4459_v10 = vcombine.low %v420_v57, %v428_v60  ;;  %v448_v14 = vld [vmem:[%s6166_s9 + $0x2f0] sm:$0xff]  ;;  %v357_v57 = vld [vmem:[%s6166_s9 + $0x18] sm:$0xff] }
 0x17f   : > { %3451 = vmatprep.subr.bf16.mxu0 %v5488_v18  ;;  %2926 = vmatprep.mubr.bf16.mxu1 %v4412_v19  ;;  %v5533_v17 = vld [vmem:[%s6174_s26 + $0x394] ss:$8 sps:$4 sm:$0xff]   ;;  %v4476_v19 = vcombine.high %v436_v9, %v444_v12  ;;  %v4483_v27 = vcombine.low %v440_v13, %v448_v14 }
 0x180   : > { %3378 = vmatprep.mubr.bf16.mxu0 %v4420_v20  ;;  %v5536_v18 = vld [vmem:[%s6174_s26 + $0x794] ss:$8 sps:$4 sm:$0xff]   ;;  %v4484_v20 = vcombine.high %v440_v13, %v448_v14 }
 0x181   : > { %3000 = vmatpush1.bf16.msra.mxu1 %v5483_v21  ;;  %v5531_v21 = vld [vmem:[%s6174_s26 + $0x390] ss:$8 sps:$4 sm:$0xff]  }
 0x182   : > { %3452 = vmatpush1.bf16.msra.mxu0 %v5486_v22  ;;  %3001 = vmatprep.subr.bf16.mxu1 %v5491_v23  ;;  %v5534_v22 = vld [vmem:[%s6174_s26 + $0x790] ss:$8 sps:$4 sm:$0xff]   ;;  %v5539_v23 = vld [vmem:[%s6174_s26 + $0x3a4] ss:$8 sps:$4 sm:$0xff]  }
 0x183   : > { %3453 = vmatprep.subr.bf16.mxu0 %v5494_v24  ;;  %v5542_v24 = vld [vmem:[%s6174_s26 + $0x7a4] ss:$8 sps:$4 sm:$0xff]   ;;  %v476_v44 = vld [vmem:[%s6166_s9 + $0x3d0] sm:$0xff]  ;;  %v365_v60 = vld [vmem:[%s6166_s9 + $0x58] sm:$0xff] }
 0x184   : > { %2927 = vmatmul.mubr.bf16.gmra.mrb[4].mxu1 %v4411_v29  ;;  %v456_v29 = vld [vmem:[%s6166_s9 + $0x330] sm:$0xff] }
 0x185   : > { %3379 = vmatmul.mubr.bf16.gmra.mrb[4].mxu0 %v4419_v30  ;;  %3002 = vmatpush1.bf16.msra.mxu1 %v5489_v25  ;;  %v452_v25 = vld [vmem:[%s6166_s9 + $0x310] sm:$0xff] }
 0x186   : > { %3454 = vmatpush1.bf16.msra.mxu0 %v5492_v26  ;;  %3003 = vmatprep.subr.bf16.mxu1 %v5497_v33  ;;  %v4475_v26 = vcombine.low %v436_v9, %v444_v12  ;;  %v464_v30 = vld [vmem:[%s6166_s9 + $0x370] sm:$0xff]  ;;  %v377_v9 = vld [vmem:[%s6166_s9 + $0xb8] sm:$0xff]  ;;  %v4405_v12 = vcombine.low %v361_v61, %v369_v62 }
 0x187   : > { %3455 = vmatprep.subr.bf16.mxu0 %v5500_v34  ;;  %2936 = vmatprep.mubr.bf16.mxu1 %v4428_v35  ;;  %v5545_v33 = vld [vmem:[%s6174_s26 + $0x3b4] ss:$8 sps:$4 sm:$0xff]   ;;  %v4492_v35 = vcombine.high %v452_v25, %v460_v28 }
 0x188   : > { %3388 = vmatprep.mubr.bf16.mxu0 %v4436_v36  ;;  %v5548_v34 = vld [vmem:[%s6174_s26 + $0x7b4] ss:$8 sps:$4 sm:$0xff]   ;;  %v4500_v36 = vcombine.high %v456_v29, %v464_v30 }
 0x189   : > { %3004 = vmatpush1.bf16.msra.mxu1 %v5495_v37  ;;  %v5543_v37 = vld [vmem:[%s6174_s26 + $0x3b0] ss:$8 sps:$4 sm:$0xff]  }
 0x18a   : > { %3456 = vmatpush1.bf16.msra.mxu0 %v5498_v38  ;;  %3005 = vmatprep.subr.bf16.mxu1 %v5503_v39  ;;  %v5546_v38 = vld [vmem:[%s6174_s26 + $0x7b0] ss:$8 sps:$4 sm:$0xff]   ;;  %v5551_v39 = vld [vmem:[%s6174_s26 + $0x3c4] ss:$8 sps:$4 sm:$0xff]  }
 0x18b   : > { %3457 = vmatprep.subr.bf16.mxu0 %v5506_v40  ;;  %v5554_v40 = vld [vmem:[%s6174_s26 + $0x7c4] ss:$8 sps:$4 sm:$0xff]  }
 0x18c   : > { %2937 = vmatmul.mubr.bf16.gmra.mrb[8].mxu1 %v4427_v42  ;;  %v4491_v42 = vcombine.low %v452_v25, %v460_v28  ;;  %v409_v25 = vld [vmem:[%s6166_s9 + $0x1b8] sm:$0xff] }
 0x18d   : > { %3389 = vmatmul.mubr.bf16.gmra.mrb[8].mxu0 %v4435_v43  ;;  %3006 = vmatpush1.bf16.msra.mxu1 %v5501_v47  ;;  %v4499_v43 = vcombine.low %v456_v29, %v464_v30  ;;  %v5549_v47 = vld [vmem:[%s6174_s26 + $0x3c0] ss:$8 sps:$4 sm:$0xff]  }
 0x18e   : > { %3458 = vmatpush1.bf16.msra.mxu0 %v5504_v48  ;;  %3007 = vmatprep.subr.bf16.mxu1 %v5509_v49  ;;  %v5552_v48 = vld [vmem:[%s6174_s26 + $0x7c0] ss:$8 sps:$4 sm:$0xff]   ;;  %v5557_v49 = vld [vmem:[%s6174_s26 + $0x3d4] ss:$8 sps:$4 sm:$0xff]  }
 0x18f   : > { %3459 = vmatprep.subr.bf16.mxu0 %v5512_v50  ;;  %2946 = vmatprep.mubr.bf16.mxu1 %v4444_v51  ;;  %v5560_v50 = vld [vmem:[%s6174_s26 + $0x7d4] ss:$8 sps:$4 sm:$0xff]   ;;  %v4508_v51 = vcombine.high %v468_v41, %v476_v44 }
 0x190   : > { %3398 = vmatprep.mubr.bf16.mxu0 %v4452_v52  ;;  %v4516_v52 = vcombine.high %v472_v45, %v480_v46 }
 0x191   : > { %3008 = vmatpush1.bf16.msra.mxu1 %v5507_v53  ;;  %v5555_v53 = vld [vmem:[%s6174_s26 + $0x3d0] ss:$8 sps:$4 sm:$0xff]  }
 0x192   : > { %3460 = vmatpush1.bf16.msra.mxu0 %v5510_v54  ;;  %3009 = vmatprep.subr.bf16.mxu1 %v5515_v55  ;;  %v5558_v54 = vld [vmem:[%s6174_s26 + $0x7d0] ss:$8 sps:$4 sm:$0xff]   ;;  %v5563_v55 = vld [vmem:[%s6174_s26 + $0x3e4] ss:$8 sps:$4 sm:$0xff]  }
 0x193   : > { %3461 = vmatprep.subr.bf16.mxu0 %v5518_v56  ;;  %v5566_v56 = vld [vmem:[%s6174_s26 + $0x7e4] ss:$8 sps:$4 sm:$0xff]  }
 0x194   : > { %2947 = vmatmul.mubr.bf16.gmra.mrb[12].mxu1 %v4443_v58  ;;  %v4507_v58 = vcombine.low %v468_v41, %v476_v44  ;;  %v441_v41 = vld [vmem:[%s6166_s9 + $0x2b8] sm:$0xff] }
 0x195   : > { %3399 = vmatmul.mubr.bf16.gmra.mrb[12].mxu0 %v4451_v59  ;;  %3010 = vmatpush1.bf16.msra.mxu1 %v5513_v63  ;;  %v4515_v59 = vcombine.low %v472_v45, %v480_v46  ;;  %v5561_v63 = vld [vmem:[%s6174_s26 + $0x3e0] ss:$8 sps:$4 sm:$0xff]  }
 0x196   : > { %3462 = vmatpush1.bf16.msra.mxu0 %v5516_v0  ;;  %3011 = vmatprep.subr.bf16.mxu1 %v5521_v1  ;;  %v5564_v0 = vld [vmem:[%s6174_s26 + $0x7e0] ss:$8 sps:$4 sm:$0xff]   ;;  %v5569_v1 = vld [vmem:[%s6174_s26 + $0x3f4] ss:$8 sps:$4 sm:$0xff]  }
 0x197   : > { %3463 = vmatprep.subr.bf16.mxu0 %v5524_v2  ;;  %2956 = vmatprep.mubr.bf16.mxu1 %v4460_v3  ;;  %v5572_v2 = vld [vmem:[%s6174_s26 + $0x7f4] ss:$8 sps:$4 sm:$0xff]   ;;  %v4398_v3 = vcombine.high %v357_v57, %v365_v60 }
 0x198   : > { %3408 = vmatprep.mubr.bf16.mxu0 %v4468_v4  ;;  %v4406_v4 = vcombine.high %v361_v61, %v369_v62 }
 0x199   : > { %3012 = vmatpush1.bf16.msra.mxu1 %v5519_v5  ;;  %v5567_v5 = vld [vmem:[%s6174_s26 + $0x3f0] ss:$8 sps:$4 sm:$0xff]  }
 0x19a   : > { %3464 = vmatpush1.bf16.msra.mxu0 %v5522_v6  ;;  %3013 = vmatprep.subr.bf16.mxu1 %v5527_v7  ;;  %v5570_v6 = vld [vmem:[%s6174_s26 + $0x7f0] ss:$8 sps:$4 sm:$0xff]  }
 0x19b   : > { %3465 = vmatprep.subr.bf16.mxu0 %v5530_v8  ;;  %v373_v7 = vld [vmem:[%s6166_s9 + $0x98] sm:$0xff] }
 0x19c   : > { %2957 = vmatmul.mubr.bf16.gmra.mrb[16].mxu1 %v4459_v10  ;;  %v381_v8 = vld [vmem:[%s6166_s9 + $0xd8] sm:$0xff] }
 0x19d   : > { %3409 = vmatmul.mubr.bf16.gmra.mrb[16].mxu0 %v4467_v11  ;;  %3014 = vmatpush1.bf16.msra.mxu1 %v5525_v15  ;;  %v385_v10 = vld [vmem:[%s6166_s9 + $0xf8] sm:$0xff]  ;;  %v4397_v11 = vcombine.low %v357_v57, %v365_v60  ;;  %v4414_v13 = vcombine.high %v373_v7, %v381_v8 }
 0x19e   : > { %3466 = vmatpush1.bf16.msra.mxu0 %v5528_v16  ;;  %3015 = vmatprep.subr.bf16.mxu1 %v5533_v17  ;;  %v4422_v14 = vcombine.high %v377_v9, %v385_v10  ;;  %v389_v15 = vld [vmem:[%s6166_s9 + $0x118] sm:$0xff] }
 0x19f   : > { %3467 = vmatprep.subr.bf16.mxu0 %v5536_v18  ;;  %2966 = vmatprep.mubr.bf16.mxu1 %v4476_v19  ;;  %v397_v16 = vld [vmem:[%s6166_s9 + $0x158] sm:$0xff]  ;;  %v4413_v19 = vcombine.low %v373_v7, %v381_v8 }
 0x1a0   : > { %3418 = vmatprep.mubr.bf16.mxu0 %v4484_v20  ;;  %v393_v17 = vld [vmem:[%s6166_s9 + $0x138] sm:$0xff]  ;;  %v4421_v20 = vcombine.low %v377_v9, %v385_v10  ;;  %v324_v10 = vld [vmem:[#allocation2 + $0x10] sm:$0xff] }
 0x1a1   : > { %3016 = vmatpush1.bf16.msra.mxu1 %v5531_v21  ;;  %v401_v18 = vld [vmem:[%s6166_s9 + $0x178] sm:$0xff]  ;;  %v4430_v21 = vcombine.high %v389_v15, %v397_v16 }
 0x1a2   : > { %3468 = vmatpush1.bf16.msra.mxu0 %v5534_v22  ;;  %3017 = vmatprep.subr.bf16.mxu1 %v5539_v23  ;;  %v4438_v22 = vcombine.high %v393_v17, %v401_v18  ;;  %v405_v23 = vld [vmem:[%s6166_s9 + $0x198] sm:$0xff]  ;;  %v4437_v28 = vcombine.low %v393_v17, %v401_v18 }
 0x1a3   : > { %3469 = vmatprep.subr.bf16.mxu0 %v5542_v24  ;;  %v413_v24 = vld [vmem:[%s6166_s9 + $0x1d8] sm:$0xff] }
 0x1a4   : > { %2967 = vmatmul.mubr.bf16.gmra.mrb[20].mxu1 %v4475_v26  ;;  %v417_v26 = vld [vmem:[%s6166_s9 + $0x1f8] sm:$0xff]  ;;  %v4446_v29 = vcombine.high %v405_v23, %v413_v24 }
 0x1a5   : > { %3419 = vmatmul.mubr.bf16.gmra.mrb[20].mxu0 %v4483_v27  ;;  %3018 = vmatpush1.bf16.msra.mxu1 %v5537_v31  ;;  %v4429_v27 = vcombine.low %v389_v15, %v397_v16  ;;  %v4454_v30 = vcombine.high %v409_v25, %v417_v26  ;;  %v421_v31 = vld [vmem:[%s6166_s9 + $0x218] sm:$0xff] }
 0x1a6   : > { %3470 = vmatpush1.bf16.msra.mxu0 %v5540_v32  ;;  %3019 = vmatprep.subr.bf16.mxu1 %v5545_v33  ;;  %v429_v32 = vld [vmem:[%s6166_s9 + $0x258] sm:$0xff] }
 0x1a7   : > { %3471 = vmatprep.subr.bf16.mxu0 %v5548_v34  ;;  %2976 = vmatprep.mubr.bf16.mxu1 %v4492_v35  ;;  %v425_v33 = vld [vmem:[%s6166_s9 + $0x238] sm:$0xff]  ;;  %v4445_v35 = vcombine.low %v405_v23, %v413_v24 }
 0x1a8   : > { %3428 = vmatprep.mubr.bf16.mxu0 %v4500_v36  ;;  %v433_v34 = vld [vmem:[%s6166_s9 + $0x278] sm:$0xff]  ;;  %v4453_v36 = vcombine.low %v409_v25, %v417_v26  ;;  %v327_v26 = vld [vmem:[#allocation2 + $0x28] sm:$0xff] }
 0x1a9   : > { %3020 = vmatpush1.bf16.msra.mxu1 %v5543_v37  ;;  %v4462_v37 = vcombine.high %v421_v31, %v429_v32  ;;  %v4469_v44 = vcombine.low %v425_v33, %v433_v34  ;;  %v473_v57 = vld [vmem:[%s6166_s9 + $0x3b8] sm:$0xff] }
 0x1aa   : > { %3472 = vmatpush1.bf16.msra.mxu0 %v5546_v38  ;;  %3021 = vmatprep.subr.bf16.mxu1 %v5551_v39  ;;  %v4470_v38 = vcombine.high %v425_v33, %v433_v34  ;;  %v437_v39 = vld [vmem:[%s6166_s9 + $0x298] sm:$0xff] }
 0x1ab   : > { %3473 = vmatprep.subr.bf16.mxu0 %v5554_v40  ;;  %v445_v40 = vld [vmem:[%s6166_s9 + $0x2d8] sm:$0xff] }
 0x1ac   : > { %2977 = vmatmul.mubr.bf16.gmra.mrb[24].mxu1 %v4491_v42  ;;  %v449_v42 = vld [vmem:[%s6166_s9 + $0x2f8] sm:$0xff]  ;;  %v4478_v45 = vcombine.high %v437_v39, %v445_v40 }
 0x1ad   : > { %3429 = vmatmul.mubr.bf16.gmra.mrb[24].mxu0 %v4499_v43  ;;  %3022 = vmatpush1.bf16.msra.mxu1 %v5549_v47  ;;  %v4461_v43 = vcombine.low %v421_v31, %v429_v32  ;;  %v4486_v46 = vcombine.high %v441_v41, %v449_v42  ;;  %v453_v47 = vld [vmem:[%s6166_s9 + $0x318] sm:$0xff] }
 0x1ae   : > { %3474 = vmatpush1.bf16.msra.mxu0 %v5552_v48  ;;  %3023 = vmatprep.subr.bf16.mxu1 %v5557_v49  ;;  %v461_v48 = vld [vmem:[%s6166_s9 + $0x358] sm:$0xff] }
 0x1af   : > { %3475 = vmatprep.subr.bf16.mxu0 %v5560_v50  ;;  %2986 = vmatprep.mubr.bf16.mxu1 %v4508_v51  ;;  %v457_v49 = vld [vmem:[%s6166_s9 + $0x338] sm:$0xff]  ;;  %v4477_v51 = vcombine.low %v437_v39, %v445_v40 }
 0x1b0   : > { %3438 = vmatprep.mubr.bf16.mxu0 %v4516_v52  ;;  %v465_v50 = vld [vmem:[%s6166_s9 + $0x378] sm:$0xff]  ;;  %v4485_v52 = vcombine.low %v441_v41, %v449_v42  ;;  %v330_v42 = vld [vmem:[#allocation2 + $0x40] sm:$0xff] }
 0x1b1   : > { %3024 = vmatpush1.bf16.msra.mxu1 %v5555_v53  ;;  %v4494_v53 = vcombine.high %v453_v47, %v461_v48  ;;  %v4501_v60 = vcombine.low %v457_v49, %v465_v50  ;;  %v325_v15 = vld [vmem:[#allocation2 + $0x18] sm:$0xff] }
 0x1b2   : > { %3476 = vmatpush1.bf16.msra.mxu0 %v5558_v54  ;;  %3025 = vmatprep.subr.bf16.mxu1 %v5563_v55  ;;  %v4502_v54 = vcombine.high %v457_v49, %v465_v50  ;;  %v469_v55 = vld [vmem:[%s6166_s9 + $0x398] sm:$0xff]  ;;  %v332_v50 = vld [vmem:[#allocation2 + $0x50] sm:$0xff] }
 0x1b3   : > { %3477 = vmatprep.subr.bf16.mxu0 %v5566_v56  ;;  %v477_v56 = vld [vmem:[%s6166_s9 + $0x3d8] sm:$0xff] }
 0x1b4   : > { %2987 = vmatmul.mubr.bf16.gmra.mrb[28].mxu1 %v4507_v58  ;;  %v481_v58 = vld [vmem:[%s6166_s9 + $0x3f8] sm:$0xff]  ;;  %v4510_v61 = vcombine.high %v469_v55, %v477_v56 }
 0x1b5   : > { %3439 = vmatmul.mubr.bf16.gmra.mrb[28].mxu0 %v4515_v59  ;;  %3026 = vmatpush1.bf16.msra.mxu1 %v5561_v63  ;;  %v4493_v59 = vcombine.low %v453_v47, %v461_v48  ;;  %v4518_v62 = vcombine.high %v473_v57, %v481_v58  ;;  %v4509_v63 = vcombine.low %v469_v55, %v477_v56  ;;  %v333_v55 = vld [vmem:[#allocation2 + $0x58] sm:$0xff] }
 0x1b6   : > { %3478 = vmatpush1.bf16.msra.mxu0 %v5564_v0  ;;  %3027 = vmatprep.subr.bf16.mxu1 %v5569_v1  ;;  %v4517_v0 = vcombine.low %v473_v57, %v481_v58 }
 0x1b7   : > { %3479 = vmatprep.subr.bf16.mxu0 %v5572_v2  ;;  %3029 = vmatprep.mubr.bf16.mxu1 %v4398_v3  ;;  %v322_v2 = vld [vmem:[#allocation2] sm:$0xff] }
 0x1b8   : > { %3481 = vmatprep.mubr.bf16.mxu0 %v4406_v4 }
 0x1b9   : > { %3028 = vmatpush1.bf16.msra.mxu1 %v5567_v5 }
 0x1ba   : > { %3480 = vmatpush1.bf16.msra.mxu0 %v5570_v6  ;;  %v323_v6 = vld [vmem:[#allocation2 + $0x8] sm:$0xff] }
 0x1bc   : > { %3030 = vmatmul.mubr.bf16.vlgmr.msra.gmra.mrb[0].mxu1 %v4397_v11 }
 0x1bd   : > { %3482 = vmatmul.mubr.bf16.vlgmr.msra.gmra.mrb[0].mxu0 %v4405_v12  ;;  %3039 = vmatprep.mubr.bf16.mxu1 %v4414_v13 }
 0x1be   : > { %3491 = vmatprep.mubr.bf16.mxu0 %v4422_v14 }
 0x1c4   : > { %3040 = vmatmul.mubr.bf16.gmra.mrb[4].mxu1 %v4413_v19 }
 0x1c5   : > { %3492 = vmatmul.mubr.bf16.gmra.mrb[4].mxu0 %v4421_v20  ;;  %3049 = vmatprep.mubr.bf16.mxu1 %v4430_v21 }
 0x1c6   : > { %3501 = vmatprep.mubr.bf16.mxu0 %v4438_v22  ;;  %v326_v22 = vld [vmem:[#allocation2 + $0x20] sm:$0xff] }
 0x1cc   : > { %3050 = vmatmul.mubr.bf16.gmra.mrb[8].mxu1 %v4429_v27 }
 0x1cd   : > { %3502 = vmatmul.mubr.bf16.gmra.mrb[8].mxu0 %v4437_v28  ;;  %3059 = vmatprep.mubr.bf16.mxu1 %v4446_v29 }
 0x1ce   : > { %3511 = vmatprep.mubr.bf16.mxu0 %v4454_v30  ;;  %v328_v30 = vld [vmem:[#allocation2 + $0x30] sm:$0xff] }
 0x1d4   : > { %3060 = vmatmul.mubr.bf16.gmra.mrb[12].mxu1 %v4445_v35  ;;  %v329_v35 = vld [vmem:[#allocation2 + $0x38] sm:$0xff] }
 0x1d5   : > { %3512 = vmatmul.mubr.bf16.gmra.mrb[12].mxu0 %v4453_v36  ;;  %3069 = vmatprep.mubr.bf16.mxu1 %v4462_v37 }
 0x1d6   : > { %3521 = vmatprep.mubr.bf16.mxu0 %v4470_v38 }
 0x1dc   : > { %3070 = vmatmul.mubr.bf16.gmra.mrb[16].mxu1 %v4461_v43 }
 0x1dd   : > { %3522 = vmatmul.mubr.bf16.gmra.mrb[16].mxu0 %v4469_v44  ;;  %3079 = vmatprep.mubr.bf16.mxu1 %v4478_v45 }
 0x1de   : > { %3531 = vmatprep.mubr.bf16.mxu0 %v4486_v46  ;;  %v331_v46 = vld [vmem:[#allocation2 + $0x48] sm:$0xff] }
 0x1e4   : > { %3080 = vmatmul.mubr.bf16.gmra.mrb[20].mxu1 %v4477_v51 }
 0x1e5   : > { %3532 = vmatmul.mubr.bf16.gmra.mrb[20].mxu0 %v4485_v52  ;;  %3089 = vmatprep.mubr.bf16.mxu1 %v4494_v53 }
 0x1e6   : > { %3541 = vmatprep.mubr.bf16.mxu0 %v4502_v54 }
 0x1ec   : > { %3090 = vmatmul.mubr.bf16.gmra.mrb[24].mxu1 %v4493_v59 }
 0x1ed   : > { %3542 = vmatmul.mubr.bf16.gmra.mrb[24].mxu0 %v4501_v60  ;;  %3099 = vmatprep.mubr.bf16.mxu1 %v4510_v61 }
 0x1ee   : > { %3551 = vmatprep.mubr.bf16.mxu0 %v4518_v62  ;;  %v334_v62 = vld [vmem:[#allocation2 + $0x60] sm:$0xff] }
 0x1f4   : > { %3100 = vmatmul.mubr.bf16.gmra.mrb[28].mxu1 %v4509_v63 }
 0x1f5   : > { %3552 = vmatmul.mubr.bf16.gmra.mrb[28].mxu0 %v4517_v0 }
 0x28f   : > { %v3031_v1 = vpop.f32.mrb[0].mxu1 }
 0x290   : > { %v3483_v3 = vpop.f32.mrb[0].mxu0  ;;  %v3033_v5 = vpop.f32.mrb[1].mxu1 }
 0x291   : > { %v4818_v4 = vadd.f32 %v3483_v3, %v3031_v1  ;;  %v3485_v7 = vpop.f32.mrb[1].mxu0  ;;  %v3035_v9 = vpop.f32.mrb[2].mxu1 }
 0x292   : > { %v4819_v8 = vadd.f32 %v3485_v7, %v3033_v5  ;;  %v3487_v11 = vpop.f32.mrb[2].mxu0  ;;  %v3037_v14 = vpop.f32.mrb[3].mxu1 }
 0x293   : > { %v3562_v12 = vadd.f32 %v4818_v4, %v322_v2  ;;  %v4820_v13 = vadd.f32 %v3487_v11, %v3035_v9  ;;  %v3489_v16 = vpop.f32.mrb[3].mxu0  ;;  %v335_v2 = vld [vmem:[#allocation2 + $0x68] sm:$0xff]  ;;  %v337_v11 = vld [vmem:[#allocation2 + $0x78] sm:$0xff] }
 0x294   : > { %v3563_v17 = vadd.f32 %v4819_v8, %v323_v6  ;;  %v4821_v18 = vadd.f32 %v3489_v16, %v3037_v14  ;;  %v336_v6 = vld [vmem:[#allocation2 + $0x70] sm:$0xff] }
 0x295   : > { %3594 = vst [vmem:[#allocation2] sm:$0xff] %v3562_v12  ;;  %v3564_v19 = vadd.f32 %v4820_v13, %v324_v10 }
 0x296   : > { %3595 = vst [vmem:[#allocation2 + $0x8] sm:$0xff] %v3563_v17  ;;  %v3565_v20 = vadd.f32 %v4821_v18, %v325_v15  ;;  %v338_v18 = vld [vmem:[#allocation2 + $0x80] sm:$0xff] }
 0x297   : > { %3596 = vst [vmem:[#allocation2 + $0x10] sm:$0xff] %v3564_v19  ;;  %v3041_v21 = vpop.f32.mrb[4].mxu1 }
 0x298   : > { %3597 = vst [vmem:[#allocation2 + $0x18] sm:$0xff] %v3565_v20  ;;  %v3493_v23 = vpop.f32.mrb[4].mxu0  ;;  %v3043_v25 = vpop.f32.mrb[5].mxu1 }
 0x299   : > { %v4822_v24 = vadd.f32 %v3493_v23, %v3041_v21  ;;  %v3495_v27 = vpop.f32.mrb[5].mxu0  ;;  %v3045_v29 = vpop.f32.mrb[6].mxu1 }
 0x29a   : > { %v4823_v28 = vadd.f32 %v3495_v27, %v3043_v25  ;;  %v3497_v31 = vpop.f32.mrb[6].mxu0  ;;  %v3047_v34 = vpop.f32.mrb[7].mxu1 }
 0x29b   : > { %v3566_v32 = vadd.f32 %v4822_v24, %v326_v22  ;;  %v4824_v33 = vadd.f32 %v3497_v31, %v3045_v29  ;;  %v3499_v36 = vpop.f32.mrb[7].mxu0  ;;  %v339_v22 = vld [vmem:[#allocation2 + $0x88] sm:$0xff]  ;;  %v341_v31 = vld [vmem:[#allocation2 + $0x98] sm:$0xff] }
 0x29c   : > { %v3567_v37 = vadd.f32 %v4823_v28, %v327_v26  ;;  %v4825_v38 = vadd.f32 %v3499_v36, %v3047_v34  ;;  %v340_v26 = vld [vmem:[#allocation2 + $0x90] sm:$0xff] }
 0x29d   : > { %3598 = vst [vmem:[#allocation2 + $0x20] sm:$0xff] %v3566_v32  ;;  %v3568_v39 = vadd.f32 %v4824_v33, %v328_v30 }
 0x29e   : > { %3599 = vst [vmem:[#allocation2 + $0x28] sm:$0xff] %v3567_v37  ;;  %v3569_v40 = vadd.f32 %v4825_v38, %v329_v35  ;;  %v342_v38 = vld [vmem:[#allocation2 + $0xa0] sm:$0xff] }
 0x29f   : > { %3600 = vst [vmem:[#allocation2 + $0x30] sm:$0xff] %v3568_v39  ;;  %v3051_v41 = vpop.f32.mrb[8].mxu1 }
 0x2a0   : > { %3601 = vst [vmem:[#allocation2 + $0x38] sm:$0xff] %v3569_v40  ;;  %v3503_v43 = vpop.f32.mrb[8].mxu0  ;;  %v3053_v45 = vpop.f32.mrb[9].mxu1 }
 0x2a1   : > { %v4826_v44 = vadd.f32 %v3503_v43, %v3051_v41  ;;  %v3505_v47 = vpop.f32.mrb[9].mxu0  ;;  %v3055_v49 = vpop.f32.mrb[10].mxu1 }
 0x2a2   : > { %v4827_v48 = vadd.f32 %v3505_v47, %v3053_v45  ;;  %v3507_v51 = vpop.f32.mrb[10].mxu0  ;;  %v3057_v54 = vpop.f32.mrb[11].mxu1 }
 0x2a3   : > { %v3570_v52 = vadd.f32 %v4826_v44, %v330_v42  ;;  %v4828_v53 = vadd.f32 %v3507_v51, %v3055_v49  ;;  %v3509_v56 = vpop.f32.mrb[11].mxu0  ;;  %v343_v42 = vld [vmem:[#allocation2 + $0xa8] sm:$0xff]  ;;  %v345_v51 = vld [vmem:[#allocation2 + $0xb8] sm:$0xff] }
 0x2a4   : > { %v3571_v57 = vadd.f32 %v4827_v48, %v331_v46  ;;  %v4829_v58 = vadd.f32 %v3509_v56, %v3057_v54  ;;  %v344_v46 = vld [vmem:[#allocation2 + $0xb0] sm:$0xff] }
 0x2a5   : > { %3602 = vst [vmem:[#allocation2 + $0x40] sm:$0xff] %v3570_v52  ;;  %v3572_v59 = vadd.f32 %v4828_v53, %v332_v50 }
 0x2a6   : > { %3603 = vst [vmem:[#allocation2 + $0x48] sm:$0xff] %v3571_v57  ;;  %v3573_v60 = vadd.f32 %v4829_v58, %v333_v55  ;;  %v346_v58 = vld [vmem:[#allocation2 + $0xc0] sm:$0xff] }
 0x2a7   : > { %3604 = vst [vmem:[#allocation2 + $0x50] sm:$0xff] %v3572_v59  ;;  %v3061_v61 = vpop.f32.mrb[12].mxu1 }
 0x2a8   : > { %3605 = vst [vmem:[#allocation2 + $0x58] sm:$0xff] %v3573_v60  ;;  %v3513_v63 = vpop.f32.mrb[12].mxu0  ;;  %v3063_v1 = vpop.f32.mrb[13].mxu1 }
 0x2a9   : > { %v4830_v0 = vadd.f32 %v3513_v63, %v3061_v61  ;;  %v3515_v3 = vpop.f32.mrb[13].mxu0  ;;  %v3065_v5 = vpop.f32.mrb[14].mxu1 }
 0x2aa   : > { %v4831_v4 = vadd.f32 %v3515_v3, %v3063_v1  ;;  %v3517_v7 = vpop.f32.mrb[14].mxu0  ;;  %v3067_v10 = vpop.f32.mrb[15].mxu1 }
 0x2ab   : > { %v3574_v8 = vadd.f32 %v4830_v0, %v334_v62  ;;  %v4832_v9 = vadd.f32 %v3517_v7, %v3065_v5  ;;  %v3519_v12 = vpop.f32.mrb[15].mxu0  ;;  %v347_v62 = vld [vmem:[#allocation2 + $0xc8] sm:$0xff]  ;;  %v349_v7 = vld [vmem:[#allocation2 + $0xd8] sm:$0xff] }
 0x2ac   : > { %v3575_v13 = vadd.f32 %v4831_v4, %v335_v2  ;;  %v4833_v14 = vadd.f32 %v3519_v12, %v3067_v10  ;;  %v348_v2 = vld [vmem:[#allocation2 + $0xd0] sm:$0xff] }
 0x2ad   : > { %3606 = vst [vmem:[#allocation2 + $0x60] sm:$0xff] %v3574_v8  ;;  %v3576_v15 = vadd.f32 %v4832_v9, %v336_v6 }
 0x2ae   : > { %3607 = vst [vmem:[#allocation2 + $0x68] sm:$0xff] %v3575_v13  ;;  %v3577_v16 = vadd.f32 %v4833_v14, %v337_v11  ;;  %v350_v14 = vld [vmem:[#allocation2 + $0xe0] sm:$0xff] }
 0x2af   : > { %3608 = vst [vmem:[#allocation2 + $0x70] sm:$0xff] %v3576_v15  ;;  %v3071_v17 = vpop.f32.mrb[16].mxu1 }
 0x2b0   : > { %3609 = vst [vmem:[#allocation2 + $0x78] sm:$0xff] %v3577_v16  ;;  %v3523_v19 = vpop.f32.mrb[16].mxu0  ;;  %v3073_v21 = vpop.f32.mrb[17].mxu1 }
 0x2b1   : > { %v4834_v20 = vadd.f32 %v3523_v19, %v3071_v17  ;;  %v3525_v23 = vpop.f32.mrb[17].mxu0  ;;  %v3075_v25 = vpop.f32.mrb[18].mxu1 }
 0x2b2   : > { %v4835_v24 = vadd.f32 %v3525_v23, %v3073_v21  ;;  %v3527_v27 = vpop.f32.mrb[18].mxu0  ;;  %v3077_v30 = vpop.f32.mrb[19].mxu1 }
 0x2b3   : > { %v3578_v28 = vadd.f32 %v4834_v20, %v338_v18  ;;  %v4836_v29 = vadd.f32 %v3527_v27, %v3075_v25  ;;  %v3529_v32 = vpop.f32.mrb[19].mxu0  ;;  %v351_v18 = vld [vmem:[#allocation2 + $0xe8] sm:$0xff]  ;;  %v353_v27 = vld [vmem:[#allocation2 + $0xf8] sm:$0xff] }
 0x2b4   : > { %v3579_v33 = vadd.f32 %v4835_v24, %v339_v22  ;;  %v4837_v34 = vadd.f32 %v3529_v32, %v3077_v30  ;;  %v352_v22 = vld [vmem:[#allocation2 + $0xf0] sm:$0xff] }
 0x2b5   : > { %3610 = vst [vmem:[#allocation2 + $0x80] sm:$0xff] %v3578_v28  ;;  %v3580_v35 = vadd.f32 %v4836_v29, %v340_v26 }
 0x2b6   : > { %3611 = vst [vmem:[#allocation2 + $0x88] sm:$0xff] %v3579_v33  ;;  %v3581_v36 = vadd.f32 %v4837_v34, %v341_v31  ;;  %v6579_v33 = vld [vmem:[#allocation2] sm:$0xff] (!%p4775_p13)  ;;  %v6581_v34 = vld [vmem:[#allocation2 + $0x8] sm:$0xff] (!%p4775_p13) }
 0x2b7   : > { %3612 = vst [vmem:[#allocation2 + $0x90] sm:$0xff] %v3580_v35  ;;  %v3081_v37 = vpop.f32.mrb[20].mxu1  ;;  %v6583_v35 = vld [vmem:[#allocation2 + $0x10] sm:$0xff] (!%p4775_p13) }
 0x2b8   : > { %3613 = vst [vmem:[#allocation2 + $0x98] sm:$0xff] %v3581_v36  ;;  %v3533_v39 = vpop.f32.mrb[20].mxu0  ;;  %v3083_v41 = vpop.f32.mrb[21].mxu1  ;;  %v6585_v36 = vld [vmem:[#allocation2 + $0x18] sm:$0xff] (!%p4775_p13) }
 0x2b9   : > { %v4838_v40 = vadd.f32 %v3533_v39, %v3081_v37  ;;  %v3535_v43 = vpop.f32.mrb[21].mxu0  ;;  %v3085_v45 = vpop.f32.mrb[22].mxu1  ;;  %v6587_v37 = vld [vmem:[#allocation2 + $0x20] sm:$0xff] (!%p4775_p13)  ;;  %v3662_v39 = vadd.f32 (!%p4775_p13), %v6583_v35, %v6579_v33 }
 0x2ba   : > { %v4839_v44 = vadd.f32 %v3535_v43, %v3083_v41  ;;  %v3537_v47 = vpop.f32.mrb[22].mxu0  ;;  %v3087_v50 = vpop.f32.mrb[23].mxu1  ;;  %v6595_v41 = vld [vmem:[#allocation2 + $0x30] sm:$0xff] (!%p4775_p13)  ;;  %v3720_v43 = vmul.f32 (!%p4775_p13), %v6581_v34, %v6581_v34 }
 0x2bb   : > { %v3582_v48 = vadd.f32 %v4838_v40, %v342_v38  ;;  %v4840_v49 = vadd.f32 %v3537_v47, %v3085_v45  ;;  %v3539_v52 = vpop.f32.mrb[23].mxu0  ;;  %v6589_v38 = vld [vmem:[#allocation2 + $0x28] sm:$0xff] (!%p4775_p13)  ;;  %v3719_v40 = vmul.f32 (!%p4775_p13), %v6579_v33, %v6579_v33  ;;  %v3722_v45 = vmul.f32 (!%p4775_p13), %v6585_v36, %v6585_v36 }
 0x2bc   : > { %v3583_v53 = vadd.f32 %v4839_v44, %v343_v42  ;;  %v4841_v54 = vadd.f32 %v3539_v52, %v3087_v50  ;;  %v3675_v42 = vadd.f32 (!%p4775_p13), %v6585_v36, %v6581_v34  ;;  %v3721_v44 = vmul.f32 (!%p4775_p13), %v6583_v35, %v6583_v35 }
 0x2bd   : > { %3614 = vst [vmem:[#allocation2 + $0xa0] sm:$0xff] %v3582_v48  ;;  %v3584_v55 = vadd.f32 %v4840_v49, %v344_v46  ;;  %v6605_v46 = vld [vmem:[#allocation2 + $0x38] sm:$0xff] (!%p4775_p13)  ;;  %v3663_v47 = vadd.f32 (!%p4775_p13), %v3662_v39, %v6587_v37  ;;  %v6608_v48 = vld [vmem:[#allocation2 + $0x40] sm:$0xff] (!%p4775_p13)  ;;  %v6610_v49 = vld [vmem:[#allocation2 + $0x48] sm:$0xff] (!%p4775_p13)  ;;  %v3724_v52 = vmul.f32 (!%p4775_p13), %v6589_v38, %v6589_v38 }
 0x2be   : > { %3615 = vst [vmem:[#allocation2 + $0xa8] sm:$0xff] %v3583_v53  ;;  %v3585_v56 = vadd.f32 %v4841_v54, %v345_v51  ;;  %v3676_v50 = vadd.f32 (!%p4775_p13), %v3675_v42, %v6589_v38  ;;  %v3723_v51 = vmul.f32 (!%p4775_p13), %v6587_v37, %v6587_v37  ;;  %v6617_v53 = vld [vmem:[#allocation2 + $0x50] sm:$0xff] (!%p4775_p13) }
 0x2bf   : > { %3616 = vst [vmem:[#allocation2 + $0xb0] sm:$0xff] %v3584_v55  ;;  %v3091_v57 = vpop.f32.mrb[24].mxu1  ;;  %v3664_v54 = vadd.f32 (!%p4775_p13), %v3663_v47, %v6595_v41  ;;  %v3725_v55 = vmul.f32 (!%p4775_p13), %v6595_v41, %v6595_v41 }
 0x2c0   : > { %3617 = vst [vmem:[#allocation2 + $0xb8] sm:$0xff] %v3585_v56  ;;  %v3543_v59 = vpop.f32.mrb[24].mxu0  ;;  %v3093_v61 = vpop.f32.mrb[25].mxu1  ;;  %v6622_v56 = vld [vmem:[#allocation2 + $0x80] sm:$0xff] (!%p4775_p13) }
 0x2c1   : > { %v4842_v60 = vadd.f32 %v3543_v59, %v3091_v57  ;;  %v3545_v63 = vpop.f32.mrb[25].mxu0  ;;  %v3095_v1 = vpop.f32.mrb[26].mxu1  ;;  %v6624_v57 = vld [vmem:[#allocation2 + $0x58] sm:$0xff] (!%p4775_p13)  ;;  %v3726_v59 = vmul.f32 (!%p4775_p13), %v6605_v46, %v6605_v46 }
 0x2c2   : > { %v4843_v0 = vadd.f32 %v3545_v63, %v3093_v61  ;;  %v3547_v3 = vpop.f32.mrb[26].mxu0  ;;  %v3097_v6 = vpop.f32.mrb[27].mxu1  ;;  %v3764_v61 = vadd.f32 (!%p4775_p13), %v3722_v45, %v3720_v43  ;;  %v6631_v63 = vld [vmem:[#allocation2 + $0x90] sm:$0xff] (!%p4775_p13) }
 0x2c3   : > { %v3586_v4 = vadd.f32 %v4842_v60, %v346_v58  ;;  %v4844_v5 = vadd.f32 %v3547_v3, %v3095_v1  ;;  %v3549_v8 = vpop.f32.mrb[27].mxu0  ;;  %v3677_v58 = vadd.f32 (!%p4775_p13), %v3676_v50, %v6605_v46  ;;  %v3751_v60 = vadd.f32 (!%p4775_p13), %v3721_v44, %v3719_v40  ;;  %v6638_v3 = vld [vmem:[#allocation2 + $0x98] sm:$0xff] (!%p4775_p13) }
 0x2c4   : > { %v3587_v9 = vadd.f32 %v4843_v0, %v347_v62  ;;  %v4845_v10 = vadd.f32 %v3549_v8, %v3097_v6  ;;  %v6629_v62 = vld [vmem:[#allocation2 + $0x88] sm:$0xff] (!%p4775_p13)  ;;  %v3665_v0 = vadd.f32 (!%p4775_p13), %v3664_v54, %v6608_v48  ;;  %v3727_v1 = vmul.f32 (!%p4775_p13), %v6608_v48, %v6608_v48  ;;  %v6644_v6 = vld [vmem:[#allocation2 + $0x60] sm:$0xff] (!%p4775_p13) }
 0x2c5   : > { %3618 = vst [vmem:[#allocation2 + $0xc0] sm:$0xff] %v3586_v4  ;;  %v3588_v11 = vadd.f32 %v4844_v5, %v348_v2  ;;  %v3728_v2 = vmul.f32 (!%p4775_p13), %v6610_v49, %v6610_v49  ;;  %v6640_v4 = vld [vmem:[#allocation2 + $0xa0] sm:$0xff] (!%p4775_p13)  ;;  %v3688_v5 = vadd.f32 (!%p4775_p13), %v6631_v63, %v6622_v56  ;;  %v3678_v8 = vadd.f32 (!%p4775_p13), %v3677_v58, %v6610_v49 }
 0x2c6   : > { %3619 = vst [vmem:[#allocation2 + $0xc8] sm:$0xff] %v3587_v9  ;;  %v3589_v12 = vadd.f32 %v4845_v10, %v349_v7  ;;  %v6646_v7 = vld [vmem:[#allocation2 + $0x68] sm:$0xff] (!%p4775_p13)  ;;  %v3752_v9 = vadd.f32 (!%p4775_p13), %v3751_v60, %v3723_v51  ;;  %v3765_v10 = vadd.f32 (!%p4775_p13), %v3764_v61, %v3724_v52 }
 0x2c7   : > { %3620 = vst [vmem:[#allocation2 + $0xd0] sm:$0xff] %v3588_v11  ;;  %v3101_v13 = vpop.f32.mrb[28].mxu1  ;;  %v6649_v11 = vld [vmem:[#allocation2 + $0xa8] sm:$0xff] (!%p4775_p13) }
 0x2c8   : > { %3621 = vst [vmem:[#allocation2 + $0xd8] sm:$0xff] %v3589_v12  ;;  %v3553_v15 = vpop.f32.mrb[28].mxu0  ;;  %v3103_v17 = vpop.f32.mrb[29].mxu1  ;;  %v3701_v12 = vadd.f32 (!%p4775_p13), %v6638_v3, %v6629_v62 }
 0x2c9   : > { %v4846_v16 = vadd.f32 %v3553_v15, %v3101_v13  ;;  %v3555_v19 = vpop.f32.mrb[29].mxu0  ;;  %v3105_v21 = vpop.f32.mrb[30].mxu1  ;;  %v3666_v13 = vadd.f32 (!%p4775_p13), %v3665_v0, %v6617_v53  ;;  %v3730_v15 = vmul.f32 (!%p4775_p13), %v6624_v57, %v6624_v57 }
 0x2ca   : > { %v4847_v20 = vadd.f32 %v3555_v19, %v3103_v17  ;;  %v3557_v23 = vpop.f32.mrb[30].mxu0  ;;  %v3107_v26 = vpop.f32.mrb[31].mxu1  ;;  %3629 = sbr.rel (%p4775_p13) target bundleno = 841 (0x349), region = 52  ;;  %v6660_v17 = vld [vmem:[#allocation2 + $0x70] sm:$0xff] (!%p4775_p13)  ;;  %v3679_v19 = vadd.f32 (!%p4775_p13), %v3678_v8, %v6624_v57 }
 0x2cb   : > { %v3590_v24 = vadd.f32 %v4846_v16, %v350_v14  ;;  %v4848_v25 = vadd.f32 %v3557_v23, %v3105_v21  ;;  %v3559_v28 = vpop.f32.mrb[31].mxu0  ;;  %v3729_v14 = vmul.f32 (!%p4775_p13), %v6617_v53, %v6617_v53  ;;  %v6658_v16 = vld [vmem:[#allocation2 + $0xb0] sm:$0xff] (!%p4775_p13)  ;;  %v3766_v21 = vadd.f32 (!%p4775_p13), %v3765_v10, %v3726_v59 }
 0x2cc   : > { %v3591_v29 = vadd.f32 %v4847_v20, %v351_v18  ;;  %v4849_v30 = vadd.f32 %v3559_v28, %v3107_v26  ;;  %v6662_v18 = vld [vmem:[#allocation2 + $0x78] sm:$0xff] (!%p4775_p13)  ;;  %v3753_v20 = vadd.f32 (!%p4775_p13), %v3752_v9, %v3725_v55  ;;  %v3689_v23 = vadd.f32 (!%p4775_p13), %v3688_v5, %v6640_v4 }
 0x2cd   : > { %3622 = vst [vmem:[#allocation2 + $0xe0] sm:$0xff] %v3590_v24  ;;  %v3592_v31 = vadd.f32 %v4848_v25, %v352_v22  ;;  %v6665_v22 = vld [vmem:[#allocation2 + $0xb8] sm:$0xff] (!%p4775_p13)  ;;  %v3667_v24 = vadd.f32 (!%p4775_p13), %v3666_v13, %v6644_v6  ;;  %v3731_v25 = vmul.f32 (!%p4775_p13), %v6644_v6, %v6644_v6  ;;  %v3732_v26 = vmul.f32 (!%p4775_p13), %v6646_v7, %v6646_v7 }
 0x2ce   : > { %3623 = vst [vmem:[#allocation2 + $0xe8] sm:$0xff] %v3591_v29  ;;  %v3593_v32 = vadd.f32 %v4849_v30, %v353_v27  ;;  %v6673_v27 = vld [vmem:[#allocation2 + $0xc0] sm:$0xff] (!%p4775_p13)  ;;  %v3702_v28 = vadd.f32 (!%p4775_p13), %v3701_v12, %v6649_v11  ;;  %v3680_v29 = vadd.f32 (!%p4775_p13), %v3679_v19, %v6646_v7  ;;  %v3754_v30 = vadd.f32 (!%p4775_p13), %v3753_v20, %v3727_v1  ;;  %v6685_v44 = vld [vmem:[#allocation2 + $0xd0] sm:$0xff] (!%p4775_p13) }
 0x2cf   : > { %3624 = vst [vmem:[#allocation2 + $0xf0] sm:$0xff] %v3592_v31  ;;  %v3767_v31 = vadd.f32 (!%p4775_p13), %v3766_v21, %v3728_v2  ;;  %v3690_v39 = vadd.f32 (!%p4775_p13), %v3689_v23, %v6658_v16  ;;  %v3668_v40 = vadd.f32 (!%p4775_p13), %v3667_v24, %v6660_v17  ;;  %v3733_v42 = vmul.f32 (!%p4775_p13), %v6660_v17, %v6660_v17  ;;  %v6689_v52 = vld [vmem:[#allocation2 + $0xd8] sm:$0xff] (!%p4775_p13) }
 0x2d0   : > { %3625 = vst [vmem:[#allocation2 + $0xf8] sm:$0xff] %v3593_v32  ;;  %v6677_v32 = vld [vmem:[#allocation2 + $0xc8] sm:$0xff] (!%p4775_p13)  ;;  %v3734_v43 = vmul.f32 (!%p4775_p13), %v6662_v18, %v6662_v18  ;;  %v3703_v45 = vadd.f32 (!%p4775_p13), %v3702_v28, %v6665_v22  ;;  %v3681_v47 = vadd.f32 (!%p4775_p13), %v3680_v29, %v6662_v18  ;;  %v3755_v50 = vadd.f32 (!%p4775_p13), %v3754_v30, %v3729_v14 }
 0x2d1   : > { %v3768_v51 = vadd.f32 %v3767_v31, %v3730_v15  ;;  %v3691_v54 = vadd.f32 %v3690_v39, %v6673_v27  ;;  %v3669_v55 = vrot.slane %v3668_v40, 4 }
 0x2d2   : > { %v3704_v59 = vadd.f32 %v3703_v45, %v6677_v32  ;;  %v3682_v60 = vrot.slane %v3681_v47, 4  ;;  %v3756_v61 = vadd.f32 %v3755_v50, %v3731_v25 }
 0x2d3   : > { %v3769_v0 = vadd.f32 %v3768_v51, %v3732_v26  ;;  %v3692_v2 = vadd.f32 %v3691_v54, %v6685_v44  ;;  %v3670_v5 = vadd.f32 %v3669_v55, %v3668_v40  ;;  %v3735_v40 = vmul.f32 %v6622_v56, %v6622_v56 }
 0x2d4   : > { %v6692_v58 = vld [vmem:[#allocation2 + $0xe0] sm:$0xff]  ;;  %v3705_v9 = vadd.f32 %v3704_v59, %v6689_v52  ;;  %v3683_v10 = vadd.f32 %v3682_v60, %v3681_v47  ;;  %v3757_v12 = vadd.f32 %v3756_v61, %v3733_v42  ;;  %v3737_v42 = vmul.f32 %v6631_v63, %v6631_v63 }
 0x2d5   : > { %v6695_v1 = vld [vmem:[#allocation2 + $0xe8] sm:$0xff]  ;;  %v3770_v13 = vadd.f32 %v3769_v0, %v3734_v43  ;;  %v3693_v14 = vadd.f32 %v3692_v2, %v6692_v58  ;;  %v3671_v15 = vrot.slane %v3670_v5, 2  ;;  %v3736_v54 = vmul.f32 %v6629_v62, %v6629_v62 }
 0x2d6   : > { %v6698_v8 = vld [vmem:[#allocation2 + $0xf0] sm:$0xff]  ;;  %v3706_v19 = vadd.f32 %v3705_v9, %v6695_v1  ;;  %v3684_v20 = vrot.slane %v3683_v10, 2  ;;  %v3758_v21 = vrot.slane %v3757_v12, 4  ;;  %v3738_v55 = vmul.f32 %v6638_v3, %v6638_v3 }
 0x2d7   : > { %v3771_v23 = vrot.slane %v3770_v13, 4  ;;  %v6703_v24 = vld [vmem:[#allocation2 + $0xf8] sm:$0xff]  ;;  %v3694_v25 = vadd.f32 %v3693_v14, %v6698_v8  ;;  %v3672_v26 = vadd.f32 %v3671_v15, %v3670_v5  ;;  %v3739_v59 = vmul.f32 %v6640_v4, %v6640_v4 }
 0x2d8   : > { %v3685_v28 = vadd.f32 %v3684_v20, %v3683_v10  ;;  %v3759_v29 = vadd.f32 %v3758_v21, %v3757_v12  ;;  %v3707_v39 = vadd.f32 %v3706_v19, %v6703_v24  ;;  %v3740_v2 = vmul.f32 %v6649_v11, %v6649_v11 }
 0x2d9   : > { %v3772_v30 = vadd.f32 %v3771_v23, %v3770_v13  ;;  %v3673_v31 = vrot.slane %v3672_v26, 1  ;;  %v3695_v50 = vrot.slane %v3694_v25, 4  ;;  %v3741_v10 = vmul.f32 %v6658_v16, %v6658_v16 }
 0x2da   : > { %v3686_v43 = vrot.slane %v3685_v28, 1  ;;  %v3760_v45 = vrot.slane %v3759_v29, 2  ;;  %v3708_v9 = vrot.slane %v3707_v39, 4  ;;  %v3777_v12 = vadd.f32 %v3737_v42, %v3735_v40 }
 0x2db   : > { %v3773_v47 = vrot.slane %v3772_v30, 2  ;;  %v3674_v51 = vadd.f32 %v3673_v31, %v3672_v26  ;;  %v3696_v19 = vadd.f32 %v3695_v50, %v3694_v25  ;;  %v3742_v20 = vmul.f32 %v6665_v22, %v6665_v22 }
 0x2dc   : > { %v3687_v60 = vadd.f32 %v3686_v43, %v3685_v28  ;;  %v3761_v61 = vadd.f32 %v3760_v45, %v3759_v29  ;;  %v3743_v21 = vmul.f32 %v6673_v27, %v6673_v27  ;;  %v3778_v23 = vadd.f32 %v3777_v12, %v3739_v59 }
 0x2dd   : > { %v3774_v0 = vadd.f32 %v3773_v47, %v3772_v30  ;;  %v6719_v5 = vmul.f32 0.015625, %v3674_v51  ;;  %v3790_v26 = vadd.f32 %v3738_v55, %v3736_v54  ;;  %v3744_v40 = vmul.f32 %v6677_v32, %v6677_v32 }
 0x2de   : > { %v6723_v13 = vmul.f32 0.015625, %v3687_v60  ;;  %v3762_v14 = vrot.slane %v3761_v61, 1  ;;  %v3745_v25 = vmul.f32 %v6685_v44, %v6685_v44  ;;  %v3779_v42 = vadd.f32 %v3778_v23, %v3741_v10 }
 0x2df   : > { %v3775_v15 = vrot.slane %v3774_v0, 1  ;;  %v3807_v30 = vmul.f32 %v6719_v5, %v6719_v5  ;;  %v3791_v43 = vadd.f32 %v3790_v26, %v3740_v2  ;;  %v3697_v50 = vrot.slane %v3696_v19, 2 }
 0x2e0   : > { %v3763_v28 = vadd.f32 %v3762_v14, %v3761_v61  ;;  %v3808_v31 = vmul.f32 %v6723_v13, %v6723_v13  ;;  %v3709_v51 = vadd.f32 %v3708_v9, %v3707_v39  ;;  %v3746_v54 = vmul.f32 %v6689_v52, %v6689_v52 }
 0x2e1   : > { %v3776_v29 = vadd.f32 %v3775_v15, %v3774_v0  ;;  %v3747_v55 = vmul.f32 %v6692_v58, %v6692_v58  ;;  %v3780_v59 = vadd.f32 %v3779_v42, %v3743_v21  ;;  %v3792_v60 = vadd.f32 %v3791_v43, %v3742_v20 }
 0x2e2   : > { %v3803_v45 = vmul.f32 0.015625, %v3763_v28  ;;  %v3748_v12 = vmul.f32 %v6695_v1, %v6695_v1  ;;  %v3749_v2 = vmul.f32 %v6698_v8, %v6698_v8  ;;  %v3698_v9 = vadd.f32 %v3697_v50, %v3696_v19 }
 0x2e3   : > { %v3804_v47 = vmul.f32 0.015625, %v3776_v29  ;;  %v3781_v10 = vadd.f32 %v3780_v59, %v3745_v25  ;;  %v3793_v14 = vadd.f32 %v3792_v60, %v3744_v40  ;;  %v3710_v23 = vrot.slane %v3709_v51, 2 }
 0x2e4   : > { %v3811_v61 = vsub.f32 %v3803_v45, %v3807_v30  ;;  %v3750_v26 = vmul.f32 %v6703_v24, %v6703_v24  ;;  %v3699_v42 = vrot.slane %v3698_v9, 1  ;;  %v5837_v40 = vmov 1966171168  }
 0x2e5   : > { %v3812_v0 = vsub.f32 %v3804_v47, %v3808_v31  ;;  %v3782_v28 = vadd.f32 %v3781_v10, %v3747_v55  ;;  %v3794_v21 = vadd.f32 %v3793_v14, %v3746_v54  ;;  %v3711_v43 = vadd.f32 %v3710_v23, %v3709_v51 }
 0x2e6   : > { %v3815_v15 = vmax.f32 %v3811_v61, 0.0  ;;  %v3834_v47 = vunpack.c.l.s4 %v5837_v40  ;;  %v3836_v59 = vlaneseq  ;;  %v3700_v60 = vadd.f32 %v3699_v42, %v3698_v9 }
 0x2e7   : > { %v3816_v39 = vmax.f32 %v3812_v0, 0.0  ;;  %v3783_v30 = vadd.f32 %v3782_v28, %v3749_v2  ;;  %v3795_v31 = vadd.f32 %v3794_v21, %v3748_v12  ;;  %v3712_v61 = vrot.slane %v3711_v43, 1 }
 0x2e8   : > { %v3820_v20 = vadd.f32 1e-05, %v3815_v15  ;;  %v3835_v54 = vunpack.c.0.s8 %v3834_v47  ;;  %v3837_v10 = vshrl.u32 %v3836_v59, 7  ;;  %v6747_v15 = vmul.f32 0.015625, %v3700_v60 }
 0x2e9   : > { %v3821_v29 = vadd.f32 1e-05, %v3816_v39  ;;  %v3784_v45 = vrot.slane %v3783_v30, 4  ;;  %v3796_v25 = vadd.f32 %v3795_v31, %v3750_v26  ;;  %v3713_v12 = vadd.f32 %v3712_v61, %v3711_v43 }
 0x2ea   : > { %5573 = vrsqrt.f32 %v3820_v20  ;;  %v6749_v26 = vsub.s32 %v3835_v54, %v3837_v10  ;;  %v6761_v40 = vsub.s32 1, %v3837_v10 }
 0x2eb   : > { %5575 = vrsqrt.f32 %v3821_v29  ;;  %v3785_v19 = vadd.f32 %v3784_v45, %v3783_v30  ;;  %v3797_v50 = vrot.slane %v3796_v25, 4  ;;  %v6751_v29 = vmul.f32 0.015625, %v3713_v12  ;;  %v6757_v45 = vld [vmem:[%s6184_s21] ss:$2 sm:$0x3] }
 0x2ec   : > { %v3809_v30 = vmul.f32 %v6747_v15, %v6747_v15 }
 0x2ed   : > { %v3786_v0 = vrot.slane %v3785_v19, 2  ;;  %v3798_v55 = vadd.f32 %v3797_v50, %v3796_v25  ;;  %v6759_v25 = vsub.s32 0, %v3837_v10 }
 0x2ef   : > { %v3787_v14 = vadd.f32 %v3786_v0, %v3785_v19  ;;  %v3799_v2 = vrot.slane %v3798_v55, 2  ;;  %v3810_v19 = vmul.f32 %v6751_v29, %v6751_v29 }
 0x2f1   : > { %v3788_v51 = vrot.slane %v3787_v14, 1  ;;  %v3800_v39 = vadd.f32 %v3799_v2, %v3798_v55 }
 0x2f3   : > { %v3789_v21 = vadd.f32 %v3788_v51, %v3787_v14  ;;  %v3801_v20 = vrot.slane %v3800_v39, 1 }
 0x2f4   : > { %v5574_v23 = vpop.eup %5573 }
 0x2f5   : > { %v5576_v28 = vpop.eup %5575  ;;  %v3802_v31 = vadd.f32 %v3801_v20, %v3800_v39  ;;  %v3805_v42 = vmul.f32 0.015625, %v3789_v21 }
 0x2f6   : > { %v3832_v9 = vcombine.low %v5574_v23, %v5576_v28  ;;  %v6773_v23 = vld [vmem:[%s6184_s21 + $0x1] ss:$2 sm:$0x3] }
 0x2f7   : > { %v3806_v59 = vmul.f32 0.015625, %v3802_v31  ;;  %v3813_v50 = vsub.f32 %v3805_v42, %v3809_v30 }
 0x2f8   : > { %v3839_v43 = vrot.slane %v3832_v9, %v6749_v26 }
 0x2f9   : > { %v3814_v55 = vsub.f32 %v3806_v59, %v3810_v19  ;;  %v3817_v54 = vmax.f32 %v3813_v50, 0.0 }
 0x2fa   : > { %v3846_v47 = vrot.slane %v3839_v43, %v6749_v26 }
 0x2fb   : > { %v3818_v12 = vmax.f32 %v3814_v55, 0.0  ;;  %v3822_v51 = vadd.f32 1e-05, %v3817_v54 }
 0x2fc   : > { %v3864_v60 = vmul.f32 %v3846_v47, %v6757_v45 }
 0x2fd   : > { %v3823_v21 = vadd.f32 1e-05, %v3818_v12  ;;  %5577 = vrsqrt.f32 %v3822_v51 }
 0x2fe   : > { %v3873_v61 = vrot.slane %v3864_v60, %v6759_v25  ;;  %v3877_v0 = vrot.slane %v3864_v60, %v6761_v40 }
 0x2ff   : > { %5579 = vrsqrt.f32 %v3823_v21 }
 0x300   : > { %v3890_v14 = vmul.f32 %v3873_v61, %v6719_v5  ;;  %v3891_v10 = vmul.f32 %v3877_v0, %v6723_v13  ;;  %v3932_v20 = vmul.f32 %v3873_v61, %v6579_v33  ;;  %v3933_v9 = vmul.f32 %v3877_v0, %v6581_v34 }
 0x301   : > { %v3934_v30 = vmul.f32 %v3873_v61, %v6583_v35  ;;  %v3935_v5 = vmul.f32 %v3877_v0, %v6585_v36  ;;  %v3936_v31 = vmul.f32 %v3873_v61, %v6587_v37  ;;  %v3937_v42 = vmul.f32 %v3877_v0, %v6589_v38 }
 0x302   : > { %v3898_v2 = vcombine.low %v3890_v14, %v3891_v10  ;;  %v3938_v43 = vmul.f32 %v3873_v61, %v6595_v41  ;;  %v3939_v47 = vmul.f32 %v3877_v0, %v6605_v46  ;;  %v3940_v59 = vmul.f32 %v3873_v61, %v6608_v48 }
 0x303   : > { %v3941_v33 = vmul.f32 %v3877_v0, %v6610_v49  ;;  %v3942_v34 = vmul.f32 %v3873_v61, %v6617_v53  ;;  %v3943_v37 = vmul.f32 %v3877_v0, %v6624_v57  ;;  %v3944_v38 = vmul.f32 %v3873_v61, %v6644_v6 }
 0x304   : > { %v3905_v39 = vrot.slane %v3898_v2, %v6749_v26  ;;  %v3945_v41 = vmul.f32 %v3877_v0, %v6646_v7  ;;  %v6798_v46 = vmul.f32 %v3873_v61, %v6660_v17  ;;  %v6801_v48 = vmul.f32 %v3877_v0, %v6662_v18 }
 0x306   : > { %v3912_v28 = vrot.slane %v3905_v39, %v6749_v26 }
 0x307   : > { %v6811_v55 = vpop.eup %5577 }
 0x308   : > { %v3930_v13 = vsub.f32 %v6773_v23, %v3912_v28 }
 0x30a   : > { %v6789_v35 = vrot.slane %v3930_v13, %v6759_v25  ;;  %v6792_v36 = vrot.slane %v3930_v13, %v6761_v40 }
 0x30c   : > { %v3986_v49 = vadd.f32 %v6789_v35, %v3932_v20  ;;  %v3987_v53 = vadd.f32 %v6792_v36, %v3933_v9  ;;  %v3988_v19 = vadd.f32 %v6789_v35, %v3934_v30  ;;  %v3989_v50 = vadd.f32 %v6792_v36, %v3935_v5 }
 0x30d   : > { %v3990_v57 = vadd.f32 %v6789_v35, %v3936_v31  ;;  %v3991_v6 = vadd.f32 %v6792_v36, %v3937_v42  ;;  %v3992_v7 = vadd.f32 %v6789_v35, %v3938_v43  ;;  %v3993_v17 = vadd.f32 %v6792_v36, %v3939_v47  ;;  %v5580_v43 = vpop.eup %5579 }
 0x30e   : > { %vm4018_vm0 = vcmp.ge.f32.partialorder %v3986_v49, 0.0  ;;  %vm4019_vm1 = vcmp.ge.f32.partialorder %v3987_v53, 0.0  ;;  %v4050_v18 = vmul.f32 0.2, %v3986_v49  ;;  %v4051_v60 = vmul.f32 0.2, %v3987_v53 }
 0x30f   : > { %vm4020_vm2 = vcmp.ge.f32.partialorder %v3988_v19, 0.0  ;;  %vm4021_vm3 = vcmp.ge.f32.partialorder %v3989_v50, 0.0  ;;  %v4052_v61 = vmul.f32 0.2, %v3988_v19  ;;  %v4053_v0 = vmul.f32 0.2, %v3989_v50 }
 0x310   : > { %v4082_v54 = vsel %vm4018_vm0, %v3986_v49, %v4050_v18  ;;  %v4083_v14 = vsel %vm4019_vm1, %v3987_v53, %v4051_v60  ;;  %vm4022_vm4 = vcmp.ge.f32.partialorder %v3990_v57, 0.0  ;;  %vm4023_vm5 = vcmp.ge.f32.partialorder %v3991_v6, 0.0 }
 0x311   : > { %v4801_v10 = vpack.c.bf16 %v4083_v14, %v4082_v54  ;;  %v4084_v2 = vsel %vm4020_vm2, %v3988_v19, %v4052_v61  ;;  %v4085_v12 = vsel %vm4021_vm3, %v3989_v50, %v4053_v0  ;;  %v4054_v51 = vmul.f32 0.2, %v3990_v57 }
 0x312   : > { %v4802_v39 = vpack.c.bf16 %v4085_v12, %v4084_v2  ;;  %v4055_v28 = vmul.f32 0.2, %v3991_v6  ;;  %vm4024_vm6 = vcmp.ge.f32.partialorder %v3992_v7, 0.0  ;;  %vm4025_vm7 = vcmp.ge.f32.partialorder %v3993_v17, 0.0 }
 0x313   : > { %4210 = vst [vmem:[%s6191_s8] sm:$0xff] %v4801_v10  ;;  %v4086_v21 = vsel %vm4022_vm4, %v3990_v57, %v4054_v51  ;;  %v4056_v20 = vmul.f32 0.2, %v3992_v7  ;;  %v4057_v9 = vmul.f32 0.2, %v3993_v17  ;;  %v3994_v30 = vadd.f32 %v6789_v35, %v3940_v59 }
 0x314   : > { %4211 = vst [vmem:[%s6191_s8 + $0x8] sm:$0xff] %v4802_v39  ;;  %v4087_v5 = vsel %vm4023_vm5, %v3991_v6, %v4055_v28  ;;  %v3995_v13 = vadd.f32 %v6792_v36, %v3941_v33  ;;  %v3996_v31 = vadd.f32 %v6789_v35, %v3942_v34  ;;  %v3997_v42 = vadd.f32 %v6792_v36, %v3943_v37 }
 0x315   : > { %v4803_v47 = vpack.c.bf16 %v4087_v5, %v4086_v21  ;;  %v4088_v49 = vsel %vm4024_vm6, %v3992_v7, %v4056_v20  ;;  %v4089_v53 = vsel %vm4025_vm7, %v3993_v17, %v4057_v9  ;;  %vm4026_vm8 = vcmp.ge.f32.partialorder %v3994_v30, 0.0 }
 0x316   : > { %v4804_v19 = vpack.c.bf16 %v4089_v53, %v4088_v49  ;;  %vm4027_vm9 = vcmp.ge.f32.partialorder %v3995_v13, 0.0  ;;  %v4058_v50 = vmul.f32 0.2, %v3994_v30  ;;  %v4059_v57 = vmul.f32 0.2, %v3995_v13 }
 0x317   : > { %4212 = vst [vmem:[%s6191_s8 + $0x10] sm:$0xff] %v4803_v47  ;;  %vm4028_vm10 = vcmp.ge.f32.partialorder %v3996_v31, 0.0  ;;  %vm4029_vm11 = vcmp.ge.f32.partialorder %v3997_v42, 0.0  ;;  %v4060_v59 = vmul.f32 0.2, %v3996_v31  ;;  %v3998_v37 = vadd.f32 %v6789_v35, %v3944_v38 }
 0x318   : > { %v4061_v33 = vmul.f32 0.2, %v3997_v42  ;;  %4213 = vst [vmem:[%s6191_s8 + $0x18] sm:$0xff] %v4804_v19  ;;  %v4090_v34 = vsel %vm4026_vm8, %v3994_v30, %v4058_v50  ;;  %v4091_v6 = vsel %vm4027_vm9, %v3995_v13, %v4059_v57  ;;  %v3999_v7 = vadd.f32 %v6792_v36, %v3945_v41 }
 0x319   : > { %v4805_v17 = vpack.c.bf16 %v4091_v6, %v4090_v34  ;;  %v4092_v18 = vsel %vm4028_vm10, %v3996_v31, %v4060_v59  ;;  %v4000_v61 = vadd.f32 %v6789_v35, %v6798_v46  ;;  %vm4030_vm12 = vcmp.ge.f32.partialorder %v3998_v37, 0.0 }
 0x31a   : > { %v4093_v60 = vsel %vm4029_vm11, %v3997_v42, %v4061_v33  ;;  %vm4031_vm13 = vcmp.ge.f32.partialorder %v3999_v7, 0.0  ;;  %v4062_v54 = vmul.f32 0.2, %v3998_v37  ;;  %v4063_v14 = vmul.f32 0.2, %v3999_v7 }
 0x31b   : > { %v4806_v0 = vpack.c.bf16 %v4093_v60, %v4092_v18  ;;  %4214 = vst [vmem:[%s6191_s8 + $0x20] sm:$0xff] %v4805_v17  ;;  %v4001_v10 = vadd.f32 %v6792_v36, %v6801_v48  ;;  %vm4032_vm14 = vcmp.ge.f32.partialorder %v4000_v61, 0.0  ;;  %v4064_v38 = vmul.f32 0.2, %v4000_v61 }
 0x31c   : > { %v4094_v41 = vsel %vm4030_vm12, %v3998_v37, %v4062_v54  ;;  %v3847_v2 = vcombine.low %v6811_v55, %v5580_v43  ;;  %v4095_v12 = vsel %vm4031_vm13, %v3999_v7, %v4063_v14 }
 0x31d   : > { %4215 = vst [vmem:[%s6191_s8 + $0x28] sm:$0xff] %v4806_v0  ;;  %vm4033_vm15 = vcmp.ge.f32.partialorder %v4001_v10, 0.0  ;;  %v4065_v35 = vmul.f32 0.2, %v4001_v10  ;;  %v4096_v46 = vsel %vm4032_vm14, %v4000_v61, %v4064_v38  ;;  %v4807_v51 = vpack.c.bf16 %v4095_v12, %v4094_v41 }
 0x31e   : > { %v3854_v39 = vrot.slane %v3847_v2, %v6749_v26 }
 0x31f   : > { %v4097_v28 = vsel %vm4033_vm15, %v4001_v10, %v4065_v35  ;;  %4216 = vst [vmem:[%s6191_s8 + $0x30] sm:$0xff] %v4807_v51 }
 0x320   : > { %v4808_v21 = vpack.c.bf16 %v4097_v28, %v4096_v46  ;;  %v3861_v20 = vrot.slane %v3854_v39, %v6749_v26 }
 0x322   : > { %4217 = vst [vmem:[%s6191_s8 + $0x38] sm:$0xff] %v4808_v21  ;;  %v3865_v36 = vmul.f32 %v3861_v20, %v6757_v45 }
 0x324   : > { %v3881_v48 = vrot.slane %v3865_v36, %v6759_v25  ;;  %v3885_v9 = vrot.slane %v3865_v36, %v6761_v40 }
 0x326   : > { %v3892_v55 = vmul.f32 %v3881_v48, %v6747_v15  ;;  %v3893_v30 = vmul.f32 %v3885_v9, %v6751_v29  ;;  %v3948_v42 = vmul.f32 %v3881_v48, %v6622_v56  ;;  %v3949_v43 = vmul.f32 %v3885_v9, %v6629_v62 }
 0x327   : > { %v3950_v47 = vmul.f32 %v3881_v48, %v6631_v63  ;;  %v3951_v49 = vmul.f32 %v3885_v9, %v6638_v3  ;;  %v3952_v53 = vmul.f32 %v3881_v48, %v6640_v4  ;;  %v3953_v15 = vmul.f32 %v3885_v9, %v6649_v11 }
 0x328   : > { %v3913_v5 = vcombine.low %v3892_v55, %v3893_v30  ;;  %v3954_v29 = vmul.f32 %v3881_v48, %v6658_v16  ;;  %v3955_v19 = vmul.f32 %v3885_v9, %v6665_v22  ;;  %v3957_v56 = vmul.f32 %v3885_v9, %v6677_v32 }
 0x329   : > { %v3958_v3 = vmul.f32 %v3881_v48, %v6685_v44  ;;  %v3959_v4 = vmul.f32 %v3885_v9, %v6689_v52  ;;  %v3960_v11 = vmul.f32 %v3881_v48, %v6692_v58  ;;  %v3961_v16 = vmul.f32 %v3885_v9, %v6695_v1 }
 0x32a   : > { %v3920_v13 = vrot.slane %v3913_v5, %v6749_v26  ;;  %v3962_v22 = vmul.f32 %v3881_v48, %v6698_v8 }
 0x32c   : > { %v3927_v31 = vrot.slane %v3920_v13, %v6749_v26  ;;  %v3956_v26 = vmul.f32 %v3881_v48, %v6673_v27  ;;  %v6864_v27 = vmul.f32 %v3885_v9, %v6703_v24 }
 0x32e   : > { %v3931_v45 = vsub.f32 %v6773_v23, %v3927_v31 }
 0x330   : > { %v6853_v62 = vrot.slane %v3931_v45, %v6759_v25  ;;  %v6856_v63 = vrot.slane %v3931_v45, %v6761_v40 }
 0x332   : > { %v4002_v32 = vadd.f32 %v6853_v62, %v3948_v42  ;;  %v4003_v25 = vadd.f32 %v6856_v63, %v3949_v43  ;;  %v4004_v40 = vadd.f32 %v6853_v62, %v3950_v47  ;;  %v4005_v23 = vadd.f32 %v6856_v63, %v3951_v49 }
 0x333   : > { %v4006_v44 = vadd.f32 %v6853_v62, %v3952_v53  ;;  %v4007_v52 = vadd.f32 %v6856_v63, %v3953_v15  ;;  %v4008_v58 = vadd.f32 %v6853_v62, %v3954_v29  ;;  %v4009_v1 = vadd.f32 %v6856_v63, %v3955_v19 }
 0x334   : > { %vm4034_vm0 = vcmp.ge.f32.partialorder %v4002_v32, 0.0  ;;  %vm4035_vm1 = vcmp.ge.f32.partialorder %v4003_v25, 0.0  ;;  %v4066_v8 = vmul.f32 0.2, %v4002_v32  ;;  %v4067_v24 = vmul.f32 0.2, %v4003_v25 }
 0x335   : > { %vm4036_vm2 = vcmp.ge.f32.partialorder %v4004_v40, 0.0  ;;  %vm4037_vm3 = vcmp.ge.f32.partialorder %v4005_v23, 0.0  ;;  %v4068_v50 = vmul.f32 0.2, %v4004_v40  ;;  %v4069_v57 = vmul.f32 0.2, %v4005_v23 }
 0x336   : > { %v4098_v59 = vsel %vm4034_vm0, %v4002_v32, %v4066_v8  ;;  %v4099_v33 = vsel %vm4035_vm1, %v4003_v25, %v4067_v24  ;;  %vm4038_vm4 = vcmp.ge.f32.partialorder %v4006_v44, 0.0  ;;  %vm4039_vm5 = vcmp.ge.f32.partialorder %v4007_v52, 0.0 }
 0x337   : > { %v4809_v34 = vpack.c.bf16 %v4099_v33, %v4098_v59  ;;  %v4100_v6 = vsel %vm4036_vm2, %v4004_v40, %v4068_v50  ;;  %v4101_v37 = vsel %vm4037_vm3, %v4005_v23, %v4069_v57  ;;  %v4070_v7 = vmul.f32 0.2, %v4006_v44 }
 0x338   : > { %v4810_v17 = vpack.c.bf16 %v4101_v37, %v4100_v6  ;;  %v4071_v18 = vmul.f32 0.2, %v4007_v52  ;;  %vm4040_vm6 = vcmp.ge.f32.partialorder %v4008_v58, 0.0  ;;  %vm4041_vm7 = vcmp.ge.f32.partialorder %v4009_v1, 0.0 }
 0x339   : > { %4218 = vst [vmem:[%s6191_s8 + $0x40] sm:$0xff] %v4809_v34  ;;  %v4102_v60 = vsel %vm4038_vm4, %v4006_v44, %v4070_v7  ;;  %v4072_v61 = vmul.f32 0.2, %v4008_v58  ;;  %v4073_v0 = vmul.f32 0.2, %v4009_v1  ;;  %v4010_v54 = vadd.f32 %v6853_v62, %v3956_v26 }
 0x33a   : > { %4219 = vst [vmem:[%s6191_s8 + $0x48] sm:$0xff] %v4810_v17  ;;  %v4103_v14 = vsel %vm4039_vm5, %v4007_v52, %v4071_v18  ;;  %v4011_v10 = vadd.f32 %v6856_v63, %v3957_v56  ;;  %v4012_v38 = vadd.f32 %v6853_v62, %v3958_v3  ;;  %v4013_v41 = vadd.f32 %v6856_v63, %v3959_v4 }
 0x33b   : > { %v4811_v2 = vpack.c.bf16 %v4103_v14, %v4102_v60  ;;  %v4104_v12 = vsel %vm4040_vm6, %v4008_v58, %v4072_v61  ;;  %v4105_v35 = vsel %vm4041_vm7, %v4009_v1, %v4073_v0  ;;  %vm4042_vm8 = vcmp.ge.f32.partialorder %v4010_v54, 0.0 }
 0x33c   : > { %v4812_v46 = vpack.c.bf16 %v4105_v35, %v4104_v12  ;;  %vm4043_vm9 = vcmp.ge.f32.partialorder %v4011_v10, 0.0  ;;  %v4074_v51 = vmul.f32 0.2, %v4010_v54  ;;  %v4075_v39 = vmul.f32 0.2, %v4011_v10 }
 0x33d   : > { %4220 = vst [vmem:[%s6191_s8 + $0x50] sm:$0xff] %v4811_v2  ;;  %vm4044_vm10 = vcmp.ge.f32.partialorder %v4012_v38, 0.0  ;;  %vm4045_vm11 = vcmp.ge.f32.partialorder %v4013_v41, 0.0  ;;  %v4076_v28 = vmul.f32 0.2, %v4012_v38  ;;  %v4014_v48 = vadd.f32 %v6853_v62, %v3960_v11 }
 0x33e   : > { %v4077_v21 = vmul.f32 0.2, %v4013_v41  ;;  %4221 = vst [vmem:[%s6191_s8 + $0x58] sm:$0xff] %v4812_v46  ;;  %v4106_v20 = vsel %vm4042_vm8, %v4010_v54, %v4074_v51  ;;  %v4107_v36 = vsel %vm4043_vm9, %v4011_v10, %v4075_v39  ;;  %v4015_v9 = vadd.f32 %v6856_v63, %v3961_v16 }
 0x33f   : > { %v4813_v55 = vpack.c.bf16 %v4107_v36, %v4106_v20  ;;  %v4108_v30 = vsel %vm4044_vm10, %v4012_v38, %v4076_v28  ;;  %v4016_v13 = vadd.f32 %v6853_v62, %v3962_v22  ;;  %vm4046_vm12 = vcmp.ge.f32.partialorder %v4014_v48, 0.0 }
 0x340   : > { %v4109_v5 = vsel %vm4045_vm11, %v4013_v41, %v4077_v21  ;;  %vm4047_vm13 = vcmp.ge.f32.partialorder %v4015_v9, 0.0  ;;  %v4078_v42 = vmul.f32 0.2, %v4014_v48  ;;  %v4079_v43 = vmul.f32 0.2, %v4015_v9 }
 0x341   : > { %v4814_v31 = vpack.c.bf16 %v4109_v5, %v4108_v30  ;;  %4222 = vst [vmem:[%s6191_s8 + $0x60] sm:$0xff] %v4813_v55  ;;  %v4017_v47 = vadd.f32 %v6856_v63, %v6864_v27  ;;  %vm4048_vm14 = vcmp.ge.f32.partialorder %v4016_v13, 0.0  ;;  %v4080_v45 = vmul.f32 0.2, %v4016_v13 }
 0x342   : > { %v4110_v49 = vsel %vm4046_vm12, %v4014_v48, %v4078_v42  ;;  %v4111_v53 = vsel %vm4047_vm13, %v4015_v9, %v4079_v43 }
 0x343   : > { %4223 = vst [vmem:[%s6191_s8 + $0x68] sm:$0xff] %v4814_v31  ;;  %vm4049_vm15 = vcmp.ge.f32.partialorder %v4017_v47, 0.0  ;;  %v4081_v15 = vmul.f32 0.2, %v4017_v47  ;;  %v4112_v29 = vsel %vm4048_vm14, %v4016_v13, %v4080_v45  ;;  %v4815_v19 = vpack.c.bf16 %v4111_v53, %v4110_v49 }
 0x345   : > { %v4113_v26 = vsel %vm4049_vm15, %v4017_v47, %v4081_v15  ;;  %4224 = vst [vmem:[%s6191_s8 + $0x70] sm:$0xff] %v4815_v19 }
 0x346   : > { %v4816_v56 = vpack.c.bf16 %v4113_v26, %v4112_v29 }
 0x348   : > { %4225 = vst [vmem:[%s6191_s8 + $0x78] sm:$0xff] %v4816_v56 }
 0x349 PF: > { %s7032_s18 = sld [smem:[#allocation17_spill]]  ;;  %s7033_s9 = sld [smem:[#allocation24_spill]] }
 0x34a   : > { %s4240_s0 = sshll.u32 %s6191_s8, 4  ;;  %s4227_s1 = scalar_lea.sflag [#allocation5], %s6181_s28  ;;  %s6898_s0 = int_to_ptr.vmem [resolvable:$true] %s4240_s0 }
 0x34b   : > { %s5671_s22 = scalar_lea.vmem %s6898_s0, 2048  ;;  %p7034_p10 = scmp.ne.s32.totalorder %s7021_s2, 0 }
 0x34c   : > { %p5672_p3 = scmp.ne.s32.totalorder %s6898_s0, %s5671_s22  ;;  %s5838_s26 = smov [#allocation9]  }
 0x34d   : > { %s5675_s3 = sshll.u32 %s5838_s26, 4  ;;  %s5676_s3 = int_to_ptr.vmem [resolvable:$false] %s5675_s3 }
 0x34e   : > { %p5673_p4 = pnand %p5672_p3, %p7034_p10  ;;  %s5677_s21 = scalar_lea.vmem %s5676_s3, 4096 }
 0x34f   : > { %s4817_s5 = sshll.u32 %s7032_s18, 7  ;;  %p5678_p0 = scmp.lt.s32.totalorder %s6898_s0, %s5676_s3 }
 0x350   : > { %s6895_s27 = scalar_lea.hbm %s7033_s9, %s4817_s5  ;;  %p5674_p8 = pneg %p5673_p4 }
 0x351   : > { %p5679_p2 = scmp.lt.s32.totalorder %s5677_s21, %s5671_s22 }
 0x353   : > { %p5680_p1 = por %p5679_p2, %p5678_p0 }
 0x355   : > { %p5681_p11 = pnand %p5680_p1, %p5674_p8 }
 0x357   : > { %5684 = shalt.err (!%p5681_p11)
}
 0x358   : > { %s5685_s6 = scalar_lea.hbm %s6895_s27, 2048  ;;  %s5689_s29 = scalar_lea.hbm %s7033_s9, 4096 }
 0x359   : > { %p5686_p6 = scmp.ne.s32.totalorder %s6895_s27, %s5685_s6  ;;  %p5690_p12 = scmp.lt.u32.totalorder %s6895_s27, %s7033_s9 }
 0x35a   : > { %p5691_p7 = scmp.lt.u32.totalorder %s5689_s29, %s5685_s6  ;;  %p5693_p3 = scmp.lt.u32.totalorder %s5685_s6, %s6895_s27 }
 0x35b   : > { %p5687_p9 = pnand %p5686_p6, %p7034_p10 }
 0x35c   : > { %p5692_p13 = por %p5691_p7, %p5690_p12 }
 0x35d   : > { %p5688_p5 = pneg %p5687_p9 }
 0x35e   : > { %p5694_p4 = por %p5693_p3, %p5692_p13 }
 0x360   : > { %p5695_p8 = pnand %p5694_p4, %p5688_p5 }
 0x362   : > { %5698 = shalt.err (!%p5695_p8)
}
 0x363   : > { %s5839_s10 = smov 128   ;;  %s5840_s24 = smov 256  }
 0x364   : > { %s5841_s22 = smov 8  }
 0x365   : > { %5048 = dma.vmem_to_hbm [thread:$0]  (%p7034_p10), %s6898_s0, 2048, %s6895_s27, %s4227_s1, %s5839_s10, %s5840_s24, %s5841_s22  }
 0x366 PF: > { %s7035_s26 = sld [smem:[#allocation14_spill]]  ;;  %p5065_p0 = scmp.ge.s32.totalorder %s5825_s25, 2 }
 0x367   : > { %p7036_p2 = scmp.ne.s32.totalorder %s7022_s4, 0 }
 0x369   : > { %p5061_p1 = pnand %p5065_p0, %p7036_p2 }
 0x36c   : > { %s4255_s3 = sand.u32 1, %s7035_s26  }
 0x36d   : > { %s4256_s21 = scalar_lea.sflag [#allocation5], %s4255_s3 }
 0x36e   : > { %5768 = dma.done.wait (!%p5061_p1), %s4256_s21, 2048  }
 0x36f   : > { %5770 = vsyncadd (!%p5061_p1), %s4256_s21, 4294965248  ;;  %s22_s25 = sadd.s32 1, %s5825_s25   ;;  %s7038_s22 = sld [smem:[#allocation18_spill]] }
 0x370   : > { %p6929_p11 = scmp.ge.s32.totalorder %s22_s25, 6   ;;  %s7039_s2 = sld [smem:[#allocation19_spill]] }
 0x371   : > { %s7040_s24 = sld [smem:[#allocation20_spill]]  ;;  %s7041_s12 = smov %s5777_s13 }
 0x372   : > { %s7042_s13 = smov %s5781_s14  ;;  %s7043_s14 = smov %s6103_s15 }
 0x373   : > { %s7044_s15 = smov %s5789_s16  ;;  %s7045_s16 = smov %s5793_s17 }
 0x374   : > { %s7046_s17 = smov %s5968_s11  ;;  %s7047_s18 = smov %s5801_s19 }
 0x375   : > { %s7048_s19 = smov %s5805_s20  ;;  %s7049_s20 = smov %s6029_s7 }
 0x376   : > { %s7050_s21 = smov %s5817_s23  ;;  %s7051_s23 = smov %s7039_s2 }
 0x377   :  { %21 = sbr.rel (!%p6929_p11) target bundleno = 17 (0x11), region = 110 }
 0x37e   :  { %4261 = vsyncpa [#allocation4], 1 }
 0x37f   :  { %4263 = vsyncpa [#allocation4 + $0x1], 1 }
 0x380   :  { %4264 = vsyncpa [#allocation7], 1 }
 0x381   :  { %4266 = vsyncpa [#allocation7 + $0x1], 1 }
 0x382   :  { %4267 = vsyncpa [#allocation5], 1 }
 0x383   :  { %4269 = vsyncpa [#allocation5 + $0x1], 1 }

// kernel: wgan_discriminator_forward.5
= control target key start
LH: loop header
LB: loop body
LE: loop exit
PB: predicated region body
PF: predicated region fallthrough
CT: control target
= control target key end

     0   :  { %s10452_s0 = inlined_call_operand.hbm [shape: bf16[32,8192], index: 0, kind: input, shape index: {}]   ;;  %s10453_s1 = inlined_call_operand.vmem [shape: bf16[8192,1024], index: 1, kind: input, shape index: {}]   ;;  %s10454_s2 = inlined_call_operand.hbm [shape: f32[2,1024], index: 2, kind: input, shape index: {}]   ;;  %s10455_s3 = inlined_call_operand.hbm [shape: f32[16,1024], index: 3, kind: input, shape index: {}]   ;;  %s10456_s4 = inlined_call_operand.hbm [shape: f32[2,1024], index: 4, kind: output, shape index: {}]  }
   0x1   :  { %10471 = sst [smem:[#allocation26_spill]] %s10452_s0 }
   0x2   :  { %10472 = sst [smem:[#allocation27_spill]] %s10456_s4 }
   0x3   :  { %9 = vsyncpa [#allocation4], 0 }
   0x4   :  { %11 = vsyncpa [#allocation4 + $0x1], 0 }
   0x5   :  { %12 = vsyncpa [#allocation8], 0 }
   0x6   :  { %14 = vsyncpa [#allocation8 + $0x1], 0 }
   0x7   :  { %15 = vsyncpa [#allocation5], 0 }
   0x8   :  { %17 = vsyncpa [#allocation5 + $0x1], 0  ;;  %s8220_s15 = smov 0   ;;  %s8222_s16 = smov 0  }
   0x9   :  { %s8224_s17 = smov 0   ;;  %s8226_s18 = smov 0  }
   0xa   :  { %s8228_s19 = smov 0   ;;  %s8230_s20 = smov 0  }
   0xb   :  { %s8232_s21 = smov 0   ;;  %s8234_s22 = smov 0  }
   0xc   :  { %s8236_s23 = smov 0   ;;  %s8238_s24 = smov 0  }
   0xd   :  { %s8240_s25 = smov 0   ;;  %s8242_s26 = smov 0  }
   0xe   :  { %s8244_s27 = smov 0  }
   0xf LB: > { %10473 = sst [smem:[#allocation14_spill]] %s8133_s15  ;;  %s8284_s28 = sadd.s32 4294967295, %s8181_s27   ;;  %s8181_s27 = sphi %s8244_s27, %s23_s27   ;;  %s8177_s26 = sphi %s8242_s26, %s10525_s26   ;;  %s8173_s25 = sphi %s8240_s25, %s10524_s25   ;;  %s8169_s24 = sphi %s8238_s24, %s10523_s24   ;;  %s8165_s23 = sphi %s8236_s23, %s10522_s23   ;;  %s8161_s22 = sphi %s8234_s22, %s10511_s22   ;;  %s8157_s21 = sphi %s8232_s21, %s10521_s21   ;;  %s8153_s20 = sphi %s8230_s20, %s10520_s20   ;;  %s8149_s19 = sphi %s8228_s19, %s10519_s19   ;;  %s8145_s18 = sphi %s8226_s18, %s10518_s18   ;;  %s8141_s17 = sphi %s8224_s17, %s10517_s17   ;;  %s8137_s16 = sphi %s8222_s16, %s10516_s16   ;;  %s8133_s15 = sphi %s8220_s15, %s10515_s15  }
  0x10   : > { %10474 = sst [smem:[#allocation15_spill]] %s8161_s22  ;;  %s32_s30 = sadd.s32 1, %s8173_s25 }
  0x11   : > { %10475 = sst [smem:[#allocation16_spill]] %s8165_s23  ;;  %s35_s5 = sadd.s32 1, %s8177_s26 }
  0x12   : > { %10476 = sst [smem:[#allocation17_spill]] %s8169_s24  ;;  %p33_p0 = scmp.ge.s32.totalorder %s32_s30, 4 }
  0x13   : > { %s42_s6 = sadd.s32 1, %s8161_s22  ;;  %p49_p1 = scmp.ne.s32.totalorder %s8161_s22, %s8157_s21 }
  0x14   : > { %p50_p2 = scmp.eq.s32.totalorder %s8181_s27, 0  ;;  %s10527_s30 = smov (%p33_p0, %s32_s30), 0 }
  0x15   : > { %10477 = sst [smem:[#allocation18_spill]] %s10527_s30  ;;  %s10529_s5 = smov (!%p33_p0, %s35_s5), %s8177_s26 }
  0x16   : > { %s39_s7 = ssub.s32 %s8173_s25, %s10527_s30  ;;  %p8300_p3 = por %p50_p2, %p49_p1 }
  0x17   : > { %p37_p4 = scmp.ge.s32.totalorder %s10529_s5, 2  ;;  %p40_p5 = scmp.eq.s32.totalorder %s39_s7, 0 }
  0x18   : > { %p55_p6 = scmp.ne.s32.totalorder %s8157_s21, %s8153_s20  ;;  %p56_p7 = scmp.eq.s32.totalorder %s8284_s28, 0 }
  0x19   : > { %s10531_s5 = smov (%p37_p4, %s10529_s5), 0  ;;  %s70_s13 = sadd.s32 1, %s8149_s19 }
  0x1a   : > { %10479 = sst [smem:[#allocation19_spill]] %s10531_s5  ;;  %p8313_p8 = por %p56_p7, %p55_p6 }
  0x1b   : > { %s8309_s9 = scalar_select %p40_p5, %s8161_s22, %s42_s6  }
  0x1c   : > { %s10481_s10 = scalar_select %p8313_p8, 1, 0 }
  0x1d   : > { %10480 = sst [smem:[#allocation20_spill]] %s8309_s9  ;;  %s66_s11 = ssub.s32 %s8177_s26, %s10531_s5 }
  0x1e   : > { %s67_s12 = sor.u32 %s66_s11, %s39_s7  ;;  %p77_p10 = scmp.ne.s32.totalorder %s8149_s19, %s8145_s18 }
  0x1f   : > { %p68_p9 = scmp.eq.s32.totalorder %s67_s12, 0  ;;  %p94_p11 = scmp.eq.s32.totalorder %s66_s11, 0 }
  0x20   : > { %s96_s14 = sadd.s32 1, %s8141_s17  ;;  %p8328_p12 = por %p77_p10, %p50_p2 }
  0x21   : > { %s8324_s20 = scalar_select %p68_p9, %s8149_s19, %s70_s13  }
  0x22   : > { %p103_p13 = scmp.ne.s32.totalorder %s8141_s17, %s8137_s16  ;;  %p109_p1 = scmp.ne.s32.totalorder %s8137_s16, %s8133_s15 }
  0x23   : > { %10482 = sst [smem:[#allocation21_spill]] %s8324_s20  ;;  %p159_p4 = scmp.eq.s32.totalorder %s8284_s28, 7 }
  0x24   : > { %s8335_s29 = scalar_select %p94_p11, %s8141_s17, %s96_s14  }
  0x25   : > { %p8339_p0 = por %p103_p13, %p50_p2  ;;  %s10486_s7 = sadd.s32 4294967294, %s8181_s27  }
  0x26   : > { %10484 = sst [smem:[#allocation22_spill]] %s8335_s29  ;;  %p165_p5 = scmp.eq.s32.totalorder %s10486_s7, 7 }
  0x27   : > { %s10485_s30 = scalar_select %p8339_p0, 1, 0 }
  0x28   : > { %p8350_p6 = por %p109_p1, %p56_p7  ;;  %p8354_p9 = por %p159_p4, %p103_p13 }
  0x29   : > { %p8358_p10 = por %p165_p5, %p109_p1  ;;  %p6356_p2 = scmp.ge.s32.totalorder %s8181_s27, 8 }
  0x2a   : > { %s10487_s11 = scalar_select %p8350_p6, 1, 0 }
  0x2b   : > { %s10489_s12 = scalar_select %p8354_p9, 1, 0 }
  0x2c   : > { %10488 = sst [smem:[#allocation23_spill]] %s10487_s11  ;;  %181 = sbr.rel (%p6356_p2) target bundleno = 392 (0x188), region = 16 }
  0x2d   : > { %10490 = sst [smem:[#allocation24_spill]] %s10489_s12  ;;  %s185_s14 = sand.u32 (!%p6356_p2), 1, %s8161_s22  }
  0x2e   : > { %s10491_s13 = scalar_select %p8358_p10, 1, 0 }
  0x2f   : > { %s6929_s7 = sshll.u32 (!%p6356_p2), %s8173_s25, 10  ;;  %s6357_s5 = sshll.u32 (!%p6356_p2), %s185_s14, 8 }
  0x30   : > { %10492 = sst [smem:[#allocation25_spill]] %s10491_s13  ;;  %s10493_s0 = sld [smem:[#allocation26_spill]] (!%p6356_p2) }
  0x31   : > { %s189_s15 = scalar_lea.vmem (!%p6356_p2), [#allocation3], %s6357_s5  ;;  %s8372_s4 = scalar_lea.sflag (!%p6356_p2), [#allocation4], %s185_s14 }
  0x32   : > { %s196_s13 = sshll.u32 (!%p6356_p2), %s189_s15, 4  ;;  %s8370_s13 = int_to_ptr.vmem [resolvable:$true] %s196_s13 }
  0x36   : > { %s8368_s29 = scalar_lea.hbm %s10493_s0, %s6929_s7  ;;  %s7959_s9 = scalar_lea.hbm %s10493_s0, 16384 }
  0x37   : > { %s7955_s12 = scalar_lea.hbm %s8368_s29, 4096  ;;  %p7960_p1 = scmp.lt.u32.totalorder %s8368_s29, %s10493_s0 }
  0x38   : > { %p7956_p7 = scmp.ne.s32.totalorder %s8368_s29, %s7955_s12  ;;  %p7961_p4 = scmp.lt.u32.totalorder %s7959_s9, %s7955_s12 }
  0x39   : > { %p7963_p2 = scmp.lt.u32.totalorder %s7955_s12, %s8368_s29 }
  0x3a   : > { %p7957_p11 = pnand %p7956_p7, %p8300_p3  ;;  %p7962_p5 = por %p7961_p4, %p7960_p1 }
  0x3c   : > { %p7958_p13 = pneg %p7957_p11  ;;  %p7964_p10 = por %p7963_p2, %p7962_p5 }
  0x3e   : > { %p7965_p9 = pnand %p7964_p10, %p7958_p13 }
  0x40   : > { %7968 = shalt.err (!%p7965_p9)
}
  0x41   : > { %s7969_s15 = scalar_lea.vmem %s8370_s13, 4096  ;;  %s8183_s22 = smov [#allocation3]  }
  0x42   : > { %p7970_p7 = scmp.ne.s32.totalorder %s8370_s13, %s7969_s15  ;;  %s7973_s24 = sshll.u32 %s8183_s22, 4  ;;  %s7974_s24 = int_to_ptr.vmem [resolvable:$false] %s7973_s24 }
  0x43   : > { %s7975_s5 = scalar_lea.vmem %s7974_s24, 8192  ;;  %p7976_p8 = scmp.lt.s32.totalorder %s8370_s13, %s7974_s24 }
  0x44   : > { %p7971_p11 = pnand %p7970_p7, %p8300_p3  ;;  %p7977_p0 = scmp.lt.s32.totalorder %s7975_s5, %s7969_s15 }
  0x46   : > { %p7972_p6 = pneg %p7971_p11  ;;  %p7978_p1 = por %p7977_p0, %p7976_p8 }
  0x48   : > { %p7979_p4 = pnand %p7978_p1, %p7972_p6 }
  0x4a   : > { %7982 = shalt.err (!%p7979_p4)
}
  0x4b   : > { %s8184_s12 = smov 4096   ;;  %s8185_s14 = smov 1024  }
  0x4c   : > { %s8186_s9 = smov 64   ;;  %205 = sbr.rel (!%p8328_p12) target bundleno = 340 (0x154), region = 24 }
  0x4d   : > { %7046 = dma.hbm_to_vmem [thread:$0]  (%p8300_p3), %s8368_s29, 4096, %s8370_s13, %s8372_s4, %s8184_s12, %s8185_s14, %s8186_s9  }
  0x4e   : > { %s207_s20 = sand.u32 (%p8328_p12), 1, %s8149_s19   ;;  %s6362_s7 = sshll.u32 (%p8328_p12), %s8177_s26, 2 }
  0x4f   : > { %s6360_s15 = sshll.u32 (%p8328_p12), %s207_s20, 12  ;;  %s6930_s22 = sshll.u32 (%p8328_p12), %s8173_s25, 11 }
  0x50   : > { %s213_s24 = sadd.s32 (%p8328_p12), %s6930_s22, %s6362_s7  ;;  %s8410_s4 = scalar_lea.vmem (%p8328_p12), [#allocation6], %s6360_s15 }
  0x51   : > { %s6364_s5 = sshll.u32 (%p8328_p12), %s213_s24, 2 }
  0x52   : > { %s8405_s11 = scalar_lea.vmem (%p8328_p12), %s10453_s1, %s6364_s5 }
  0x53   : > { %v228_v0 = vld [vmem:[%s8405_s11] sm:$0xff]  ;;  %v230_v1 = vld [vmem:[%s8405_s11 + $0x8] sm:$0xff] }
  0x54   : > { %v232_v2 = vld [vmem:[%s8405_s11 + $0x20] sm:$0xff]  ;;  %229 = vst [vmem:[%s8410_s4] sm:$0xff] %v228_v0  ;;  %231 = vst [vmem:[%s8410_s4 + $0x8] sm:$0xff] %v230_v1  ;;  %v234_v3 = vld [vmem:[%s8405_s11 + $0x28] sm:$0xff] }
  0x55   : > { %233 = vst [vmem:[%s8410_s4 + $0x10] sm:$0xff] %v232_v2  ;;  %v236_v4 = vld [vmem:[%s8405_s11 + $0x40] sm:$0xff]  ;;  %v238_v5 = vld [vmem:[%s8405_s11 + $0x48] sm:$0xff]  ;;  %235 = vst [vmem:[%s8410_s4 + $0x18] sm:$0xff] %v234_v3 }
  0x56   : > { %237 = vst [vmem:[%s8410_s4 + $0x20] sm:$0xff] %v236_v4  ;;  %239 = vst [vmem:[%s8410_s4 + $0x28] sm:$0xff] %v238_v5  ;;  %v240_v6 = vld [vmem:[%s8405_s11 + $0x60] sm:$0xff]  ;;  %v242_v7 = vld [vmem:[%s8405_s11 + $0x68] sm:$0xff] }
  0x57   : > { %v244_v8 = vld [vmem:[%s8405_s11 + $0x80] sm:$0xff]  ;;  %241 = vst [vmem:[%s8410_s4 + $0x30] sm:$0xff] %v240_v6  ;;  %243 = vst [vmem:[%s8410_s4 + $0x38] sm:$0xff] %v242_v7  ;;  %v246_v9 = vld [vmem:[%s8405_s11 + $0x88] sm:$0xff] }
  0x58   : > { %245 = vst [vmem:[%s8410_s4 + $0x40] sm:$0xff] %v244_v8  ;;  %v248_v10 = vld [vmem:[%s8405_s11 + $0xa0] sm:$0xff]  ;;  %v250_v11 = vld [vmem:[%s8405_s11 + $0xa8] sm:$0xff]  ;;  %247 = vst [vmem:[%s8410_s4 + $0x48] sm:$0xff] %v246_v9 }
  0x59   : > { %249 = vst [vmem:[%s8410_s4 + $0x50] sm:$0xff] %v248_v10  ;;  %251 = vst [vmem:[%s8410_s4 + $0x58] sm:$0xff] %v250_v11  ;;  %v252_v12 = vld [vmem:[%s8405_s11 + $0xc0] sm:$0xff]  ;;  %v254_v13 = vld [vmem:[%s8405_s11 + $0xc8] sm:$0xff] }
  0x5a   : > { %v256_v14 = vld [vmem:[%s8405_s11 + $0xe0] sm:$0xff]  ;;  %253 = vst [vmem:[%s8410_s4 + $0x60] sm:$0xff] %v252_v12  ;;  %255 = vst [vmem:[%s8410_s4 + $0x68] sm:$0xff] %v254_v13  ;;  %v258_v15 = vld [vmem:[%s8405_s11 + $0xe8] sm:$0xff] }
  0x5b   : > { %257 = vst [vmem:[%s8410_s4 + $0x70] sm:$0xff] %v256_v14  ;;  %v260_v16 = vld [vmem:[%s8405_s11 + $0x100] sm:$0xff]  ;;  %v262_v17 = vld [vmem:[%s8405_s11 + $0x108] sm:$0xff]  ;;  %259 = vst [vmem:[%s8410_s4 + $0x78] sm:$0xff] %v258_v15 }
  0x5c   : > { %261 = vst [vmem:[%s8410_s4 + $0x80] sm:$0xff] %v260_v16  ;;  %263 = vst [vmem:[%s8410_s4 + $0x88] sm:$0xff] %v262_v17  ;;  %v264_v18 = vld [vmem:[%s8405_s11 + $0x120] sm:$0xff]  ;;  %v266_v19 = vld [vmem:[%s8405_s11 + $0x128] sm:$0xff] }
  0x5d   : > { %v268_v20 = vld [vmem:[%s8405_s11 + $0x140] sm:$0xff]  ;;  %265 = vst [vmem:[%s8410_s4 + $0x90] sm:$0xff] %v264_v18  ;;  %267 = vst [vmem:[%s8410_s4 + $0x98] sm:$0xff] %v266_v19  ;;  %v270_v21 = vld [vmem:[%s8405_s11 + $0x148] sm:$0xff] }
  0x5e   : > { %269 = vst [vmem:[%s8410_s4 + $0xa0] sm:$0xff] %v268_v20  ;;  %v272_v22 = vld [vmem:[%s8405_s11 + $0x160] sm:$0xff]  ;;  %v274_v23 = vld [vmem:[%s8405_s11 + $0x168] sm:$0xff]  ;;  %271 = vst [vmem:[%s8410_s4 + $0xa8] sm:$0xff] %v270_v21 }
  0x5f   : > { %273 = vst [vmem:[%s8410_s4 + $0xb0] sm:$0xff] %v272_v22  ;;  %275 = vst [vmem:[%s8410_s4 + $0xb8] sm:$0xff] %v274_v23  ;;  %v276_v24 = vld [vmem:[%s8405_s11 + $0x180] sm:$0xff]  ;;  %v278_v25 = vld [vmem:[%s8405_s11 + $0x188] sm:$0xff] }
  0x60   : > { %v280_v26 = vld [vmem:[%s8405_s11 + $0x1a0] sm:$0xff]  ;;  %277 = vst [vmem:[%s8410_s4 + $0xc0] sm:$0xff] %v276_v24  ;;  %279 = vst [vmem:[%s8410_s4 + $0xc8] sm:$0xff] %v278_v25  ;;  %v282_v27 = vld [vmem:[%s8405_s11 + $0x1a8] sm:$0xff] }
  0x61   : > { %281 = vst [vmem:[%s8410_s4 + $0xd0] sm:$0xff] %v280_v26  ;;  %v284_v28 = vld [vmem:[%s8405_s11 + $0x1c0] sm:$0xff]  ;;  %v286_v29 = vld [vmem:[%s8405_s11 + $0x1c8] sm:$0xff]  ;;  %283 = vst [vmem:[%s8410_s4 + $0xd8] sm:$0xff] %v282_v27 }
  0x62   : > { %285 = vst [vmem:[%s8410_s4 + $0xe0] sm:$0xff] %v284_v28  ;;  %287 = vst [vmem:[%s8410_s4 + $0xe8] sm:$0xff] %v286_v29  ;;  %v288_v30 = vld [vmem:[%s8405_s11 + $0x1e0] sm:$0xff]  ;;  %v290_v31 = vld [vmem:[%s8405_s11 + $0x1e8] sm:$0xff] }
  0x63   : > { %v292_v32 = vld [vmem:[%s8405_s11 + $0x200] sm:$0xff]  ;;  %289 = vst [vmem:[%s8410_s4 + $0xf0] sm:$0xff] %v288_v30  ;;  %291 = vst [vmem:[%s8410_s4 + $0xf8] sm:$0xff] %v290_v31  ;;  %v294_v33 = vld [vmem:[%s8405_s11 + $0x208] sm:$0xff] }
  0x64   : > { %293 = vst [vmem:[%s8410_s4 + $0x100] sm:$0xff] %v292_v32  ;;  %v296_v34 = vld [vmem:[%s8405_s11 + $0x220] sm:$0xff]  ;;  %v298_v35 = vld [vmem:[%s8405_s11 + $0x228] sm:$0xff]  ;;  %295 = vst [vmem:[%s8410_s4 + $0x108] sm:$0xff] %v294_v33 }
  0x65   : > { %297 = vst [vmem:[%s8410_s4 + $0x110] sm:$0xff] %v296_v34  ;;  %299 = vst [vmem:[%s8410_s4 + $0x118] sm:$0xff] %v298_v35  ;;  %v300_v36 = vld [vmem:[%s8405_s11 + $0x240] sm:$0xff]  ;;  %v302_v37 = vld [vmem:[%s8405_s11 + $0x248] sm:$0xff] }
  0x66   : > { %v304_v38 = vld [vmem:[%s8405_s11 + $0x260] sm:$0xff]  ;;  %301 = vst [vmem:[%s8410_s4 + $0x120] sm:$0xff] %v300_v36  ;;  %303 = vst [vmem:[%s8410_s4 + $0x128] sm:$0xff] %v302_v37  ;;  %v306_v39 = vld [vmem:[%s8405_s11 + $0x268] sm:$0xff] }
  0x67   : > { %305 = vst [vmem:[%s8410_s4 + $0x130] sm:$0xff] %v304_v38  ;;  %v308_v40 = vld [vmem:[%s8405_s11 + $0x280] sm:$0xff]  ;;  %v310_v41 = vld [vmem:[%s8405_s11 + $0x288] sm:$0xff]  ;;  %307 = vst [vmem:[%s8410_s4 + $0x138] sm:$0xff] %v306_v39 }
  0x68   : > { %309 = vst [vmem:[%s8410_s4 + $0x140] sm:$0xff] %v308_v40  ;;  %311 = vst [vmem:[%s8410_s4 + $0x148] sm:$0xff] %v310_v41  ;;  %v312_v42 = vld [vmem:[%s8405_s11 + $0x2a0] sm:$0xff]  ;;  %v314_v43 = vld [vmem:[%s8405_s11 + $0x2a8] sm:$0xff] }
  0x69   : > { %v316_v44 = vld [vmem:[%s8405_s11 + $0x2c0] sm:$0xff]  ;;  %313 = vst [vmem:[%s8410_s4 + $0x150] sm:$0xff] %v312_v42  ;;  %315 = vst [vmem:[%s8410_s4 + $0x158] sm:$0xff] %v314_v43  ;;  %v318_v45 = vld [vmem:[%s8405_s11 + $0x2c8] sm:$0xff] }
  0x6a   : > { %317 = vst [vmem:[%s8410_s4 + $0x160] sm:$0xff] %v316_v44  ;;  %v320_v46 = vld [vmem:[%s8405_s11 + $0x2e0] sm:$0xff]  ;;  %v322_v47 = vld [vmem:[%s8405_s11 + $0x2e8] sm:$0xff]  ;;  %319 = vst [vmem:[%s8410_s4 + $0x168] sm:$0xff] %v318_v45 }
  0x6b   : > { %321 = vst [vmem:[%s8410_s4 + $0x170] sm:$0xff] %v320_v46  ;;  %323 = vst [vmem:[%s8410_s4 + $0x178] sm:$0xff] %v322_v47  ;;  %v324_v48 = vld [vmem:[%s8405_s11 + $0x300] sm:$0xff]  ;;  %v326_v49 = vld [vmem:[%s8405_s11 + $0x308] sm:$0xff] }
  0x6c   : > { %v328_v50 = vld [vmem:[%s8405_s11 + $0x320] sm:$0xff]  ;;  %325 = vst [vmem:[%s8410_s4 + $0x180] sm:$0xff] %v324_v48  ;;  %327 = vst [vmem:[%s8410_s4 + $0x188] sm:$0xff] %v326_v49  ;;  %v330_v51 = vld [vmem:[%s8405_s11 + $0x328] sm:$0xff] }
  0x6d   : > { %329 = vst [vmem:[%s8410_s4 + $0x190] sm:$0xff] %v328_v50  ;;  %v332_v52 = vld [vmem:[%s8405_s11 + $0x340] sm:$0xff]  ;;  %v334_v53 = vld [vmem:[%s8405_s11 + $0x348] sm:$0xff]  ;;  %331 = vst [vmem:[%s8410_s4 + $0x198] sm:$0xff] %v330_v51 }
  0x6e   : > { %333 = vst [vmem:[%s8410_s4 + $0x1a0] sm:$0xff] %v332_v52  ;;  %335 = vst [vmem:[%s8410_s4 + $0x1a8] sm:$0xff] %v334_v53  ;;  %v336_v54 = vld [vmem:[%s8405_s11 + $0x360] sm:$0xff]  ;;  %v338_v55 = vld [vmem:[%s8405_s11 + $0x368] sm:$0xff] }
  0x6f   : > { %v340_v56 = vld [vmem:[%s8405_s11 + $0x380] sm:$0xff]  ;;  %337 = vst [vmem:[%s8410_s4 + $0x1b0] sm:$0xff] %v336_v54  ;;  %339 = vst [vmem:[%s8410_s4 + $0x1b8] sm:$0xff] %v338_v55  ;;  %v342_v57 = vld [vmem:[%s8405_s11 + $0x388] sm:$0xff] }
  0x70   : > { %341 = vst [vmem:[%s8410_s4 + $0x1c0] sm:$0xff] %v340_v56  ;;  %v344_v58 = vld [vmem:[%s8405_s11 + $0x3a0] sm:$0xff]  ;;  %v346_v59 = vld [vmem:[%s8405_s11 + $0x3a8] sm:$0xff]  ;;  %343 = vst [vmem:[%s8410_s4 + $0x1c8] sm:$0xff] %v342_v57 }
  0x71   : > { %345 = vst [vmem:[%s8410_s4 + $0x1d0] sm:$0xff] %v344_v58  ;;  %347 = vst [vmem:[%s8410_s4 + $0x1d8] sm:$0xff] %v346_v59  ;;  %v348_v60 = vld [vmem:[%s8405_s11 + $0x3c0] sm:$0xff]  ;;  %v350_v61 = vld [vmem:[%s8405_s11 + $0x3c8] sm:$0xff] }
  0x72   : > { %v352_v62 = vld [vmem:[%s8405_s11 + $0x3e0] sm:$0xff]  ;;  %349 = vst [vmem:[%s8410_s4 + $0x1e0] sm:$0xff] %v348_v60  ;;  %351 = vst [vmem:[%s8410_s4 + $0x1e8] sm:$0xff] %v350_v61  ;;  %v354_v63 = vld [vmem:[%s8405_s11 + $0x3e8] sm:$0xff] }
  0x73   : > { %353 = vst [vmem:[%s8410_s4 + $0x1f0] sm:$0xff] %v352_v62  ;;  %v356_v0 = vld [vmem:[%s8405_s11 + $0x400] sm:$0xff]  ;;  %v358_v1 = vld [vmem:[%s8405_s11 + $0x408] sm:$0xff]  ;;  %355 = vst [vmem:[%s8410_s4 + $0x1f8] sm:$0xff] %v354_v63 }
  0x74   : > { %357 = vst [vmem:[%s8410_s4 + $0x200] sm:$0xff] %v356_v0  ;;  %359 = vst [vmem:[%s8410_s4 + $0x208] sm:$0xff] %v358_v1  ;;  %v360_v2 = vld [vmem:[%s8405_s11 + $0x420] sm:$0xff]  ;;  %v362_v3 = vld [vmem:[%s8405_s11 + $0x428] sm:$0xff] }
  0x75   : > { %v364_v4 = vld [vmem:[%s8405_s11 + $0x440] sm:$0xff]  ;;  %361 = vst [vmem:[%s8410_s4 + $0x210] sm:$0xff] %v360_v2  ;;  %363 = vst [vmem:[%s8410_s4 + $0x218] sm:$0xff] %v362_v3  ;;  %v366_v5 = vld [vmem:[%s8405_s11 + $0x448] sm:$0xff] }
  0x76   : > { %365 = vst [vmem:[%s8410_s4 + $0x220] sm:$0xff] %v364_v4  ;;  %v368_v6 = vld [vmem:[%s8405_s11 + $0x460] sm:$0xff]  ;;  %v370_v7 = vld [vmem:[%s8405_s11 + $0x468] sm:$0xff]  ;;  %367 = vst [vmem:[%s8410_s4 + $0x228] sm:$0xff] %v366_v5 }
  0x77   : > { %369 = vst [vmem:[%s8410_s4 + $0x230] sm:$0xff] %v368_v6  ;;  %371 = vst [vmem:[%s8410_s4 + $0x238] sm:$0xff] %v370_v7  ;;  %v372_v8 = vld [vmem:[%s8405_s11 + $0x480] sm:$0xff]  ;;  %v374_v9 = vld [vmem:[%s8405_s11 + $0x488] sm:$0xff] }
  0x78   : > { %v376_v10 = vld [vmem:[%s8405_s11 + $0x4a0] sm:$0xff]  ;;  %373 = vst [vmem:[%s8410_s4 + $0x240] sm:$0xff] %v372_v8  ;;  %375 = vst [vmem:[%s8410_s4 + $0x248] sm:$0xff] %v374_v9  ;;  %v378_v11 = vld [vmem:[%s8405_s11 + $0x4a8] sm:$0xff] }
  0x79   : > { %377 = vst [vmem:[%s8410_s4 + $0x250] sm:$0xff] %v376_v10  ;;  %v380_v12 = vld [vmem:[%s8405_s11 + $0x4c0] sm:$0xff]  ;;  %v382_v13 = vld [vmem:[%s8405_s11 + $0x4c8] sm:$0xff]  ;;  %379 = vst [vmem:[%s8410_s4 + $0x258] sm:$0xff] %v378_v11 }
  0x7a   : > { %381 = vst [vmem:[%s8410_s4 + $0x260] sm:$0xff] %v380_v12  ;;  %383 = vst [vmem:[%s8410_s4 + $0x268] sm:$0xff] %v382_v13  ;;  %v384_v14 = vld [vmem:[%s8405_s11 + $0x4e0] sm:$0xff]  ;;  %v386_v15 = vld [vmem:[%s8405_s11 + $0x4e8] sm:$0xff] }
  0x7b   : > { %v388_v16 = vld [vmem:[%s8405_s11 + $0x500] sm:$0xff]  ;;  %385 = vst [vmem:[%s8410_s4 + $0x270] sm:$0xff] %v384_v14  ;;  %387 = vst [vmem:[%s8410_s4 + $0x278] sm:$0xff] %v386_v15  ;;  %v390_v17 = vld [vmem:[%s8405_s11 + $0x508] sm:$0xff] }
  0x7c   : > { %389 = vst [vmem:[%s8410_s4 + $0x280] sm:$0xff] %v388_v16  ;;  %v392_v18 = vld [vmem:[%s8405_s11 + $0x520] sm:$0xff]  ;;  %v394_v19 = vld [vmem:[%s8405_s11 + $0x528] sm:$0xff]  ;;  %391 = vst [vmem:[%s8410_s4 + $0x288] sm:$0xff] %v390_v17 }
  0x7d   : > { %393 = vst [vmem:[%s8410_s4 + $0x290] sm:$0xff] %v392_v18  ;;  %395 = vst [vmem:[%s8410_s4 + $0x298] sm:$0xff] %v394_v19  ;;  %v396_v20 = vld [vmem:[%s8405_s11 + $0x540] sm:$0xff]  ;;  %v398_v21 = vld [vmem:[%s8405_s11 + $0x548] sm:$0xff] }
  0x7e   : > { %v400_v22 = vld [vmem:[%s8405_s11 + $0x560] sm:$0xff]  ;;  %397 = vst [vmem:[%s8410_s4 + $0x2a0] sm:$0xff] %v396_v20  ;;  %399 = vst [vmem:[%s8410_s4 + $0x2a8] sm:$0xff] %v398_v21  ;;  %v402_v23 = vld [vmem:[%s8405_s11 + $0x568] sm:$0xff] }
  0x7f   : > { %401 = vst [vmem:[%s8410_s4 + $0x2b0] sm:$0xff] %v400_v22  ;;  %v404_v24 = vld [vmem:[%s8405_s11 + $0x580] sm:$0xff]  ;;  %v406_v25 = vld [vmem:[%s8405_s11 + $0x588] sm:$0xff]  ;;  %403 = vst [vmem:[%s8410_s4 + $0x2b8] sm:$0xff] %v402_v23 }
  0x80   : > { %405 = vst [vmem:[%s8410_s4 + $0x2c0] sm:$0xff] %v404_v24  ;;  %407 = vst [vmem:[%s8410_s4 + $0x2c8] sm:$0xff] %v406_v25  ;;  %v408_v26 = vld [vmem:[%s8405_s11 + $0x5a0] sm:$0xff]  ;;  %v410_v27 = vld [vmem:[%s8405_s11 + $0x5a8] sm:$0xff] }
  0x81   : > { %v412_v28 = vld [vmem:[%s8405_s11 + $0x5c0] sm:$0xff]  ;;  %409 = vst [vmem:[%s8410_s4 + $0x2d0] sm:$0xff] %v408_v26  ;;  %411 = vst [vmem:[%s8410_s4 + $0x2d8] sm:$0xff] %v410_v27  ;;  %v414_v29 = vld [vmem:[%s8405_s11 + $0x5c8] sm:$0xff] }
  0x82   : > { %413 = vst [vmem:[%s8410_s4 + $0x2e0] sm:$0xff] %v412_v28  ;;  %v416_v30 = vld [vmem:[%s8405_s11 + $0x5e0] sm:$0xff]  ;;  %v418_v31 = vld [vmem:[%s8405_s11 + $0x5e8] sm:$0xff]  ;;  %415 = vst [vmem:[%s8410_s4 + $0x2e8] sm:$0xff] %v414_v29 }
  0x83   : > { %417 = vst [vmem:[%s8410_s4 + $0x2f0] sm:$0xff] %v416_v30  ;;  %419 = vst [vmem:[%s8410_s4 + $0x2f8] sm:$0xff] %v418_v31  ;;  %v420_v32 = vld [vmem:[%s8405_s11 + $0x600] sm:$0xff]  ;;  %v422_v33 = vld [vmem:[%s8405_s11 + $0x608] sm:$0xff] }
  0x84   : > { %v424_v34 = vld [vmem:[%s8405_s11 + $0x620] sm:$0xff]  ;;  %421 = vst [vmem:[%s8410_s4 + $0x300] sm:$0xff] %v420_v32  ;;  %423 = vst [vmem:[%s8410_s4 + $0x308] sm:$0xff] %v422_v33  ;;  %v426_v35 = vld [vmem:[%s8405_s11 + $0x628] sm:$0xff] }
  0x85   : > { %425 = vst [vmem:[%s8410_s4 + $0x310] sm:$0xff] %v424_v34  ;;  %v428_v36 = vld [vmem:[%s8405_s11 + $0x640] sm:$0xff]  ;;  %v430_v37 = vld [vmem:[%s8405_s11 + $0x648] sm:$0xff]  ;;  %427 = vst [vmem:[%s8410_s4 + $0x318] sm:$0xff] %v426_v35 }
  0x86   : > { %429 = vst [vmem:[%s8410_s4 + $0x320] sm:$0xff] %v428_v36  ;;  %431 = vst [vmem:[%s8410_s4 + $0x328] sm:$0xff] %v430_v37  ;;  %v432_v38 = vld [vmem:[%s8405_s11 + $0x660] sm:$0xff]  ;;  %v434_v39 = vld [vmem:[%s8405_s11 + $0x668] sm:$0xff] }
  0x87   : > { %v436_v40 = vld [vmem:[%s8405_s11 + $0x680] sm:$0xff]  ;;  %433 = vst [vmem:[%s8410_s4 + $0x330] sm:$0xff] %v432_v38  ;;  %435 = vst [vmem:[%s8410_s4 + $0x338] sm:$0xff] %v434_v39  ;;  %v438_v41 = vld [vmem:[%s8405_s11 + $0x688] sm:$0xff] }
  0x88   : > { %437 = vst [vmem:[%s8410_s4 + $0x340] sm:$0xff] %v436_v40  ;;  %v440_v42 = vld [vmem:[%s8405_s11 + $0x6a0] sm:$0xff]  ;;  %v442_v43 = vld [vmem:[%s8405_s11 + $0x6a8] sm:$0xff]  ;;  %439 = vst [vmem:[%s8410_s4 + $0x348] sm:$0xff] %v438_v41 }
  0x89   : > { %441 = vst [vmem:[%s8410_s4 + $0x350] sm:$0xff] %v440_v42  ;;  %443 = vst [vmem:[%s8410_s4 + $0x358] sm:$0xff] %v442_v43  ;;  %v444_v44 = vld [vmem:[%s8405_s11 + $0x6c0] sm:$0xff]  ;;  %v446_v45 = vld [vmem:[%s8405_s11 + $0x6c8] sm:$0xff] }
  0x8a   : > { %v448_v46 = vld [vmem:[%s8405_s11 + $0x6e0] sm:$0xff]  ;;  %445 = vst [vmem:[%s8410_s4 + $0x360] sm:$0xff] %v444_v44  ;;  %447 = vst [vmem:[%s8410_s4 + $0x368] sm:$0xff] %v446_v45  ;;  %v450_v47 = vld [vmem:[%s8405_s11 + $0x6e8] sm:$0xff] }
  0x8b   : > { %449 = vst [vmem:[%s8410_s4 + $0x370] sm:$0xff] %v448_v46  ;;  %v452_v48 = vld [vmem:[%s8405_s11 + $0x700] sm:$0xff]  ;;  %v454_v49 = vld [vmem:[%s8405_s11 + $0x708] sm:$0xff]  ;;  %451 = vst [vmem:[%s8410_s4 + $0x378] sm:$0xff] %v450_v47 }
  0x8c   : > { %453 = vst [vmem:[%s8410_s4 + $0x380] sm:$0xff] %v452_v48  ;;  %455 = vst [vmem:[%s8410_s4 + $0x388] sm:$0xff] %v454_v49  ;;  %v456_v50 = vld [vmem:[%s8405_s11 + $0x720] sm:$0xff]  ;;  %v458_v51 = vld [vmem:[%s8405_s11 + $0x728] sm:$0xff] }
  0x8d   : > { %v460_v52 = vld [vmem:[%s8405_s11 + $0x740] sm:$0xff]  ;;  %457 = vst [vmem:[%s8410_s4 + $0x390] sm:$0xff] %v456_v50  ;;  %459 = vst [vmem:[%s8410_s4 + $0x398] sm:$0xff] %v458_v51  ;;  %v462_v53 = vld [vmem:[%s8405_s11 + $0x748] sm:$0xff] }
  0x8e   : > { %461 = vst [vmem:[%s8410_s4 + $0x3a0] sm:$0xff] %v460_v52  ;;  %v464_v54 = vld [vmem:[%s8405_s11 + $0x760] sm:$0xff]  ;;  %v466_v55 = vld [vmem:[%s8405_s11 + $0x768] sm:$0xff]  ;;  %463 = vst [vmem:[%s8410_s4 + $0x3a8] sm:$0xff] %v462_v53 }
  0x8f   : > { %465 = vst [vmem:[%s8410_s4 + $0x3b0] sm:$0xff] %v464_v54  ;;  %467 = vst [vmem:[%s8410_s4 + $0x3b8] sm:$0xff] %v466_v55  ;;  %v468_v56 = vld [vmem:[%s8405_s11 + $0x780] sm:$0xff]  ;;  %v470_v57 = vld [vmem:[%s8405_s11 + $0x788] sm:$0xff] }
  0x90   : > { %v472_v58 = vld [vmem:[%s8405_s11 + $0x7a0] sm:$0xff]  ;;  %469 = vst [vmem:[%s8410_s4 + $0x3c0] sm:$0xff] %v468_v56  ;;  %471 = vst [vmem:[%s8410_s4 + $0x3c8] sm:$0xff] %v470_v57  ;;  %v474_v59 = vld [vmem:[%s8405_s11 + $0x7a8] sm:$0xff] }
  0x91   : > { %473 = vst [vmem:[%s8410_s4 + $0x3d0] sm:$0xff] %v472_v58  ;;  %v476_v60 = vld [vmem:[%s8405_s11 + $0x7c0] sm:$0xff]  ;;  %v478_v61 = vld [vmem:[%s8405_s11 + $0x7c8] sm:$0xff]  ;;  %475 = vst [vmem:[%s8410_s4 + $0x3d8] sm:$0xff] %v474_v59 }
  0x92   : > { %477 = vst [vmem:[%s8410_s4 + $0x3e0] sm:$0xff] %v476_v60  ;;  %479 = vst [vmem:[%s8410_s4 + $0x3e8] sm:$0xff] %v478_v61  ;;  %v480_v62 = vld [vmem:[%s8405_s11 + $0x7e0] sm:$0xff]  ;;  %v482_v63 = vld [vmem:[%s8405_s11 + $0x7e8] sm:$0xff] }
  0x93   : > { %v484_v0 = vld [vmem:[%s8405_s11 + $0x800] sm:$0xff]  ;;  %481 = vst [vmem:[%s8410_s4 + $0x3f0] sm:$0xff] %v480_v62  ;;  %483 = vst [vmem:[%s8410_s4 + $0x3f8] sm:$0xff] %v482_v63  ;;  %v486_v1 = vld [vmem:[%s8405_s11 + $0x808] sm:$0xff] }
  0x94   : > { %485 = vst [vmem:[%s8410_s4 + $0x400] sm:$0xff] %v484_v0  ;;  %v488_v2 = vld [vmem:[%s8405_s11 + $0x820] sm:$0xff]  ;;  %v490_v3 = vld [vmem:[%s8405_s11 + $0x828] sm:$0xff]  ;;  %487 = vst [vmem:[%s8410_s4 + $0x408] sm:$0xff] %v486_v1 }
  0x95   : > { %489 = vst [vmem:[%s8410_s4 + $0x410] sm:$0xff] %v488_v2  ;;  %491 = vst [vmem:[%s8410_s4 + $0x418] sm:$0xff] %v490_v3  ;;  %v492_v4 = vld [vmem:[%s8405_s11 + $0x840] sm:$0xff]  ;;  %v494_v5 = vld [vmem:[%s8405_s11 + $0x848] sm:$0xff] }
  0x96   : > { %v496_v6 = vld [vmem:[%s8405_s11 + $0x860] sm:$0xff]  ;;  %493 = vst [vmem:[%s8410_s4 + $0x420] sm:$0xff] %v492_v4  ;;  %495 = vst [vmem:[%s8410_s4 + $0x428] sm:$0xff] %v494_v5  ;;  %v498_v7 = vld [vmem:[%s8405_s11 + $0x868] sm:$0xff] }
  0x97   : > { %497 = vst [vmem:[%s8410_s4 + $0x430] sm:$0xff] %v496_v6  ;;  %v500_v8 = vld [vmem:[%s8405_s11 + $0x880] sm:$0xff]  ;;  %v502_v9 = vld [vmem:[%s8405_s11 + $0x888] sm:$0xff]  ;;  %499 = vst [vmem:[%s8410_s4 + $0x438] sm:$0xff] %v498_v7 }
  0x98   : > { %501 = vst [vmem:[%s8410_s4 + $0x440] sm:$0xff] %v500_v8  ;;  %503 = vst [vmem:[%s8410_s4 + $0x448] sm:$0xff] %v502_v9  ;;  %v504_v10 = vld [vmem:[%s8405_s11 + $0x8a0] sm:$0xff]  ;;  %v506_v11 = vld [vmem:[%s8405_s11 + $0x8a8] sm:$0xff] }
  0x99   : > { %v508_v12 = vld [vmem:[%s8405_s11 + $0x8c0] sm:$0xff]  ;;  %505 = vst [vmem:[%s8410_s4 + $0x450] sm:$0xff] %v504_v10  ;;  %507 = vst [vmem:[%s8410_s4 + $0x458] sm:$0xff] %v506_v11  ;;  %v510_v13 = vld [vmem:[%s8405_s11 + $0x8c8] sm:$0xff] }
  0x9a   : > { %509 = vst [vmem:[%s8410_s4 + $0x460] sm:$0xff] %v508_v12  ;;  %v512_v14 = vld [vmem:[%s8405_s11 + $0x8e0] sm:$0xff]  ;;  %v514_v15 = vld [vmem:[%s8405_s11 + $0x8e8] sm:$0xff]  ;;  %511 = vst [vmem:[%s8410_s4 + $0x468] sm:$0xff] %v510_v13 }
  0x9b   : > { %513 = vst [vmem:[%s8410_s4 + $0x470] sm:$0xff] %v512_v14  ;;  %515 = vst [vmem:[%s8410_s4 + $0x478] sm:$0xff] %v514_v15  ;;  %v516_v16 = vld [vmem:[%s8405_s11 + $0x900] sm:$0xff]  ;;  %v518_v17 = vld [vmem:[%s8405_s11 + $0x908] sm:$0xff] }
  0x9c   : > { %v520_v18 = vld [vmem:[%s8405_s11 + $0x920] sm:$0xff]  ;;  %517 = vst [vmem:[%s8410_s4 + $0x480] sm:$0xff] %v516_v16  ;;  %519 = vst [vmem:[%s8410_s4 + $0x488] sm:$0xff] %v518_v17  ;;  %v522_v19 = vld [vmem:[%s8405_s11 + $0x928] sm:$0xff] }
  0x9d   : > { %521 = vst [vmem:[%s8410_s4 + $0x490] sm:$0xff] %v520_v18  ;;  %v524_v20 = vld [vmem:[%s8405_s11 + $0x940] sm:$0xff]  ;;  %v526_v21 = vld [vmem:[%s8405_s11 + $0x948] sm:$0xff]  ;;  %523 = vst [vmem:[%s8410_s4 + $0x498] sm:$0xff] %v522_v19 }
  0x9e   : > { %525 = vst [vmem:[%s8410_s4 + $0x4a0] sm:$0xff] %v524_v20  ;;  %527 = vst [vmem:[%s8410_s4 + $0x4a8] sm:$0xff] %v526_v21  ;;  %v528_v22 = vld [vmem:[%s8405_s11 + $0x960] sm:$0xff]  ;;  %v530_v23 = vld [vmem:[%s8405_s11 + $0x968] sm:$0xff] }
  0x9f   : > { %v532_v24 = vld [vmem:[%s8405_s11 + $0x980] sm:$0xff]  ;;  %529 = vst [vmem:[%s8410_s4 + $0x4b0] sm:$0xff] %v528_v22  ;;  %531 = vst [vmem:[%s8410_s4 + $0x4b8] sm:$0xff] %v530_v23  ;;  %v534_v25 = vld [vmem:[%s8405_s11 + $0x988] sm:$0xff] }
  0xa0   : > { %533 = vst [vmem:[%s8410_s4 + $0x4c0] sm:$0xff] %v532_v24  ;;  %v536_v26 = vld [vmem:[%s8405_s11 + $0x9a0] sm:$0xff]  ;;  %v538_v27 = vld [vmem:[%s8405_s11 + $0x9a8] sm:$0xff]  ;;  %535 = vst [vmem:[%s8410_s4 + $0x4c8] sm:$0xff] %v534_v25 }
  0xa1   : > { %537 = vst [vmem:[%s8410_s4 + $0x4d0] sm:$0xff] %v536_v26  ;;  %539 = vst [vmem:[%s8410_s4 + $0x4d8] sm:$0xff] %v538_v27  ;;  %v540_v28 = vld [vmem:[%s8405_s11 + $0x9c0] sm:$0xff]  ;;  %v542_v29 = vld [vmem:[%s8405_s11 + $0x9c8] sm:$0xff] }
  0xa2   : > { %v544_v30 = vld [vmem:[%s8405_s11 + $0x9e0] sm:$0xff]  ;;  %541 = vst [vmem:[%s8410_s4 + $0x4e0] sm:$0xff] %v540_v28  ;;  %543 = vst [vmem:[%s8410_s4 + $0x4e8] sm:$0xff] %v542_v29  ;;  %v546_v31 = vld [vmem:[%s8405_s11 + $0x9e8] sm:$0xff] }
  0xa3   : > { %545 = vst [vmem:[%s8410_s4 + $0x4f0] sm:$0xff] %v544_v30  ;;  %v548_v32 = vld [vmem:[%s8405_s11 + $0xa00] sm:$0xff]  ;;  %v550_v33 = vld [vmem:[%s8405_s11 + $0xa08] sm:$0xff]  ;;  %547 = vst [vmem:[%s8410_s4 + $0x4f8] sm:$0xff] %v546_v31 }
  0xa4   : > { %549 = vst [vmem:[%s8410_s4 + $0x500] sm:$0xff] %v548_v32  ;;  %551 = vst [vmem:[%s8410_s4 + $0x508] sm:$0xff] %v550_v33  ;;  %v552_v34 = vld [vmem:[%s8405_s11 + $0xa20] sm:$0xff]  ;;  %v554_v35 = vld [vmem:[%s8405_s11 + $0xa28] sm:$0xff] }
  0xa5   : > { %v556_v36 = vld [vmem:[%s8405_s11 + $0xa40] sm:$0xff]  ;;  %553 = vst [vmem:[%s8410_s4 + $0x510] sm:$0xff] %v552_v34  ;;  %555 = vst [vmem:[%s8410_s4 + $0x518] sm:$0xff] %v554_v35  ;;  %v558_v37 = vld [vmem:[%s8405_s11 + $0xa48] sm:$0xff] }
  0xa6   : > { %557 = vst [vmem:[%s8410_s4 + $0x520] sm:$0xff] %v556_v36  ;;  %v560_v38 = vld [vmem:[%s8405_s11 + $0xa60] sm:$0xff]  ;;  %v562_v39 = vld [vmem:[%s8405_s11 + $0xa68] sm:$0xff]  ;;  %559 = vst [vmem:[%s8410_s4 + $0x528] sm:$0xff] %v558_v37 }
  0xa7   : > { %561 = vst [vmem:[%s8410_s4 + $0x530] sm:$0xff] %v560_v38  ;;  %563 = vst [vmem:[%s8410_s4 + $0x538] sm:$0xff] %v562_v39  ;;  %v564_v40 = vld [vmem:[%s8405_s11 + $0xa80] sm:$0xff]  ;;  %v566_v41 = vld [vmem:[%s8405_s11 + $0xa88] sm:$0xff] }
  0xa8   : > { %v568_v42 = vld [vmem:[%s8405_s11 + $0xaa0] sm:$0xff]  ;;  %565 = vst [vmem:[%s8410_s4 + $0x540] sm:$0xff] %v564_v40  ;;  %567 = vst [vmem:[%s8410_s4 + $0x548] sm:$0xff] %v566_v41  ;;  %v570_v43 = vld [vmem:[%s8405_s11 + $0xaa8] sm:$0xff] }
  0xa9   : > { %569 = vst [vmem:[%s8410_s4 + $0x550] sm:$0xff] %v568_v42  ;;  %v572_v44 = vld [vmem:[%s8405_s11 + $0xac0] sm:$0xff]  ;;  %v574_v45 = vld [vmem:[%s8405_s11 + $0xac8] sm:$0xff]  ;;  %571 = vst [vmem:[%s8410_s4 + $0x558] sm:$0xff] %v570_v43 }
  0xaa   : > { %573 = vst [vmem:[%s8410_s4 + $0x560] sm:$0xff] %v572_v44  ;;  %575 = vst [vmem:[%s8410_s4 + $0x568] sm:$0xff] %v574_v45  ;;  %v576_v46 = vld [vmem:[%s8405_s11 + $0xae0] sm:$0xff]  ;;  %v578_v47 = vld [vmem:[%s8405_s11 + $0xae8] sm:$0xff] }
  0xab   : > { %v580_v48 = vld [vmem:[%s8405_s11 + $0xb00] sm:$0xff]  ;;  %577 = vst [vmem:[%s8410_s4 + $0x570] sm:$0xff] %v576_v46  ;;  %579 = vst [vmem:[%s8410_s4 + $0x578] sm:$0xff] %v578_v47  ;;  %v582_v49 = vld [vmem:[%s8405_s11 + $0xb08] sm:$0xff] }
  0xac   : > { %581 = vst [vmem:[%s8410_s4 + $0x580] sm:$0xff] %v580_v48  ;;  %v584_v50 = vld [vmem:[%s8405_s11 + $0xb20] sm:$0xff]  ;;  %v586_v51 = vld [vmem:[%s8405_s11 + $0xb28] sm:$0xff]  ;;  %583 = vst [vmem:[%s8410_s4 + $0x588] sm:$0xff] %v582_v49 }
  0xad   : > { %585 = vst [vmem:[%s8410_s4 + $0x590] sm:$0xff] %v584_v50  ;;  %587 = vst [vmem:[%s8410_s4 + $0x598] sm:$0xff] %v586_v51  ;;  %v588_v52 = vld [vmem:[%s8405_s11 + $0xb40] sm:$0xff]  ;;  %v590_v53 = vld [vmem:[%s8405_s11 + $0xb48] sm:$0xff] }
  0xae   : > { %v592_v54 = vld [vmem:[%s8405_s11 + $0xb60] sm:$0xff]  ;;  %589 = vst [vmem:[%s8410_s4 + $0x5a0] sm:$0xff] %v588_v52  ;;  %591 = vst [vmem:[%s8410_s4 + $0x5a8] sm:$0xff] %v590_v53  ;;  %v594_v55 = vld [vmem:[%s8405_s11 + $0xb68] sm:$0xff] }
  0xaf   : > { %593 = vst [vmem:[%s8410_s4 + $0x5b0] sm:$0xff] %v592_v54  ;;  %v596_v56 = vld [vmem:[%s8405_s11 + $0xb80] sm:$0xff]  ;;  %v598_v57 = vld [vmem:[%s8405_s11 + $0xb88] sm:$0xff]  ;;  %595 = vst [vmem:[%s8410_s4 + $0x5b8] sm:$0xff] %v594_v55 }
  0xb0   : > { %597 = vst [vmem:[%s8410_s4 + $0x5c0] sm:$0xff] %v596_v56  ;;  %599 = vst [vmem:[%s8410_s4 + $0x5c8] sm:$0xff] %v598_v57  ;;  %v600_v58 = vld [vmem:[%s8405_s11 + $0xba0] sm:$0xff]  ;;  %v602_v59 = vld [vmem:[%s8405_s11 + $0xba8] sm:$0xff] }
  0xb1   : > { %v604_v60 = vld [vmem:[%s8405_s11 + $0xbc0] sm:$0xff]  ;;  %601 = vst [vmem:[%s8410_s4 + $0x5d0] sm:$0xff] %v600_v58  ;;  %603 = vst [vmem:[%s8410_s4 + $0x5d8] sm:$0xff] %v602_v59  ;;  %v606_v61 = vld [vmem:[%s8405_s11 + $0xbc8] sm:$0xff] }
  0xb2   : > { %605 = vst [vmem:[%s8410_s4 + $0x5e0] sm:$0xff] %v604_v60  ;;  %v608_v62 = vld [vmem:[%s8405_s11 + $0xbe0] sm:$0xff]  ;;  %v610_v63 = vld [vmem:[%s8405_s11 + $0xbe8] sm:$0xff]  ;;  %607 = vst [vmem:[%s8410_s4 + $0x5e8] sm:$0xff] %v606_v61 }
  0xb3   : > { %609 = vst [vmem:[%s8410_s4 + $0x5f0] sm:$0xff] %v608_v62  ;;  %611 = vst [vmem:[%s8410_s4 + $0x5f8] sm:$0xff] %v610_v63  ;;  %v612_v0 = vld [vmem:[%s8405_s11 + $0xc00] sm:$0xff]  ;;  %v614_v1 = vld [vmem:[%s8405_s11 + $0xc08] sm:$0xff] }
  0xb4   : > { %v616_v2 = vld [vmem:[%s8405_s11 + $0xc20] sm:$0xff]  ;;  %613 = vst [vmem:[%s8410_s4 + $0x600] sm:$0xff] %v612_v0  ;;  %615 = vst [vmem:[%s8410_s4 + $0x608] sm:$0xff] %v614_v1  ;;  %v618_v3 = vld [vmem:[%s8405_s11 + $0xc28] sm:$0xff] }
  0xb5   : > { %617 = vst [vmem:[%s8410_s4 + $0x610] sm:$0xff] %v616_v2  ;;  %v620_v4 = vld [vmem:[%s8405_s11 + $0xc40] sm:$0xff]  ;;  %v622_v5 = vld [vmem:[%s8405_s11 + $0xc48] sm:$0xff]  ;;  %619 = vst [vmem:[%s8410_s4 + $0x618] sm:$0xff] %v618_v3 }
  0xb6   : > { %621 = vst [vmem:[%s8410_s4 + $0x620] sm:$0xff] %v620_v4  ;;  %623 = vst [vmem:[%s8410_s4 + $0x628] sm:$0xff] %v622_v5  ;;  %v624_v6 = vld [vmem:[%s8405_s11 + $0xc60] sm:$0xff]  ;;  %v626_v7 = vld [vmem:[%s8405_s11 + $0xc68] sm:$0xff] }
  0xb7   : > { %v628_v8 = vld [vmem:[%s8405_s11 + $0xc80] sm:$0xff]  ;;  %625 = vst [vmem:[%s8410_s4 + $0x630] sm:$0xff] %v624_v6  ;;  %627 = vst [vmem:[%s8410_s4 + $0x638] sm:$0xff] %v626_v7  ;;  %v630_v9 = vld [vmem:[%s8405_s11 + $0xc88] sm:$0xff] }
  0xb8   : > { %629 = vst [vmem:[%s8410_s4 + $0x640] sm:$0xff] %v628_v8  ;;  %v632_v10 = vld [vmem:[%s8405_s11 + $0xca0] sm:$0xff]  ;;  %v634_v11 = vld [vmem:[%s8405_s11 + $0xca8] sm:$0xff]  ;;  %631 = vst [vmem:[%s8410_s4 + $0x648] sm:$0xff] %v630_v9 }
  0xb9   : > { %633 = vst [vmem:[%s8410_s4 + $0x650] sm:$0xff] %v632_v10  ;;  %635 = vst [vmem:[%s8410_s4 + $0x658] sm:$0xff] %v634_v11  ;;  %v636_v12 = vld [vmem:[%s8405_s11 + $0xcc0] sm:$0xff]  ;;  %v638_v13 = vld [vmem:[%s8405_s11 + $0xcc8] sm:$0xff] }
  0xba   : > { %v640_v14 = vld [vmem:[%s8405_s11 + $0xce0] sm:$0xff]  ;;  %637 = vst [vmem:[%s8410_s4 + $0x660] sm:$0xff] %v636_v12  ;;  %639 = vst [vmem:[%s8410_s4 + $0x668] sm:$0xff] %v638_v13  ;;  %v642_v15 = vld [vmem:[%s8405_s11 + $0xce8] sm:$0xff] }
  0xbb   : > { %641 = vst [vmem:[%s8410_s4 + $0x670] sm:$0xff] %v640_v14  ;;  %v644_v16 = vld [vmem:[%s8405_s11 + $0xd00] sm:$0xff]  ;;  %v646_v17 = vld [vmem:[%s8405_s11 + $0xd08] sm:$0xff]  ;;  %643 = vst [vmem:[%s8410_s4 + $0x678] sm:$0xff] %v642_v15 }
  0xbc   : > { %645 = vst [vmem:[%s8410_s4 + $0x680] sm:$0xff] %v644_v16  ;;  %647 = vst [vmem:[%s8410_s4 + $0x688] sm:$0xff] %v646_v17  ;;  %v648_v18 = vld [vmem:[%s8405_s11 + $0xd20] sm:$0xff]  ;;  %v650_v19 = vld [vmem:[%s8405_s11 + $0xd28] sm:$0xff] }
  0xbd   : > { %v652_v20 = vld [vmem:[%s8405_s11 + $0xd40] sm:$0xff]  ;;  %649 = vst [vmem:[%s8410_s4 + $0x690] sm:$0xff] %v648_v18  ;;  %651 = vst [vmem:[%s8410_s4 + $0x698] sm:$0xff] %v650_v19  ;;  %v654_v21 = vld [vmem:[%s8405_s11 + $0xd48] sm:$0xff] }
  0xbe   : > { %653 = vst [vmem:[%s8410_s4 + $0x6a0] sm:$0xff] %v652_v20  ;;  %v656_v22 = vld [vmem:[%s8405_s11 + $0xd60] sm:$0xff]  ;;  %v658_v23 = vld [vmem:[%s8405_s11 + $0xd68] sm:$0xff]  ;;  %655 = vst [vmem:[%s8410_s4 + $0x6a8] sm:$0xff] %v654_v21 }
  0xbf   : > { %657 = vst [vmem:[%s8410_s4 + $0x6b0] sm:$0xff] %v656_v22  ;;  %659 = vst [vmem:[%s8410_s4 + $0x6b8] sm:$0xff] %v658_v23  ;;  %v660_v24 = vld [vmem:[%s8405_s11 + $0xd80] sm:$0xff]  ;;  %v662_v25 = vld [vmem:[%s8405_s11 + $0xd88] sm:$0xff] }
  0xc0   : > { %v664_v26 = vld [vmem:[%s8405_s11 + $0xda0] sm:$0xff]  ;;  %661 = vst [vmem:[%s8410_s4 + $0x6c0] sm:$0xff] %v660_v24  ;;  %663 = vst [vmem:[%s8410_s4 + $0x6c8] sm:$0xff] %v662_v25  ;;  %v666_v27 = vld [vmem:[%s8405_s11 + $0xda8] sm:$0xff] }
  0xc1   : > { %665 = vst [vmem:[%s8410_s4 + $0x6d0] sm:$0xff] %v664_v26  ;;  %v668_v28 = vld [vmem:[%s8405_s11 + $0xdc0] sm:$0xff]  ;;  %v670_v29 = vld [vmem:[%s8405_s11 + $0xdc8] sm:$0xff]  ;;  %667 = vst [vmem:[%s8410_s4 + $0x6d8] sm:$0xff] %v666_v27 }
  0xc2   : > { %669 = vst [vmem:[%s8410_s4 + $0x6e0] sm:$0xff] %v668_v28  ;;  %671 = vst [vmem:[%s8410_s4 + $0x6e8] sm:$0xff] %v670_v29  ;;  %v672_v30 = vld [vmem:[%s8405_s11 + $0xde0] sm:$0xff]  ;;  %v674_v31 = vld [vmem:[%s8405_s11 + $0xde8] sm:$0xff] }
  0xc3   : > { %v676_v32 = vld [vmem:[%s8405_s11 + $0xe00] sm:$0xff]  ;;  %673 = vst [vmem:[%s8410_s4 + $0x6f0] sm:$0xff] %v672_v30  ;;  %675 = vst [vmem:[%s8410_s4 + $0x6f8] sm:$0xff] %v674_v31  ;;  %v678_v33 = vld [vmem:[%s8405_s11 + $0xe08] sm:$0xff] }
  0xc4   : > { %677 = vst [vmem:[%s8410_s4 + $0x700] sm:$0xff] %v676_v32  ;;  %v680_v34 = vld [vmem:[%s8405_s11 + $0xe20] sm:$0xff]  ;;  %v682_v35 = vld [vmem:[%s8405_s11 + $0xe28] sm:$0xff]  ;;  %679 = vst [vmem:[%s8410_s4 + $0x708] sm:$0xff] %v678_v33 }
  0xc5   : > { %681 = vst [vmem:[%s8410_s4 + $0x710] sm:$0xff] %v680_v34  ;;  %683 = vst [vmem:[%s8410_s4 + $0x718] sm:$0xff] %v682_v35  ;;  %v684_v36 = vld [vmem:[%s8405_s11 + $0xe40] sm:$0xff]  ;;  %v686_v37 = vld [vmem:[%s8405_s11 + $0xe48] sm:$0xff] }
  0xc6   : > { %v688_v38 = vld [vmem:[%s8405_s11 + $0xe60] sm:$0xff]  ;;  %685 = vst [vmem:[%s8410_s4 + $0x720] sm:$0xff] %v684_v36  ;;  %687 = vst [vmem:[%s8410_s4 + $0x728] sm:$0xff] %v686_v37  ;;  %v690_v39 = vld [vmem:[%s8405_s11 + $0xe68] sm:$0xff] }
  0xc7   : > { %689 = vst [vmem:[%s8410_s4 + $0x730] sm:$0xff] %v688_v38  ;;  %v692_v40 = vld [vmem:[%s8405_s11 + $0xe80] sm:$0xff]  ;;  %v694_v41 = vld [vmem:[%s8405_s11 + $0xe88] sm:$0xff]  ;;  %691 = vst [vmem:[%s8410_s4 + $0x738] sm:$0xff] %v690_v39 }
  0xc8   : > { %693 = vst [vmem:[%s8410_s4 + $0x740] sm:$0xff] %v692_v40  ;;  %695 = vst [vmem:[%s8410_s4 + $0x748] sm:$0xff] %v694_v41  ;;  %v696_v42 = vld [vmem:[%s8405_s11 + $0xea0] sm:$0xff]  ;;  %v698_v43 = vld [vmem:[%s8405_s11 + $0xea8] sm:$0xff] }
  0xc9   : > { %v700_v44 = vld [vmem:[%s8405_s11 + $0xec0] sm:$0xff]  ;;  %697 = vst [vmem:[%s8410_s4 + $0x750] sm:$0xff] %v696_v42  ;;  %699 = vst [vmem:[%s8410_s4 + $0x758] sm:$0xff] %v698_v43  ;;  %v702_v45 = vld [vmem:[%s8405_s11 + $0xec8] sm:$0xff] }
  0xca   : > { %701 = vst [vmem:[%s8410_s4 + $0x760] sm:$0xff] %v700_v44  ;;  %v704_v46 = vld [vmem:[%s8405_s11 + $0xee0] sm:$0xff]  ;;  %v706_v47 = vld [vmem:[%s8405_s11 + $0xee8] sm:$0xff]  ;;  %703 = vst [vmem:[%s8410_s4 + $0x768] sm:$0xff] %v702_v45 }
  0xcb   : > { %705 = vst [vmem:[%s8410_s4 + $0x770] sm:$0xff] %v704_v46  ;;  %707 = vst [vmem:[%s8410_s4 + $0x778] sm:$0xff] %v706_v47  ;;  %v708_v48 = vld [vmem:[%s8405_s11 + $0xf00] sm:$0xff]  ;;  %v710_v49 = vld [vmem:[%s8405_s11 + $0xf08] sm:$0xff] }
  0xcc   : > { %v712_v50 = vld [vmem:[%s8405_s11 + $0xf20] sm:$0xff]  ;;  %709 = vst [vmem:[%s8410_s4 + $0x780] sm:$0xff] %v708_v48  ;;  %711 = vst [vmem:[%s8410_s4 + $0x788] sm:$0xff] %v710_v49  ;;  %v714_v51 = vld [vmem:[%s8405_s11 + $0xf28] sm:$0xff] }
  0xcd   : > { %713 = vst [vmem:[%s8410_s4 + $0x790] sm:$0xff] %v712_v50  ;;  %v716_v52 = vld [vmem:[%s8405_s11 + $0xf40] sm:$0xff]  ;;  %v718_v53 = vld [vmem:[%s8405_s11 + $0xf48] sm:$0xff]  ;;  %715 = vst [vmem:[%s8410_s4 + $0x798] sm:$0xff] %v714_v51 }
  0xce   : > { %717 = vst [vmem:[%s8410_s4 + $0x7a0] sm:$0xff] %v716_v52  ;;  %719 = vst [vmem:[%s8410_s4 + $0x7a8] sm:$0xff] %v718_v53  ;;  %v720_v54 = vld [vmem:[%s8405_s11 + $0xf60] sm:$0xff]  ;;  %v722_v55 = vld [vmem:[%s8405_s11 + $0xf68] sm:$0xff] }
  0xcf   : > { %v724_v56 = vld [vmem:[%s8405_s11 + $0xf80] sm:$0xff]  ;;  %721 = vst [vmem:[%s8410_s4 + $0x7b0] sm:$0xff] %v720_v54  ;;  %723 = vst [vmem:[%s8410_s4 + $0x7b8] sm:$0xff] %v722_v55  ;;  %v726_v57 = vld [vmem:[%s8405_s11 + $0xf88] sm:$0xff] }
  0xd0   : > { %725 = vst [vmem:[%s8410_s4 + $0x7c0] sm:$0xff] %v724_v56  ;;  %v728_v58 = vld [vmem:[%s8405_s11 + $0xfa0] sm:$0xff]  ;;  %v730_v59 = vld [vmem:[%s8405_s11 + $0xfa8] sm:$0xff]  ;;  %727 = vst [vmem:[%s8410_s4 + $0x7c8] sm:$0xff] %v726_v57 }
  0xd1   : > { %729 = vst [vmem:[%s8410_s4 + $0x7d0] sm:$0xff] %v728_v58  ;;  %731 = vst [vmem:[%s8410_s4 + $0x7d8] sm:$0xff] %v730_v59  ;;  %v732_v60 = vld [vmem:[%s8405_s11 + $0xfc0] sm:$0xff]  ;;  %v734_v61 = vld [vmem:[%s8405_s11 + $0xfc8] sm:$0xff] }
  0xd2   : > { %v736_v62 = vld [vmem:[%s8405_s11 + $0xfe0] sm:$0xff]  ;;  %733 = vst [vmem:[%s8410_s4 + $0x7e0] sm:$0xff] %v732_v60  ;;  %735 = vst [vmem:[%s8410_s4 + $0x7e8] sm:$0xff] %v734_v61  ;;  %v738_v63 = vld [vmem:[%s8405_s11 + $0xfe8] sm:$0xff] }
  0xd3   : > { %737 = vst [vmem:[%s8410_s4 + $0x7f0] sm:$0xff] %v736_v62  ;;  %v740_v0 = vld [vmem:[%s8405_s11 + $0x1000] sm:$0xff]  ;;  %v742_v1 = vld [vmem:[%s8405_s11 + $0x1008] sm:$0xff]  ;;  %739 = vst [vmem:[%s8410_s4 + $0x7f8] sm:$0xff] %v738_v63 }
  0xd4   : > { %741 = vst [vmem:[%s8410_s4 + $0x800] sm:$0xff] %v740_v0  ;;  %743 = vst [vmem:[%s8410_s4 + $0x808] sm:$0xff] %v742_v1  ;;  %v744_v2 = vld [vmem:[%s8405_s11 + $0x1020] sm:$0xff]  ;;  %v746_v3 = vld [vmem:[%s8405_s11 + $0x1028] sm:$0xff] }
  0xd5   : > { %v748_v4 = vld [vmem:[%s8405_s11 + $0x1040] sm:$0xff]  ;;  %745 = vst [vmem:[%s8410_s4 + $0x810] sm:$0xff] %v744_v2  ;;  %747 = vst [vmem:[%s8410_s4 + $0x818] sm:$0xff] %v746_v3  ;;  %v750_v5 = vld [vmem:[%s8405_s11 + $0x1048] sm:$0xff] }
  0xd6   : > { %749 = vst [vmem:[%s8410_s4 + $0x820] sm:$0xff] %v748_v4  ;;  %v752_v6 = vld [vmem:[%s8405_s11 + $0x1060] sm:$0xff]  ;;  %v754_v7 = vld [vmem:[%s8405_s11 + $0x1068] sm:$0xff]  ;;  %751 = vst [vmem:[%s8410_s4 + $0x828] sm:$0xff] %v750_v5 }
  0xd7   : > { %753 = vst [vmem:[%s8410_s4 + $0x830] sm:$0xff] %v752_v6  ;;  %755 = vst [vmem:[%s8410_s4 + $0x838] sm:$0xff] %v754_v7  ;;  %v756_v8 = vld [vmem:[%s8405_s11 + $0x1080] sm:$0xff]  ;;  %v758_v9 = vld [vmem:[%s8405_s11 + $0x1088] sm:$0xff] }
  0xd8   : > { %v760_v10 = vld [vmem:[%s8405_s11 + $0x10a0] sm:$0xff]  ;;  %757 = vst [vmem:[%s8410_s4 + $0x840] sm:$0xff] %v756_v8  ;;  %759 = vst [vmem:[%s8410_s4 + $0x848] sm:$0xff] %v758_v9  ;;  %v762_v11 = vld [vmem:[%s8405_s11 + $0x10a8] sm:$0xff] }
  0xd9   : > { %761 = vst [vmem:[%s8410_s4 + $0x850] sm:$0xff] %v760_v10  ;;  %v764_v12 = vld [vmem:[%s8405_s11 + $0x10c0] sm:$0xff]  ;;  %v766_v13 = vld [vmem:[%s8405_s11 + $0x10c8] sm:$0xff]  ;;  %763 = vst [vmem:[%s8410_s4 + $0x858] sm:$0xff] %v762_v11 }
  0xda   : > { %765 = vst [vmem:[%s8410_s4 + $0x860] sm:$0xff] %v764_v12  ;;  %767 = vst [vmem:[%s8410_s4 + $0x868] sm:$0xff] %v766_v13  ;;  %v768_v14 = vld [vmem:[%s8405_s11 + $0x10e0] sm:$0xff]  ;;  %v770_v15 = vld [vmem:[%s8405_s11 + $0x10e8] sm:$0xff] }
  0xdb   : > { %v772_v16 = vld [vmem:[%s8405_s11 + $0x1100] sm:$0xff]  ;;  %769 = vst [vmem:[%s8410_s4 + $0x870] sm:$0xff] %v768_v14  ;;  %771 = vst [vmem:[%s8410_s4 + $0x878] sm:$0xff] %v770_v15  ;;  %v774_v17 = vld [vmem:[%s8405_s11 + $0x1108] sm:$0xff] }
  0xdc   : > { %773 = vst [vmem:[%s8410_s4 + $0x880] sm:$0xff] %v772_v16  ;;  %v776_v18 = vld [vmem:[%s8405_s11 + $0x1120] sm:$0xff]  ;;  %v778_v19 = vld [vmem:[%s8405_s11 + $0x1128] sm:$0xff]  ;;  %775 = vst [vmem:[%s8410_s4 + $0x888] sm:$0xff] %v774_v17 }
  0xdd   : > { %777 = vst [vmem:[%s8410_s4 + $0x890] sm:$0xff] %v776_v18  ;;  %779 = vst [vmem:[%s8410_s4 + $0x898] sm:$0xff] %v778_v19  ;;  %v780_v20 = vld [vmem:[%s8405_s11 + $0x1140] sm:$0xff]  ;;  %v782_v21 = vld [vmem:[%s8405_s11 + $0x1148] sm:$0xff] }
  0xde   : > { %v784_v22 = vld [vmem:[%s8405_s11 + $0x1160] sm:$0xff]  ;;  %781 = vst [vmem:[%s8410_s4 + $0x8a0] sm:$0xff] %v780_v20  ;;  %783 = vst [vmem:[%s8410_s4 + $0x8a8] sm:$0xff] %v782_v21  ;;  %v786_v23 = vld [vmem:[%s8405_s11 + $0x1168] sm:$0xff] }
  0xdf   : > { %785 = vst [vmem:[%s8410_s4 + $0x8b0] sm:$0xff] %v784_v22  ;;  %v788_v24 = vld [vmem:[%s8405_s11 + $0x1180] sm:$0xff]  ;;  %v790_v25 = vld [vmem:[%s8405_s11 + $0x1188] sm:$0xff]  ;;  %787 = vst [vmem:[%s8410_s4 + $0x8b8] sm:$0xff] %v786_v23 }
  0xe0   : > { %789 = vst [vmem:[%s8410_s4 + $0x8c0] sm:$0xff] %v788_v24  ;;  %791 = vst [vmem:[%s8410_s4 + $0x8c8] sm:$0xff] %v790_v25  ;;  %v792_v26 = vld [vmem:[%s8405_s11 + $0x11a0] sm:$0xff]  ;;  %v794_v27 = vld [vmem:[%s8405_s11 + $0x11a8] sm:$0xff] }
  0xe1   : > { %v796_v28 = vld [vmem:[%s8405_s11 + $0x11c0] sm:$0xff]  ;;  %793 = vst [vmem:[%s8410_s4 + $0x8d0] sm:$0xff] %v792_v26  ;;  %795 = vst [vmem:[%s8410_s4 + $0x8d8] sm:$0xff] %v794_v27  ;;  %v798_v29 = vld [vmem:[%s8405_s11 + $0x11c8] sm:$0xff] }
  0xe2   : > { %797 = vst [vmem:[%s8410_s4 + $0x8e0] sm:$0xff] %v796_v28  ;;  %v800_v30 = vld [vmem:[%s8405_s11 + $0x11e0] sm:$0xff]  ;;  %v802_v31 = vld [vmem:[%s8405_s11 + $0x11e8] sm:$0xff]  ;;  %799 = vst [vmem:[%s8410_s4 + $0x8e8] sm:$0xff] %v798_v29 }
  0xe3   : > { %801 = vst [vmem:[%s8410_s4 + $0x8f0] sm:$0xff] %v800_v30  ;;  %803 = vst [vmem:[%s8410_s4 + $0x8f8] sm:$0xff] %v802_v31  ;;  %v804_v32 = vld [vmem:[%s8405_s11 + $0x1200] sm:$0xff]  ;;  %v806_v33 = vld [vmem:[%s8405_s11 + $0x1208] sm:$0xff] }
  0xe4   : > { %v808_v34 = vld [vmem:[%s8405_s11 + $0x1220] sm:$0xff]  ;;  %805 = vst [vmem:[%s8410_s4 + $0x900] sm:$0xff] %v804_v32  ;;  %807 = vst [vmem:[%s8410_s4 + $0x908] sm:$0xff] %v806_v33  ;;  %v810_v35 = vld [vmem:[%s8405_s11 + $0x1228] sm:$0xff] }
  0xe5   : > { %809 = vst [vmem:[%s8410_s4 + $0x910] sm:$0xff] %v808_v34  ;;  %v812_v36 = vld [vmem:[%s8405_s11 + $0x1240] sm:$0xff]  ;;  %v814_v37 = vld [vmem:[%s8405_s11 + $0x1248] sm:$0xff]  ;;  %811 = vst [vmem:[%s8410_s4 + $0x918] sm:$0xff] %v810_v35 }
  0xe6   : > { %813 = vst [vmem:[%s8410_s4 + $0x920] sm:$0xff] %v812_v36  ;;  %815 = vst [vmem:[%s8410_s4 + $0x928] sm:$0xff] %v814_v37  ;;  %v816_v38 = vld [vmem:[%s8405_s11 + $0x1260] sm:$0xff]  ;;  %v818_v39 = vld [vmem:[%s8405_s11 + $0x1268] sm:$0xff] }
  0xe7   : > { %v820_v40 = vld [vmem:[%s8405_s11 + $0x1280] sm:$0xff]  ;;  %817 = vst [vmem:[%s8410_s4 + $0x930] sm:$0xff] %v816_v38  ;;  %819 = vst [vmem:[%s8410_s4 + $0x938] sm:$0xff] %v818_v39  ;;  %v822_v41 = vld [vmem:[%s8405_s11 + $0x1288] sm:$0xff] }
  0xe8   : > { %821 = vst [vmem:[%s8410_s4 + $0x940] sm:$0xff] %v820_v40  ;;  %v824_v42 = vld [vmem:[%s8405_s11 + $0x12a0] sm:$0xff]  ;;  %v826_v43 = vld [vmem:[%s8405_s11 + $0x12a8] sm:$0xff]  ;;  %823 = vst [vmem:[%s8410_s4 + $0x948] sm:$0xff] %v822_v41 }
  0xe9   : > { %825 = vst [vmem:[%s8410_s4 + $0x950] sm:$0xff] %v824_v42  ;;  %827 = vst [vmem:[%s8410_s4 + $0x958] sm:$0xff] %v826_v43  ;;  %v828_v44 = vld [vmem:[%s8405_s11 + $0x12c0] sm:$0xff]  ;;  %v830_v45 = vld [vmem:[%s8405_s11 + $0x12c8] sm:$0xff] }
  0xea   : > { %v832_v46 = vld [vmem:[%s8405_s11 + $0x12e0] sm:$0xff]  ;;  %829 = vst [vmem:[%s8410_s4 + $0x960] sm:$0xff] %v828_v44  ;;  %831 = vst [vmem:[%s8410_s4 + $0x968] sm:$0xff] %v830_v45  ;;  %v834_v47 = vld [vmem:[%s8405_s11 + $0x12e8] sm:$0xff] }
  0xeb   : > { %833 = vst [vmem:[%s8410_s4 + $0x970] sm:$0xff] %v832_v46  ;;  %v836_v48 = vld [vmem:[%s8405_s11 + $0x1300] sm:$0xff]  ;;  %v838_v49 = vld [vmem:[%s8405_s11 + $0x1308] sm:$0xff]  ;;  %835 = vst [vmem:[%s8410_s4 + $0x978] sm:$0xff] %v834_v47 }
  0xec   : > { %837 = vst [vmem:[%s8410_s4 + $0x980] sm:$0xff] %v836_v48  ;;  %839 = vst [vmem:[%s8410_s4 + $0x988] sm:$0xff] %v838_v49  ;;  %v840_v50 = vld [vmem:[%s8405_s11 + $0x1320] sm:$0xff]  ;;  %v842_v51 = vld [vmem:[%s8405_s11 + $0x1328] sm:$0xff] }
  0xed   : > { %v844_v52 = vld [vmem:[%s8405_s11 + $0x1340] sm:$0xff]  ;;  %841 = vst [vmem:[%s8410_s4 + $0x990] sm:$0xff] %v840_v50  ;;  %843 = vst [vmem:[%s8410_s4 + $0x998] sm:$0xff] %v842_v51  ;;  %v846_v53 = vld [vmem:[%s8405_s11 + $0x1348] sm:$0xff] }
  0xee   : > { %845 = vst [vmem:[%s8410_s4 + $0x9a0] sm:$0xff] %v844_v52  ;;  %v848_v54 = vld [vmem:[%s8405_s11 + $0x1360] sm:$0xff]  ;;  %v850_v55 = vld [vmem:[%s8405_s11 + $0x1368] sm:$0xff]  ;;  %847 = vst [vmem:[%s8410_s4 + $0x9a8] sm:$0xff] %v846_v53 }
  0xef   : > { %849 = vst [vmem:[%s8410_s4 + $0x9b0] sm:$0xff] %v848_v54  ;;  %851 = vst [vmem:[%s8410_s4 + $0x9b8] sm:$0xff] %v850_v55  ;;  %v852_v56 = vld [vmem:[%s8405_s11 + $0x1380] sm:$0xff]  ;;  %v854_v57 = vld [vmem:[%s8405_s11 + $0x1388] sm:$0xff] }
  0xf0   : > { %v856_v58 = vld [vmem:[%s8405_s11 + $0x13a0] sm:$0xff]  ;;  %853 = vst [vmem:[%s8410_s4 + $0x9c0] sm:$0xff] %v852_v56  ;;  %855 = vst [vmem:[%s8410_s4 + $0x9c8] sm:$0xff] %v854_v57  ;;  %v858_v59 = vld [vmem:[%s8405_s11 + $0x13a8] sm:$0xff] }
  0xf1   : > { %857 = vst [vmem:[%s8410_s4 + $0x9d0] sm:$0xff] %v856_v58  ;;  %v860_v60 = vld [vmem:[%s8405_s11 + $0x13c0] sm:$0xff]  ;;  %v862_v61 = vld [vmem:[%s8405_s11 + $0x13c8] sm:$0xff]  ;;  %859 = vst [vmem:[%s8410_s4 + $0x9d8] sm:$0xff] %v858_v59 }
  0xf2   : > { %861 = vst [vmem:[%s8410_s4 + $0x9e0] sm:$0xff] %v860_v60  ;;  %863 = vst [vmem:[%s8410_s4 + $0x9e8] sm:$0xff] %v862_v61  ;;  %v864_v62 = vld [vmem:[%s8405_s11 + $0x13e0] sm:$0xff]  ;;  %v866_v63 = vld [vmem:[%s8405_s11 + $0x13e8] sm:$0xff] }
  0xf3   : > { %v868_v0 = vld [vmem:[%s8405_s11 + $0x1400] sm:$0xff]  ;;  %865 = vst [vmem:[%s8410_s4 + $0x9f0] sm:$0xff] %v864_v62  ;;  %867 = vst [vmem:[%s8410_s4 + $0x9f8] sm:$0xff] %v866_v63  ;;  %v870_v1 = vld [vmem:[%s8405_s11 + $0x1408] sm:$0xff] }
  0xf4   : > { %869 = vst [vmem:[%s8410_s4 + $0xa00] sm:$0xff] %v868_v0  ;;  %v872_v2 = vld [vmem:[%s8405_s11 + $0x1420] sm:$0xff]  ;;  %v874_v3 = vld [vmem:[%s8405_s11 + $0x1428] sm:$0xff]  ;;  %871 = vst [vmem:[%s8410_s4 + $0xa08] sm:$0xff] %v870_v1 }
  0xf5   : > { %873 = vst [vmem:[%s8410_s4 + $0xa10] sm:$0xff] %v872_v2  ;;  %875 = vst [vmem:[%s8410_s4 + $0xa18] sm:$0xff] %v874_v3  ;;  %v876_v4 = vld [vmem:[%s8405_s11 + $0x1440] sm:$0xff]  ;;  %v878_v5 = vld [vmem:[%s8405_s11 + $0x1448] sm:$0xff] }
  0xf6   : > { %v880_v6 = vld [vmem:[%s8405_s11 + $0x1460] sm:$0xff]  ;;  %877 = vst [vmem:[%s8410_s4 + $0xa20] sm:$0xff] %v876_v4  ;;  %879 = vst [vmem:[%s8410_s4 + $0xa28] sm:$0xff] %v878_v5  ;;  %v882_v7 = vld [vmem:[%s8405_s11 + $0x1468] sm:$0xff] }
  0xf7   : > { %881 = vst [vmem:[%s8410_s4 + $0xa30] sm:$0xff] %v880_v6  ;;  %v884_v8 = vld [vmem:[%s8405_s11 + $0x1480] sm:$0xff]  ;;  %v886_v9 = vld [vmem:[%s8405_s11 + $0x1488] sm:$0xff]  ;;  %883 = vst [vmem:[%s8410_s4 + $0xa38] sm:$0xff] %v882_v7 }
  0xf8   : > { %885 = vst [vmem:[%s8410_s4 + $0xa40] sm:$0xff] %v884_v8  ;;  %887 = vst [vmem:[%s8410_s4 + $0xa48] sm:$0xff] %v886_v9  ;;  %v888_v10 = vld [vmem:[%s8405_s11 + $0x14a0] sm:$0xff]  ;;  %v890_v11 = vld [vmem:[%s8405_s11 + $0x14a8] sm:$0xff] }
  0xf9   : > { %v892_v12 = vld [vmem:[%s8405_s11 + $0x14c0] sm:$0xff]  ;;  %889 = vst [vmem:[%s8410_s4 + $0xa50] sm:$0xff] %v888_v10  ;;  %891 = vst [vmem:[%s8410_s4 + $0xa58] sm:$0xff] %v890_v11  ;;  %v894_v13 = vld [vmem:[%s8405_s11 + $0x14c8] sm:$0xff] }
  0xfa   : > { %893 = vst [vmem:[%s8410_s4 + $0xa60] sm:$0xff] %v892_v12  ;;  %v896_v14 = vld [vmem:[%s8405_s11 + $0x14e0] sm:$0xff]  ;;  %v898_v15 = vld [vmem:[%s8405_s11 + $0x14e8] sm:$0xff]  ;;  %895 = vst [vmem:[%s8410_s4 + $0xa68] sm:$0xff] %v894_v13 }
  0xfb   : > { %897 = vst [vmem:[%s8410_s4 + $0xa70] sm:$0xff] %v896_v14  ;;  %899 = vst [vmem:[%s8410_s4 + $0xa78] sm:$0xff] %v898_v15  ;;  %v900_v16 = vld [vmem:[%s8405_s11 + $0x1500] sm:$0xff]  ;;  %v902_v17 = vld [vmem:[%s8405_s11 + $0x1508] sm:$0xff] }
  0xfc   : > { %v904_v18 = vld [vmem:[%s8405_s11 + $0x1520] sm:$0xff]  ;;  %901 = vst [vmem:[%s8410_s4 + $0xa80] sm:$0xff] %v900_v16  ;;  %903 = vst [vmem:[%s8410_s4 + $0xa88] sm:$0xff] %v902_v17  ;;  %v906_v19 = vld [vmem:[%s8405_s11 + $0x1528] sm:$0xff] }
  0xfd   : > { %905 = vst [vmem:[%s8410_s4 + $0xa90] sm:$0xff] %v904_v18  ;;  %v908_v20 = vld [vmem:[%s8405_s11 + $0x1540] sm:$0xff]  ;;  %v910_v21 = vld [vmem:[%s8405_s11 + $0x1548] sm:$0xff]  ;;  %907 = vst [vmem:[%s8410_s4 + $0xa98] sm:$0xff] %v906_v19 }
  0xfe   : > { %909 = vst [vmem:[%s8410_s4 + $0xaa0] sm:$0xff] %v908_v20  ;;  %911 = vst [vmem:[%s8410_s4 + $0xaa8] sm:$0xff] %v910_v21  ;;  %v912_v22 = vld [vmem:[%s8405_s11 + $0x1560] sm:$0xff]  ;;  %v914_v23 = vld [vmem:[%s8405_s11 + $0x1568] sm:$0xff] }
  0xff   : > { %v916_v24 = vld [vmem:[%s8405_s11 + $0x1580] sm:$0xff]  ;;  %913 = vst [vmem:[%s8410_s4 + $0xab0] sm:$0xff] %v912_v22  ;;  %915 = vst [vmem:[%s8410_s4 + $0xab8] sm:$0xff] %v914_v23  ;;  %v918_v25 = vld [vmem:[%s8405_s11 + $0x1588] sm:$0xff] }
 0x100   : > { %917 = vst [vmem:[%s8410_s4 + $0xac0] sm:$0xff] %v916_v24  ;;  %v920_v26 = vld [vmem:[%s8405_s11 + $0x15a0] sm:$0xff]  ;;  %v922_v27 = vld [vmem:[%s8405_s11 + $0x15a8] sm:$0xff]  ;;  %919 = vst [vmem:[%s8410_s4 + $0xac8] sm:$0xff] %v918_v25 }
 0x101   : > { %921 = vst [vmem:[%s8410_s4 + $0xad0] sm:$0xff] %v920_v26  ;;  %923 = vst [vmem:[%s8410_s4 + $0xad8] sm:$0xff] %v922_v27  ;;  %v924_v28 = vld [vmem:[%s8405_s11 + $0x15c0] sm:$0xff]  ;;  %v926_v29 = vld [vmem:[%s8405_s11 + $0x15c8] sm:$0xff] }
 0x102   : > { %v928_v30 = vld [vmem:[%s8405_s11 + $0x15e0] sm:$0xff]  ;;  %925 = vst [vmem:[%s8410_s4 + $0xae0] sm:$0xff] %v924_v28  ;;  %927 = vst [vmem:[%s8410_s4 + $0xae8] sm:$0xff] %v926_v29  ;;  %v930_v31 = vld [vmem:[%s8405_s11 + $0x15e8] sm:$0xff] }
 0x103   : > { %929 = vst [vmem:[%s8410_s4 + $0xaf0] sm:$0xff] %v928_v30  ;;  %v932_v32 = vld [vmem:[%s8405_s11 + $0x1600] sm:$0xff]  ;;  %v934_v33 = vld [vmem:[%s8405_s11 + $0x1608] sm:$0xff]  ;;  %931 = vst [vmem:[%s8410_s4 + $0xaf8] sm:$0xff] %v930_v31 }
 0x104   : > { %933 = vst [vmem:[%s8410_s4 + $0xb00] sm:$0xff] %v932_v32  ;;  %935 = vst [vmem:[%s8410_s4 + $0xb08] sm:$0xff] %v934_v33  ;;  %v936_v34 = vld [vmem:[%s8405_s11 + $0x1620] sm:$0xff]  ;;  %v938_v35 = vld [vmem:[%s8405_s11 + $0x1628] sm:$0xff] }
 0x105   : > { %v940_v36 = vld [vmem:[%s8405_s11 + $0x1640] sm:$0xff]  ;;  %937 = vst [vmem:[%s8410_s4 + $0xb10] sm:$0xff] %v936_v34  ;;  %939 = vst [vmem:[%s8410_s4 + $0xb18] sm:$0xff] %v938_v35  ;;  %v942_v37 = vld [vmem:[%s8405_s11 + $0x1648] sm:$0xff] }
 0x106   : > { %941 = vst [vmem:[%s8410_s4 + $0xb20] sm:$0xff] %v940_v36  ;;  %v944_v38 = vld [vmem:[%s8405_s11 + $0x1660] sm:$0xff]  ;;  %v946_v39 = vld [vmem:[%s8405_s11 + $0x1668] sm:$0xff]  ;;  %943 = vst [vmem:[%s8410_s4 + $0xb28] sm:$0xff] %v942_v37 }
 0x107   : > { %945 = vst [vmem:[%s8410_s4 + $0xb30] sm:$0xff] %v944_v38  ;;  %947 = vst [vmem:[%s8410_s4 + $0xb38] sm:$0xff] %v946_v39  ;;  %v948_v40 = vld [vmem:[%s8405_s11 + $0x1680] sm:$0xff]  ;;  %v950_v41 = vld [vmem:[%s8405_s11 + $0x1688] sm:$0xff] }
 0x108   : > { %v952_v42 = vld [vmem:[%s8405_s11 + $0x16a0] sm:$0xff]  ;;  %949 = vst [vmem:[%s8410_s4 + $0xb40] sm:$0xff] %v948_v40  ;;  %951 = vst [vmem:[%s8410_s4 + $0xb48] sm:$0xff] %v950_v41  ;;  %v954_v43 = vld [vmem:[%s8405_s11 + $0x16a8] sm:$0xff] }
 0x109   : > { %953 = vst [vmem:[%s8410_s4 + $0xb50] sm:$0xff] %v952_v42  ;;  %v956_v44 = vld [vmem:[%s8405_s11 + $0x16c0] sm:$0xff]  ;;  %v958_v45 = vld [vmem:[%s8405_s11 + $0x16c8] sm:$0xff]  ;;  %955 = vst [vmem:[%s8410_s4 + $0xb58] sm:$0xff] %v954_v43 }
 0x10a   : > { %957 = vst [vmem:[%s8410_s4 + $0xb60] sm:$0xff] %v956_v44  ;;  %959 = vst [vmem:[%s8410_s4 + $0xb68] sm:$0xff] %v958_v45  ;;  %v960_v46 = vld [vmem:[%s8405_s11 + $0x16e0] sm:$0xff]  ;;  %v962_v47 = vld [vmem:[%s8405_s11 + $0x16e8] sm:$0xff] }
 0x10b   : > { %v964_v48 = vld [vmem:[%s8405_s11 + $0x1700] sm:$0xff]  ;;  %961 = vst [vmem:[%s8410_s4 + $0xb70] sm:$0xff] %v960_v46  ;;  %963 = vst [vmem:[%s8410_s4 + $0xb78] sm:$0xff] %v962_v47  ;;  %v966_v49 = vld [vmem:[%s8405_s11 + $0x1708] sm:$0xff] }
 0x10c   : > { %965 = vst [vmem:[%s8410_s4 + $0xb80] sm:$0xff] %v964_v48  ;;  %v968_v50 = vld [vmem:[%s8405_s11 + $0x1720] sm:$0xff]  ;;  %v970_v51 = vld [vmem:[%s8405_s11 + $0x1728] sm:$0xff]  ;;  %967 = vst [vmem:[%s8410_s4 + $0xb88] sm:$0xff] %v966_v49 }
 0x10d   : > { %969 = vst [vmem:[%s8410_s4 + $0xb90] sm:$0xff] %v968_v50  ;;  %971 = vst [vmem:[%s8410_s4 + $0xb98] sm:$0xff] %v970_v51  ;;  %v972_v52 = vld [vmem:[%s8405_s11 + $0x1740] sm:$0xff]  ;;  %v974_v53 = vld [vmem:[%s8405_s11 + $0x1748] sm:$0xff] }
 0x10e   : > { %v976_v54 = vld [vmem:[%s8405_s11 + $0x1760] sm:$0xff]  ;;  %973 = vst [vmem:[%s8410_s4 + $0xba0] sm:$0xff] %v972_v52  ;;  %975 = vst [vmem:[%s8410_s4 + $0xba8] sm:$0xff] %v974_v53  ;;  %v978_v55 = vld [vmem:[%s8405_s11 + $0x1768] sm:$0xff] }
 0x10f   : > { %977 = vst [vmem:[%s8410_s4 + $0xbb0] sm:$0xff] %v976_v54  ;;  %v980_v56 = vld [vmem:[%s8405_s11 + $0x1780] sm:$0xff]  ;;  %v982_v57 = vld [vmem:[%s8405_s11 + $0x1788] sm:$0xff]  ;;  %979 = vst [vmem:[%s8410_s4 + $0xbb8] sm:$0xff] %v978_v55 }
 0x110   : > { %981 = vst [vmem:[%s8410_s4 + $0xbc0] sm:$0xff] %v980_v56  ;;  %983 = vst [vmem:[%s8410_s4 + $0xbc8] sm:$0xff] %v982_v57  ;;  %v984_v58 = vld [vmem:[%s8405_s11 + $0x17a0] sm:$0xff]  ;;  %v986_v59 = vld [vmem:[%s8405_s11 + $0x17a8] sm:$0xff] }
 0x111   : > { %v988_v60 = vld [vmem:[%s8405_s11 + $0x17c0] sm:$0xff]  ;;  %985 = vst [vmem:[%s8410_s4 + $0xbd0] sm:$0xff] %v984_v58  ;;  %987 = vst [vmem:[%s8410_s4 + $0xbd8] sm:$0xff] %v986_v59  ;;  %v990_v61 = vld [vmem:[%s8405_s11 + $0x17c8] sm:$0xff] }
 0x112   : > { %989 = vst [vmem:[%s8410_s4 + $0xbe0] sm:$0xff] %v988_v60  ;;  %v992_v62 = vld [vmem:[%s8405_s11 + $0x17e0] sm:$0xff]  ;;  %v994_v63 = vld [vmem:[%s8405_s11 + $0x17e8] sm:$0xff]  ;;  %991 = vst [vmem:[%s8410_s4 + $0xbe8] sm:$0xff] %v990_v61 }
 0x113   : > { %993 = vst [vmem:[%s8410_s4 + $0xbf0] sm:$0xff] %v992_v62  ;;  %995 = vst [vmem:[%s8410_s4 + $0xbf8] sm:$0xff] %v994_v63  ;;  %v996_v0 = vld [vmem:[%s8405_s11 + $0x1800] sm:$0xff]  ;;  %v998_v1 = vld [vmem:[%s8405_s11 + $0x1808] sm:$0xff] }
 0x114   : > { %v1000_v2 = vld [vmem:[%s8405_s11 + $0x1820] sm:$0xff]  ;;  %997 = vst [vmem:[%s8410_s4 + $0xc00] sm:$0xff] %v996_v0  ;;  %999 = vst [vmem:[%s8410_s4 + $0xc08] sm:$0xff] %v998_v1  ;;  %v1002_v3 = vld [vmem:[%s8405_s11 + $0x1828] sm:$0xff] }
 0x115   : > { %1001 = vst [vmem:[%s8410_s4 + $0xc10] sm:$0xff] %v1000_v2  ;;  %v1004_v4 = vld [vmem:[%s8405_s11 + $0x1840] sm:$0xff]  ;;  %v1006_v5 = vld [vmem:[%s8405_s11 + $0x1848] sm:$0xff]  ;;  %1003 = vst [vmem:[%s8410_s4 + $0xc18] sm:$0xff] %v1002_v3 }
 0x116   : > { %1005 = vst [vmem:[%s8410_s4 + $0xc20] sm:$0xff] %v1004_v4  ;;  %1007 = vst [vmem:[%s8410_s4 + $0xc28] sm:$0xff] %v1006_v5  ;;  %v1008_v6 = vld [vmem:[%s8405_s11 + $0x1860] sm:$0xff]  ;;  %v1010_v7 = vld [vmem:[%s8405_s11 + $0x1868] sm:$0xff] }
 0x117   : > { %v1012_v8 = vld [vmem:[%s8405_s11 + $0x1880] sm:$0xff]  ;;  %1009 = vst [vmem:[%s8410_s4 + $0xc30] sm:$0xff] %v1008_v6  ;;  %1011 = vst [vmem:[%s8410_s4 + $0xc38] sm:$0xff] %v1010_v7  ;;  %v1014_v9 = vld [vmem:[%s8405_s11 + $0x1888] sm:$0xff] }
 0x118   : > { %1013 = vst [vmem:[%s8410_s4 + $0xc40] sm:$0xff] %v1012_v8  ;;  %v1016_v10 = vld [vmem:[%s8405_s11 + $0x18a0] sm:$0xff]  ;;  %v1018_v11 = vld [vmem:[%s8405_s11 + $0x18a8] sm:$0xff]  ;;  %1015 = vst [vmem:[%s8410_s4 + $0xc48] sm:$0xff] %v1014_v9 }
 0x119   : > { %1017 = vst [vmem:[%s8410_s4 + $0xc50] sm:$0xff] %v1016_v10  ;;  %1019 = vst [vmem:[%s8410_s4 + $0xc58] sm:$0xff] %v1018_v11  ;;  %v1020_v12 = vld [vmem:[%s8405_s11 + $0x18c0] sm:$0xff]  ;;  %v1022_v13 = vld [vmem:[%s8405_s11 + $0x18c8] sm:$0xff] }
 0x11a   : > { %v1024_v14 = vld [vmem:[%s8405_s11 + $0x18e0] sm:$0xff]  ;;  %1021 = vst [vmem:[%s8410_s4 + $0xc60] sm:$0xff] %v1020_v12  ;;  %1023 = vst [vmem:[%s8410_s4 + $0xc68] sm:$0xff] %v1022_v13  ;;  %v1026_v15 = vld [vmem:[%s8405_s11 + $0x18e8] sm:$0xff] }
 0x11b   : > { %1025 = vst [vmem:[%s8410_s4 + $0xc70] sm:$0xff] %v1024_v14  ;;  %v1028_v16 = vld [vmem:[%s8405_s11 + $0x1900] sm:$0xff]  ;;  %v1030_v17 = vld [vmem:[%s8405_s11 + $0x1908] sm:$0xff]  ;;  %1027 = vst [vmem:[%s8410_s4 + $0xc78] sm:$0xff] %v1026_v15 }
 0x11c   : > { %1029 = vst [vmem:[%s8410_s4 + $0xc80] sm:$0xff] %v1028_v16  ;;  %1031 = vst [vmem:[%s8410_s4 + $0xc88] sm:$0xff] %v1030_v17  ;;  %v1032_v18 = vld [vmem:[%s8405_s11 + $0x1920] sm:$0xff]  ;;  %v1034_v19 = vld [vmem:[%s8405_s11 + $0x1928] sm:$0xff] }
 0x11d   : > { %v1036_v20 = vld [vmem:[%s8405_s11 + $0x1940] sm:$0xff]  ;;  %1033 = vst [vmem:[%s8410_s4 + $0xc90] sm:$0xff] %v1032_v18  ;;  %1035 = vst [vmem:[%s8410_s4 + $0xc98] sm:$0xff] %v1034_v19  ;;  %v1038_v21 = vld [vmem:[%s8405_s11 + $0x1948] sm:$0xff] }
 0x11e   : > { %1037 = vst [vmem:[%s8410_s4 + $0xca0] sm:$0xff] %v1036_v20  ;;  %v1040_v22 = vld [vmem:[%s8405_s11 + $0x1960] sm:$0xff]  ;;  %v1042_v23 = vld [vmem:[%s8405_s11 + $0x1968] sm:$0xff]  ;;  %1039 = vst [vmem:[%s8410_s4 + $0xca8] sm:$0xff] %v1038_v21 }
 0x11f   : > { %1041 = vst [vmem:[%s8410_s4 + $0xcb0] sm:$0xff] %v1040_v22  ;;  %1043 = vst [vmem:[%s8410_s4 + $0xcb8] sm:$0xff] %v1042_v23  ;;  %v1044_v24 = vld [vmem:[%s8405_s11 + $0x1980] sm:$0xff]  ;;  %v1046_v25 = vld [vmem:[%s8405_s11 + $0x1988] sm:$0xff] }
 0x120   : > { %v1048_v26 = vld [vmem:[%s8405_s11 + $0x19a0] sm:$0xff]  ;;  %1045 = vst [vmem:[%s8410_s4 + $0xcc0] sm:$0xff] %v1044_v24  ;;  %1047 = vst [vmem:[%s8410_s4 + $0xcc8] sm:$0xff] %v1046_v25  ;;  %v1050_v27 = vld [vmem:[%s8405_s11 + $0x19a8] sm:$0xff] }
 0x121   : > { %1049 = vst [vmem:[%s8410_s4 + $0xcd0] sm:$0xff] %v1048_v26  ;;  %v1052_v28 = vld [vmem:[%s8405_s11 + $0x19c0] sm:$0xff]  ;;  %v1054_v29 = vld [vmem:[%s8405_s11 + $0x19c8] sm:$0xff]  ;;  %1051 = vst [vmem:[%s8410_s4 + $0xcd8] sm:$0xff] %v1050_v27 }
 0x122   : > { %1053 = vst [vmem:[%s8410_s4 + $0xce0] sm:$0xff] %v1052_v28  ;;  %1055 = vst [vmem:[%s8410_s4 + $0xce8] sm:$0xff] %v1054_v29  ;;  %v1056_v30 = vld [vmem:[%s8405_s11 + $0x19e0] sm:$0xff]  ;;  %v1058_v31 = vld [vmem:[%s8405_s11 + $0x19e8] sm:$0xff] }
 0x123   : > { %v1060_v32 = vld [vmem:[%s8405_s11 + $0x1a00] sm:$0xff]  ;;  %1057 = vst [vmem:[%s8410_s4 + $0xcf0] sm:$0xff] %v1056_v30  ;;  %1059 = vst [vmem:[%s8410_s4 + $0xcf8] sm:$0xff] %v1058_v31  ;;  %v1062_v33 = vld [vmem:[%s8405_s11 + $0x1a08] sm:$0xff] }
 0x124   : > { %1061 = vst [vmem:[%s8410_s4 + $0xd00] sm:$0xff] %v1060_v32  ;;  %v1064_v34 = vld [vmem:[%s8405_s11 + $0x1a20] sm:$0xff]  ;;  %v1066_v35 = vld [vmem:[%s8405_s11 + $0x1a28] sm:$0xff]  ;;  %1063 = vst [vmem:[%s8410_s4 + $0xd08] sm:$0xff] %v1062_v33 }
 0x125   : > { %1065 = vst [vmem:[%s8410_s4 + $0xd10] sm:$0xff] %v1064_v34  ;;  %1067 = vst [vmem:[%s8410_s4 + $0xd18] sm:$0xff] %v1066_v35  ;;  %v1068_v36 = vld [vmem:[%s8405_s11 + $0x1a40] sm:$0xff]  ;;  %v1070_v37 = vld [vmem:[%s8405_s11 + $0x1a48] sm:$0xff] }
 0x126   : > { %v1072_v38 = vld [vmem:[%s8405_s11 + $0x1a60] sm:$0xff]  ;;  %1069 = vst [vmem:[%s8410_s4 + $0xd20] sm:$0xff] %v1068_v36  ;;  %1071 = vst [vmem:[%s8410_s4 + $0xd28] sm:$0xff] %v1070_v37  ;;  %v1074_v39 = vld [vmem:[%s8405_s11 + $0x1a68] sm:$0xff] }
 0x127   : > { %1073 = vst [vmem:[%s8410_s4 + $0xd30] sm:$0xff] %v1072_v38  ;;  %v1076_v40 = vld [vmem:[%s8405_s11 + $0x1a80] sm:$0xff]  ;;  %v1078_v41 = vld [vmem:[%s8405_s11 + $0x1a88] sm:$0xff]  ;;  %1075 = vst [vmem:[%s8410_s4 + $0xd38] sm:$0xff] %v1074_v39 }
 0x128   : > { %1077 = vst [vmem:[%s8410_s4 + $0xd40] sm:$0xff] %v1076_v40  ;;  %1079 = vst [vmem:[%s8410_s4 + $0xd48] sm:$0xff] %v1078_v41  ;;  %v1080_v42 = vld [vmem:[%s8405_s11 + $0x1aa0] sm:$0xff]  ;;  %v1082_v43 = vld [vmem:[%s8405_s11 + $0x1aa8] sm:$0xff] }
 0x129   : > { %v1084_v44 = vld [vmem:[%s8405_s11 + $0x1ac0] sm:$0xff]  ;;  %1081 = vst [vmem:[%s8410_s4 + $0xd50] sm:$0xff] %v1080_v42  ;;  %1083 = vst [vmem:[%s8410_s4 + $0xd58] sm:$0xff] %v1082_v43  ;;  %v1086_v45 = vld [vmem:[%s8405_s11 + $0x1ac8] sm:$0xff] }
 0x12a   : > { %1085 = vst [vmem:[%s8410_s4 + $0xd60] sm:$0xff] %v1084_v44  ;;  %v1088_v46 = vld [vmem:[%s8405_s11 + $0x1ae0] sm:$0xff]  ;;  %v1090_v47 = vld [vmem:[%s8405_s11 + $0x1ae8] sm:$0xff]  ;;  %1087 = vst [vmem:[%s8410_s4 + $0xd68] sm:$0xff] %v1086_v45 }
 0x12b   : > { %1089 = vst [vmem:[%s8410_s4 + $0xd70] sm:$0xff] %v1088_v46  ;;  %1091 = vst [vmem:[%s8410_s4 + $0xd78] sm:$0xff] %v1090_v47  ;;  %v1092_v48 = vld [vmem:[%s8405_s11 + $0x1b00] sm:$0xff]  ;;  %v1094_v49 = vld [vmem:[%s8405_s11 + $0x1b08] sm:$0xff] }
 0x12c   : > { %v1096_v50 = vld [vmem:[%s8405_s11 + $0x1b20] sm:$0xff]  ;;  %1093 = vst [vmem:[%s8410_s4 + $0xd80] sm:$0xff] %v1092_v48  ;;  %1095 = vst [vmem:[%s8410_s4 + $0xd88] sm:$0xff] %v1094_v49  ;;  %v1098_v51 = vld [vmem:[%s8405_s11 + $0x1b28] sm:$0xff] }
 0x12d   : > { %1097 = vst [vmem:[%s8410_s4 + $0xd90] sm:$0xff] %v1096_v50  ;;  %v1100_v52 = vld [vmem:[%s8405_s11 + $0x1b40] sm:$0xff]  ;;  %v1102_v53 = vld [vmem:[%s8405_s11 + $0x1b48] sm:$0xff]  ;;  %1099 = vst [vmem:[%s8410_s4 + $0xd98] sm:$0xff] %v1098_v51 }
 0x12e   : > { %1101 = vst [vmem:[%s8410_s4 + $0xda0] sm:$0xff] %v1100_v52  ;;  %1103 = vst [vmem:[%s8410_s4 + $0xda8] sm:$0xff] %v1102_v53  ;;  %v1104_v54 = vld [vmem:[%s8405_s11 + $0x1b60] sm:$0xff]  ;;  %v1106_v55 = vld [vmem:[%s8405_s11 + $0x1b68] sm:$0xff] }
 0x12f   : > { %v1108_v56 = vld [vmem:[%s8405_s11 + $0x1b80] sm:$0xff]  ;;  %1105 = vst [vmem:[%s8410_s4 + $0xdb0] sm:$0xff] %v1104_v54  ;;  %1107 = vst [vmem:[%s8410_s4 + $0xdb8] sm:$0xff] %v1106_v55  ;;  %v1110_v57 = vld [vmem:[%s8405_s11 + $0x1b88] sm:$0xff] }
 0x130   : > { %1109 = vst [vmem:[%s8410_s4 + $0xdc0] sm:$0xff] %v1108_v56  ;;  %v1112_v58 = vld [vmem:[%s8405_s11 + $0x1ba0] sm:$0xff]  ;;  %v1114_v59 = vld [vmem:[%s8405_s11 + $0x1ba8] sm:$0xff]  ;;  %1111 = vst [vmem:[%s8410_s4 + $0xdc8] sm:$0xff] %v1110_v57 }
 0x131   : > { %1113 = vst [vmem:[%s8410_s4 + $0xdd0] sm:$0xff] %v1112_v58  ;;  %1115 = vst [vmem:[%s8410_s4 + $0xdd8] sm:$0xff] %v1114_v59  ;;  %v1116_v60 = vld [vmem:[%s8405_s11 + $0x1bc0] sm:$0xff]  ;;  %v1118_v61 = vld [vmem:[%s8405_s11 + $0x1bc8] sm:$0xff] }
 0x132   : > { %v1120_v62 = vld [vmem:[%s8405_s11 + $0x1be0] sm:$0xff]  ;;  %1117 = vst [vmem:[%s8410_s4 + $0xde0] sm:$0xff] %v1116_v60  ;;  %1119 = vst [vmem:[%s8410_s4 + $0xde8] sm:$0xff] %v1118_v61  ;;  %v1122_v63 = vld [vmem:[%s8405_s11 + $0x1be8] sm:$0xff] }
 0x133   : > { %1121 = vst [vmem:[%s8410_s4 + $0xdf0] sm:$0xff] %v1120_v62  ;;  %v1124_v0 = vld [vmem:[%s8405_s11 + $0x1c00] sm:$0xff]  ;;  %v1126_v1 = vld [vmem:[%s8405_s11 + $0x1c08] sm:$0xff]  ;;  %1123 = vst [vmem:[%s8410_s4 + $0xdf8] sm:$0xff] %v1122_v63 }
 0x134   : > { %1125 = vst [vmem:[%s8410_s4 + $0xe00] sm:$0xff] %v1124_v0  ;;  %1127 = vst [vmem:[%s8410_s4 + $0xe08] sm:$0xff] %v1126_v1  ;;  %v1128_v2 = vld [vmem:[%s8405_s11 + $0x1c20] sm:$0xff]  ;;  %v1130_v3 = vld [vmem:[%s8405_s11 + $0x1c28] sm:$0xff] }
 0x135   : > { %v1132_v4 = vld [vmem:[%s8405_s11 + $0x1c40] sm:$0xff]  ;;  %1129 = vst [vmem:[%s8410_s4 + $0xe10] sm:$0xff] %v1128_v2  ;;  %1131 = vst [vmem:[%s8410_s4 + $0xe18] sm:$0xff] %v1130_v3  ;;  %v1134_v5 = vld [vmem:[%s8405_s11 + $0x1c48] sm:$0xff] }
 0x136   : > { %1133 = vst [vmem:[%s8410_s4 + $0xe20] sm:$0xff] %v1132_v4  ;;  %v1136_v6 = vld [vmem:[%s8405_s11 + $0x1c60] sm:$0xff]  ;;  %v1138_v7 = vld [vmem:[%s8405_s11 + $0x1c68] sm:$0xff]  ;;  %1135 = vst [vmem:[%s8410_s4 + $0xe28] sm:$0xff] %v1134_v5 }
 0x137   : > { %1137 = vst [vmem:[%s8410_s4 + $0xe30] sm:$0xff] %v1136_v6  ;;  %1139 = vst [vmem:[%s8410_s4 + $0xe38] sm:$0xff] %v1138_v7  ;;  %v1140_v8 = vld [vmem:[%s8405_s11 + $0x1c80] sm:$0xff]  ;;  %v1142_v9 = vld [vmem:[%s8405_s11 + $0x1c88] sm:$0xff] }
 0x138   : > { %v1144_v10 = vld [vmem:[%s8405_s11 + $0x1ca0] sm:$0xff]  ;;  %1141 = vst [vmem:[%s8410_s4 + $0xe40] sm:$0xff] %v1140_v8  ;;  %1143 = vst [vmem:[%s8410_s4 + $0xe48] sm:$0xff] %v1142_v9  ;;  %v1146_v11 = vld [vmem:[%s8405_s11 + $0x1ca8] sm:$0xff] }
 0x139   : > { %1145 = vst [vmem:[%s8410_s4 + $0xe50] sm:$0xff] %v1144_v10  ;;  %v1148_v12 = vld [vmem:[%s8405_s11 + $0x1cc0] sm:$0xff]  ;;  %v1150_v13 = vld [vmem:[%s8405_s11 + $0x1cc8] sm:$0xff]  ;;  %1147 = vst [vmem:[%s8410_s4 + $0xe58] sm:$0xff] %v1146_v11 }
 0x13a   : > { %1149 = vst [vmem:[%s8410_s4 + $0xe60] sm:$0xff] %v1148_v12  ;;  %1151 = vst [vmem:[%s8410_s4 + $0xe68] sm:$0xff] %v1150_v13  ;;  %v1152_v14 = vld [vmem:[%s8405_s11 + $0x1ce0] sm:$0xff]  ;;  %v1154_v15 = vld [vmem:[%s8405_s11 + $0x1ce8] sm:$0xff] }
 0x13b   : > { %v1156_v16 = vld [vmem:[%s8405_s11 + $0x1d00] sm:$0xff]  ;;  %1153 = vst [vmem:[%s8410_s4 + $0xe70] sm:$0xff] %v1152_v14  ;;  %1155 = vst [vmem:[%s8410_s4 + $0xe78] sm:$0xff] %v1154_v15  ;;  %v1158_v17 = vld [vmem:[%s8405_s11 + $0x1d08] sm:$0xff] }
 0x13c   : > { %1157 = vst [vmem:[%s8410_s4 + $0xe80] sm:$0xff] %v1156_v16  ;;  %v1160_v18 = vld [vmem:[%s8405_s11 + $0x1d20] sm:$0xff]  ;;  %v1162_v19 = vld [vmem:[%s8405_s11 + $0x1d28] sm:$0xff]  ;;  %1159 = vst [vmem:[%s8410_s4 + $0xe88] sm:$0xff] %v1158_v17 }
 0x13d   : > { %1161 = vst [vmem:[%s8410_s4 + $0xe90] sm:$0xff] %v1160_v18  ;;  %1163 = vst [vmem:[%s8410_s4 + $0xe98] sm:$0xff] %v1162_v19  ;;  %v1164_v20 = vld [vmem:[%s8405_s11 + $0x1d40] sm:$0xff]  ;;  %v1166_v21 = vld [vmem:[%s8405_s11 + $0x1d48] sm:$0xff] }
 0x13e   : > { %v1168_v22 = vld [vmem:[%s8405_s11 + $0x1d60] sm:$0xff]  ;;  %1165 = vst [vmem:[%s8410_s4 + $0xea0] sm:$0xff] %v1164_v20  ;;  %1167 = vst [vmem:[%s8410_s4 + $0xea8] sm:$0xff] %v1166_v21  ;;  %v1170_v23 = vld [vmem:[%s8405_s11 + $0x1d68] sm:$0xff] }
 0x13f   : > { %1169 = vst [vmem:[%s8410_s4 + $0xeb0] sm:$0xff] %v1168_v22  ;;  %v1172_v24 = vld [vmem:[%s8405_s11 + $0x1d80] sm:$0xff]  ;;  %v1174_v25 = vld [vmem:[%s8405_s11 + $0x1d88] sm:$0xff]  ;;  %1171 = vst [vmem:[%s8410_s4 + $0xeb8] sm:$0xff] %v1170_v23 }
 0x140   : > { %1173 = vst [vmem:[%s8410_s4 + $0xec0] sm:$0xff] %v1172_v24  ;;  %1175 = vst [vmem:[%s8410_s4 + $0xec8] sm:$0xff] %v1174_v25  ;;  %v1176_v26 = vld [vmem:[%s8405_s11 + $0x1da0] sm:$0xff]  ;;  %v1178_v27 = vld [vmem:[%s8405_s11 + $0x1da8] sm:$0xff] }
 0x141   : > { %v1180_v28 = vld [vmem:[%s8405_s11 + $0x1dc0] sm:$0xff]  ;;  %1177 = vst [vmem:[%s8410_s4 + $0xed0] sm:$0xff] %v1176_v26  ;;  %1179 = vst [vmem:[%s8410_s4 + $0xed8] sm:$0xff] %v1178_v27  ;;  %v1182_v29 = vld [vmem:[%s8405_s11 + $0x1dc8] sm:$0xff] }
 0x142   : > { %1181 = vst [vmem:[%s8410_s4 + $0xee0] sm:$0xff] %v1180_v28  ;;  %v1184_v30 = vld [vmem:[%s8405_s11 + $0x1de0] sm:$0xff]  ;;  %v1186_v31 = vld [vmem:[%s8405_s11 + $0x1de8] sm:$0xff]  ;;  %1183 = vst [vmem:[%s8410_s4 + $0xee8] sm:$0xff] %v1182_v29 }
 0x143   : > { %1185 = vst [vmem:[%s8410_s4 + $0xef0] sm:$0xff] %v1184_v30  ;;  %1187 = vst [vmem:[%s8410_s4 + $0xef8] sm:$0xff] %v1186_v31  ;;  %v1188_v32 = vld [vmem:[%s8405_s11 + $0x1e00] sm:$0xff]  ;;  %v1190_v33 = vld [vmem:[%s8405_s11 + $0x1e08] sm:$0xff] }
 0x144   : > { %v1192_v34 = vld [vmem:[%s8405_s11 + $0x1e20] sm:$0xff]  ;;  %1189 = vst [vmem:[%s8410_s4 + $0xf00] sm:$0xff] %v1188_v32  ;;  %1191 = vst [vmem:[%s8410_s4 + $0xf08] sm:$0xff] %v1190_v33  ;;  %v1194_v35 = vld [vmem:[%s8405_s11 + $0x1e28] sm:$0xff] }
 0x145   : > { %1193 = vst [vmem:[%s8410_s4 + $0xf10] sm:$0xff] %v1192_v34  ;;  %v1196_v36 = vld [vmem:[%s8405_s11 + $0x1e40] sm:$0xff]  ;;  %v1198_v37 = vld [vmem:[%s8405_s11 + $0x1e48] sm:$0xff]  ;;  %1195 = vst [vmem:[%s8410_s4 + $0xf18] sm:$0xff] %v1194_v35 }
 0x146   : > { %1197 = vst [vmem:[%s8410_s4 + $0xf20] sm:$0xff] %v1196_v36  ;;  %1199 = vst [vmem:[%s8410_s4 + $0xf28] sm:$0xff] %v1198_v37  ;;  %v1200_v38 = vld [vmem:[%s8405_s11 + $0x1e60] sm:$0xff]  ;;  %v1202_v39 = vld [vmem:[%s8405_s11 + $0x1e68] sm:$0xff] }
 0x147   : > { %v1204_v40 = vld [vmem:[%s8405_s11 + $0x1e80] sm:$0xff]  ;;  %1201 = vst [vmem:[%s8410_s4 + $0xf30] sm:$0xff] %v1200_v38  ;;  %1203 = vst [vmem:[%s8410_s4 + $0xf38] sm:$0xff] %v1202_v39  ;;  %v1206_v41 = vld [vmem:[%s8405_s11 + $0x1e88] sm:$0xff] }
 0x148   : > { %1205 = vst [vmem:[%s8410_s4 + $0xf40] sm:$0xff] %v1204_v40  ;;  %v1208_v42 = vld [vmem:[%s8405_s11 + $0x1ea0] sm:$0xff]  ;;  %v1210_v43 = vld [vmem:[%s8405_s11 + $0x1ea8] sm:$0xff]  ;;  %1207 = vst [vmem:[%s8410_s4 + $0xf48] sm:$0xff] %v1206_v41 }
 0x149   : > { %1209 = vst [vmem:[%s8410_s4 + $0xf50] sm:$0xff] %v1208_v42  ;;  %1211 = vst [vmem:[%s8410_s4 + $0xf58] sm:$0xff] %v1210_v43  ;;  %v1212_v44 = vld [vmem:[%s8405_s11 + $0x1ec0] sm:$0xff]  ;;  %v1214_v45 = vld [vmem:[%s8405_s11 + $0x1ec8] sm:$0xff] }
 0x14a   : > { %v1216_v46 = vld [vmem:[%s8405_s11 + $0x1ee0] sm:$0xff]  ;;  %1213 = vst [vmem:[%s8410_s4 + $0xf60] sm:$0xff] %v1212_v44  ;;  %1215 = vst [vmem:[%s8410_s4 + $0xf68] sm:$0xff] %v1214_v45  ;;  %v1218_v47 = vld [vmem:[%s8405_s11 + $0x1ee8] sm:$0xff] }
 0x14b   : > { %1217 = vst [vmem:[%s8410_s4 + $0xf70] sm:$0xff] %v1216_v46  ;;  %v1220_v48 = vld [vmem:[%s8405_s11 + $0x1f00] sm:$0xff]  ;;  %v1222_v49 = vld [vmem:[%s8405_s11 + $0x1f08] sm:$0xff]  ;;  %1219 = vst [vmem:[%s8410_s4 + $0xf78] sm:$0xff] %v1218_v47 }
 0x14c   : > { %1221 = vst [vmem:[%s8410_s4 + $0xf80] sm:$0xff] %v1220_v48  ;;  %1223 = vst [vmem:[%s8410_s4 + $0xf88] sm:$0xff] %v1222_v49  ;;  %v1224_v50 = vld [vmem:[%s8405_s11 + $0x1f20] sm:$0xff]  ;;  %v1226_v51 = vld [vmem:[%s8405_s11 + $0x1f28] sm:$0xff] }
 0x14d   : > { %v1228_v52 = vld [vmem:[%s8405_s11 + $0x1f40] sm:$0xff]  ;;  %1225 = vst [vmem:[%s8410_s4 + $0xf90] sm:$0xff] %v1224_v50  ;;  %1227 = vst [vmem:[%s8410_s4 + $0xf98] sm:$0xff] %v1226_v51  ;;  %v1230_v53 = vld [vmem:[%s8405_s11 + $0x1f48] sm:$0xff] }
 0x14e   : > { %1229 = vst [vmem:[%s8410_s4 + $0xfa0] sm:$0xff] %v1228_v52  ;;  %v1232_v54 = vld [vmem:[%s8405_s11 + $0x1f60] sm:$0xff]  ;;  %v1234_v55 = vld [vmem:[%s8405_s11 + $0x1f68] sm:$0xff]  ;;  %1231 = vst [vmem:[%s8410_s4 + $0xfa8] sm:$0xff] %v1230_v53 }
 0x14f   : > { %1233 = vst [vmem:[%s8410_s4 + $0xfb0] sm:$0xff] %v1232_v54  ;;  %1235 = vst [vmem:[%s8410_s4 + $0xfb8] sm:$0xff] %v1234_v55  ;;  %v1236_v56 = vld [vmem:[%s8405_s11 + $0x1f80] sm:$0xff]  ;;  %v1238_v57 = vld [vmem:[%s8405_s11 + $0x1f88] sm:$0xff] }
 0x150   : > { %v1240_v58 = vld [vmem:[%s8405_s11 + $0x1fa0] sm:$0xff]  ;;  %1237 = vst [vmem:[%s8410_s4 + $0xfc0] sm:$0xff] %v1236_v56  ;;  %1239 = vst [vmem:[%s8410_s4 + $0xfc8] sm:$0xff] %v1238_v57  ;;  %v1242_v59 = vld [vmem:[%s8405_s11 + $0x1fa8] sm:$0xff] }
 0x151   : > { %1241 = vst [vmem:[%s8410_s4 + $0xfd0] sm:$0xff] %v1240_v58  ;;  %v1244_v60 = vld [vmem:[%s8405_s11 + $0x1fc0] sm:$0xff]  ;;  %v1246_v61 = vld [vmem:[%s8405_s11 + $0x1fc8] sm:$0xff]  ;;  %1243 = vst [vmem:[%s8410_s4 + $0xfd8] sm:$0xff] %v1242_v59 }
 0x152   : > { %1245 = vst [vmem:[%s8410_s4 + $0xfe0] sm:$0xff] %v1244_v60  ;;  %1247 = vst [vmem:[%s8410_s4 + $0xfe8] sm:$0xff] %v1246_v61  ;;  %v1248_v62 = vld [vmem:[%s8405_s11 + $0x1fe0] sm:$0xff]  ;;  %v1250_v63 = vld [vmem:[%s8405_s11 + $0x1fe8] sm:$0xff] }
 0x153   : > { %1249 = vst [vmem:[%s8410_s4 + $0xff0] sm:$0xff] %v1248_v62  ;;  %1251 = vst [vmem:[%s8410_s4 + $0xff8] sm:$0xff] %v1250_v63 }
 0x154 PF: > { %s1258_s0 = sand.u32 1, %s8181_s27   ;;  %s1260_s23 = sand.u32 1, %s8141_s17  }
 0x155   : > { %s6365_s29 = sshll.u32 %s1260_s23, 3  ;;  %s6931_s8 = sshll.u32 %s8177_s26, 7 }
 0x156   : > { %s9439_s12 = scalar_lea.hbm %s10454_s2, %s6931_s8  ;;  %s1262_s11 = scalar_lea.vmem [#allocation7], %s6365_s29 }
 0x157   : > { %s1270_s9 = sshll.u32 %s1262_s11, 4  ;;  %s9443_s20 = sshll.u32 %s1260_s23, 6  ;;  %s9441_s9 = int_to_ptr.vmem [resolvable:$true] %s1270_s9 }
 0x158   : > { %s9445_s7 = scalar_lea.sflag [#allocation8], %s1258_s0  ;;  %s7983_s15 = scalar_lea.hbm %s9439_s12, 128 }
 0x159   : > { %p7984_p3 = scmp.ne.s32.totalorder %s9439_s12, %s7983_s15  ;;  %p10494_p8 = scmp.ne.s32.totalorder %s10485_s30, 0 }
 0x15a   : > { %s7987_s5 = scalar_lea.hbm %s10454_s2, 256  ;;  %p7988_p6 = scmp.lt.u32.totalorder %s9439_s12, %s10454_s2 }
 0x15b   : > { %p7985_p12 = pnand %p7984_p3, %p10494_p8  ;;  %p7989_p9 = scmp.lt.u32.totalorder %s7987_s5, %s7983_s15 }
 0x15c   : > { %p7991_p13 = scmp.lt.u32.totalorder %s7983_s15, %s9439_s12 }
 0x15d   : > { %p7986_p0 = pneg %p7985_p12  ;;  %p7990_p10 = por %p7989_p9, %p7988_p6 }
 0x15f   : > { %p7992_p5 = por %p7991_p13, %p7990_p10 }
 0x161   : > { %p7993_p2 = pnand %p7992_p5, %p7986_p0 }
 0x163   : > { %7996 = shalt.err (!%p7993_p2)
}
 0x164   : > { %s7997_s0 = scalar_lea.vmem %s9441_s9, 128  ;;  %s8187_s23 = smov [#allocation7]  }
 0x165   : > { %p7998_p7 = scmp.ne.s32.totalorder %s9441_s9, %s7997_s0  ;;  %s8001_s29 = sshll.u32 %s8187_s23, 4  ;;  %s8002_s29 = int_to_ptr.vmem [resolvable:$false] %s8001_s29 }
 0x166   : > { %s8003_s6 = scalar_lea.vmem %s8002_s29, 256  ;;  %p8004_p4 = scmp.lt.s32.totalorder %s9441_s9, %s8002_s29 }
 0x167   : > { %p7999_p11 = pnand %p7998_p7, %p10494_p8  ;;  %p8005_p3 = scmp.lt.s32.totalorder %s8003_s6, %s7997_s0 }
 0x169   : > { %p8000_p1 = pneg %p7999_p11  ;;  %p8006_p12 = por %p8005_p3, %p8004_p4 }
 0x16b   : > { %p8007_p6 = pnand %p8006_p12, %p8000_p1 }
 0x16d   : > { %8010 = shalt.err (!%p8007_p6)
}
 0x16e   : > { %7047 = dma.hbm_to_vmem [thread:$0]  (%p10494_p8), %s9439_s12, 128, %s9441_s9, %s9445_s7  }
 0x16f   : > { %s6932_s13 = sshll.u32 %s8177_s26, 9  ;;  %s1281_s11 = scalar_lea.vmem [#allocation9], %s9443_s20 }
 0x170   : > { %s1288_s15 = sshll.u32 %s1281_s11, 4  ;;  %s9474_s5 = scalar_lea.hbm %s10455_s3, %s6932_s13  ;;  %s9476_s15 = int_to_ptr.vmem [resolvable:$true] %s1288_s15 }
 0x171   : > { %s8011_s4 = scalar_lea.hbm %s9474_s5, 1024  ;;  %s8015_s20 = scalar_lea.hbm %s10455_s3, 2048 }
 0x172   : > { %p8012_p0 = scmp.ne.s32.totalorder %s9474_s5, %s8011_s4  ;;  %p8016_p13 = scmp.lt.u32.totalorder %s9474_s5, %s10455_s3 }
 0x173   : > { %p8017_p5 = scmp.lt.u32.totalorder %s8015_s20, %s8011_s4  ;;  %p8019_p7 = scmp.lt.u32.totalorder %s8011_s4, %s9474_s5 }
 0x174   : > { %p8013_p9 = pnand %p8012_p0, %p10494_p8 }
 0x175   : > { %p8018_p2 = por %p8017_p5, %p8016_p13 }
 0x176   : > { %p8014_p10 = pneg %p8013_p9 }
 0x177   : > { %p8020_p11 = por %p8019_p7, %p8018_p2 }
 0x179   : > { %p8021_p1 = pnand %p8020_p11, %p8014_p10 }
 0x17b   : > { %8024 = shalt.err (!%p8021_p1)
}
 0x17c   : > { %s8025_s23 = scalar_lea.vmem %s9476_s15, 1024  ;;  %s8188_s29 = smov [#allocation9]  }
 0x17d   : > { %p8026_p4 = scmp.ne.s32.totalorder %s9476_s15, %s8025_s23  ;;  %s8029_s6 = sshll.u32 %s8188_s29, 4  ;;  %s8030_s6 = int_to_ptr.vmem [resolvable:$false] %s8029_s6 }
 0x17e   : > { %s8031_s13 = scalar_lea.vmem %s8030_s6, 2048  ;;  %p8032_p6 = scmp.lt.s32.totalorder %s9476_s15, %s8030_s6 }
 0x17f   : > { %p8027_p3 = pnand %p8026_p4, %p10494_p8  ;;  %p8033_p0 = scmp.lt.s32.totalorder %s8031_s13, %s8025_s23 }
 0x181   : > { %p8028_p12 = pneg %p8027_p3  ;;  %p8034_p9 = por %p8033_p0, %p8032_p6 }
 0x183   : > { %p8035_p13 = pnand %p8034_p9, %p8028_p12 }
 0x185   : > { %8038 = shalt.err (!%p8035_p13)
}
 0x186   : > { %s8189_s11 = smov 512   ;;  %s8190_s22 = smov 32  }
 0x187   : > { %7048 = dma.hbm_to_vmem [thread:$0]  (%p10494_p8), %s9474_s5, 1024, %s9476_s15, %s9445_s7, %s8185_s14, %s8189_s11, %s8190_s22  }
 0x188 PF: > { %p6371_p10 = scmp.ge.s32.totalorder %s8181_s27, 1  ;;  %p1296_p5 = scmp.lt.s32.totalorder %s8181_s27, 9 }
 0x18a   : > { %p1297_p2 = pnand %p6371_p10, %p1296_p5 }
 0x18b   : > { %s1302_s24 = sand.u32 (!%p1297_p2), 1, %s8157_s21   ;;  %p10495_p7 = scmp.ne.s32.totalorder (!%p1297_p2), %s10481_s10, 0 }
 0x18c   : > { %1300 = sbr.rel (%p1297_p2) target bundleno = 1331 (0x533), region = 55  ;;  %s6372_s4 = sshll.u32 (!%p1297_p2), %s1302_s24, 8 }
 0x18d   : > { %s1303_s12 = scalar_lea.sflag (!%p1297_p2), [#allocation4], %s1302_s24  ;;  %s9504_s9 = scalar_lea.vmem (!%p1297_p2), [#allocation3], %s6372_s4 }
 0x193   : > { %8120 = dma.done.wait (%p10495_p7), %s1303_s12, 4096  }
 0x194   : > { %8122 = vsyncadd (%p10495_p7), %s1303_s12, 4294963200  ;;  %s10496_s30 = sld [smem:[#allocation23_spill]]  ;;  %s1312_s14 = sand.u32 1, %s8145_s18  }
 0x195   : > { %s1318_s7 = sand.u32 1, %s8284_s28   ;;  %s6373_s15 = sshll.u32 %s1312_s14, 12 }
 0x196   : > { %s9513_s5 = sand.u32 1, %s8137_s16   ;;  %s9516_s8 = scalar_lea.vmem [#allocation6], %s6373_s15 }
 0x197   : > { %s6374_s20 = sshll.u32 %s9513_s5, 3  ;;  %s1319_s0 = scalar_lea.sflag [#allocation8], %s1318_s7 }
 0x198   : > { %s9518_s23 = scalar_lea.vmem [#allocation7], %s6374_s20 }
 0x19a   : > { %p10497_p8 = scmp.ne.s32.totalorder %s10496_s30, 0 }
 0x19c   : > { %8124 = dma.done.wait (%p10497_p8), %s1319_s0, 1152  }
 0x19d   : > { %8126 = vsyncadd (%p10497_p8), %s1319_s0, 4294966144  ;;  %s6375_s10 = sshll.u32 %s9513_s5, 6  ;;  %s9527_s18 = scalar_lea.vmem [#allocation10], %s6374_s20 }
 0x19e   : > { %s9525_s29 = scalar_lea.vmem [#allocation9], %s6375_s10  ;;  %s10498_s28 = sld [smem:[#allocation16_spill]] }
 0x1a4   : > { %p6377_p11 = scmp.ne.s32.totalorder %s10498_s28, 0 }
 0x1a5   : > { %v8191_v0 = vmov (!%p6377_p11), 0.0  }
 0x1a6   : > { %1379 = sbr.rel (%p6377_p11) target bundleno = 430 (0x1ae), region = 75  ;;  %1380 = vst [vmem:[#allocation2] sm:$0xff] (!%p6377_p11), %v8191_v0  ;;  %1381 = vst [vmem:[#allocation2 + $0x8] sm:$0xff] (!%p6377_p11), %v8191_v0 }
 0x1a7   : > { %1382 = vst [vmem:[#allocation2 + $0x10] sm:$0xff] (!%p6377_p11), %v8191_v0  ;;  %1383 = vst [vmem:[#allocation2 + $0x18] sm:$0xff] (!%p6377_p11), %v8191_v0 }
 0x1a8   : > { %1384 = vst [vmem:[#allocation2 + $0x20] sm:$0xff] (!%p6377_p11), %v8191_v0  ;;  %1385 = vst [vmem:[#allocation2 + $0x28] sm:$0xff] (!%p6377_p11), %v8191_v0 }
 0x1a9   : > { %1386 = vst [vmem:[#allocation2 + $0x30] sm:$0xff] (!%p6377_p11), %v8191_v0  ;;  %1387 = vst [vmem:[#allocation2 + $0x38] sm:$0xff] (!%p6377_p11), %v8191_v0 }
 0x1aa   : > { %1388 = vst [vmem:[#allocation2 + $0x40] sm:$0xff] (!%p6377_p11), %v8191_v0  ;;  %1389 = vst [vmem:[#allocation2 + $0x48] sm:$0xff] (!%p6377_p11), %v8191_v0 }
 0x1ab   : > { %1390 = vst [vmem:[#allocation2 + $0x50] sm:$0xff] (!%p6377_p11), %v8191_v0  ;;  %1391 = vst [vmem:[#allocation2 + $0x58] sm:$0xff] (!%p6377_p11), %v8191_v0 }
 0x1ac   : > { %1392 = vst [vmem:[#allocation2 + $0x60] sm:$0xff] (!%p6377_p11), %v8191_v0  ;;  %1393 = vst [vmem:[#allocation2 + $0x68] sm:$0xff] (!%p6377_p11), %v8191_v0 }
 0x1ad   : > { %1394 = vst [vmem:[#allocation2 + $0x70] sm:$0xff] %v8191_v0  ;;  %1395 = vst [vmem:[#allocation2 + $0x78] sm:$0xff] %v8191_v0 }
 0x1ae PF: > { %v7171_v1 = vld [vmem:[%s9516_s8 + $0x4] ss:$16 sps:$4 sm:$0xff]   ;;  %v7173_v2 = vld [vmem:[%s9516_s8 + $0xc] ss:$16 sps:$4 sm:$0xff]   ;;  %v7175_v3 = vld [vmem:[%s9516_s8] ss:$16 sps:$4 sm:$0xff]  }
 0x1af   : > { %4676 = vmatprep.subr.bf16.mxu0 %v7171_v1  ;;  %v7176_v4 = vld [vmem:[%s9516_s8 + $0x8] ss:$16 sps:$4 sm:$0xff]   ;;  %5100 = vmatprep.subr.bf16.mxu1 %v7173_v2  ;;  %v7177_v5 = vld [vmem:[%s9516_s8 + $0x24] ss:$16 sps:$4 sm:$0xff]   ;;  %v7179_v6 = vld [vmem:[%s9516_s8 + $0x2c] ss:$16 sps:$4 sm:$0xff]  }
 0x1b0   : > { %4677 = vmatpush1.bf16.msra.mxu0 %v7175_v3  ;;  %5101 = vmatpush1.bf16.msra.mxu1 %v7176_v4  ;;  %v7181_v7 = vld [vmem:[%s9516_s8 + $0x20] ss:$16 sps:$4 sm:$0xff]   ;;  %v7182_v8 = vld [vmem:[%s9516_s8 + $0x28] ss:$16 sps:$4 sm:$0xff]   ;;  %v7183_v9 = vld [vmem:[%s9516_s8 + $0x44] ss:$16 sps:$4 sm:$0xff]  }
 0x1b1   : > { %4678 = vmatprep.subr.bf16.mxu0 %v7177_v5  ;;  %5102 = vmatprep.subr.bf16.mxu1 %v7179_v6  ;;  %v7185_v10 = vld [vmem:[%s9516_s8 + $0x4c] ss:$16 sps:$4 sm:$0xff]   ;;  %v7187_v11 = vld [vmem:[%s9516_s8 + $0x40] ss:$16 sps:$4 sm:$0xff]   ;;  %v7188_v12 = vld [vmem:[%s9516_s8 + $0x48] ss:$16 sps:$4 sm:$0xff]  }
 0x1b2   : > { %v7189_v13 = vld [vmem:[%s9516_s8 + $0x64] ss:$16 sps:$4 sm:$0xff]   ;;  %v7191_v14 = vld [vmem:[%s9516_s8 + $0x6c] ss:$16 sps:$4 sm:$0xff]   ;;  %v7193_v15 = vld [vmem:[%s9516_s8 + $0x60] ss:$16 sps:$4 sm:$0xff]  }
 0x1b3   : > { %v7194_v16 = vld [vmem:[%s9516_s8 + $0x68] ss:$16 sps:$4 sm:$0xff]   ;;  %v7195_v17 = vld [vmem:[%s9516_s8 + $0x84] ss:$16 sps:$4 sm:$0xff]   ;;  %v7197_v18 = vld [vmem:[%s9516_s8 + $0x8c] ss:$16 sps:$4 sm:$0xff]  }
 0x1b4   : > { %4679 = vmatpush1.bf16.msra.mxu0 %v7181_v7  ;;  %5103 = vmatpush1.bf16.msra.mxu1 %v7182_v8  ;;  %v7199_v19 = vld [vmem:[%s9516_s8 + $0x80] ss:$16 sps:$4 sm:$0xff]   ;;  %v7200_v20 = vld [vmem:[%s9516_s8 + $0x88] ss:$16 sps:$4 sm:$0xff]   ;;  %v7201_v21 = vld [vmem:[%s9516_s8 + $0xa4] ss:$16 sps:$4 sm:$0xff]  }
 0x1b5   : > { %4680 = vmatprep.subr.bf16.mxu0 %v7183_v9  ;;  %5104 = vmatprep.subr.bf16.mxu1 %v7185_v10  ;;  %v7203_v22 = vld [vmem:[%s9516_s8 + $0xac] ss:$16 sps:$4 sm:$0xff]   ;;  %v7205_v23 = vld [vmem:[%s9516_s8 + $0xa0] ss:$16 sps:$4 sm:$0xff]   ;;  %v7206_v24 = vld [vmem:[%s9516_s8 + $0xa8] ss:$16 sps:$4 sm:$0xff]  }
 0x1b6   : > { %v7207_v25 = vld [vmem:[%s9516_s8 + $0xc4] ss:$16 sps:$4 sm:$0xff]   ;;  %v7209_v26 = vld [vmem:[%s9516_s8 + $0xcc] ss:$16 sps:$4 sm:$0xff]   ;;  %v7211_v27 = vld [vmem:[%s9516_s8 + $0xc0] ss:$16 sps:$4 sm:$0xff]  }
 0x1b7   : > { %v7212_v28 = vld [vmem:[%s9516_s8 + $0xc8] ss:$16 sps:$4 sm:$0xff]   ;;  %v7213_v29 = vld [vmem:[%s9516_s8 + $0xe4] ss:$16 sps:$4 sm:$0xff]   ;;  %v7215_v30 = vld [vmem:[%s9516_s8 + $0xec] ss:$16 sps:$4 sm:$0xff]  }
 0x1b8   : > { %4681 = vmatpush1.bf16.msra.mxu0 %v7187_v11  ;;  %5105 = vmatpush1.bf16.msra.mxu1 %v7188_v12  ;;  %v7217_v31 = vld [vmem:[%s9516_s8 + $0xe0] ss:$16 sps:$4 sm:$0xff]   ;;  %v7218_v32 = vld [vmem:[%s9516_s8 + $0xe8] ss:$16 sps:$4 sm:$0xff]   ;;  %v7219_v33 = vld [vmem:[%s9516_s8 + $0x104] ss:$16 sps:$4 sm:$0xff]  }
 0x1b9   : > { %4682 = vmatprep.subr.bf16.mxu0 %v7189_v13  ;;  %5106 = vmatprep.subr.bf16.mxu1 %v7191_v14  ;;  %v7221_v34 = vld [vmem:[%s9516_s8 + $0x10c] ss:$16 sps:$4 sm:$0xff]   ;;  %v7223_v35 = vld [vmem:[%s9516_s8 + $0x100] ss:$16 sps:$4 sm:$0xff]   ;;  %v7224_v36 = vld [vmem:[%s9516_s8 + $0x108] ss:$16 sps:$4 sm:$0xff]  }
 0x1ba   : > { %v7225_v37 = vld [vmem:[%s9516_s8 + $0x124] ss:$16 sps:$4 sm:$0xff]   ;;  %v7227_v38 = vld [vmem:[%s9516_s8 + $0x12c] ss:$16 sps:$4 sm:$0xff]   ;;  %v7229_v39 = vld [vmem:[%s9516_s8 + $0x120] ss:$16 sps:$4 sm:$0xff]  }
 0x1bb   : > { %v7230_v40 = vld [vmem:[%s9516_s8 + $0x128] ss:$16 sps:$4 sm:$0xff]   ;;  %v7231_v41 = vld [vmem:[%s9516_s8 + $0x144] ss:$16 sps:$4 sm:$0xff]   ;;  %v7233_v42 = vld [vmem:[%s9516_s8 + $0x14c] ss:$16 sps:$4 sm:$0xff]  }
 0x1bc   : > { %4683 = vmatpush1.bf16.msra.mxu0 %v7193_v15  ;;  %5107 = vmatpush1.bf16.msra.mxu1 %v7194_v16  ;;  %v7235_v43 = vld [vmem:[%s9516_s8 + $0x140] ss:$16 sps:$4 sm:$0xff]   ;;  %v7236_v44 = vld [vmem:[%s9516_s8 + $0x148] ss:$16 sps:$4 sm:$0xff]   ;;  %v7237_v45 = vld [vmem:[%s9516_s8 + $0x164] ss:$16 sps:$4 sm:$0xff]  }
 0x1bd   : > { %4684 = vmatprep.subr.bf16.mxu0 %v7195_v17  ;;  %5108 = vmatprep.subr.bf16.mxu1 %v7197_v18  ;;  %v7239_v46 = vld [vmem:[%s9516_s8 + $0x16c] ss:$16 sps:$4 sm:$0xff]   ;;  %v1412_v47 = vld [vmem:[%s9504_s9] sm:$0xff]  ;;  %v7242_v50 = vld [vmem:[%s9516_s8 + $0x168] ss:$16 sps:$4 sm:$0xff]   ;;  %s10499_s6 = sld [smem:[#allocation16_spill]] }
 0x1be   : > { %v1420_v48 = vld [vmem:[%s9504_s9 + $0x40] sm:$0xff]  ;;  %v7245_v53 = vld [vmem:[%s9516_s8 + $0x18c] ss:$16 sps:$4 sm:$0xff]   ;;  %v7248_v55 = vld [vmem:[%s9516_s8 + $0x188] ss:$16 sps:$4 sm:$0xff]  }
 0x1bf   : > { %v7241_v49 = vld [vmem:[%s9516_s8 + $0x160] ss:$16 sps:$4 sm:$0xff]   ;;  %v6379_v51 = vcombine.high %v1412_v47, %v1420_v48  ;;  %v7243_v52 = vld [vmem:[%s9516_s8 + $0x184] ss:$16 sps:$4 sm:$0xff]   ;;  %v7251_v57 = vld [vmem:[%s9516_s8 + $0x1ac] ss:$16 sps:$4 sm:$0xff]   ;;  %v6378_v6 = vcombine.low %v1412_v47, %v1420_v48 }
 0x1c0   : > { %4685 = vmatpush1.bf16.msra.mxu0 %v7199_v19  ;;  %5109 = vmatpush1.bf16.msra.mxu1 %v7200_v20  ;;  %v7247_v54 = vld [vmem:[%s9516_s8 + $0x180] ss:$16 sps:$4 sm:$0xff]   ;;  %v7249_v56 = vld [vmem:[%s9516_s8 + $0x1a4] ss:$16 sps:$4 sm:$0xff]   ;;  %v7254_v59 = vld [vmem:[%s9516_s8 + $0x1a8] ss:$16 sps:$4 sm:$0xff]  }
 0x1c1   : > { %4686 = vmatprep.subr.bf16.mxu0 %v7201_v21  ;;  %5110 = vmatprep.subr.bf16.mxu1 %v7203_v22  ;;  %v7253_v58 = vld [vmem:[%s9516_s8 + $0x1a0] ss:$16 sps:$4 sm:$0xff]   ;;  %v7255_v60 = vld [vmem:[%s9516_s8 + $0x1c4] ss:$16 sps:$4 sm:$0xff]   ;;  %v7257_v61 = vld [vmem:[%s9516_s8 + $0x1cc] ss:$16 sps:$4 sm:$0xff]  }
 0x1c2   : > { %4708 = vmatprep.mubr.bf16.mxu0 %v6379_v51  ;;  %5132 = vmatprep.mubr.bf16.mxu1 %v6379_v51  ;;  %v7259_v62 = vld [vmem:[%s9516_s8 + $0x1c0] ss:$16 sps:$4 sm:$0xff]   ;;  %v7260_v63 = vld [vmem:[%s9516_s8 + $0x1c8] ss:$16 sps:$4 sm:$0xff]   ;;  %v7261_v0 = vld [vmem:[%s9516_s8 + $0x1e4] ss:$16 sps:$4 sm:$0xff]  }
 0x1c3   : > { %v7263_v1 = vld [vmem:[%s9516_s8 + $0x1ec] ss:$16 sps:$4 sm:$0xff]   ;;  %v7265_v2 = vld [vmem:[%s9516_s8 + $0x1e0] ss:$16 sps:$4 sm:$0xff]   ;;  %v7266_v3 = vld [vmem:[%s9516_s8 + $0x1e8] ss:$16 sps:$4 sm:$0xff]  }
 0x1c4   : > { %4687 = vmatpush1.bf16.msra.mxu0 %v7205_v23  ;;  %5111 = vmatpush1.bf16.msra.mxu1 %v7206_v24  ;;  %v7269_v4 = vld [vmem:[%s9516_s8 + $0x204] ss:$16 sps:$4 sm:$0xff]   ;;  %v7272_v5 = vld [vmem:[%s9516_s8 + $0x20c] ss:$16 sps:$4 sm:$0xff]   ;;  %v7267_v7 = vld [vmem:[%s9516_s8 + $0x200] ss:$16 sps:$4 sm:$0xff]  }
 0x1c5   : > { %4688 = vmatprep.subr.bf16.mxu0 %v7207_v25  ;;  %5112 = vmatprep.subr.bf16.mxu1 %v7209_v26  ;;  %v7270_v8 = vld [vmem:[%s9516_s8 + $0x208] ss:$16 sps:$4 sm:$0xff]   ;;  %v7275_v9 = vld [vmem:[%s9516_s8 + $0x224] ss:$16 sps:$4 sm:$0xff]   ;;  %v7278_v10 = vld [vmem:[%s9516_s8 + $0x22c] ss:$16 sps:$4 sm:$0xff]  }
 0x1c6   : > { %v7273_v11 = vld [vmem:[%s9516_s8 + $0x220] ss:$16 sps:$4 sm:$0xff]   ;;  %v7276_v12 = vld [vmem:[%s9516_s8 + $0x228] ss:$16 sps:$4 sm:$0xff]   ;;  %v7281_v13 = vld [vmem:[%s9516_s8 + $0x244] ss:$16 sps:$4 sm:$0xff]  }
 0x1c7   : > { %v7284_v14 = vld [vmem:[%s9516_s8 + $0x24c] ss:$16 sps:$4 sm:$0xff]   ;;  %v7279_v15 = vld [vmem:[%s9516_s8 + $0x240] ss:$16 sps:$4 sm:$0xff]   ;;  %v7282_v16 = vld [vmem:[%s9516_s8 + $0x248] ss:$16 sps:$4 sm:$0xff]  }
 0x1c8   : > { %4689 = vmatpush1.bf16.msra.mxu0 %v7211_v27  ;;  %5113 = vmatpush1.bf16.msra.mxu1 %v7212_v28  ;;  %v7287_v17 = vld [vmem:[%s9516_s8 + $0x264] ss:$16 sps:$4 sm:$0xff]   ;;  %v7290_v18 = vld [vmem:[%s9516_s8 + $0x26c] ss:$16 sps:$4 sm:$0xff]   ;;  %v7285_v19 = vld [vmem:[%s9516_s8 + $0x260] ss:$16 sps:$4 sm:$0xff]  }
 0x1c9   : > { %4690 = vmatprep.subr.bf16.mxu0 %v7213_v29  ;;  %5114 = vmatprep.subr.bf16.mxu1 %v7215_v30  ;;  %v7288_v20 = vld [vmem:[%s9516_s8 + $0x268] ss:$16 sps:$4 sm:$0xff]   ;;  %v7293_v21 = vld [vmem:[%s9516_s8 + $0x284] ss:$16 sps:$4 sm:$0xff]   ;;  %v7296_v22 = vld [vmem:[%s9516_s8 + $0x28c] ss:$16 sps:$4 sm:$0xff]  }
 0x1ca   : > { %v7291_v23 = vld [vmem:[%s9516_s8 + $0x280] ss:$16 sps:$4 sm:$0xff]   ;;  %v7294_v24 = vld [vmem:[%s9516_s8 + $0x288] ss:$16 sps:$4 sm:$0xff]   ;;  %v7299_v25 = vld [vmem:[%s9516_s8 + $0x2a4] ss:$16 sps:$4 sm:$0xff]  }
 0x1cb   : > { %v7302_v26 = vld [vmem:[%s9516_s8 + $0x2ac] ss:$16 sps:$4 sm:$0xff]   ;;  %v1428_v27 = vld [vmem:[%s9504_s9 + $0x80] sm:$0xff]  ;;  %v7318_v47 = vld [vmem:[%s9516_s8 + $0x308] ss:$16 sps:$4 sm:$0xff]   ;;  %p6922_p1 = scmp.ne.s32.totalorder %s10499_s6, 3 }
 0x1cc   : > { %4691 = vmatpush1.bf16.msra.mxu0 %v7217_v31  ;;  %5115 = vmatpush1.bf16.msra.mxu1 %v7218_v32  ;;  %v1436_v28 = vld [vmem:[%s9504_s9 + $0xc0] sm:$0xff]  ;;  %v7300_v31 = vld [vmem:[%s9516_s8 + $0x2a8] ss:$16 sps:$4 sm:$0xff]  }
 0x1cd   : > { %4692 = vmatprep.subr.bf16.mxu0 %v7219_v33  ;;  %5116 = vmatprep.subr.bf16.mxu1 %v7221_v34  ;;  %v6395_v29 = vcombine.high %v1428_v27, %v1436_v28  ;;  %v7297_v30 = vld [vmem:[%s9516_s8 + $0x2a0] ss:$16 sps:$4 sm:$0xff]   ;;  %v6394_v32 = vcombine.low %v1428_v27, %v1436_v28  ;;  %v7305_v33 = vld [vmem:[%s9516_s8 + $0x2c4] ss:$16 sps:$4 sm:$0xff]   ;;  %v7308_v34 = vld [vmem:[%s9516_s8 + $0x2cc] ss:$16 sps:$4 sm:$0xff]  }
 0x1ce   : > { %v7323_v48 = vld [vmem:[%s9516_s8 + $0x324] ss:$16 sps:$4 sm:$0xff]   ;;  %v7324_v51 = vld [vmem:[%s9516_s8 + $0x328] ss:$16 sps:$4 sm:$0xff]  }
 0x1cf   : > { %v9688_v28 = vld [vmem:[%s9504_s9 + $0x50] sm:$0xff] }
 0x1d0   : > { %4693 = vmatpush1.bf16.msra.mxu0 %v7223_v35  ;;  %5117 = vmatpush1.bf16.msra.mxu1 %v7224_v36  ;;  %v9625_v35 = vld [vmem:[%s9504_s9 + $0x8] sm:$0xff] }
 0x1d1   : > { %4694 = vmatprep.subr.bf16.mxu0 %v7225_v37  ;;  %5118 = vmatprep.subr.bf16.mxu1 %v7227_v38  ;;  %v9628_v36 = vld [vmem:[%s9504_s9 + $0x48] sm:$0xff]  ;;  %v7303_v37 = vld [vmem:[%s9516_s8 + $0x2c0] ss:$16 sps:$4 sm:$0xff]  }
 0x1d2   : > { %v7306_v38 = vld [vmem:[%s9516_s8 + $0x2c8] ss:$16 sps:$4 sm:$0xff]  }
 0x1d4   : > { %4695 = vmatpush1.bf16.msra.mxu0 %v7229_v39  ;;  %5119 = vmatpush1.bf16.msra.mxu1 %v7230_v40  ;;  %v6381_v39 = vcombine.high %v9625_v35, %v9628_v36  ;;  %v7311_v40 = vld [vmem:[%s9516_s8 + $0x2e4] ss:$16 sps:$4 sm:$0xff]  }
 0x1d5   : > { %4696 = vmatprep.subr.bf16.mxu0 %v7231_v41  ;;  %5120 = vmatprep.subr.bf16.mxu1 %v7233_v42  ;;  %v7314_v41 = vld [vmem:[%s9516_s8 + $0x2ec] ss:$16 sps:$4 sm:$0xff]   ;;  %v7309_v42 = vld [vmem:[%s9516_s8 + $0x2e0] ss:$16 sps:$4 sm:$0xff]  }
 0x1d8   : > { %4697 = vmatpush1.bf16.msra.mxu0 %v7235_v43  ;;  %5121 = vmatpush1.bf16.msra.mxu1 %v7236_v44  ;;  %v7312_v43 = vld [vmem:[%s9516_s8 + $0x2e8] ss:$16 sps:$4 sm:$0xff]   ;;  %v7317_v44 = vld [vmem:[%s9516_s8 + $0x304] ss:$16 sps:$4 sm:$0xff]  }
 0x1d9   : > { %4698 = vmatprep.subr.bf16.mxu0 %v7237_v45  ;;  %5122 = vmatprep.subr.bf16.mxu1 %v7239_v46  ;;  %v7320_v45 = vld [vmem:[%s9516_s8 + $0x30c] ss:$16 sps:$4 sm:$0xff]   ;;  %v7315_v46 = vld [vmem:[%s9516_s8 + $0x300] ss:$16 sps:$4 sm:$0xff]  }
 0x1dc   : > { %4699 = vmatpush1.bf16.msra.mxu0 %v7241_v49  ;;  %5123 = vmatpush1.bf16.msra.mxu1 %v7242_v50  ;;  %v7326_v49 = vld [vmem:[%s9516_s8 + $0x32c] ss:$16 sps:$4 sm:$0xff]   ;;  %v7321_v50 = vld [vmem:[%s9516_s8 + $0x320] ss:$16 sps:$4 sm:$0xff]  }
 0x1dd   : > { %4700 = vmatprep.subr.bf16.mxu0 %v7243_v52  ;;  %5124 = vmatprep.subr.bf16.mxu1 %v7245_v53  ;;  %v7329_v52 = vld [vmem:[%s9516_s8 + $0x344] ss:$16 sps:$4 sm:$0xff]   ;;  %v7332_v53 = vld [vmem:[%s9516_s8 + $0x34c] ss:$16 sps:$4 sm:$0xff]  }
 0x1e0   : > { %4701 = vmatpush1.bf16.msra.mxu0 %v7247_v54  ;;  %5125 = vmatpush1.bf16.msra.mxu1 %v7248_v55  ;;  %v7327_v54 = vld [vmem:[%s9516_s8 + $0x340] ss:$16 sps:$4 sm:$0xff]   ;;  %v7330_v55 = vld [vmem:[%s9516_s8 + $0x348] ss:$16 sps:$4 sm:$0xff]  }
 0x1e1   : > { %4702 = vmatprep.subr.bf16.mxu0 %v7249_v56  ;;  %5126 = vmatprep.subr.bf16.mxu1 %v7251_v57  ;;  %v7335_v56 = vld [vmem:[%s9516_s8 + $0x364] ss:$16 sps:$4 sm:$0xff]   ;;  %v7338_v57 = vld [vmem:[%s9516_s8 + $0x36c] ss:$16 sps:$4 sm:$0xff]  }
 0x1e4   : > { %4703 = vmatpush1.bf16.msra.mxu0 %v7253_v58  ;;  %5127 = vmatpush1.bf16.msra.mxu1 %v7254_v59  ;;  %v7333_v58 = vld [vmem:[%s9516_s8 + $0x360] ss:$16 sps:$4 sm:$0xff]   ;;  %v7336_v59 = vld [vmem:[%s9516_s8 + $0x368] ss:$16 sps:$4 sm:$0xff]  }
 0x1e5   : > { %4704 = vmatprep.subr.bf16.mxu0 %v7255_v60  ;;  %5128 = vmatprep.subr.bf16.mxu1 %v7257_v61  ;;  %v7341_v60 = vld [vmem:[%s9516_s8 + $0x384] ss:$16 sps:$4 sm:$0xff]   ;;  %v7344_v61 = vld [vmem:[%s9516_s8 + $0x38c] ss:$16 sps:$4 sm:$0xff]  }
 0x1e8   : > { %4705 = vmatpush1.bf16.msra.mxu0 %v7259_v62  ;;  %5129 = vmatpush1.bf16.msra.mxu1 %v7260_v63  ;;  %v7339_v62 = vld [vmem:[%s9516_s8 + $0x380] ss:$16 sps:$4 sm:$0xff]   ;;  %v7342_v63 = vld [vmem:[%s9516_s8 + $0x388] ss:$16 sps:$4 sm:$0xff]  }
 0x1e9   : > { %4706 = vmatprep.subr.bf16.mxu0 %v7261_v0  ;;  %5130 = vmatprep.subr.bf16.mxu1 %v7263_v1  ;;  %v7347_v0 = vld [vmem:[%s9516_s8 + $0x3a4] ss:$16 sps:$4 sm:$0xff]   ;;  %v7350_v1 = vld [vmem:[%s9516_s8 + $0x3ac] ss:$16 sps:$4 sm:$0xff]  }
 0x1ec   : > { %4707 = vmatpush1.bf16.msra.mxu0 %v7265_v2  ;;  %5131 = vmatpush1.bf16.msra.mxu1 %v7266_v3  ;;  %v7345_v2 = vld [vmem:[%s9516_s8 + $0x3a0] ss:$16 sps:$4 sm:$0xff]   ;;  %v7348_v3 = vld [vmem:[%s9516_s8 + $0x3a8] ss:$16 sps:$4 sm:$0xff]  }
 0x1ed   : > { %4729 = vmatprep.subr.bf16.mxu0 %v7269_v4  ;;  %5153 = vmatprep.subr.bf16.mxu1 %v7272_v5  ;;  %v7353_v4 = vld [vmem:[%s9516_s8 + $0x3c4] ss:$16 sps:$4 sm:$0xff]   ;;  %v7356_v5 = vld [vmem:[%s9516_s8 + $0x3cc] ss:$16 sps:$4 sm:$0xff]  }
 0x1ef   : > { %4709 = vmatmul.mubr.bf16.vlgmr.msra.gmra.mrb[0].mxu0 %v6378_v6  ;;  %5133 = vmatmul.mubr.bf16.vlgmr.msra.gmra.mrb[0].mxu1 %v6378_v6  ;;  %v7351_v6 = vld [vmem:[%s9516_s8 + $0x3c0] ss:$16 sps:$4 sm:$0xff]  }
 0x1f0   : > { %4730 = vmatpush1.bf16.msra.mxu0 %v7267_v7  ;;  %5154 = vmatpush1.bf16.msra.mxu1 %v7270_v8  ;;  %v7354_v7 = vld [vmem:[%s9516_s8 + $0x3c8] ss:$16 sps:$4 sm:$0xff]   ;;  %v7359_v8 = vld [vmem:[%s9516_s8 + $0x3e4] ss:$16 sps:$4 sm:$0xff]  }
 0x1f1   : > { %4731 = vmatprep.subr.bf16.mxu0 %v7275_v9  ;;  %5155 = vmatprep.subr.bf16.mxu1 %v7278_v10  ;;  %v7362_v9 = vld [vmem:[%s9516_s8 + $0x3ec] ss:$16 sps:$4 sm:$0xff]   ;;  %v7357_v10 = vld [vmem:[%s9516_s8 + $0x3e0] ss:$16 sps:$4 sm:$0xff]  }
 0x1f2   : > { %4718 = vmatprep.mubr.bf16.mxu0 %v6395_v29  ;;  %5142 = vmatprep.mubr.bf16.mxu1 %v6395_v29  ;;  %v7375_v29 = vld [vmem:[%s9516_s8 + $0x440] ss:$16 sps:$4 sm:$0xff]  }
 0x1f4   : > { %4732 = vmatpush1.bf16.msra.mxu0 %v7273_v11  ;;  %5156 = vmatpush1.bf16.msra.mxu1 %v7276_v12  ;;  %v7360_v11 = vld [vmem:[%s9516_s8 + $0x3e8] ss:$16 sps:$4 sm:$0xff]   ;;  %v7365_v12 = vld [vmem:[%s9516_s8 + $0x404] ss:$16 sps:$4 sm:$0xff]  }
 0x1f5   : > { %4733 = vmatprep.subr.bf16.mxu0 %v7281_v13  ;;  %5157 = vmatprep.subr.bf16.mxu1 %v7284_v14  ;;  %v7368_v13 = vld [vmem:[%s9516_s8 + $0x40c] ss:$16 sps:$4 sm:$0xff]   ;;  %v7363_v14 = vld [vmem:[%s9516_s8 + $0x400] ss:$16 sps:$4 sm:$0xff]  }
 0x1f7   : > { %4719 = vmatmul.mubr.bf16.gmra.mrb[4].mxu0 %v6394_v32  ;;  %5143 = vmatmul.mubr.bf16.gmra.mrb[4].mxu1 %v6394_v32  ;;  %v7386_v32 = vld [vmem:[%s9516_s8 + $0x46c] ss:$16 sps:$4 sm:$0xff]  }
 0x1f8   : > { %4734 = vmatpush1.bf16.msra.mxu0 %v7279_v15  ;;  %5158 = vmatpush1.bf16.msra.mxu1 %v7282_v16  ;;  %v7366_v15 = vld [vmem:[%s9516_s8 + $0x408] ss:$16 sps:$4 sm:$0xff]   ;;  %v6380_v16 = vcombine.low %v9625_v35, %v9628_v36  ;;  %v7389_v36 = vld [vmem:[%s9516_s8 + $0x484] ss:$16 sps:$4 sm:$0xff]  }
 0x1f9   : > { %4735 = vmatprep.subr.bf16.mxu0 %v7287_v17  ;;  %5159 = vmatprep.subr.bf16.mxu1 %v7290_v18  ;;  %v1429_v17 = vld [vmem:[%s9504_s9 + $0x88] sm:$0xff] }
 0x1fa   : > { %4761 = vmatprep.mubr.bf16.mxu0 %v6381_v39  ;;  %5185 = vmatprep.mubr.bf16.mxu1 %v6381_v39  ;;  %v1437_v18 = vld [vmem:[%s9504_s9 + $0xc8] sm:$0xff] }
 0x1fb   : > { %v6396_v27 = vcombine.low %v1429_v17, %v1437_v18  ;;  %v7384_v35 = vld [vmem:[%s9516_s8 + $0x468] ss:$16 sps:$4 sm:$0xff]  }
 0x1fc   : > { %4736 = vmatpush1.bf16.msra.mxu0 %v7285_v19  ;;  %5160 = vmatpush1.bf16.msra.mxu1 %v7288_v20  ;;  %v7371_v19 = vld [vmem:[%s9516_s8 + $0x424] ss:$16 sps:$4 sm:$0xff]   ;;  %v7374_v20 = vld [vmem:[%s9516_s8 + $0x42c] ss:$16 sps:$4 sm:$0xff]   ;;  %v7390_v39 = vld [vmem:[%s9516_s8 + $0x488] ss:$16 sps:$4 sm:$0xff]  }
 0x1fd   : > { %4737 = vmatprep.subr.bf16.mxu0 %v7293_v21  ;;  %5161 = vmatprep.subr.bf16.mxu1 %v7296_v22  ;;  %v6397_v21 = vcombine.high %v1429_v17, %v1437_v18  ;;  %v7369_v22 = vld [vmem:[%s9516_s8 + $0x420] ss:$16 sps:$4 sm:$0xff]   ;;  %v7458_v17 = vld [vmem:[%s9516_s8 + $0x5ec] ss:$16 sps:$4 sm:$0xff]  }
 0x1fe   : > { %v7453_v18 = vld [vmem:[%s9516_s8 + $0x5e0] ss:$16 sps:$4 sm:$0xff]  }
 0x200   : > { %4738 = vmatpush1.bf16.msra.mxu0 %v7291_v23  ;;  %5162 = vmatpush1.bf16.msra.mxu1 %v7294_v24  ;;  %v7372_v23 = vld [vmem:[%s9516_s8 + $0x428] ss:$16 sps:$4 sm:$0xff]   ;;  %v7377_v24 = vld [vmem:[%s9516_s8 + $0x444] ss:$16 sps:$4 sm:$0xff]  }
 0x201   : > { %4739 = vmatprep.subr.bf16.mxu0 %v7299_v25  ;;  %5163 = vmatprep.subr.bf16.mxu1 %v7302_v26  ;;  %v7380_v25 = vld [vmem:[%s9516_s8 + $0x44c] ss:$16 sps:$4 sm:$0xff]   ;;  %v9685_v26 = vld [vmem:[%s9504_s9 + $0x10] sm:$0xff] }
 0x204   : > { %4740 = vmatpush1.bf16.msra.mxu0 %v7297_v30  ;;  %5164 = vmatpush1.bf16.msra.mxu1 %v7300_v31  ;;  %v7378_v30 = vld [vmem:[%s9516_s8 + $0x448] ss:$16 sps:$4 sm:$0xff]   ;;  %v7383_v31 = vld [vmem:[%s9516_s8 + $0x464] ss:$16 sps:$4 sm:$0xff]  }
 0x205   : > { %4741 = vmatprep.subr.bf16.mxu0 %v7305_v33  ;;  %5165 = vmatprep.subr.bf16.mxu1 %v7308_v34  ;;  %v6383_v33 = vcombine.high %v9685_v26, %v9688_v28  ;;  %v7381_v34 = vld [vmem:[%s9516_s8 + $0x460] ss:$16 sps:$4 sm:$0xff]  }
 0x208   : > { %4742 = vmatpush1.bf16.msra.mxu0 %v7303_v37  ;;  %5166 = vmatpush1.bf16.msra.mxu1 %v7306_v38  ;;  %v7392_v37 = vld [vmem:[%s9516_s8 + $0x48c] ss:$16 sps:$4 sm:$0xff]   ;;  %v7387_v38 = vld [vmem:[%s9516_s8 + $0x480] ss:$16 sps:$4 sm:$0xff]  }
 0x209   : > { %4743 = vmatprep.subr.bf16.mxu0 %v7311_v40  ;;  %5167 = vmatprep.subr.bf16.mxu1 %v7314_v41  ;;  %v7395_v40 = vld [vmem:[%s9516_s8 + $0x4a4] ss:$16 sps:$4 sm:$0xff]   ;;  %v7398_v41 = vld [vmem:[%s9516_s8 + $0x4ac] ss:$16 sps:$4 sm:$0xff]  }
 0x20c   : > { %4744 = vmatpush1.bf16.msra.mxu0 %v7309_v42  ;;  %5168 = vmatpush1.bf16.msra.mxu1 %v7312_v43  ;;  %v7393_v42 = vld [vmem:[%s9516_s8 + $0x4a0] ss:$16 sps:$4 sm:$0xff]   ;;  %v7396_v43 = vld [vmem:[%s9516_s8 + $0x4a8] ss:$16 sps:$4 sm:$0xff]  }
 0x20d   : > { %4745 = vmatprep.subr.bf16.mxu0 %v7317_v44  ;;  %5169 = vmatprep.subr.bf16.mxu1 %v7320_v45  ;;  %v7401_v44 = vld [vmem:[%s9516_s8 + $0x4c4] ss:$16 sps:$4 sm:$0xff]   ;;  %v7404_v45 = vld [vmem:[%s9516_s8 + $0x4cc] ss:$16 sps:$4 sm:$0xff]  }
 0x210   : > { %4746 = vmatpush1.bf16.msra.mxu0 %v7315_v46  ;;  %5170 = vmatpush1.bf16.msra.mxu1 %v7318_v47  ;;  %v7399_v46 = vld [vmem:[%s9516_s8 + $0x4c0] ss:$16 sps:$4 sm:$0xff]   ;;  %v7402_v47 = vld [vmem:[%s9516_s8 + $0x4c8] ss:$16 sps:$4 sm:$0xff]  }
 0x211   : > { %4747 = vmatprep.subr.bf16.mxu0 %v7323_v48  ;;  %5171 = vmatprep.subr.bf16.mxu1 %v7326_v49  ;;  %v7407_v48 = vld [vmem:[%s9516_s8 + $0x4e4] ss:$16 sps:$4 sm:$0xff]   ;;  %v7410_v49 = vld [vmem:[%s9516_s8 + $0x4ec] ss:$16 sps:$4 sm:$0xff]  }
 0x214   : > { %4748 = vmatpush1.bf16.msra.mxu0 %v7321_v50  ;;  %5172 = vmatpush1.bf16.msra.mxu1 %v7324_v51  ;;  %v7405_v50 = vld [vmem:[%s9516_s8 + $0x4e0] ss:$16 sps:$4 sm:$0xff]   ;;  %v7408_v51 = vld [vmem:[%s9516_s8 + $0x4e8] ss:$16 sps:$4 sm:$0xff]  }
 0x215   : > { %4749 = vmatprep.subr.bf16.mxu0 %v7329_v52  ;;  %5173 = vmatprep.subr.bf16.mxu1 %v7332_v53  ;;  %v7413_v52 = vld [vmem:[%s9516_s8 + $0x504] ss:$16 sps:$4 sm:$0xff]   ;;  %v7416_v53 = vld [vmem:[%s9516_s8 + $0x50c] ss:$16 sps:$4 sm:$0xff]  }
 0x218   : > { %4750 = vmatpush1.bf16.msra.mxu0 %v7327_v54  ;;  %5174 = vmatpush1.bf16.msra.mxu1 %v7330_v55  ;;  %v7411_v54 = vld [vmem:[%s9516_s8 + $0x500] ss:$16 sps:$4 sm:$0xff]   ;;  %v7414_v55 = vld [vmem:[%s9516_s8 + $0x508] ss:$16 sps:$4 sm:$0xff]  }
 0x219   : > { %4751 = vmatprep.subr.bf16.mxu0 %v7335_v56  ;;  %5175 = vmatprep.subr.bf16.mxu1 %v7338_v57  ;;  %v7419_v56 = vld [vmem:[%s9516_s8 + $0x524] ss:$16 sps:$4 sm:$0xff]   ;;  %v7422_v57 = vld [vmem:[%s9516_s8 + $0x52c] ss:$16 sps:$4 sm:$0xff]  }
 0x21c   : > { %4752 = vmatpush1.bf16.msra.mxu0 %v7333_v58  ;;  %5176 = vmatpush1.bf16.msra.mxu1 %v7336_v59  ;;  %v7417_v58 = vld [vmem:[%s9516_s8 + $0x520] ss:$16 sps:$4 sm:$0xff]   ;;  %v7420_v59 = vld [vmem:[%s9516_s8 + $0x528] ss:$16 sps:$4 sm:$0xff]  }
 0x21d   : > { %4753 = vmatprep.subr.bf16.mxu0 %v7341_v60  ;;  %5177 = vmatprep.subr.bf16.mxu1 %v7344_v61  ;;  %v7425_v60 = vld [vmem:[%s9516_s8 + $0x544] ss:$16 sps:$4 sm:$0xff]   ;;  %v7428_v61 = vld [vmem:[%s9516_s8 + $0x54c] ss:$16 sps:$4 sm:$0xff]  }
 0x220   : > { %4754 = vmatpush1.bf16.msra.mxu0 %v7339_v62  ;;  %5178 = vmatpush1.bf16.msra.mxu1 %v7342_v63  ;;  %v7423_v62 = vld [vmem:[%s9516_s8 + $0x540] ss:$16 sps:$4 sm:$0xff]   ;;  %v7426_v63 = vld [vmem:[%s9516_s8 + $0x548] ss:$16 sps:$4 sm:$0xff]  }
 0x221   : > { %4755 = vmatprep.subr.bf16.mxu0 %v7347_v0  ;;  %5179 = vmatprep.subr.bf16.mxu1 %v7350_v1  ;;  %v7431_v0 = vld [vmem:[%s9516_s8 + $0x564] ss:$16 sps:$4 sm:$0xff]   ;;  %v7434_v1 = vld [vmem:[%s9516_s8 + $0x56c] ss:$16 sps:$4 sm:$0xff]  }
 0x224   : > { %4756 = vmatpush1.bf16.msra.mxu0 %v7345_v2  ;;  %5180 = vmatpush1.bf16.msra.mxu1 %v7348_v3  ;;  %v7429_v2 = vld [vmem:[%s9516_s8 + $0x560] ss:$16 sps:$4 sm:$0xff]   ;;  %v7432_v3 = vld [vmem:[%s9516_s8 + $0x568] ss:$16 sps:$4 sm:$0xff]  }
 0x225   : > { %4757 = vmatprep.subr.bf16.mxu0 %v7353_v4  ;;  %5181 = vmatprep.subr.bf16.mxu1 %v7356_v5  ;;  %v7437_v4 = vld [vmem:[%s9516_s8 + $0x584] ss:$16 sps:$4 sm:$0xff]   ;;  %v7440_v5 = vld [vmem:[%s9516_s8 + $0x58c] ss:$16 sps:$4 sm:$0xff]  }
 0x228   : > { %4758 = vmatpush1.bf16.msra.mxu0 %v7351_v6  ;;  %5182 = vmatpush1.bf16.msra.mxu1 %v7354_v7  ;;  %v7435_v6 = vld [vmem:[%s9516_s8 + $0x580] ss:$16 sps:$4 sm:$0xff]   ;;  %v7438_v7 = vld [vmem:[%s9516_s8 + $0x588] ss:$16 sps:$4 sm:$0xff]  }
 0x229   : > { %4759 = vmatprep.subr.bf16.mxu0 %v7359_v8  ;;  %5183 = vmatprep.subr.bf16.mxu1 %v7362_v9  ;;  %v7443_v8 = vld [vmem:[%s9516_s8 + $0x5a4] ss:$16 sps:$4 sm:$0xff]   ;;  %v7446_v9 = vld [vmem:[%s9516_s8 + $0x5ac] ss:$16 sps:$4 sm:$0xff]  }
 0x22c   : > { %4760 = vmatpush1.bf16.msra.mxu0 %v7357_v10  ;;  %5184 = vmatpush1.bf16.msra.mxu1 %v7360_v11  ;;  %v7441_v10 = vld [vmem:[%s9516_s8 + $0x5a0] ss:$16 sps:$4 sm:$0xff]   ;;  %v7444_v11 = vld [vmem:[%s9516_s8 + $0x5a8] ss:$16 sps:$4 sm:$0xff]  }
 0x22d   : > { %4782 = vmatprep.subr.bf16.mxu0 %v7365_v12  ;;  %5206 = vmatprep.subr.bf16.mxu1 %v7368_v13  ;;  %v7449_v12 = vld [vmem:[%s9516_s8 + $0x5c4] ss:$16 sps:$4 sm:$0xff]   ;;  %v7452_v13 = vld [vmem:[%s9516_s8 + $0x5cc] ss:$16 sps:$4 sm:$0xff]  }
 0x22f   : > { %4762 = vmatmul.mubr.bf16.vlgmr.msra.gmra.mrb[0].mxu0 %v6380_v16  ;;  %5186 = vmatmul.mubr.bf16.vlgmr.msra.gmra.mrb[0].mxu1 %v6380_v16  ;;  %v7455_v16 = vld [vmem:[%s9516_s8 + $0x5e4] ss:$16 sps:$4 sm:$0xff]  }
 0x230   : > { %4783 = vmatpush1.bf16.msra.mxu0 %v7363_v14  ;;  %5207 = vmatpush1.bf16.msra.mxu1 %v7366_v15  ;;  %v7447_v14 = vld [vmem:[%s9516_s8 + $0x5c0] ss:$16 sps:$4 sm:$0xff]   ;;  %v7450_v15 = vld [vmem:[%s9516_s8 + $0x5c8] ss:$16 sps:$4 sm:$0xff]  }
 0x231   : > { %4784 = vmatprep.subr.bf16.mxu0 %v7371_v19  ;;  %5208 = vmatprep.subr.bf16.mxu1 %v7374_v20  ;;  %v7456_v19 = vld [vmem:[%s9516_s8 + $0x5e8] ss:$16 sps:$4 sm:$0xff]   ;;  %v7461_v20 = vld [vmem:[%s9516_s8 + $0x604] ss:$16 sps:$4 sm:$0xff]  }
 0x232   : > { %4771 = vmatprep.mubr.bf16.mxu0 %v6397_v21  ;;  %5195 = vmatprep.mubr.bf16.mxu1 %v6397_v21  ;;  %v7464_v21 = vld [vmem:[%s9516_s8 + $0x60c] ss:$16 sps:$4 sm:$0xff]  }
 0x234   : > { %4785 = vmatpush1.bf16.msra.mxu0 %v7369_v22  ;;  %5209 = vmatpush1.bf16.msra.mxu1 %v7372_v23  ;;  %v1430_v22 = vld [vmem:[%s9504_s9 + $0x90] sm:$0xff]  ;;  %v6382_v23 = vcombine.low %v9685_v26, %v9688_v28  ;;  %v7468_v28 = vld [vmem:[%s9516_s8 + $0x628] ss:$16 sps:$4 sm:$0xff]  }
 0x235   : > { %4786 = vmatprep.subr.bf16.mxu0 %v7377_v24  ;;  %5210 = vmatprep.subr.bf16.mxu1 %v7380_v25  ;;  %v1438_v24 = vld [vmem:[%s9504_s9 + $0xd0] sm:$0xff] }
 0x236   : > { %v7459_v25 = vld [vmem:[%s9516_s8 + $0x600] ss:$16 sps:$4 sm:$0xff]  }
 0x237   : > { %4772 = vmatmul.mubr.bf16.gmra.mrb[4].mxu0 %v6396_v27  ;;  %5196 = vmatmul.mubr.bf16.gmra.mrb[4].mxu1 %v6396_v27  ;;  %v7462_v27 = vld [vmem:[%s9516_s8 + $0x608] ss:$16 sps:$4 sm:$0xff]   ;;  %v7465_v26 = vld [vmem:[%s9516_s8 + $0x620] ss:$16 sps:$4 sm:$0xff]  }
 0x238   : > { %4787 = vmatpush1.bf16.msra.mxu0 %v7375_v29  ;;  %5211 = vmatpush1.bf16.msra.mxu1 %v7378_v30  ;;  %v7467_v29 = vld [vmem:[%s9516_s8 + $0x624] ss:$16 sps:$4 sm:$0xff]   ;;  %v7470_v30 = vld [vmem:[%s9516_s8 + $0x62c] ss:$16 sps:$4 sm:$0xff]  }
 0x239   : > { %4788 = vmatprep.subr.bf16.mxu0 %v7383_v31  ;;  %5212 = vmatprep.subr.bf16.mxu1 %v7386_v32  ;;  %v6399_v31 = vcombine.high %v1430_v22, %v1438_v24  ;;  %v7473_v32 = vld [vmem:[%s9516_s8 + $0x644] ss:$16 sps:$4 sm:$0xff]  }
 0x23a   : > { %4814 = vmatprep.mubr.bf16.mxu0 %v6383_v33  ;;  %5238 = vmatprep.mubr.bf16.mxu1 %v6383_v33  ;;  %v7476_v33 = vld [vmem:[%s9516_s8 + $0x64c] ss:$16 sps:$4 sm:$0xff]  }
 0x23c   : > { %4789 = vmatpush1.bf16.msra.mxu0 %v7381_v34  ;;  %5213 = vmatpush1.bf16.msra.mxu1 %v7384_v35  ;;  %v9761_v34 = vld [vmem:[%s9504_s9 + $0x18] sm:$0xff]  ;;  %v6398_v35 = vcombine.low %v1430_v22, %v1438_v24  ;;  %v7543_v22 = vld [vmem:[%s9516_s8 + $0x7c0] ss:$16 sps:$4 sm:$0xff]   ;;  %v7551_v24 = vld [vmem:[%s9516_s8 + $0x7e4] ss:$16 sps:$4 sm:$0xff]  }
 0x23d   : > { %4790 = vmatprep.subr.bf16.mxu0 %v7389_v36  ;;  %5214 = vmatprep.subr.bf16.mxu1 %v7392_v37  ;;  %v9764_v36 = vld [vmem:[%s9504_s9 + $0x58] sm:$0xff]  ;;  %v7471_v37 = vld [vmem:[%s9516_s8 + $0x640] ss:$16 sps:$4 sm:$0xff]  }
 0x240   : > { %4791 = vmatpush1.bf16.msra.mxu0 %v7387_v38  ;;  %5215 = vmatpush1.bf16.msra.mxu1 %v7390_v39  ;;  %v7474_v38 = vld [vmem:[%s9516_s8 + $0x648] ss:$16 sps:$4 sm:$0xff]   ;;  %v7479_v39 = vld [vmem:[%s9516_s8 + $0x664] ss:$16 sps:$4 sm:$0xff]  }
 0x241   : > { %4792 = vmatprep.subr.bf16.mxu0 %v7395_v40  ;;  %5216 = vmatprep.subr.bf16.mxu1 %v7398_v41  ;;  %v7482_v40 = vld [vmem:[%s9516_s8 + $0x66c] ss:$16 sps:$4 sm:$0xff]   ;;  %v6385_v41 = vcombine.high %v9761_v34, %v9764_v36 }
 0x244   : > { %4793 = vmatpush1.bf16.msra.mxu0 %v7393_v42  ;;  %5217 = vmatpush1.bf16.msra.mxu1 %v7396_v43  ;;  %v7477_v42 = vld [vmem:[%s9516_s8 + $0x660] ss:$16 sps:$4 sm:$0xff]   ;;  %v7480_v43 = vld [vmem:[%s9516_s8 + $0x668] ss:$16 sps:$4 sm:$0xff]  }
 0x245   : > { %4794 = vmatprep.subr.bf16.mxu0 %v7401_v44  ;;  %5218 = vmatprep.subr.bf16.mxu1 %v7404_v45  ;;  %v7485_v44 = vld [vmem:[%s9516_s8 + $0x684] ss:$16 sps:$4 sm:$0xff]   ;;  %v7488_v45 = vld [vmem:[%s9516_s8 + $0x68c] ss:$16 sps:$4 sm:$0xff]  }
 0x248   : > { %4795 = vmatpush1.bf16.msra.mxu0 %v7399_v46  ;;  %5219 = vmatpush1.bf16.msra.mxu1 %v7402_v47  ;;  %v7483_v46 = vld [vmem:[%s9516_s8 + $0x680] ss:$16 sps:$4 sm:$0xff]   ;;  %v7486_v47 = vld [vmem:[%s9516_s8 + $0x688] ss:$16 sps:$4 sm:$0xff]  }
 0x249   : > { %4796 = vmatprep.subr.bf16.mxu0 %v7407_v48  ;;  %5220 = vmatprep.subr.bf16.mxu1 %v7410_v49  ;;  %v7491_v48 = vld [vmem:[%s9516_s8 + $0x6a4] ss:$16 sps:$4 sm:$0xff]   ;;  %v7494_v49 = vld [vmem:[%s9516_s8 + $0x6ac] ss:$16 sps:$4 sm:$0xff]  }
 0x24c   : > { %4797 = vmatpush1.bf16.msra.mxu0 %v7405_v50  ;;  %5221 = vmatpush1.bf16.msra.mxu1 %v7408_v51  ;;  %v7489_v50 = vld [vmem:[%s9516_s8 + $0x6a0] ss:$16 sps:$4 sm:$0xff]   ;;  %v7492_v51 = vld [vmem:[%s9516_s8 + $0x6a8] ss:$16 sps:$4 sm:$0xff]  }
 0x24d   : > { %4798 = vmatprep.subr.bf16.mxu0 %v7413_v52  ;;  %5222 = vmatprep.subr.bf16.mxu1 %v7416_v53  ;;  %v7497_v52 = vld [vmem:[%s9516_s8 + $0x6c4] ss:$16 sps:$4 sm:$0xff]   ;;  %v7500_v53 = vld [vmem:[%s9516_s8 + $0x6cc] ss:$16 sps:$4 sm:$0xff]  }
 0x250   : > { %4799 = vmatpush1.bf16.msra.mxu0 %v7411_v54  ;;  %5223 = vmatpush1.bf16.msra.mxu1 %v7414_v55  ;;  %v7495_v54 = vld [vmem:[%s9516_s8 + $0x6c0] ss:$16 sps:$4 sm:$0xff]   ;;  %v7498_v55 = vld [vmem:[%s9516_s8 + $0x6c8] ss:$16 sps:$4 sm:$0xff]  }
 0x251   : > { %4800 = vmatprep.subr.bf16.mxu0 %v7419_v56  ;;  %5224 = vmatprep.subr.bf16.mxu1 %v7422_v57  ;;  %v7503_v56 = vld [vmem:[%s9516_s8 + $0x6e4] ss:$16 sps:$4 sm:$0xff]   ;;  %v7506_v57 = vld [vmem:[%s9516_s8 + $0x6ec] ss:$16 sps:$4 sm:$0xff]  }
 0x254   : > { %4801 = vmatpush1.bf16.msra.mxu0 %v7417_v58  ;;  %5225 = vmatpush1.bf16.msra.mxu1 %v7420_v59  ;;  %v7501_v58 = vld [vmem:[%s9516_s8 + $0x6e0] ss:$16 sps:$4 sm:$0xff]   ;;  %v7504_v59 = vld [vmem:[%s9516_s8 + $0x6e8] ss:$16 sps:$4 sm:$0xff]  }
 0x255   : > { %4802 = vmatprep.subr.bf16.mxu0 %v7425_v60  ;;  %5226 = vmatprep.subr.bf16.mxu1 %v7428_v61  ;;  %v7509_v60 = vld [vmem:[%s9516_s8 + $0x704] ss:$16 sps:$4 sm:$0xff]   ;;  %v7512_v61 = vld [vmem:[%s9516_s8 + $0x70c] ss:$16 sps:$4 sm:$0xff]  }
 0x258   : > { %4803 = vmatpush1.bf16.msra.mxu0 %v7423_v62  ;;  %5227 = vmatpush1.bf16.msra.mxu1 %v7426_v63  ;;  %v7507_v62 = vld [vmem:[%s9516_s8 + $0x700] ss:$16 sps:$4 sm:$0xff]   ;;  %v7510_v63 = vld [vmem:[%s9516_s8 + $0x708] ss:$16 sps:$4 sm:$0xff]  }
 0x259   : > { %4804 = vmatprep.subr.bf16.mxu0 %v7431_v0  ;;  %5228 = vmatprep.subr.bf16.mxu1 %v7434_v1  ;;  %v7515_v0 = vld [vmem:[%s9516_s8 + $0x724] ss:$16 sps:$4 sm:$0xff]   ;;  %v7518_v1 = vld [vmem:[%s9516_s8 + $0x72c] ss:$16 sps:$4 sm:$0xff]  }
 0x25c   : > { %4805 = vmatpush1.bf16.msra.mxu0 %v7429_v2  ;;  %5229 = vmatpush1.bf16.msra.mxu1 %v7432_v3  ;;  %v7513_v2 = vld [vmem:[%s9516_s8 + $0x720] ss:$16 sps:$4 sm:$0xff]   ;;  %v7516_v3 = vld [vmem:[%s9516_s8 + $0x728] ss:$16 sps:$4 sm:$0xff]  }
 0x25d   : > { %4806 = vmatprep.subr.bf16.mxu0 %v7437_v4  ;;  %5230 = vmatprep.subr.bf16.mxu1 %v7440_v5  ;;  %v7521_v4 = vld [vmem:[%s9516_s8 + $0x744] ss:$16 sps:$4 sm:$0xff]   ;;  %v7524_v5 = vld [vmem:[%s9516_s8 + $0x74c] ss:$16 sps:$4 sm:$0xff]  }
 0x260   : > { %4807 = vmatpush1.bf16.msra.mxu0 %v7435_v6  ;;  %5231 = vmatpush1.bf16.msra.mxu1 %v7438_v7  ;;  %v7519_v6 = vld [vmem:[%s9516_s8 + $0x740] ss:$16 sps:$4 sm:$0xff]   ;;  %v7522_v7 = vld [vmem:[%s9516_s8 + $0x748] ss:$16 sps:$4 sm:$0xff]  }
 0x261   : > { %4808 = vmatprep.subr.bf16.mxu0 %v7443_v8  ;;  %5232 = vmatprep.subr.bf16.mxu1 %v7446_v9  ;;  %v7527_v8 = vld [vmem:[%s9516_s8 + $0x764] ss:$16 sps:$4 sm:$0xff]   ;;  %v7530_v9 = vld [vmem:[%s9516_s8 + $0x76c] ss:$16 sps:$4 sm:$0xff]  }
 0x264   : > { %4809 = vmatpush1.bf16.msra.mxu0 %v7441_v10  ;;  %5233 = vmatpush1.bf16.msra.mxu1 %v7444_v11  ;;  %v7525_v10 = vld [vmem:[%s9516_s8 + $0x760] ss:$16 sps:$4 sm:$0xff]   ;;  %v7528_v11 = vld [vmem:[%s9516_s8 + $0x768] ss:$16 sps:$4 sm:$0xff]  }
 0x265   : > { %4810 = vmatprep.subr.bf16.mxu0 %v7449_v12  ;;  %5234 = vmatprep.subr.bf16.mxu1 %v7452_v13  ;;  %v7533_v12 = vld [vmem:[%s9516_s8 + $0x784] ss:$16 sps:$4 sm:$0xff]   ;;  %v7536_v13 = vld [vmem:[%s9516_s8 + $0x78c] ss:$16 sps:$4 sm:$0xff]  }
 0x268   : > { %4811 = vmatpush1.bf16.msra.mxu0 %v7447_v14  ;;  %5235 = vmatpush1.bf16.msra.mxu1 %v7450_v15  ;;  %v7531_v14 = vld [vmem:[%s9516_s8 + $0x780] ss:$16 sps:$4 sm:$0xff]   ;;  %v7534_v15 = vld [vmem:[%s9516_s8 + $0x788] ss:$16 sps:$4 sm:$0xff]  }
 0x269   : > { %4812 = vmatprep.subr.bf16.mxu0 %v7455_v16  ;;  %5236 = vmatprep.subr.bf16.mxu1 %v7458_v17  ;;  %v7539_v16 = vld [vmem:[%s9516_s8 + $0x7a4] ss:$16 sps:$4 sm:$0xff]   ;;  %v7542_v17 = vld [vmem:[%s9516_s8 + $0x7ac] ss:$16 sps:$4 sm:$0xff]  }
 0x26c   : > { %4813 = vmatpush1.bf16.msra.mxu0 %v7453_v18  ;;  %5237 = vmatpush1.bf16.msra.mxu1 %v7456_v19  ;;  %v7537_v18 = vld [vmem:[%s9516_s8 + $0x7a0] ss:$16 sps:$4 sm:$0xff]   ;;  %v7540_v19 = vld [vmem:[%s9516_s8 + $0x7a8] ss:$16 sps:$4 sm:$0xff]  }
 0x26d   : > { %4835 = vmatprep.subr.bf16.mxu0 %v7461_v20  ;;  %5259 = vmatprep.subr.bf16.mxu1 %v7464_v21  ;;  %v7545_v20 = vld [vmem:[%s9516_s8 + $0x7c4] ss:$16 sps:$4 sm:$0xff]   ;;  %v7548_v21 = vld [vmem:[%s9516_s8 + $0x7cc] ss:$16 sps:$4 sm:$0xff]  }
 0x26f   : > { %4815 = vmatmul.mubr.bf16.vlgmr.msra.gmra.mrb[0].mxu0 %v6382_v23  ;;  %5239 = vmatmul.mubr.bf16.vlgmr.msra.gmra.mrb[0].mxu1 %v6382_v23  ;;  %v7546_v23 = vld [vmem:[%s9516_s8 + $0x7c8] ss:$16 sps:$4 sm:$0xff]  }
 0x270   : > { %4836 = vmatpush1.bf16.msra.mxu0 %v7459_v25  ;;  %5260 = vmatpush1.bf16.msra.mxu1 %v7462_v27  ;;  %v7554_v25 = vld [vmem:[%s9516_s8 + $0x7ec] ss:$16 sps:$4 sm:$0xff]   ;;  %v7549_v27 = vld [vmem:[%s9516_s8 + $0x7e0] ss:$16 sps:$4 sm:$0xff]  }
 0x271   : > { %4837 = vmatprep.subr.bf16.mxu0 %v7467_v29  ;;  %5261 = vmatprep.subr.bf16.mxu1 %v7470_v30  ;;  %v7552_v29 = vld [vmem:[%s9516_s8 + $0x7e8] ss:$16 sps:$4 sm:$0xff]   ;;  %v7557_v30 = vld [vmem:[%s9516_s8 + $0x804] ss:$16 sps:$4 sm:$0xff]  }
 0x272   : > { %4824 = vmatprep.mubr.bf16.mxu0 %v6399_v31  ;;  %5248 = vmatprep.mubr.bf16.mxu1 %v6399_v31  ;;  %v7560_v31 = vld [vmem:[%s9516_s8 + $0x80c] ss:$16 sps:$4 sm:$0xff]  }
 0x274   : > { %4838 = vmatpush1.bf16.msra.mxu0 %v7465_v26  ;;  %5262 = vmatpush1.bf16.msra.mxu1 %v7468_v28  ;;  %v1431_v26 = vld [vmem:[%s9504_s9 + $0x98] sm:$0xff]  ;;  %v6384_v28 = vcombine.low %v9761_v34, %v9764_v36  ;;  %v7569_v36 = vld [vmem:[%s9516_s8 + $0x844] ss:$16 sps:$4 sm:$0xff]  }
 0x275   : > { %4839 = vmatprep.subr.bf16.mxu0 %v7473_v32  ;;  %5263 = vmatprep.subr.bf16.mxu1 %v7476_v33  ;;  %v1439_v32 = vld [vmem:[%s9504_s9 + $0xd8] sm:$0xff]  ;;  %v7555_v33 = vld [vmem:[%s9516_s8 + $0x800] ss:$16 sps:$4 sm:$0xff]  }
 0x276   : > { %v7564_v34 = vld [vmem:[%s9516_s8 + $0x828] ss:$16 sps:$4 sm:$0xff]  }
 0x277   : > { %4825 = vmatmul.mubr.bf16.gmra.mrb[4].mxu0 %v6398_v35  ;;  %5249 = vmatmul.mubr.bf16.gmra.mrb[4].mxu1 %v6398_v35  ;;  %v7558_v35 = vld [vmem:[%s9516_s8 + $0x808] ss:$16 sps:$4 sm:$0xff]  }
 0x278   : > { %4840 = vmatpush1.bf16.msra.mxu0 %v7471_v37  ;;  %5264 = vmatpush1.bf16.msra.mxu1 %v7474_v38  ;;  %v7563_v37 = vld [vmem:[%s9516_s8 + $0x824] ss:$16 sps:$4 sm:$0xff]   ;;  %v7566_v38 = vld [vmem:[%s9516_s8 + $0x82c] ss:$16 sps:$4 sm:$0xff]  }
 0x279   : > { %4841 = vmatprep.subr.bf16.mxu0 %v7479_v39  ;;  %5265 = vmatprep.subr.bf16.mxu1 %v7482_v40  ;;  %v6401_v39 = vcombine.high %v1431_v26, %v1439_v32  ;;  %v7561_v40 = vld [vmem:[%s9516_s8 + $0x820] ss:$16 sps:$4 sm:$0xff]  }
 0x27a   : > { %4867 = vmatprep.mubr.bf16.mxu0 %v6385_v41  ;;  %5291 = vmatprep.mubr.bf16.mxu1 %v6385_v41  ;;  %v7572_v41 = vld [vmem:[%s9516_s8 + $0x84c] ss:$16 sps:$4 sm:$0xff]  }
 0x27c   : > { %4842 = vmatpush1.bf16.msra.mxu0 %v7477_v42  ;;  %5266 = vmatpush1.bf16.msra.mxu1 %v7480_v43  ;;  %v9837_v42 = vld [vmem:[%s9504_s9 + $0x20] sm:$0xff]  ;;  %v6400_v43 = vcombine.low %v1431_v26, %v1439_v32 }
 0x27d   : > { %4843 = vmatprep.subr.bf16.mxu0 %v7485_v44  ;;  %5267 = vmatprep.subr.bf16.mxu1 %v7488_v45  ;;  %v9840_v44 = vld [vmem:[%s9504_s9 + $0x60] sm:$0xff] }
 0x27e   : > { %v7567_v45 = vld [vmem:[%s9516_s8 + $0x840] ss:$16 sps:$4 sm:$0xff]   ;;  %v7647_v32 = vld [vmem:[%s9516_s8 + $0x9e4] ss:$16 sps:$4 sm:$0xff]  }
 0x27f   : > { %v7639_v26 = vld [vmem:[%s9516_s8 + $0x9c0] ss:$16 sps:$4 sm:$0xff]  }
 0x280   : > { %4844 = vmatpush1.bf16.msra.mxu0 %v7483_v46  ;;  %5268 = vmatpush1.bf16.msra.mxu1 %v7486_v47  ;;  %v7570_v46 = vld [vmem:[%s9516_s8 + $0x848] ss:$16 sps:$4 sm:$0xff]   ;;  %v7575_v47 = vld [vmem:[%s9516_s8 + $0x864] ss:$16 sps:$4 sm:$0xff]  }
 0x281   : > { %4845 = vmatprep.subr.bf16.mxu0 %v7491_v48  ;;  %5269 = vmatprep.subr.bf16.mxu1 %v7494_v49  ;;  %v7578_v48 = vld [vmem:[%s9516_s8 + $0x86c] ss:$16 sps:$4 sm:$0xff]   ;;  %v6387_v49 = vcombine.high %v9837_v42, %v9840_v44 }
 0x284   : > { %4846 = vmatpush1.bf16.msra.mxu0 %v7489_v50  ;;  %5270 = vmatpush1.bf16.msra.mxu1 %v7492_v51  ;;  %v7573_v50 = vld [vmem:[%s9516_s8 + $0x860] ss:$16 sps:$4 sm:$0xff]   ;;  %v7576_v51 = vld [vmem:[%s9516_s8 + $0x868] ss:$16 sps:$4 sm:$0xff]  }
 0x285   : > { %4847 = vmatprep.subr.bf16.mxu0 %v7497_v52  ;;  %5271 = vmatprep.subr.bf16.mxu1 %v7500_v53  ;;  %v7581_v52 = vld [vmem:[%s9516_s8 + $0x884] ss:$16 sps:$4 sm:$0xff]   ;;  %v7584_v53 = vld [vmem:[%s9516_s8 + $0x88c] ss:$16 sps:$4 sm:$0xff]  }
 0x288   : > { %4848 = vmatpush1.bf16.msra.mxu0 %v7495_v54  ;;  %5272 = vmatpush1.bf16.msra.mxu1 %v7498_v55  ;;  %v7579_v54 = vld [vmem:[%s9516_s8 + $0x880] ss:$16 sps:$4 sm:$0xff]   ;;  %v7582_v55 = vld [vmem:[%s9516_s8 + $0x888] ss:$16 sps:$4 sm:$0xff]  }
 0x289   : > { %4849 = vmatprep.subr.bf16.mxu0 %v7503_v56  ;;  %5273 = vmatprep.subr.bf16.mxu1 %v7506_v57  ;;  %v7587_v56 = vld [vmem:[%s9516_s8 + $0x8a4] ss:$16 sps:$4 sm:$0xff]   ;;  %v7590_v57 = vld [vmem:[%s9516_s8 + $0x8ac] ss:$16 sps:$4 sm:$0xff]  }
 0x28c   : > { %4850 = vmatpush1.bf16.msra.mxu0 %v7501_v58  ;;  %5274 = vmatpush1.bf16.msra.mxu1 %v7504_v59  ;;  %v7585_v58 = vld [vmem:[%s9516_s8 + $0x8a0] ss:$16 sps:$4 sm:$0xff]   ;;  %v7588_v59 = vld [vmem:[%s9516_s8 + $0x8a8] ss:$16 sps:$4 sm:$0xff]  }
 0x28d   : > { %4851 = vmatprep.subr.bf16.mxu0 %v7509_v60  ;;  %5275 = vmatprep.subr.bf16.mxu1 %v7512_v61  ;;  %v7593_v60 = vld [vmem:[%s9516_s8 + $0x8c4] ss:$16 sps:$4 sm:$0xff]   ;;  %v7596_v61 = vld [vmem:[%s9516_s8 + $0x8cc] ss:$16 sps:$4 sm:$0xff]  }
 0x290   : > { %4852 = vmatpush1.bf16.msra.mxu0 %v7507_v62  ;;  %5276 = vmatpush1.bf16.msra.mxu1 %v7510_v63  ;;  %v7591_v62 = vld [vmem:[%s9516_s8 + $0x8c0] ss:$16 sps:$4 sm:$0xff]   ;;  %v7594_v63 = vld [vmem:[%s9516_s8 + $0x8c8] ss:$16 sps:$4 sm:$0xff]  }
 0x291   : > { %4853 = vmatprep.subr.bf16.mxu0 %v7515_v0  ;;  %5277 = vmatprep.subr.bf16.mxu1 %v7518_v1  ;;  %v7599_v0 = vld [vmem:[%s9516_s8 + $0x8e4] ss:$16 sps:$4 sm:$0xff]   ;;  %v7602_v1 = vld [vmem:[%s9516_s8 + $0x8ec] ss:$16 sps:$4 sm:$0xff]  }
 0x294   : > { %4854 = vmatpush1.bf16.msra.mxu0 %v7513_v2  ;;  %5278 = vmatpush1.bf16.msra.mxu1 %v7516_v3  ;;  %v7597_v2 = vld [vmem:[%s9516_s8 + $0x8e0] ss:$16 sps:$4 sm:$0xff]   ;;  %v7600_v3 = vld [vmem:[%s9516_s8 + $0x8e8] ss:$16 sps:$4 sm:$0xff]  }
 0x295   : > { %4855 = vmatprep.subr.bf16.mxu0 %v7521_v4  ;;  %5279 = vmatprep.subr.bf16.mxu1 %v7524_v5  ;;  %v7605_v4 = vld [vmem:[%s9516_s8 + $0x904] ss:$16 sps:$4 sm:$0xff]   ;;  %v7608_v5 = vld [vmem:[%s9516_s8 + $0x90c] ss:$16 sps:$4 sm:$0xff]  }
 0x298   : > { %4856 = vmatpush1.bf16.msra.mxu0 %v7519_v6  ;;  %5280 = vmatpush1.bf16.msra.mxu1 %v7522_v7  ;;  %v7603_v6 = vld [vmem:[%s9516_s8 + $0x900] ss:$16 sps:$4 sm:$0xff]   ;;  %v7606_v7 = vld [vmem:[%s9516_s8 + $0x908] ss:$16 sps:$4 sm:$0xff]  }
 0x299   : > { %4857 = vmatprep.subr.bf16.mxu0 %v7527_v8  ;;  %5281 = vmatprep.subr.bf16.mxu1 %v7530_v9  ;;  %v7611_v8 = vld [vmem:[%s9516_s8 + $0x924] ss:$16 sps:$4 sm:$0xff]   ;;  %v7614_v9 = vld [vmem:[%s9516_s8 + $0x92c] ss:$16 sps:$4 sm:$0xff]  }
 0x29c   : > { %4858 = vmatpush1.bf16.msra.mxu0 %v7525_v10  ;;  %5282 = vmatpush1.bf16.msra.mxu1 %v7528_v11  ;;  %v7609_v10 = vld [vmem:[%s9516_s8 + $0x920] ss:$16 sps:$4 sm:$0xff]   ;;  %v7612_v11 = vld [vmem:[%s9516_s8 + $0x928] ss:$16 sps:$4 sm:$0xff]  }
 0x29d   : > { %4859 = vmatprep.subr.bf16.mxu0 %v7533_v12  ;;  %5283 = vmatprep.subr.bf16.mxu1 %v7536_v13  ;;  %v7617_v12 = vld [vmem:[%s9516_s8 + $0x944] ss:$16 sps:$4 sm:$0xff]   ;;  %v7620_v13 = vld [vmem:[%s9516_s8 + $0x94c] ss:$16 sps:$4 sm:$0xff]  }
 0x2a0   : > { %4860 = vmatpush1.bf16.msra.mxu0 %v7531_v14  ;;  %5284 = vmatpush1.bf16.msra.mxu1 %v7534_v15  ;;  %v7615_v14 = vld [vmem:[%s9516_s8 + $0x940] ss:$16 sps:$4 sm:$0xff]   ;;  %v7618_v15 = vld [vmem:[%s9516_s8 + $0x948] ss:$16 sps:$4 sm:$0xff]  }
 0x2a1   : > { %4861 = vmatprep.subr.bf16.mxu0 %v7539_v16  ;;  %5285 = vmatprep.subr.bf16.mxu1 %v7542_v17  ;;  %v7623_v16 = vld [vmem:[%s9516_s8 + $0x964] ss:$16 sps:$4 sm:$0xff]   ;;  %v7626_v17 = vld [vmem:[%s9516_s8 + $0x96c] ss:$16 sps:$4 sm:$0xff]  }
 0x2a4   : > { %4862 = vmatpush1.bf16.msra.mxu0 %v7537_v18  ;;  %5286 = vmatpush1.bf16.msra.mxu1 %v7540_v19  ;;  %v7621_v18 = vld [vmem:[%s9516_s8 + $0x960] ss:$16 sps:$4 sm:$0xff]   ;;  %v7624_v19 = vld [vmem:[%s9516_s8 + $0x968] ss:$16 sps:$4 sm:$0xff]  }
 0x2a5   : > { %4863 = vmatprep.subr.bf16.mxu0 %v7545_v20  ;;  %5287 = vmatprep.subr.bf16.mxu1 %v7548_v21  ;;  %v7629_v20 = vld [vmem:[%s9516_s8 + $0x984] ss:$16 sps:$4 sm:$0xff]   ;;  %v7632_v21 = vld [vmem:[%s9516_s8 + $0x98c] ss:$16 sps:$4 sm:$0xff]  }
 0x2a8   : > { %4864 = vmatpush1.bf16.msra.mxu0 %v7543_v22  ;;  %5288 = vmatpush1.bf16.msra.mxu1 %v7546_v23  ;;  %v7627_v22 = vld [vmem:[%s9516_s8 + $0x980] ss:$16 sps:$4 sm:$0xff]   ;;  %v7630_v23 = vld [vmem:[%s9516_s8 + $0x988] ss:$16 sps:$4 sm:$0xff]  }
 0x2a9   : > { %4865 = vmatprep.subr.bf16.mxu0 %v7551_v24  ;;  %5289 = vmatprep.subr.bf16.mxu1 %v7554_v25  ;;  %v7635_v24 = vld [vmem:[%s9516_s8 + $0x9a4] ss:$16 sps:$4 sm:$0xff]   ;;  %v7638_v25 = vld [vmem:[%s9516_s8 + $0x9ac] ss:$16 sps:$4 sm:$0xff]  }
 0x2ac   : > { %4866 = vmatpush1.bf16.msra.mxu0 %v7549_v27  ;;  %5290 = vmatpush1.bf16.msra.mxu1 %v7552_v29  ;;  %v7633_v27 = vld [vmem:[%s9516_s8 + $0x9a0] ss:$16 sps:$4 sm:$0xff]   ;;  %v7636_v29 = vld [vmem:[%s9516_s8 + $0x9a8] ss:$16 sps:$4 sm:$0xff]  }
 0x2ad   : > { %4888 = vmatprep.subr.bf16.mxu0 %v7557_v30  ;;  %5312 = vmatprep.subr.bf16.mxu1 %v7560_v31  ;;  %v7641_v30 = vld [vmem:[%s9516_s8 + $0x9c4] ss:$16 sps:$4 sm:$0xff]   ;;  %v7644_v31 = vld [vmem:[%s9516_s8 + $0x9cc] ss:$16 sps:$4 sm:$0xff]  }
 0x2af   : > { %4868 = vmatmul.mubr.bf16.vlgmr.msra.gmra.mrb[0].mxu0 %v6384_v28  ;;  %5292 = vmatmul.mubr.bf16.vlgmr.msra.gmra.mrb[0].mxu1 %v6384_v28  ;;  %v7642_v28 = vld [vmem:[%s9516_s8 + $0x9c8] ss:$16 sps:$4 sm:$0xff]  }
 0x2b0   : > { %4889 = vmatpush1.bf16.msra.mxu0 %v7555_v33  ;;  %5313 = vmatpush1.bf16.msra.mxu1 %v7558_v35  ;;  %v7650_v33 = vld [vmem:[%s9516_s8 + $0x9ec] ss:$16 sps:$4 sm:$0xff]   ;;  %v7645_v35 = vld [vmem:[%s9516_s8 + $0x9e0] ss:$16 sps:$4 sm:$0xff]  }
 0x2b1   : > { %4890 = vmatprep.subr.bf16.mxu0 %v7563_v37  ;;  %5314 = vmatprep.subr.bf16.mxu1 %v7566_v38  ;;  %v7648_v37 = vld [vmem:[%s9516_s8 + $0x9e8] ss:$16 sps:$4 sm:$0xff]   ;;  %v7653_v38 = vld [vmem:[%s9516_s8 + $0xa04] ss:$16 sps:$4 sm:$0xff]  }
 0x2b2   : > { %4877 = vmatprep.mubr.bf16.mxu0 %v6401_v39  ;;  %5301 = vmatprep.mubr.bf16.mxu1 %v6401_v39  ;;  %v7656_v39 = vld [vmem:[%s9516_s8 + $0xa0c] ss:$16 sps:$4 sm:$0xff]  }
 0x2b4   : > { %4891 = vmatpush1.bf16.msra.mxu0 %v7561_v40  ;;  %5315 = vmatpush1.bf16.msra.mxu1 %v7564_v34  ;;  %v1432_v40 = vld [vmem:[%s9504_s9 + $0xa0] sm:$0xff] }
 0x2b5   : > { %4892 = vmatprep.subr.bf16.mxu0 %v7569_v36  ;;  %5316 = vmatprep.subr.bf16.mxu1 %v7572_v41  ;;  %v1440_v34 = vld [vmem:[%s9504_s9 + $0xe0] sm:$0xff]  ;;  %v6386_v36 = vcombine.low %v9837_v42, %v9840_v44  ;;  %v7668_v44 = vld [vmem:[%s9516_s8 + $0xa4c] ss:$16 sps:$4 sm:$0xff]  }
 0x2b6   : > { %v7651_v41 = vld [vmem:[%s9516_s8 + $0xa00] ss:$16 sps:$4 sm:$0xff]   ;;  %v7665_v42 = vld [vmem:[%s9516_s8 + $0xa44] ss:$16 sps:$4 sm:$0xff]  }
 0x2b7   : > { %4878 = vmatmul.mubr.bf16.gmra.mrb[4].mxu0 %v6400_v43  ;;  %5302 = vmatmul.mubr.bf16.gmra.mrb[4].mxu1 %v6400_v43  ;;  %v7654_v43 = vld [vmem:[%s9516_s8 + $0xa08] ss:$16 sps:$4 sm:$0xff]  }
 0x2b8   : > { %4893 = vmatpush1.bf16.msra.mxu0 %v7567_v45  ;;  %5317 = vmatpush1.bf16.msra.mxu1 %v7570_v46  ;;  %v7659_v45 = vld [vmem:[%s9516_s8 + $0xa24] ss:$16 sps:$4 sm:$0xff]   ;;  %v7662_v46 = vld [vmem:[%s9516_s8 + $0xa2c] ss:$16 sps:$4 sm:$0xff]  }
 0x2b9   : > { %4894 = vmatprep.subr.bf16.mxu0 %v7575_v47  ;;  %5318 = vmatprep.subr.bf16.mxu1 %v7578_v48  ;;  %v7657_v47 = vld [vmem:[%s9516_s8 + $0xa20] ss:$16 sps:$4 sm:$0xff]   ;;  %v7660_v48 = vld [vmem:[%s9516_s8 + $0xa28] ss:$16 sps:$4 sm:$0xff]  }
 0x2ba   : > { %4920 = vmatprep.mubr.bf16.mxu0 %v6387_v49  ;;  %5344 = vmatprep.mubr.bf16.mxu1 %v6387_v49  ;;  %v6403_v49 = vcombine.high %v1432_v40, %v1440_v34 }
 0x2bc   : > { %4895 = vmatpush1.bf16.msra.mxu0 %v7573_v50  ;;  %5319 = vmatpush1.bf16.msra.mxu1 %v7576_v51  ;;  %v9913_v50 = vld [vmem:[%s9504_s9 + $0x28] sm:$0xff] }
 0x2bd   : > { %4896 = vmatprep.subr.bf16.mxu0 %v7581_v52  ;;  %5320 = vmatprep.subr.bf16.mxu1 %v7584_v53  ;;  %v9916_v51 = vld [vmem:[%s9504_s9 + $0x68] sm:$0xff]  ;;  %v6402_v52 = vcombine.low %v1432_v40, %v1440_v34  ;;  %v7663_v53 = vld [vmem:[%s9516_s8 + $0xa40] ss:$16 sps:$4 sm:$0xff]  }
 0x2be   : > { %v7735_v40 = vld [vmem:[%s9516_s8 + $0xbc0] ss:$16 sps:$4 sm:$0xff]   ;;  %v7738_v34 = vld [vmem:[%s9516_s8 + $0xbc8] ss:$16 sps:$4 sm:$0xff]  }
 0x2c0   : > { %4897 = vmatpush1.bf16.msra.mxu0 %v7579_v54  ;;  %5321 = vmatpush1.bf16.msra.mxu1 %v7582_v55  ;;  %v7666_v54 = vld [vmem:[%s9516_s8 + $0xa48] ss:$16 sps:$4 sm:$0xff]   ;;  %v7671_v55 = vld [vmem:[%s9516_s8 + $0xa64] ss:$16 sps:$4 sm:$0xff]  }
 0x2c1   : > { %4898 = vmatprep.subr.bf16.mxu0 %v7587_v56  ;;  %5322 = vmatprep.subr.bf16.mxu1 %v7590_v57  ;;  %v7674_v56 = vld [vmem:[%s9516_s8 + $0xa6c] ss:$16 sps:$4 sm:$0xff]   ;;  %v6389_v57 = vcombine.high %v9913_v50, %v9916_v51 }
 0x2c4   : > { %4899 = vmatpush1.bf16.msra.mxu0 %v7585_v58  ;;  %5323 = vmatpush1.bf16.msra.mxu1 %v7588_v59  ;;  %v7669_v58 = vld [vmem:[%s9516_s8 + $0xa60] ss:$16 sps:$4 sm:$0xff]   ;;  %v7672_v59 = vld [vmem:[%s9516_s8 + $0xa68] ss:$16 sps:$4 sm:$0xff]  }
 0x2c5   : > { %4900 = vmatprep.subr.bf16.mxu0 %v7593_v60  ;;  %5324 = vmatprep.subr.bf16.mxu1 %v7596_v61  ;;  %v7677_v60 = vld [vmem:[%s9516_s8 + $0xa84] ss:$16 sps:$4 sm:$0xff]   ;;  %v7680_v61 = vld [vmem:[%s9516_s8 + $0xa8c] ss:$16 sps:$4 sm:$0xff]  }
 0x2c8   : > { %4901 = vmatpush1.bf16.msra.mxu0 %v7591_v62  ;;  %5325 = vmatpush1.bf16.msra.mxu1 %v7594_v63  ;;  %v7675_v62 = vld [vmem:[%s9516_s8 + $0xa80] ss:$16 sps:$4 sm:$0xff]   ;;  %v7678_v63 = vld [vmem:[%s9516_s8 + $0xa88] ss:$16 sps:$4 sm:$0xff]  }
 0x2c9   : > { %4902 = vmatprep.subr.bf16.mxu0 %v7599_v0  ;;  %5326 = vmatprep.subr.bf16.mxu1 %v7602_v1  ;;  %v7683_v0 = vld [vmem:[%s9516_s8 + $0xaa4] ss:$16 sps:$4 sm:$0xff]   ;;  %v7686_v1 = vld [vmem:[%s9516_s8 + $0xaac] ss:$16 sps:$4 sm:$0xff]  }
 0x2cc   : > { %4903 = vmatpush1.bf16.msra.mxu0 %v7597_v2  ;;  %5327 = vmatpush1.bf16.msra.mxu1 %v7600_v3  ;;  %v7681_v2 = vld [vmem:[%s9516_s8 + $0xaa0] ss:$16 sps:$4 sm:$0xff]   ;;  %v7684_v3 = vld [vmem:[%s9516_s8 + $0xaa8] ss:$16 sps:$4 sm:$0xff]  }
 0x2cd   : > { %4904 = vmatprep.subr.bf16.mxu0 %v7605_v4  ;;  %5328 = vmatprep.subr.bf16.mxu1 %v7608_v5  ;;  %v7689_v4 = vld [vmem:[%s9516_s8 + $0xac4] ss:$16 sps:$4 sm:$0xff]   ;;  %v7692_v5 = vld [vmem:[%s9516_s8 + $0xacc] ss:$16 sps:$4 sm:$0xff]  }
 0x2d0   : > { %4905 = vmatpush1.bf16.msra.mxu0 %v7603_v6  ;;  %5329 = vmatpush1.bf16.msra.mxu1 %v7606_v7  ;;  %v7687_v6 = vld [vmem:[%s9516_s8 + $0xac0] ss:$16 sps:$4 sm:$0xff]   ;;  %v7690_v7 = vld [vmem:[%s9516_s8 + $0xac8] ss:$16 sps:$4 sm:$0xff]  }
 0x2d1   : > { %4906 = vmatprep.subr.bf16.mxu0 %v7611_v8  ;;  %5330 = vmatprep.subr.bf16.mxu1 %v7614_v9  ;;  %v7695_v8 = vld [vmem:[%s9516_s8 + $0xae4] ss:$16 sps:$4 sm:$0xff]   ;;  %v7698_v9 = vld [vmem:[%s9516_s8 + $0xaec] ss:$16 sps:$4 sm:$0xff]  }
 0x2d4   : > { %4907 = vmatpush1.bf16.msra.mxu0 %v7609_v10  ;;  %5331 = vmatpush1.bf16.msra.mxu1 %v7612_v11  ;;  %v7693_v10 = vld [vmem:[%s9516_s8 + $0xae0] ss:$16 sps:$4 sm:$0xff]   ;;  %v7696_v11 = vld [vmem:[%s9516_s8 + $0xae8] ss:$16 sps:$4 sm:$0xff]  }
 0x2d5   : > { %4908 = vmatprep.subr.bf16.mxu0 %v7617_v12  ;;  %5332 = vmatprep.subr.bf16.mxu1 %v7620_v13  ;;  %v7701_v12 = vld [vmem:[%s9516_s8 + $0xb04] ss:$16 sps:$4 sm:$0xff]   ;;  %v7704_v13 = vld [vmem:[%s9516_s8 + $0xb0c] ss:$16 sps:$4 sm:$0xff]  }
 0x2d8   : > { %4909 = vmatpush1.bf16.msra.mxu0 %v7615_v14  ;;  %5333 = vmatpush1.bf16.msra.mxu1 %v7618_v15  ;;  %v7699_v14 = vld [vmem:[%s9516_s8 + $0xb00] ss:$16 sps:$4 sm:$0xff]   ;;  %v7702_v15 = vld [vmem:[%s9516_s8 + $0xb08] ss:$16 sps:$4 sm:$0xff]  }
 0x2d9   : > { %4910 = vmatprep.subr.bf16.mxu0 %v7623_v16  ;;  %5334 = vmatprep.subr.bf16.mxu1 %v7626_v17  ;;  %v7707_v16 = vld [vmem:[%s9516_s8 + $0xb24] ss:$16 sps:$4 sm:$0xff]   ;;  %v7710_v17 = vld [vmem:[%s9516_s8 + $0xb2c] ss:$16 sps:$4 sm:$0xff]  }
 0x2dc   : > { %4911 = vmatpush1.bf16.msra.mxu0 %v7621_v18  ;;  %5335 = vmatpush1.bf16.msra.mxu1 %v7624_v19  ;;  %v7705_v18 = vld [vmem:[%s9516_s8 + $0xb20] ss:$16 sps:$4 sm:$0xff]   ;;  %v7708_v19 = vld [vmem:[%s9516_s8 + $0xb28] ss:$16 sps:$4 sm:$0xff]  }
 0x2dd   : > { %4912 = vmatprep.subr.bf16.mxu0 %v7629_v20  ;;  %5336 = vmatprep.subr.bf16.mxu1 %v7632_v21  ;;  %v7713_v20 = vld [vmem:[%s9516_s8 + $0xb44] ss:$16 sps:$4 sm:$0xff]   ;;  %v7716_v21 = vld [vmem:[%s9516_s8 + $0xb4c] ss:$16 sps:$4 sm:$0xff]  }
 0x2e0   : > { %4913 = vmatpush1.bf16.msra.mxu0 %v7627_v22  ;;  %5337 = vmatpush1.bf16.msra.mxu1 %v7630_v23  ;;  %v7711_v22 = vld [vmem:[%s9516_s8 + $0xb40] ss:$16 sps:$4 sm:$0xff]   ;;  %v7714_v23 = vld [vmem:[%s9516_s8 + $0xb48] ss:$16 sps:$4 sm:$0xff]  }
 0x2e1   : > { %4914 = vmatprep.subr.bf16.mxu0 %v7635_v24  ;;  %5338 = vmatprep.subr.bf16.mxu1 %v7638_v25  ;;  %v7719_v24 = vld [vmem:[%s9516_s8 + $0xb64] ss:$16 sps:$4 sm:$0xff]   ;;  %v7722_v25 = vld [vmem:[%s9516_s8 + $0xb6c] ss:$16 sps:$4 sm:$0xff]  }
 0x2e4   : > { %4915 = vmatpush1.bf16.msra.mxu0 %v7633_v27  ;;  %5339 = vmatpush1.bf16.msra.mxu1 %v7636_v29  ;;  %v7717_v27 = vld [vmem:[%s9516_s8 + $0xb60] ss:$16 sps:$4 sm:$0xff]   ;;  %v7720_v29 = vld [vmem:[%s9516_s8 + $0xb68] ss:$16 sps:$4 sm:$0xff]  }
 0x2e5   : > { %4916 = vmatprep.subr.bf16.mxu0 %v7641_v30  ;;  %5340 = vmatprep.subr.bf16.mxu1 %v7644_v31  ;;  %v7725_v30 = vld [vmem:[%s9516_s8 + $0xb84] ss:$16 sps:$4 sm:$0xff]   ;;  %v7728_v31 = vld [vmem:[%s9516_s8 + $0xb8c] ss:$16 sps:$4 sm:$0xff]  }
 0x2e8   : > { %4917 = vmatpush1.bf16.msra.mxu0 %v7639_v26  ;;  %5341 = vmatpush1.bf16.msra.mxu1 %v7642_v28  ;;  %v7723_v26 = vld [vmem:[%s9516_s8 + $0xb80] ss:$16 sps:$4 sm:$0xff]   ;;  %v7726_v28 = vld [vmem:[%s9516_s8 + $0xb88] ss:$16 sps:$4 sm:$0xff]  }
 0x2e9   : > { %4918 = vmatprep.subr.bf16.mxu0 %v7647_v32  ;;  %5342 = vmatprep.subr.bf16.mxu1 %v7650_v33  ;;  %v7731_v32 = vld [vmem:[%s9516_s8 + $0xba4] ss:$16 sps:$4 sm:$0xff]   ;;  %v7734_v33 = vld [vmem:[%s9516_s8 + $0xbac] ss:$16 sps:$4 sm:$0xff]  }
 0x2ec   : > { %4919 = vmatpush1.bf16.msra.mxu0 %v7645_v35  ;;  %5343 = vmatpush1.bf16.msra.mxu1 %v7648_v37  ;;  %v7729_v35 = vld [vmem:[%s9516_s8 + $0xba0] ss:$16 sps:$4 sm:$0xff]   ;;  %v7732_v37 = vld [vmem:[%s9516_s8 + $0xba8] ss:$16 sps:$4 sm:$0xff]  }
 0x2ed   : > { %4941 = vmatprep.subr.bf16.mxu0 %v7653_v38  ;;  %5365 = vmatprep.subr.bf16.mxu1 %v7656_v39  ;;  %v7737_v38 = vld [vmem:[%s9516_s8 + $0xbc4] ss:$16 sps:$4 sm:$0xff]   ;;  %v7740_v39 = vld [vmem:[%s9516_s8 + $0xbcc] ss:$16 sps:$4 sm:$0xff]  }
 0x2ef   : > { %4921 = vmatmul.mubr.bf16.vlgmr.msra.gmra.mrb[0].mxu0 %v6386_v36  ;;  %5345 = vmatmul.mubr.bf16.vlgmr.msra.gmra.mrb[0].mxu1 %v6386_v36  ;;  %v7743_v36 = vld [vmem:[%s9516_s8 + $0xbe4] ss:$16 sps:$4 sm:$0xff]  }
 0x2f0   : > { %4942 = vmatpush1.bf16.msra.mxu0 %v7651_v41  ;;  %5366 = vmatpush1.bf16.msra.mxu1 %v7654_v43  ;;  %v7746_v41 = vld [vmem:[%s9516_s8 + $0xbec] ss:$16 sps:$4 sm:$0xff]   ;;  %v7741_v43 = vld [vmem:[%s9516_s8 + $0xbe0] ss:$16 sps:$4 sm:$0xff]  }
 0x2f1   : > { %4943 = vmatprep.subr.bf16.mxu0 %v7659_v45  ;;  %5367 = vmatprep.subr.bf16.mxu1 %v7662_v46  ;;  %v7744_v45 = vld [vmem:[%s9516_s8 + $0xbe8] ss:$16 sps:$4 sm:$0xff]   ;;  %v7749_v46 = vld [vmem:[%s9516_s8 + $0xc04] ss:$16 sps:$4 sm:$0xff]  }
 0x2f2   : > { %4930 = vmatprep.mubr.bf16.mxu0 %v6403_v49  ;;  %5354 = vmatprep.mubr.bf16.mxu1 %v6403_v49  ;;  %v1433_v49 = vld [vmem:[%s9504_s9 + $0xa8] sm:$0xff] }
 0x2f4   : > { %4944 = vmatpush1.bf16.msra.mxu0 %v7657_v47  ;;  %5368 = vmatpush1.bf16.msra.mxu1 %v7660_v48  ;;  %v7752_v47 = vld [vmem:[%s9516_s8 + $0xc0c] ss:$16 sps:$4 sm:$0xff]   ;;  %v6388_v48 = vcombine.low %v9913_v50, %v9916_v51  ;;  %v7753_v50 = vld [vmem:[%s9516_s8 + $0xc20] ss:$16 sps:$4 sm:$0xff]   ;;  %v7756_v51 = vld [vmem:[%s9516_s8 + $0xc28] ss:$16 sps:$4 sm:$0xff]  }
 0x2f5   : > { %4945 = vmatprep.subr.bf16.mxu0 %v7665_v42  ;;  %5369 = vmatprep.subr.bf16.mxu1 %v7668_v44  ;;  %v1441_v42 = vld [vmem:[%s9504_s9 + $0xe8] sm:$0xff]  ;;  %v7747_v44 = vld [vmem:[%s9516_s8 + $0xc00] ss:$16 sps:$4 sm:$0xff]  }
 0x2f7   : > { %4931 = vmatmul.mubr.bf16.gmra.mrb[4].mxu0 %v6402_v52  ;;  %5355 = vmatmul.mubr.bf16.gmra.mrb[4].mxu1 %v6402_v52  ;;  %v7750_v52 = vld [vmem:[%s9516_s8 + $0xc08] ss:$16 sps:$4 sm:$0xff]  }
 0x2f8   : > { %4946 = vmatpush1.bf16.msra.mxu0 %v7663_v53  ;;  %5370 = vmatpush1.bf16.msra.mxu1 %v7666_v54  ;;  %v7755_v53 = vld [vmem:[%s9516_s8 + $0xc24] ss:$16 sps:$4 sm:$0xff]   ;;  %v7758_v54 = vld [vmem:[%s9516_s8 + $0xc2c] ss:$16 sps:$4 sm:$0xff]  }
 0x2f9   : > { %4947 = vmatprep.subr.bf16.mxu0 %v7671_v55  ;;  %5371 = vmatprep.subr.bf16.mxu1 %v7674_v56  ;;  %v6405_v55 = vcombine.high %v1433_v49, %v1441_v42  ;;  %v7761_v56 = vld [vmem:[%s9516_s8 + $0xc44] ss:$16 sps:$4 sm:$0xff]  }
 0x2fa   : > { %4973 = vmatprep.mubr.bf16.mxu0 %v6389_v57  ;;  %5397 = vmatprep.mubr.bf16.mxu1 %v6389_v57  ;;  %v7764_v57 = vld [vmem:[%s9516_s8 + $0xc4c] ss:$16 sps:$4 sm:$0xff]  }
 0x2fc   : > { %4948 = vmatpush1.bf16.msra.mxu0 %v7669_v58  ;;  %5372 = vmatpush1.bf16.msra.mxu1 %v7672_v59  ;;  %v6404_v58 = vcombine.low %v1433_v49, %v1441_v42  ;;  %v9989_v59 = vld [vmem:[%s9504_s9 + $0x30] sm:$0xff]  ;;  %v7834_v49 = vld [vmem:[%s9516_s8 + $0xdc8] ss:$16 sps:$4 sm:$0xff]  }
 0x2fd   : > { %4949 = vmatprep.subr.bf16.mxu0 %v7677_v60  ;;  %5373 = vmatprep.subr.bf16.mxu1 %v7680_v61  ;;  %v9992_v60 = vld [vmem:[%s9504_s9 + $0x70] sm:$0xff] }
 0x2fe   : > { %v7759_v61 = vld [vmem:[%s9516_s8 + $0xc40] ss:$16 sps:$4 sm:$0xff]   ;;  %v7839_v42 = vld [vmem:[%s9516_s8 + $0xde4] ss:$16 sps:$4 sm:$0xff]  }
 0x300   : > { %4950 = vmatpush1.bf16.msra.mxu0 %v7675_v62  ;;  %5374 = vmatpush1.bf16.msra.mxu1 %v7678_v63  ;;  %v7762_v62 = vld [vmem:[%s9516_s8 + $0xc48] ss:$16 sps:$4 sm:$0xff]   ;;  %v7767_v63 = vld [vmem:[%s9516_s8 + $0xc64] ss:$16 sps:$4 sm:$0xff]  }
 0x301   : > { %4951 = vmatprep.subr.bf16.mxu0 %v7683_v0  ;;  %5375 = vmatprep.subr.bf16.mxu1 %v7686_v1  ;;  %v7770_v0 = vld [vmem:[%s9516_s8 + $0xc6c] ss:$16 sps:$4 sm:$0xff]   ;;  %v6391_v1 = vcombine.high %v9989_v59, %v9992_v60 }
 0x304   : > { %4952 = vmatpush1.bf16.msra.mxu0 %v7681_v2  ;;  %5376 = vmatpush1.bf16.msra.mxu1 %v7684_v3  ;;  %v7765_v2 = vld [vmem:[%s9516_s8 + $0xc60] ss:$16 sps:$4 sm:$0xff]   ;;  %v7768_v3 = vld [vmem:[%s9516_s8 + $0xc68] ss:$16 sps:$4 sm:$0xff]  }
 0x305   : > { %4953 = vmatprep.subr.bf16.mxu0 %v7689_v4  ;;  %5377 = vmatprep.subr.bf16.mxu1 %v7692_v5  ;;  %v7773_v4 = vld [vmem:[%s9516_s8 + $0xc84] ss:$16 sps:$4 sm:$0xff]   ;;  %v7776_v5 = vld [vmem:[%s9516_s8 + $0xc8c] ss:$16 sps:$4 sm:$0xff]  }
 0x308   : > { %4954 = vmatpush1.bf16.msra.mxu0 %v7687_v6  ;;  %5378 = vmatpush1.bf16.msra.mxu1 %v7690_v7  ;;  %v7771_v6 = vld [vmem:[%s9516_s8 + $0xc80] ss:$16 sps:$4 sm:$0xff]   ;;  %v7774_v7 = vld [vmem:[%s9516_s8 + $0xc88] ss:$16 sps:$4 sm:$0xff]  }
 0x309   : > { %4955 = vmatprep.subr.bf16.mxu0 %v7695_v8  ;;  %5379 = vmatprep.subr.bf16.mxu1 %v7698_v9  ;;  %v7779_v8 = vld [vmem:[%s9516_s8 + $0xca4] ss:$16 sps:$4 sm:$0xff]   ;;  %v7782_v9 = vld [vmem:[%s9516_s8 + $0xcac] ss:$16 sps:$4 sm:$0xff]  }
 0x30c   : > { %4956 = vmatpush1.bf16.msra.mxu0 %v7693_v10  ;;  %5380 = vmatpush1.bf16.msra.mxu1 %v7696_v11  ;;  %v7777_v10 = vld [vmem:[%s9516_s8 + $0xca0] ss:$16 sps:$4 sm:$0xff]   ;;  %v7780_v11 = vld [vmem:[%s9516_s8 + $0xca8] ss:$16 sps:$4 sm:$0xff]  }
 0x30d   : > { %4957 = vmatprep.subr.bf16.mxu0 %v7701_v12  ;;  %5381 = vmatprep.subr.bf16.mxu1 %v7704_v13  ;;  %v7785_v12 = vld [vmem:[%s9516_s8 + $0xcc4] ss:$16 sps:$4 sm:$0xff]   ;;  %v7788_v13 = vld [vmem:[%s9516_s8 + $0xccc] ss:$16 sps:$4 sm:$0xff]  }
 0x310   : > { %4958 = vmatpush1.bf16.msra.mxu0 %v7699_v14  ;;  %5382 = vmatpush1.bf16.msra.mxu1 %v7702_v15  ;;  %v7783_v14 = vld [vmem:[%s9516_s8 + $0xcc0] ss:$16 sps:$4 sm:$0xff]   ;;  %v7786_v15 = vld [vmem:[%s9516_s8 + $0xcc8] ss:$16 sps:$4 sm:$0xff]  }
 0x311   : > { %4959 = vmatprep.subr.bf16.mxu0 %v7707_v16  ;;  %5383 = vmatprep.subr.bf16.mxu1 %v7710_v17  ;;  %v7791_v16 = vld [vmem:[%s9516_s8 + $0xce4] ss:$16 sps:$4 sm:$0xff]   ;;  %v7794_v17 = vld [vmem:[%s9516_s8 + $0xcec] ss:$16 sps:$4 sm:$0xff]  }
 0x314   : > { %4960 = vmatpush1.bf16.msra.mxu0 %v7705_v18  ;;  %5384 = vmatpush1.bf16.msra.mxu1 %v7708_v19  ;;  %v7789_v18 = vld [vmem:[%s9516_s8 + $0xce0] ss:$16 sps:$4 sm:$0xff]   ;;  %v7792_v19 = vld [vmem:[%s9516_s8 + $0xce8] ss:$16 sps:$4 sm:$0xff]  }
 0x315   : > { %4961 = vmatprep.subr.bf16.mxu0 %v7713_v20  ;;  %5385 = vmatprep.subr.bf16.mxu1 %v7716_v21  ;;  %v7797_v20 = vld [vmem:[%s9516_s8 + $0xd04] ss:$16 sps:$4 sm:$0xff]   ;;  %v7800_v21 = vld [vmem:[%s9516_s8 + $0xd0c] ss:$16 sps:$4 sm:$0xff]  }
 0x318   : > { %4962 = vmatpush1.bf16.msra.mxu0 %v7711_v22  ;;  %5386 = vmatpush1.bf16.msra.mxu1 %v7714_v23  ;;  %v7795_v22 = vld [vmem:[%s9516_s8 + $0xd00] ss:$16 sps:$4 sm:$0xff]   ;;  %v7798_v23 = vld [vmem:[%s9516_s8 + $0xd08] ss:$16 sps:$4 sm:$0xff]  }
 0x319   : > { %4963 = vmatprep.subr.bf16.mxu0 %v7719_v24  ;;  %5387 = vmatprep.subr.bf16.mxu1 %v7722_v25  ;;  %v7803_v24 = vld [vmem:[%s9516_s8 + $0xd24] ss:$16 sps:$4 sm:$0xff]   ;;  %v7806_v25 = vld [vmem:[%s9516_s8 + $0xd2c] ss:$16 sps:$4 sm:$0xff]  }
 0x31c   : > { %4964 = vmatpush1.bf16.msra.mxu0 %v7717_v27  ;;  %5388 = vmatpush1.bf16.msra.mxu1 %v7720_v29  ;;  %v7801_v27 = vld [vmem:[%s9516_s8 + $0xd20] ss:$16 sps:$4 sm:$0xff]   ;;  %v7804_v29 = vld [vmem:[%s9516_s8 + $0xd28] ss:$16 sps:$4 sm:$0xff]  }
 0x31d   : > { %4965 = vmatprep.subr.bf16.mxu0 %v7725_v30  ;;  %5389 = vmatprep.subr.bf16.mxu1 %v7728_v31  ;;  %v7809_v30 = vld [vmem:[%s9516_s8 + $0xd44] ss:$16 sps:$4 sm:$0xff]   ;;  %v7812_v31 = vld [vmem:[%s9516_s8 + $0xd4c] ss:$16 sps:$4 sm:$0xff]  }
 0x320   : > { %4966 = vmatpush1.bf16.msra.mxu0 %v7723_v26  ;;  %5390 = vmatpush1.bf16.msra.mxu1 %v7726_v28  ;;  %v7807_v26 = vld [vmem:[%s9516_s8 + $0xd40] ss:$16 sps:$4 sm:$0xff]   ;;  %v7810_v28 = vld [vmem:[%s9516_s8 + $0xd48] ss:$16 sps:$4 sm:$0xff]  }
 0x321   : > { %4967 = vmatprep.subr.bf16.mxu0 %v7731_v32  ;;  %5391 = vmatprep.subr.bf16.mxu1 %v7734_v33  ;;  %v7815_v32 = vld [vmem:[%s9516_s8 + $0xd64] ss:$16 sps:$4 sm:$0xff]   ;;  %v7818_v33 = vld [vmem:[%s9516_s8 + $0xd6c] ss:$16 sps:$4 sm:$0xff]  }
 0x324   : > { %4968 = vmatpush1.bf16.msra.mxu0 %v7729_v35  ;;  %5392 = vmatpush1.bf16.msra.mxu1 %v7732_v37  ;;  %v7813_v35 = vld [vmem:[%s9516_s8 + $0xd60] ss:$16 sps:$4 sm:$0xff]   ;;  %v7816_v37 = vld [vmem:[%s9516_s8 + $0xd68] ss:$16 sps:$4 sm:$0xff]  }
 0x325   : > { %4969 = vmatprep.subr.bf16.mxu0 %v7737_v38  ;;  %5393 = vmatprep.subr.bf16.mxu1 %v7740_v39  ;;  %v7821_v38 = vld [vmem:[%s9516_s8 + $0xd84] ss:$16 sps:$4 sm:$0xff]   ;;  %v7824_v39 = vld [vmem:[%s9516_s8 + $0xd8c] ss:$16 sps:$4 sm:$0xff]  }
 0x328   : > { %4970 = vmatpush1.bf16.msra.mxu0 %v7735_v40  ;;  %5394 = vmatpush1.bf16.msra.mxu1 %v7738_v34  ;;  %v7819_v40 = vld [vmem:[%s9516_s8 + $0xd80] ss:$16 sps:$4 sm:$0xff]   ;;  %v7822_v34 = vld [vmem:[%s9516_s8 + $0xd88] ss:$16 sps:$4 sm:$0xff]  }
 0x329   : > { %4971 = vmatprep.subr.bf16.mxu0 %v7743_v36  ;;  %5395 = vmatprep.subr.bf16.mxu1 %v7746_v41  ;;  %v7827_v36 = vld [vmem:[%s9516_s8 + $0xda4] ss:$16 sps:$4 sm:$0xff]   ;;  %v7830_v41 = vld [vmem:[%s9516_s8 + $0xdac] ss:$16 sps:$4 sm:$0xff]  }
 0x32c   : > { %4972 = vmatpush1.bf16.msra.mxu0 %v7741_v43  ;;  %5396 = vmatpush1.bf16.msra.mxu1 %v7744_v45  ;;  %v7825_v43 = vld [vmem:[%s9516_s8 + $0xda0] ss:$16 sps:$4 sm:$0xff]   ;;  %v7828_v45 = vld [vmem:[%s9516_s8 + $0xda8] ss:$16 sps:$4 sm:$0xff]  }
 0x32d   : > { %4994 = vmatprep.subr.bf16.mxu0 %v7749_v46  ;;  %5418 = vmatprep.subr.bf16.mxu1 %v7752_v47  ;;  %v7833_v46 = vld [vmem:[%s9516_s8 + $0xdc4] ss:$16 sps:$4 sm:$0xff]   ;;  %v7836_v47 = vld [vmem:[%s9516_s8 + $0xdcc] ss:$16 sps:$4 sm:$0xff]  }
 0x32f   : > { %4974 = vmatmul.mubr.bf16.vlgmr.msra.gmra.mrb[0].mxu0 %v6388_v48  ;;  %5398 = vmatmul.mubr.bf16.vlgmr.msra.gmra.mrb[0].mxu1 %v6388_v48  ;;  %v7831_v48 = vld [vmem:[%s9516_s8 + $0xdc0] ss:$16 sps:$4 sm:$0xff]  }
 0x330   : > { %4995 = vmatpush1.bf16.msra.mxu0 %v7747_v44  ;;  %5419 = vmatpush1.bf16.msra.mxu1 %v7750_v52  ;;  %v7842_v44 = vld [vmem:[%s9516_s8 + $0xdec] ss:$16 sps:$4 sm:$0xff]   ;;  %v7837_v52 = vld [vmem:[%s9516_s8 + $0xde0] ss:$16 sps:$4 sm:$0xff]  }
 0x331   : > { %4996 = vmatprep.subr.bf16.mxu0 %v7755_v53  ;;  %5420 = vmatprep.subr.bf16.mxu1 %v7758_v54  ;;  %v7840_v53 = vld [vmem:[%s9516_s8 + $0xde8] ss:$16 sps:$4 sm:$0xff]   ;;  %v7845_v54 = vld [vmem:[%s9516_s8 + $0xe04] ss:$16 sps:$4 sm:$0xff]  }
 0x332   : > { %4983 = vmatprep.mubr.bf16.mxu0 %v6405_v55  ;;  %5407 = vmatprep.mubr.bf16.mxu1 %v6405_v55  ;;  %v7848_v55 = vld [vmem:[%s9516_s8 + $0xe0c] ss:$16 sps:$4 sm:$0xff]  }
 0x334   : > { %4997 = vmatpush1.bf16.msra.mxu0 %v7753_v50  ;;  %5421 = vmatpush1.bf16.msra.mxu1 %v7756_v51  ;;  %v6390_v50 = vcombine.low %v9989_v59, %v9992_v60  ;;  %v1434_v51 = vld [vmem:[%s9504_s9 + $0xb0] sm:$0xff]  ;;  %v7852_v60 = vld [vmem:[%s9516_s8 + $0xe28] ss:$16 sps:$4 sm:$0xff]  }
 0x335   : > { %4998 = vmatprep.subr.bf16.mxu0 %v7761_v56  ;;  %5422 = vmatprep.subr.bf16.mxu1 %v7764_v57  ;;  %v1442_v56 = vld [vmem:[%s9504_s9 + $0xf0] sm:$0xff] }
 0x336   : > { %v7843_v57 = vld [vmem:[%s9516_s8 + $0xe00] ss:$16 sps:$4 sm:$0xff]  }
 0x337   : > { %4984 = vmatmul.mubr.bf16.gmra.mrb[4].mxu0 %v6404_v58  ;;  %5408 = vmatmul.mubr.bf16.gmra.mrb[4].mxu1 %v6404_v58  ;;  %v7846_v58 = vld [vmem:[%s9516_s8 + $0xe08] ss:$16 sps:$4 sm:$0xff]   ;;  %v7849_v59 = vld [vmem:[%s9516_s8 + $0xe20] ss:$16 sps:$4 sm:$0xff]  }
 0x338   : > { %4999 = vmatpush1.bf16.msra.mxu0 %v7759_v61  ;;  %5423 = vmatpush1.bf16.msra.mxu1 %v7762_v62  ;;  %v7851_v61 = vld [vmem:[%s9516_s8 + $0xe24] ss:$16 sps:$4 sm:$0xff]   ;;  %v7854_v62 = vld [vmem:[%s9516_s8 + $0xe2c] ss:$16 sps:$4 sm:$0xff]  }
 0x339   : > { %5000 = vmatprep.subr.bf16.mxu0 %v7767_v63  ;;  %5424 = vmatprep.subr.bf16.mxu1 %v7770_v0  ;;  %v6407_v63 = vcombine.high %v1434_v51, %v1442_v56  ;;  %v7857_v0 = vld [vmem:[%s9516_s8 + $0xe44] ss:$16 sps:$4 sm:$0xff]  }
 0x33a   : > { %5026 = vmatprep.mubr.bf16.mxu0 %v6391_v1  ;;  %5450 = vmatprep.mubr.bf16.mxu1 %v6391_v1  ;;  %v7860_v1 = vld [vmem:[%s9516_s8 + $0xe4c] ss:$16 sps:$4 sm:$0xff]  }
 0x33c   : > { %5001 = vmatpush1.bf16.msra.mxu0 %v7765_v2  ;;  %5425 = vmatpush1.bf16.msra.mxu1 %v7768_v3  ;;  %v6406_v2 = vcombine.low %v1434_v51, %v1442_v56  ;;  %v10065_v3 = vld [vmem:[%s9504_s9 + $0x38] sm:$0xff]  ;;  %v7935_v56 = vld [vmem:[%s9516_s8 + $0xfe4] ss:$16 sps:$4 sm:$0xff]  }
 0x33d   : > { %5002 = vmatprep.subr.bf16.mxu0 %v7773_v4  ;;  %5426 = vmatprep.subr.bf16.mxu1 %v7776_v5  ;;  %v10068_v4 = vld [vmem:[%s9504_s9 + $0x78] sm:$0xff]  ;;  %v7855_v5 = vld [vmem:[%s9516_s8 + $0xe40] ss:$16 sps:$4 sm:$0xff]  }
 0x33e   : > { %v7930_v51 = vld [vmem:[%s9516_s8 + $0xfc8] ss:$16 sps:$4 sm:$0xff]  }
 0x340   : > { %5003 = vmatpush1.bf16.msra.mxu0 %v7771_v6  ;;  %5427 = vmatpush1.bf16.msra.mxu1 %v7774_v7  ;;  %v7858_v6 = vld [vmem:[%s9516_s8 + $0xe48] ss:$16 sps:$4 sm:$0xff]   ;;  %v7863_v7 = vld [vmem:[%s9516_s8 + $0xe64] ss:$16 sps:$4 sm:$0xff]  }
 0x341   : > { %5004 = vmatprep.subr.bf16.mxu0 %v7779_v8  ;;  %5428 = vmatprep.subr.bf16.mxu1 %v7782_v9  ;;  %v7866_v8 = vld [vmem:[%s9516_s8 + $0xe6c] ss:$16 sps:$4 sm:$0xff]   ;;  %v6393_v9 = vcombine.high %v10065_v3, %v10068_v4 }
 0x344   : > { %5005 = vmatpush1.bf16.msra.mxu0 %v7777_v10  ;;  %5429 = vmatpush1.bf16.msra.mxu1 %v7780_v11  ;;  %v7861_v10 = vld [vmem:[%s9516_s8 + $0xe60] ss:$16 sps:$4 sm:$0xff]   ;;  %v7864_v11 = vld [vmem:[%s9516_s8 + $0xe68] ss:$16 sps:$4 sm:$0xff]  }
 0x345   : > { %5006 = vmatprep.subr.bf16.mxu0 %v7785_v12  ;;  %5430 = vmatprep.subr.bf16.mxu1 %v7788_v13  ;;  %v7869_v12 = vld [vmem:[%s9516_s8 + $0xe84] ss:$16 sps:$4 sm:$0xff]   ;;  %v7872_v13 = vld [vmem:[%s9516_s8 + $0xe8c] ss:$16 sps:$4 sm:$0xff]  }
 0x348   : > { %5007 = vmatpush1.bf16.msra.mxu0 %v7783_v14  ;;  %5431 = vmatpush1.bf16.msra.mxu1 %v7786_v15  ;;  %v7867_v14 = vld [vmem:[%s9516_s8 + $0xe80] ss:$16 sps:$4 sm:$0xff]   ;;  %v7870_v15 = vld [vmem:[%s9516_s8 + $0xe88] ss:$16 sps:$4 sm:$0xff]  }
 0x349   : > { %5008 = vmatprep.subr.bf16.mxu0 %v7791_v16  ;;  %5432 = vmatprep.subr.bf16.mxu1 %v7794_v17  ;;  %v7875_v16 = vld [vmem:[%s9516_s8 + $0xea4] ss:$16 sps:$4 sm:$0xff]   ;;  %v7878_v17 = vld [vmem:[%s9516_s8 + $0xeac] ss:$16 sps:$4 sm:$0xff]  }
 0x34c   : > { %5009 = vmatpush1.bf16.msra.mxu0 %v7789_v18  ;;  %5433 = vmatpush1.bf16.msra.mxu1 %v7792_v19  ;;  %v7873_v18 = vld [vmem:[%s9516_s8 + $0xea0] ss:$16 sps:$4 sm:$0xff]   ;;  %v7876_v19 = vld [vmem:[%s9516_s8 + $0xea8] ss:$16 sps:$4 sm:$0xff]  }
 0x34d   : > { %5010 = vmatprep.subr.bf16.mxu0 %v7797_v20  ;;  %5434 = vmatprep.subr.bf16.mxu1 %v7800_v21  ;;  %v7881_v20 = vld [vmem:[%s9516_s8 + $0xec4] ss:$16 sps:$4 sm:$0xff]   ;;  %v7884_v21 = vld [vmem:[%s9516_s8 + $0xecc] ss:$16 sps:$4 sm:$0xff]  }
 0x350   : > { %5011 = vmatpush1.bf16.msra.mxu0 %v7795_v22  ;;  %5435 = vmatpush1.bf16.msra.mxu1 %v7798_v23  ;;  %v7879_v22 = vld [vmem:[%s9516_s8 + $0xec0] ss:$16 sps:$4 sm:$0xff]   ;;  %v7882_v23 = vld [vmem:[%s9516_s8 + $0xec8] ss:$16 sps:$4 sm:$0xff]  }
 0x351   : > { %5012 = vmatprep.subr.bf16.mxu0 %v7803_v24  ;;  %5436 = vmatprep.subr.bf16.mxu1 %v7806_v25  ;;  %v7887_v24 = vld [vmem:[%s9516_s8 + $0xee4] ss:$16 sps:$4 sm:$0xff]   ;;  %v7890_v25 = vld [vmem:[%s9516_s8 + $0xeec] ss:$16 sps:$4 sm:$0xff]  }
 0x354   : > { %5013 = vmatpush1.bf16.msra.mxu0 %v7801_v27  ;;  %5437 = vmatpush1.bf16.msra.mxu1 %v7804_v29  ;;  %v7885_v27 = vld [vmem:[%s9516_s8 + $0xee0] ss:$16 sps:$4 sm:$0xff]   ;;  %v7888_v29 = vld [vmem:[%s9516_s8 + $0xee8] ss:$16 sps:$4 sm:$0xff]  }
 0x355   : > { %5014 = vmatprep.subr.bf16.mxu0 %v7809_v30  ;;  %5438 = vmatprep.subr.bf16.mxu1 %v7812_v31  ;;  %v7893_v30 = vld [vmem:[%s9516_s8 + $0xf04] ss:$16 sps:$4 sm:$0xff]   ;;  %v7896_v31 = vld [vmem:[%s9516_s8 + $0xf0c] ss:$16 sps:$4 sm:$0xff]  }
 0x358   : > { %5015 = vmatpush1.bf16.msra.mxu0 %v7807_v26  ;;  %5439 = vmatpush1.bf16.msra.mxu1 %v7810_v28  ;;  %v7891_v26 = vld [vmem:[%s9516_s8 + $0xf00] ss:$16 sps:$4 sm:$0xff]   ;;  %v7894_v28 = vld [vmem:[%s9516_s8 + $0xf08] ss:$16 sps:$4 sm:$0xff]  }
 0x359   : > { %5016 = vmatprep.subr.bf16.mxu0 %v7815_v32  ;;  %5440 = vmatprep.subr.bf16.mxu1 %v7818_v33  ;;  %v7899_v32 = vld [vmem:[%s9516_s8 + $0xf24] ss:$16 sps:$4 sm:$0xff]   ;;  %v7902_v33 = vld [vmem:[%s9516_s8 + $0xf2c] ss:$16 sps:$4 sm:$0xff]  }
 0x35c   : > { %5017 = vmatpush1.bf16.msra.mxu0 %v7813_v35  ;;  %5441 = vmatpush1.bf16.msra.mxu1 %v7816_v37  ;;  %v7897_v35 = vld [vmem:[%s9516_s8 + $0xf20] ss:$16 sps:$4 sm:$0xff]   ;;  %v7900_v37 = vld [vmem:[%s9516_s8 + $0xf28] ss:$16 sps:$4 sm:$0xff]  }
 0x35d   : > { %5018 = vmatprep.subr.bf16.mxu0 %v7821_v38  ;;  %5442 = vmatprep.subr.bf16.mxu1 %v7824_v39  ;;  %v7905_v38 = vld [vmem:[%s9516_s8 + $0xf44] ss:$16 sps:$4 sm:$0xff]   ;;  %v7908_v39 = vld [vmem:[%s9516_s8 + $0xf4c] ss:$16 sps:$4 sm:$0xff]  }
 0x360   : > { %5019 = vmatpush1.bf16.msra.mxu0 %v7819_v40  ;;  %5443 = vmatpush1.bf16.msra.mxu1 %v7822_v34  ;;  %v7903_v40 = vld [vmem:[%s9516_s8 + $0xf40] ss:$16 sps:$4 sm:$0xff]   ;;  %v7906_v34 = vld [vmem:[%s9516_s8 + $0xf48] ss:$16 sps:$4 sm:$0xff]  }
 0x361   : > { %5020 = vmatprep.subr.bf16.mxu0 %v7827_v36  ;;  %5444 = vmatprep.subr.bf16.mxu1 %v7830_v41  ;;  %v7911_v36 = vld [vmem:[%s9516_s8 + $0xf64] ss:$16 sps:$4 sm:$0xff]   ;;  %v7914_v41 = vld [vmem:[%s9516_s8 + $0xf6c] ss:$16 sps:$4 sm:$0xff]  }
 0x364   : > { %5021 = vmatpush1.bf16.msra.mxu0 %v7825_v43  ;;  %5445 = vmatpush1.bf16.msra.mxu1 %v7828_v45  ;;  %v7909_v43 = vld [vmem:[%s9516_s8 + $0xf60] ss:$16 sps:$4 sm:$0xff]   ;;  %v7912_v45 = vld [vmem:[%s9516_s8 + $0xf68] ss:$16 sps:$4 sm:$0xff]  }
 0x365   : > { %5022 = vmatprep.subr.bf16.mxu0 %v7833_v46  ;;  %5446 = vmatprep.subr.bf16.mxu1 %v7836_v47  ;;  %v7917_v46 = vld [vmem:[%s9516_s8 + $0xf84] ss:$16 sps:$4 sm:$0xff]   ;;  %v7920_v47 = vld [vmem:[%s9516_s8 + $0xf8c] ss:$16 sps:$4 sm:$0xff]  }
 0x368   : > { %5023 = vmatpush1.bf16.msra.mxu0 %v7831_v48  ;;  %5447 = vmatpush1.bf16.msra.mxu1 %v7834_v49  ;;  %v7915_v48 = vld [vmem:[%s9516_s8 + $0xf80] ss:$16 sps:$4 sm:$0xff]   ;;  %v7918_v49 = vld [vmem:[%s9516_s8 + $0xf88] ss:$16 sps:$4 sm:$0xff]  }
 0x369   : > { %5024 = vmatprep.subr.bf16.mxu0 %v7839_v42  ;;  %5448 = vmatprep.subr.bf16.mxu1 %v7842_v44  ;;  %v7923_v42 = vld [vmem:[%s9516_s8 + $0xfa4] ss:$16 sps:$4 sm:$0xff]   ;;  %v7926_v44 = vld [vmem:[%s9516_s8 + $0xfac] ss:$16 sps:$4 sm:$0xff]  }
 0x36c   : > { %5025 = vmatpush1.bf16.msra.mxu0 %v7837_v52  ;;  %5449 = vmatpush1.bf16.msra.mxu1 %v7840_v53  ;;  %v7921_v52 = vld [vmem:[%s9516_s8 + $0xfa0] ss:$16 sps:$4 sm:$0xff]   ;;  %v7924_v53 = vld [vmem:[%s9516_s8 + $0xfa8] ss:$16 sps:$4 sm:$0xff]  }
 0x36d   : > { %5047 = vmatprep.subr.bf16.mxu0 %v7845_v54  ;;  %5471 = vmatprep.subr.bf16.mxu1 %v7848_v55  ;;  %v7929_v54 = vld [vmem:[%s9516_s8 + $0xfc4] ss:$16 sps:$4 sm:$0xff]   ;;  %v7932_v55 = vld [vmem:[%s9516_s8 + $0xfcc] ss:$16 sps:$4 sm:$0xff]  }
 0x36f   : > { %5027 = vmatmul.mubr.bf16.vlgmr.msra.gmra.mrb[0].mxu0 %v6390_v50  ;;  %5451 = vmatmul.mubr.bf16.vlgmr.msra.gmra.mrb[0].mxu1 %v6390_v50  ;;  %v7927_v50 = vld [vmem:[%s9516_s8 + $0xfc0] ss:$16 sps:$4 sm:$0xff]  }
 0x370   : > { %5048 = vmatpush1.bf16.msra.mxu0 %v7843_v57  ;;  %5472 = vmatpush1.bf16.msra.mxu1 %v7846_v58  ;;  %v7938_v57 = vld [vmem:[%s9516_s8 + $0xfec] ss:$16 sps:$4 sm:$0xff]   ;;  %v7933_v58 = vld [vmem:[%s9516_s8 + $0xfe0] ss:$16 sps:$4 sm:$0xff]  }
 0x371   : > { %5049 = vmatprep.subr.bf16.mxu0 %v7851_v61  ;;  %5473 = vmatprep.subr.bf16.mxu1 %v7854_v62  ;;  %v7936_v61 = vld [vmem:[%s9516_s8 + $0xfe8] ss:$16 sps:$4 sm:$0xff]  }
 0x372   : > { %5036 = vmatprep.mubr.bf16.mxu0 %v6407_v63  ;;  %5460 = vmatprep.mubr.bf16.mxu1 %v6407_v63  ;;  %v1435_v62 = vld [vmem:[%s9504_s9 + $0xb8] sm:$0xff] }
 0x373   : > { %v1443_v63 = vld [vmem:[%s9504_s9 + $0xf8] sm:$0xff] }
 0x374   : > { %5050 = vmatpush1.bf16.msra.mxu0 %v7849_v59  ;;  %5474 = vmatpush1.bf16.msra.mxu1 %v7852_v60  ;;  %v6392_v59 = vcombine.low %v10065_v3, %v10068_v4  ;;  %v6409_v60 = vcombine.high %v1435_v62, %v1443_v63 }
 0x375   : > { %5051 = vmatprep.subr.bf16.mxu0 %v7857_v0  ;;  %5475 = vmatprep.subr.bf16.mxu1 %v7860_v1  ;;  %v6408_v0 = vcombine.low %v1435_v62, %v1443_v63  ;;  %v1396_v1 = vld [vmem:[#allocation2] sm:$0xff] }
 0x377   : > { %5037 = vmatmul.mubr.bf16.gmra.mrb[4].mxu0 %v6406_v2  ;;  %5461 = vmatmul.mubr.bf16.gmra.mrb[4].mxu1 %v6406_v2  ;;  %v1398_v2 = vld [vmem:[#allocation2 + $0x10] sm:$0xff] }
 0x378   : > { %5052 = vmatpush1.bf16.msra.mxu0 %v7855_v5  ;;  %5476 = vmatpush1.bf16.msra.mxu1 %v7858_v6  ;;  %v1397_v5 = vld [vmem:[#allocation2 + $0x8] sm:$0xff]  ;;  %v1399_v6 = vld [vmem:[#allocation2 + $0x18] sm:$0xff] }
 0x379   : > { %5053 = vmatprep.subr.bf16.mxu0 %v7863_v7  ;;  %5477 = vmatprep.subr.bf16.mxu1 %v7866_v8 }
 0x37a   : > { %5079 = vmatprep.mubr.bf16.mxu0 %v6393_v9  ;;  %5503 = vmatprep.mubr.bf16.mxu1 %v6393_v9  ;;  %v1400_v9 = vld [vmem:[#allocation2 + $0x20] sm:$0xff] }
 0x37c   : > { %5054 = vmatpush1.bf16.msra.mxu0 %v7861_v10  ;;  %5478 = vmatpush1.bf16.msra.mxu1 %v7864_v11  ;;  %v1402_v10 = vld [vmem:[#allocation2 + $0x30] sm:$0xff] }
 0x37d   : > { %5055 = vmatprep.subr.bf16.mxu0 %v7869_v12  ;;  %5479 = vmatprep.subr.bf16.mxu1 %v7872_v13  ;;  %v1401_v13 = vld [vmem:[#allocation2 + $0x28] sm:$0xff] }
 0x380   : > { %5056 = vmatpush1.bf16.msra.mxu0 %v7867_v14  ;;  %5480 = vmatpush1.bf16.msra.mxu1 %v7870_v15  ;;  %v1403_v14 = vld [vmem:[#allocation2 + $0x38] sm:$0xff] }
 0x381   : > { %5057 = vmatprep.subr.bf16.mxu0 %v7875_v16  ;;  %5481 = vmatprep.subr.bf16.mxu1 %v7878_v17 }
 0x384   : > { %5058 = vmatpush1.bf16.msra.mxu0 %v7873_v18  ;;  %5482 = vmatpush1.bf16.msra.mxu1 %v7876_v19 }
 0x385   : > { %5059 = vmatprep.subr.bf16.mxu0 %v7881_v20  ;;  %5483 = vmatprep.subr.bf16.mxu1 %v7884_v21 }
 0x388   : > { %5060 = vmatpush1.bf16.msra.mxu0 %v7879_v22  ;;  %5484 = vmatpush1.bf16.msra.mxu1 %v7882_v23 }
 0x389   : > { %5061 = vmatprep.subr.bf16.mxu0 %v7887_v24  ;;  %5485 = vmatprep.subr.bf16.mxu1 %v7890_v25  ;;  %v1404_v25 = vld [vmem:[#allocation2 + $0x40] sm:$0xff] }
 0x38c   : > { %5062 = vmatpush1.bf16.msra.mxu0 %v7885_v27  ;;  %5486 = vmatpush1.bf16.msra.mxu1 %v7888_v29  ;;  %v1406_v27 = vld [vmem:[#allocation2 + $0x50] sm:$0xff]  ;;  %v1405_v29 = vld [vmem:[#allocation2 + $0x48] sm:$0xff] }
 0x38d   : > { %5063 = vmatprep.subr.bf16.mxu0 %v7893_v30  ;;  %5487 = vmatprep.subr.bf16.mxu1 %v7896_v31  ;;  %v1407_v30 = vld [vmem:[#allocation2 + $0x58] sm:$0xff] }
 0x390   : > { %5064 = vmatpush1.bf16.msra.mxu0 %v7891_v26  ;;  %5488 = vmatpush1.bf16.msra.mxu1 %v7894_v28  ;;  %v1408_v28 = vld [vmem:[#allocation2 + $0x60] sm:$0xff] }
 0x391   : > { %5065 = vmatprep.subr.bf16.mxu0 %v7899_v32  ;;  %5489 = vmatprep.subr.bf16.mxu1 %v7902_v33  ;;  %v1410_v32 = vld [vmem:[#allocation2 + $0x70] sm:$0xff] }
 0x394   : > { %5066 = vmatpush1.bf16.msra.mxu0 %v7897_v35  ;;  %5490 = vmatpush1.bf16.msra.mxu1 %v7900_v37 }
 0x395   : > { %5067 = vmatprep.subr.bf16.mxu0 %v7905_v38  ;;  %5491 = vmatprep.subr.bf16.mxu1 %v7908_v39  ;;  %v1409_v39 = vld [vmem:[#allocation2 + $0x68] sm:$0xff] }
 0x398   : > { %5068 = vmatpush1.bf16.msra.mxu0 %v7903_v40  ;;  %5492 = vmatpush1.bf16.msra.mxu1 %v7906_v34  ;;  %v1411_v40 = vld [vmem:[#allocation2 + $0x78] sm:$0xff] }
 0x399   : > { %5069 = vmatprep.subr.bf16.mxu0 %v7911_v36  ;;  %5493 = vmatprep.subr.bf16.mxu1 %v7914_v41 }
 0x39c   : > { %5070 = vmatpush1.bf16.msra.mxu0 %v7909_v43  ;;  %5494 = vmatpush1.bf16.msra.mxu1 %v7912_v45 }
 0x39d   : > { %5071 = vmatprep.subr.bf16.mxu0 %v7917_v46  ;;  %5495 = vmatprep.subr.bf16.mxu1 %v7920_v47 }
 0x3a0   : > { %5072 = vmatpush1.bf16.msra.mxu0 %v7915_v48  ;;  %5496 = vmatpush1.bf16.msra.mxu1 %v7918_v49 }
 0x3a1   : > { %5073 = vmatprep.subr.bf16.mxu0 %v7923_v42  ;;  %5497 = vmatprep.subr.bf16.mxu1 %v7926_v44 }
 0x3a4   : > { %5074 = vmatpush1.bf16.msra.mxu0 %v7921_v52  ;;  %5498 = vmatpush1.bf16.msra.mxu1 %v7924_v53 }
 0x3a5   : > { %5075 = vmatprep.subr.bf16.mxu0 %v7929_v54  ;;  %5499 = vmatprep.subr.bf16.mxu1 %v7932_v55 }
 0x3a8   : > { %5076 = vmatpush1.bf16.msra.mxu0 %v7927_v50  ;;  %5500 = vmatpush1.bf16.msra.mxu1 %v7930_v51 }
 0x3a9   : > { %5077 = vmatprep.subr.bf16.mxu0 %v7935_v56  ;;  %5501 = vmatprep.subr.bf16.mxu1 %v7938_v57 }
 0x3ac   : > { %5078 = vmatpush1.bf16.msra.mxu0 %v7933_v58  ;;  %5502 = vmatpush1.bf16.msra.mxu1 %v7936_v61 }
 0x3af   : > { %5080 = vmatmul.mubr.bf16.vlgmr.msra.gmra.mrb[0].mxu0 %v6392_v59  ;;  %5504 = vmatmul.mubr.bf16.vlgmr.msra.gmra.mrb[0].mxu1 %v6392_v59 }
 0x3b0   : > { %5089 = vmatprep.mubr.bf16.mxu0 %v6409_v60  ;;  %5513 = vmatprep.mubr.bf16.mxu1 %v6409_v60 }
 0x3b7   : > { %5090 = vmatmul.mubr.bf16.gmra.mrb[4].mxu0 %v6408_v0  ;;  %5514 = vmatmul.mubr.bf16.gmra.mrb[4].mxu1 %v6408_v0 }
 0x482   : > { %v5081_v7 = vpop.f32.mrb[0].mxu0  ;;  %v5505_v8 = vpop.f32.mrb[0].mxu1 }
 0x483   : > { %v5524_v11 = vadd.f32 %v5081_v7, %v1396_v1  ;;  %v5526_v3 = vadd.f32 %v5505_v8, %v1398_v2  ;;  %v5083_v4 = vpop.f32.mrb[1].mxu0  ;;  %v5507_v12 = vpop.f32.mrb[1].mxu1 }
 0x484   : > { %v5525_v15 = vadd.f32 %v5083_v4, %v1397_v5  ;;  %v5527_v16 = vadd.f32 %v5507_v12, %v1399_v6  ;;  %v5085_v17 = vpop.f32.mrb[2].mxu0  ;;  %v5509_v18 = vpop.f32.mrb[2].mxu1 }
 0x485   : > { %5540 = vst [vmem:[#allocation2] sm:$0xff] %v5524_v11  ;;  %5542 = vst [vmem:[#allocation2 + $0x10] sm:$0xff] %v5526_v3  ;;  %v5528_v19 = vadd.f32 %v5085_v17, %v1400_v9  ;;  %v5530_v20 = vadd.f32 %v5509_v18, %v1402_v10  ;;  %v5087_v21 = vpop.f32.mrb[3].mxu0  ;;  %v5511_v22 = vpop.f32.mrb[3].mxu1 }
 0x486   : > { %5541 = vst [vmem:[#allocation2 + $0x8] sm:$0xff] %v5525_v15  ;;  %5543 = vst [vmem:[#allocation2 + $0x18] sm:$0xff] %v5527_v16  ;;  %v5529_v23 = vadd.f32 %v5087_v21, %v1401_v13  ;;  %v5531_v24 = vadd.f32 %v5511_v22, %v1403_v14 }
 0x487   : > { %5544 = vst [vmem:[#allocation2 + $0x20] sm:$0xff] %v5528_v19  ;;  %5546 = vst [vmem:[#allocation2 + $0x30] sm:$0xff] %v5530_v20 }
 0x488   : > { %5545 = vst [vmem:[#allocation2 + $0x28] sm:$0xff] %v5529_v23  ;;  %5547 = vst [vmem:[#allocation2 + $0x38] sm:$0xff] %v5531_v24 }
 0x48a   : > { %v5091_v31 = vpop.f32.mrb[4].mxu0  ;;  %v5515_v26 = vpop.f32.mrb[4].mxu1  ;;  %5559 = sbr.rel (%p6922_p1) target bundleno = 1304 (0x518), region = 79 }
 0x48b   : > { %v5532_v33 = vadd.f32 %v5091_v31, %v1404_v25  ;;  %v5534_v35 = vadd.f32 %v5515_v26, %v1406_v27  ;;  %v5093_v37 = vpop.f32.mrb[5].mxu0  ;;  %v5517_v38 = vpop.f32.mrb[5].mxu1 }
 0x48c   : > { %v5533_v34 = vadd.f32 %v5093_v37, %v1405_v29  ;;  %v5535_v36 = vadd.f32 %v5517_v38, %v1407_v30  ;;  %v5095_v41 = vpop.f32.mrb[6].mxu0  ;;  %v5519_v43 = vpop.f32.mrb[6].mxu1  ;;  %v10131_v44 = vld [vmem:[#allocation2] sm:$0xff] (!%p6922_p1)  ;;  %v10135_v53 = vld [vmem:[#allocation2 + $0x10] sm:$0xff] (!%p6922_p1) }
 0x48d   : > { %5548 = vst [vmem:[#allocation2 + $0x40] sm:$0xff] %v5532_v33  ;;  %5550 = vst [vmem:[#allocation2 + $0x50] sm:$0xff] %v5534_v35  ;;  %v5536_v45 = vadd.f32 %v5095_v41, %v1408_v28  ;;  %v5538_v46 = vadd.f32 %v5519_v43, %v1410_v32  ;;  %v5097_v47 = vpop.f32.mrb[7].mxu0  ;;  %v5521_v48 = vpop.f32.mrb[7].mxu1  ;;  %v10133_v52 = vld [vmem:[#allocation2 + $0x8] sm:$0xff] (!%p6922_p1)  ;;  %v10137_v54 = vld [vmem:[#allocation2 + $0x18] sm:$0xff] (!%p6922_p1)  ;;  %v10145_v51 = vmul.f32 (!%p6922_p1), %v10131_v44, %v10131_v44 }
 0x48e   : > { %5549 = vst [vmem:[#allocation2 + $0x48] sm:$0xff] %v5533_v34  ;;  %5551 = vst [vmem:[#allocation2 + $0x58] sm:$0xff] %v5535_v36  ;;  %v5537_v49 = vadd.f32 %v5097_v47, %v1409_v39  ;;  %v5539_v42 = vadd.f32 %v5521_v48, %v1411_v40  ;;  %v10139_v55 = vld [vmem:[#allocation2 + $0x20] sm:$0xff] (!%p6922_p1)  ;;  %v10149_v56 = vmul.f32 (!%p6922_p1), %v10133_v52, %v10133_v52  ;;  %v10155_v58 = vld [vmem:[#allocation2 + $0x30] sm:$0xff] (!%p6922_p1) }
 0x48f   : > { %5552 = vst [vmem:[#allocation2 + $0x60] sm:$0xff] %v5536_v45  ;;  %5554 = vst [vmem:[#allocation2 + $0x70] sm:$0xff] %v5538_v46  ;;  %v10141_v50 = vld [vmem:[#allocation2 + $0x28] sm:$0xff] (!%p6922_p1)  ;;  %v10153_v57 = vmul.f32 (!%p6922_p1), %v10135_v53, %v10135_v53  ;;  %v10157_v61 = vld [vmem:[#allocation2 + $0x38] sm:$0xff] (!%p6922_p1)  ;;  %v5576_v63 = vadd.f32 (!%p6922_p1), %v10139_v55, %v10131_v44  ;;  %v10167_v60 = vmul.f32 (!%p6922_p1), %v10137_v54, %v10137_v54 }
 0x490   : > { %5553 = vst [vmem:[#allocation2 + $0x68] sm:$0xff] %v5537_v49  ;;  %5555 = vst [vmem:[#allocation2 + $0x78] sm:$0xff] %v5539_v42  ;;  %v5583_v59 = vadd.f32 (!%p6922_p1), %v10141_v50, %v10133_v52  ;;  %v10171_v0 = vmul.f32 (!%p6922_p1), %v10139_v55, %v10139_v55  ;;  %v5590_v6 = vadd.f32 (!%p6922_p1), %v10155_v58, %v10135_v53 }
 0x491   : > { %v5597_v7 = vadd.f32 %v10157_v61, %v10137_v54  ;;  %v10185_v8 = vmul.f32 %v10141_v50, %v10141_v50  ;;  %v10189_v9 = vmul.f32 %v10155_v58, %v10155_v58  ;;  %v5577_v4 = vrot.slane %v5576_v63, 4 }
 0x492   : > { %v5584_v12 = vrot.slane %v5583_v59, 4  ;;  %v10199_v13 = vmul.f32 %v10157_v61, %v10157_v61  ;;  %v5591_v16 = vrot.slane %v5590_v6, 4 }
 0x493   : > { %v5598_v17 = vrot.slane %v5597_v7, 4  ;;  %v5578_v20 = vadd.f32 %v5577_v4, %v5576_v63 }
 0x494   : > { %v10159_v62 = vld [vmem:[#allocation2 + $0x40] sm:$0xff]  ;;  %v10175_v2 = vld [vmem:[#allocation2 + $0x50] sm:$0xff]  ;;  %v5585_v21 = vadd.f32 %v5584_v12, %v5583_v59  ;;  %v5592_v24 = vadd.f32 %v5591_v16, %v5590_v6 }
 0x495   : > { %v10173_v1 = vld [vmem:[#allocation2 + $0x48] sm:$0xff]  ;;  %v10177_v5 = vld [vmem:[#allocation2 + $0x58] sm:$0xff]  ;;  %v10203_v14 = vmul.f32 %v10159_v62, %v10159_v62  ;;  %v5599_v25 = vadd.f32 %v5598_v17, %v5597_v7  ;;  %v5579_v30 = vrot.slane %v5578_v20, 2 }
 0x496   : > { %v10191_v10 = vld [vmem:[#allocation2 + $0x60] sm:$0xff]  ;;  %v10195_v3 = vld [vmem:[#allocation2 + $0x70] sm:$0xff]  ;;  %v5586_v31 = vrot.slane %v5585_v21, 2  ;;  %v5593_v32 = vrot.slane %v5592_v24, 2 }
 0x497   : > { %v10193_v11 = vld [vmem:[#allocation2 + $0x68] sm:$0xff]  ;;  %v10205_v15 = vld [vmem:[#allocation2 + $0x78] sm:$0xff]  ;;  %v5604_v18 = vadd.f32 %v10191_v10, %v10159_v62  ;;  %v5618_v22 = vadd.f32 %v10195_v3, %v10175_v2  ;;  %v5600_v33 = vrot.slane %v5599_v25, 2  ;;  %v5580_v38 = vadd.f32 %v5579_v30, %v5578_v20 }
 0x498   : > { %v5611_v19 = vadd.f32 %v10193_v11, %v10173_v1  ;;  %v5625_v23 = vadd.f32 %v10205_v15, %v10177_v5  ;;  %v5587_v39 = vadd.f32 %v5586_v31, %v5585_v21  ;;  %v5594_v36 = vadd.f32 %v5593_v32, %v5592_v24 }
 0x499   : > { %v5605_v27 = vrot.slane %v5604_v18, 4  ;;  %v5619_v26 = vrot.slane %v5618_v22, 4  ;;  %v5601_v41 = vadd.f32 %v5600_v33, %v5599_v25  ;;  %v5581_v46 = vrot.slane %v5580_v38, 1 }
 0x49a   : > { %v5612_v29 = vrot.slane %v5611_v19, 4  ;;  %v5626_v28 = vrot.slane %v5625_v23, 4  ;;  %v5588_v47 = vrot.slane %v5587_v39, 1  ;;  %v5595_v42 = vrot.slane %v5594_v36, 1 }
 0x49b   : > { %v5606_v35 = vadd.f32 %v5605_v27, %v5604_v18  ;;  %v5620_v40 = vadd.f32 %v5619_v26, %v5618_v22  ;;  %v5602_v63 = vrot.slane %v5601_v41, 1  ;;  %v5582_v7 = vadd.f32 %v5581_v46, %v5580_v38 }
 0x49c   : > { %v5613_v37 = vadd.f32 %v5612_v29, %v5611_v19  ;;  %v5627_v34 = vadd.f32 %v5626_v28, %v5625_v23  ;;  %v5589_v4 = vadd.f32 %v5588_v47, %v5587_v39  ;;  %v5596_v17 = vadd.f32 %v5595_v42, %v5594_v36 }
 0x49d   : > { %v5607_v43 = vrot.slane %v5606_v35, 2  ;;  %v5621_v48 = vrot.slane %v5620_v40, 2  ;;  %v5603_v18 = vadd.f32 %v5602_v63, %v5601_v41  ;;  %v10215_v23 = vmul.f32 0.0625, %v5582_v7 }
 0x49e   : > { %v5614_v45 = vrot.slane %v5613_v37, 2  ;;  %v5628_v49 = vrot.slane %v5627_v34, 2  ;;  %v10217_v24 = vmul.f32 0.0625, %v5589_v4  ;;  %v10219_v29 = vmul.f32 0.0625, %v5596_v17 }
 0x49f   : > { %v5608_v59 = vadd.f32 %v5607_v43, %v5606_v35  ;;  %v5622_v12 = vadd.f32 %v5621_v48, %v5620_v40  ;;  %v10221_v30 = vmul.f32 0.0625, %v5603_v18  ;;  %v5650_v28 = vmul.f32 %v10173_v1, %v10173_v1 }
 0x4a0   : > { %v5615_v6 = vadd.f32 %v5614_v45, %v5613_v37  ;;  %v5629_v16 = vadd.f32 %v5628_v49, %v5627_v34  ;;  %v5651_v32 = vmul.f32 %v10175_v2, %v10175_v2  ;;  %v5652_v37 = vmul.f32 %v10177_v5, %v10177_v5 }
 0x4a1   : > { %v5609_v19 = vrot.slane %v5608_v59, 1  ;;  %v5623_v21 = vrot.slane %v5622_v12, 1  ;;  %v5653_v38 = vmul.f32 %v10191_v10, %v10191_v10  ;;  %v5654_v34 = vmul.f32 %v10193_v11, %v10193_v11 }
 0x4a2   : > { %v5616_v20 = vrot.slane %v5615_v6, 1  ;;  %v5630_v22 = vrot.slane %v5629_v16, 1  ;;  %v5655_v36 = vmul.f32 %v10195_v3, %v10195_v3  ;;  %v5656_v41 = vmul.f32 %v10205_v15, %v10205_v15 }
 0x4a3   : > { %v5610_v25 = vadd.f32 %v5609_v19, %v5608_v59  ;;  %v5624_v31 = vadd.f32 %v5623_v21, %v5622_v12  ;;  %v5657_v43 = vadd.f32 %v10171_v0, %v10145_v51  ;;  %v5664_v45 = vadd.f32 %v10185_v8, %v10149_v56 }
 0x4a4   : > { %v5617_v27 = vadd.f32 %v5616_v20, %v5615_v6  ;;  %v5631_v26 = vadd.f32 %v5630_v22, %v5629_v16  ;;  %v5671_v46 = vadd.f32 %v10189_v9, %v10153_v57  ;;  %v5678_v47 = vadd.f32 %v10199_v13, %v10167_v60 }
 0x4a5   : > { %v10227_v33 = vmul.f32 0.0625, %v5610_v25  ;;  %v10235_v39 = vmul.f32 0.0625, %v5624_v31  ;;  %v5685_v48 = vadd.f32 %v5653_v38, %v10203_v14  ;;  %v5692_v49 = vadd.f32 %v5654_v34, %v5650_v28 }
 0x4a6   : > { %v10229_v35 = vmul.f32 0.0625, %v5617_v27  ;;  %v10237_v40 = vmul.f32 0.0625, %v5631_v26  ;;  %v5699_v42 = vadd.f32 %v5655_v36, %v5651_v32  ;;  %v5658_v63 = vrot.slane %v5657_v43, 4 }
 0x4a7   : > { %v5665_v59 = vrot.slane %v5664_v45, 4  ;;  %v5672_v6 = vrot.slane %v5671_v46, 4  ;;  %v5706_v7 = vadd.f32 %v5656_v41, %v5652_v37  ;;  %v5679_v4 = vrot.slane %v5678_v47, 4 }
 0x4a8   : > { %v5686_v12 = vrot.slane %v5685_v48, 4  ;;  %v5693_v51 = vrot.slane %v5692_v49, 4  ;;  %v5700_v0 = vrot.slane %v5699_v42, 4  ;;  %v5659_v16 = vadd.f32 %v5658_v63, %v5657_v43 }
 0x4a9   : > { %v5666_v56 = vadd.f32 %v5665_v59, %v5664_v45  ;;  %v5673_v8 = vadd.f32 %v5672_v6, %v5671_v46  ;;  %v5707_v17 = vrot.slane %v5706_v7, 4  ;;  %v5680_v57 = vadd.f32 %v5679_v4, %v5678_v47 }
 0x4aa   : > { %v5687_v9 = vadd.f32 %v5686_v12, %v5685_v48  ;;  %v5694_v18 = vadd.f32 %v5693_v51, %v5692_v49  ;;  %v5701_v60 = vadd.f32 %v5700_v0, %v5699_v42  ;;  %v5660_v13 = vrot.slane %v5659_v16, 2 }
 0x4ab   : > { %v5667_v14 = vrot.slane %v5666_v56, 2  ;;  %v5674_v19 = vrot.slane %v5673_v8, 2  ;;  %v5708_v20 = vadd.f32 %v5707_v17, %v5706_v7  ;;  %v5681_v21 = vrot.slane %v5680_v57, 2 }
 0x4ac   : > { %v5688_v22 = vrot.slane %v5687_v9, 2  ;;  %v5695_v25 = vrot.slane %v5694_v18, 2  ;;  %v5702_v27 = vrot.slane %v5701_v60, 2  ;;  %v5661_v31 = vadd.f32 %v5660_v13, %v5659_v16 }
 0x4ad   : > { %v5668_v26 = vadd.f32 %v5667_v14, %v5666_v56  ;;  %v5675_v28 = vadd.f32 %v5674_v19, %v5673_v8  ;;  %v5709_v32 = vrot.slane %v5708_v20, 2  ;;  %v5682_v37 = vadd.f32 %v5681_v21, %v5680_v57 }
 0x4ae   : > { %v5689_v38 = vadd.f32 %v5688_v22, %v5687_v9  ;;  %v5696_v34 = vadd.f32 %v5695_v25, %v5694_v18  ;;  %v5703_v36 = vadd.f32 %v5702_v27, %v5701_v60  ;;  %v5662_v41 = vrot.slane %v5661_v31, 1 }
 0x4af   : > { %v5669_v43 = vrot.slane %v5668_v26, 1  ;;  %v5676_v45 = vrot.slane %v5675_v28, 1  ;;  %v5710_v46 = vadd.f32 %v5709_v32, %v5708_v20  ;;  %v5683_v47 = vrot.slane %v5682_v37, 1 }
 0x4b0   : > { %v5690_v48 = vrot.slane %v5689_v38, 1  ;;  %v5697_v49 = vrot.slane %v5696_v34, 1  ;;  %v5704_v42 = vrot.slane %v5703_v36, 1  ;;  %v5663_v63 = vadd.f32 %v5662_v41, %v5661_v31 }
 0x4b1   : > { %v5670_v59 = vadd.f32 %v5669_v43, %v5668_v26  ;;  %v5677_v6 = vadd.f32 %v5676_v45, %v5675_v28  ;;  %v5711_v7 = vrot.slane %v5710_v46, 1  ;;  %v5684_v4 = vadd.f32 %v5683_v47, %v5682_v37 }
 0x4b2   : > { %v5691_v12 = vadd.f32 %v5690_v48, %v5689_v38  ;;  %v5698_v51 = vadd.f32 %v5697_v49, %v5696_v34  ;;  %v5705_v0 = vadd.f32 %v5704_v42, %v5703_v36  ;;  %v5713_v56 = vmul.f32 0.0625, %v5663_v63 }
 0x4b3   : > { %v5712_v16 = vadd.f32 %v5711_v7, %v5710_v46  ;;  %v5714_v8 = vmul.f32 0.0625, %v5670_v59  ;;  %v5715_v17 = vmul.f32 0.0625, %v5677_v6  ;;  %v5716_v57 = vmul.f32 0.0625, %v5684_v4 }
 0x4b4   : > { %v5717_v9 = vmul.f32 0.0625, %v5691_v12  ;;  %v5718_v18 = vmul.f32 0.0625, %v5698_v51  ;;  %v5719_v60 = vmul.f32 0.0625, %v5705_v0  ;;  %v5721_v14 = vmul.f32 %v10215_v23, %v10215_v23 }
 0x4b5   : > { %v5720_v13 = vmul.f32 0.0625, %v5712_v16  ;;  %v5722_v19 = vmul.f32 %v10217_v24, %v10217_v24  ;;  %v5723_v20 = vmul.f32 %v10219_v29, %v10219_v29  ;;  %v5724_v21 = vmul.f32 %v10221_v30, %v10221_v30 }
 0x4b6   : > { %v5725_v22 = vmul.f32 %v10227_v33, %v10227_v33  ;;  %v5726_v25 = vmul.f32 %v10229_v35, %v10229_v35  ;;  %v5727_v27 = vmul.f32 %v10235_v39, %v10235_v39  ;;  %v5728_v31 = vmul.f32 %v10237_v40, %v10237_v40 }
 0x4b7   : > { %v5729_v26 = vsub.f32 %v5713_v56, %v5721_v14  ;;  %v5730_v28 = vsub.f32 %v5714_v8, %v5722_v19  ;;  %v5731_v32 = vsub.f32 %v5715_v17, %v5723_v20  ;;  %v5732_v37 = vsub.f32 %v5716_v57, %v5724_v21 }
 0x4b8   : > { %v5733_v38 = vsub.f32 %v5717_v9, %v5725_v22  ;;  %v5734_v34 = vsub.f32 %v5718_v18, %v5726_v25  ;;  %v5735_v36 = vsub.f32 %v5719_v60, %v5727_v27  ;;  %v5736_v41 = vsub.f32 %v5720_v13, %v5728_v31 }
 0x4b9   : > { %v5737_v43 = vmax.f32 %v5729_v26, 0.0  ;;  %v5738_v45 = vmax.f32 %v5730_v28, 0.0  ;;  %v5739_v46 = vmax.f32 %v5731_v32, 0.0  ;;  %v5740_v47 = vmax.f32 %v5732_v37, 0.0 }
 0x4ba   : > { %v5741_v48 = vmax.f32 %v5733_v38, 0.0  ;;  %v5742_v49 = vmax.f32 %v5734_v34, 0.0  ;;  %v5743_v42 = vmax.f32 %v5735_v36, 0.0  ;;  %v5744_v6 = vmax.f32 %v5736_v41, 0.0 }
 0x4bb   : > { %v5746_v63 = vadd.f32 1e-05, %v5737_v43  ;;  %v5747_v59 = vadd.f32 1e-05, %v5738_v45  ;;  %v5748_v7 = vadd.f32 1e-05, %v5739_v46  ;;  %v5775_v17 = vlaneseq }
 0x4bc   : > { %v5749_v4 = vadd.f32 1e-05, %v5740_v47  ;;  %v5750_v12 = vadd.f32 1e-05, %v5741_v48  ;;  %v5751_v51 = vadd.f32 1e-05, %v5742_v49 }
 0x4bd   : > { %7939 = vrsqrt.f32 %v5746_v63  ;;  %v5752_v0 = vadd.f32 1e-05, %v5743_v42  ;;  %v5753_v16 = vadd.f32 1e-05, %v5744_v6  ;;  %v8192_v56 = vmov 1966171168  }
 0x4be   : > { %7941 = vrsqrt.f32 %v5747_v59  ;;  %v5773_v8 = vunpack.c.l.s4 %v8192_v56  ;;  %v10270_v9 = vshrl.u32 %v5775_v17, 7  ;;  %v5745_v43 = vld [vmem:[%s9518_s23] ss:$2 sm:$0xf] }
 0x4bf   : > { %7943 = vrsqrt.f32 %v5748_v7 }
 0x4c0   : > { %7945 = vrsqrt.f32 %v5749_v4  ;;  %v5774_v57 = vunpack.c.0.s8 %v5773_v8  ;;  %v10282_v45 = vsub.s32 0, %v10270_v9  ;;  %v10285_v48 = vsub.s32 1, %v10270_v9 }
 0x4c1   : > { %7947 = vrsqrt.f32 %v5750_v12  ;;  %v10288_v49 = vsub.s32 2, %v10270_v9  ;;  %v10291_v42 = vsub.s32 3, %v10270_v9 }
 0x4c2   : > { %7949 = vrsqrt.f32 %v5751_v51  ;;  %v10273_v19 = vsub.s32 %v5774_v57, %v10270_v9 }
 0x4c3   : > { %7951 = vrsqrt.f32 %v5752_v0 }
 0x4c4   : > { %7953 = vrsqrt.f32 %v5753_v16 }
 0x4c7   : > { %v7940_v18 = vpop.eup %7939 }
 0x4c8   : > { %v7942_v60 = vpop.eup %7941 }
 0x4c9   : > { %v7944_v13 = vpop.eup %7943  ;;  %v5770_v14 = vcombine.low %v7940_v18, %v7942_v60 }
 0x4ca   : > { %v7946_v20 = vpop.eup %7945 }
 0x4cb   : > { %v7948_v21 = vpop.eup %7947  ;;  %v5771_v22 = vcombine.low %v7944_v13, %v7946_v20  ;;  %v5778_v25 = vrot.slane %v5770_v14, %v10273_v19  ;;  %v8193_v14 = vmov 1983009808  }
 0x4cc   : > { %v7950_v27 = vpop.eup %7949  ;;  %v10306_v20 = vunpack.c.l.s4 %v8193_v14 }
 0x4cd   : > { %v7952_v31 = vpop.eup %7951  ;;  %v5785_v26 = vrot.slane %v5771_v22, %v10273_v19  ;;  %v5794_v28 = vcombine.low %v7948_v21, %v7950_v27 }
 0x4ce   : > { %v7954_v32 = vpop.eup %7953 }
 0x4cf   : > { %v5786_v37 = vcombine.low %v5778_v25, %v5785_v26  ;;  %v5795_v38 = vcombine.low %v7952_v31, %v7954_v32  ;;  %v5802_v34 = vrot.slane %v5794_v28, %v10273_v19 }
 0x4d1   : > { %v5793_v36 = vrot.slane %v5786_v37, %v10273_v19  ;;  %v5809_v41 = vrot.slane %v5795_v38, %v10273_v19  ;;  %v6923_v38 = vld [vmem:[%s9518_s23 + $0x1] ss:$2 sm:$0xf] }
 0x4d3   : > { %v5810_v46 = vcombine.low %v5802_v34, %v5809_v41  ;;  %v5820_v47 = vmul.f32 %v5793_v36, %v5745_v43 }
 0x4d5   : > { %v5817_v63 = vrot.slane %v5810_v46, %v10273_v19  ;;  %v5829_v59 = vrot.slane %v5820_v47, %v10282_v45  ;;  %v5833_v6 = vrot.slane %v5820_v47, %v10285_v48  ;;  %v5837_v7 = vrot.slane %v5820_v47, %v10288_v49 }
 0x4d6   : > { %v5841_v4 = vrot.slane %v5820_v47, %v10291_v42 }
 0x4d7   : > { %v5821_v12 = vmul.f32 %v5817_v63, %v5745_v43  ;;  %v5866_v51 = vmul.f32 %v5829_v59, %v10215_v23  ;;  %v5867_v0 = vmul.f32 %v5833_v6, %v10217_v24  ;;  %v5868_v16 = vmul.f32 %v5837_v7, %v10219_v29 }
 0x4d8   : > { %v5869_v56 = vmul.f32 %v5841_v4, %v10221_v30  ;;  %v5937_v37 = vmul.f32 %v5841_v4, %v10137_v54  ;;  %v5938_v36 = vmul.f32 %v5829_v59, %v10139_v55  ;;  %v5939_v41 = vmul.f32 %v5833_v6, %v10141_v50 }
 0x4d9   : > { %v5845_v8 = vrot.slane %v5821_v12, %v10282_v45  ;;  %v5849_v17 = vrot.slane %v5821_v12, %v10285_v48  ;;  %v5853_v57 = vrot.slane %v5821_v12, %v10288_v49  ;;  %v5857_v18 = vrot.slane %v5821_v12, %v10291_v42 }
 0x4da   : > { %v5882_v60 = vcombine.low %v5866_v51, %v5867_v0  ;;  %v5883_v13 = vcombine.low %v5868_v16, %v5869_v56  ;;  %v5940_v43 = vmul.f32 %v5837_v7, %v10155_v58 }
 0x4db   : > { %v5870_v23 = vmul.f32 %v5845_v8, %v10227_v33  ;;  %v5871_v24 = vmul.f32 %v5849_v17, %v10229_v35  ;;  %v5872_v29 = vmul.f32 %v5853_v57, %v10235_v39  ;;  %v5873_v30 = vmul.f32 %v5857_v18, %v10237_v40 }
 0x4dc   : > { %v5890_v21 = vrot.slane %v5882_v60, %v10273_v19  ;;  %v5897_v22 = vrot.slane %v5883_v13, %v10273_v19  ;;  %v5934_v33 = vmul.f32 %v5829_v59, %v10131_v44  ;;  %v6148_v35 = vunpack.c.0.s8 %v10306_v20 }
 0x4dd   : > { %v5906_v25 = vcombine.low %v5870_v23, %v5871_v24  ;;  %v5907_v27 = vcombine.low %v5872_v29, %v5873_v30  ;;  %v5935_v39 = vmul.f32 %v5833_v6, %v10133_v52  ;;  %v5936_v40 = vmul.f32 %v5837_v7, %v10135_v53 }
 0x4de   : > { %v5898_v31 = vcombine.low %v5890_v21, %v5897_v22  ;;  %v5941_v44 = vmul.f32 %v5841_v4, %v10157_v61  ;;  %v5942_v47 = vmul.f32 %v5845_v8, %v10159_v62  ;;  %v5943_v63 = vmul.f32 %v5849_v17, %v10173_v1 }
 0x4df   : > { %v5914_v26 = vrot.slane %v5906_v25, %v10273_v19  ;;  %v5921_v28 = vrot.slane %v5907_v27, %v10273_v19  ;;  %v5944_v53 = vmul.f32 %v5853_v57, %v10175_v2  ;;  %v5945_v54 = vmul.f32 %v5857_v18, %v10177_v5 }
 0x4e0   : > { %v5905_v32 = vrot.slane %v5898_v31, %v10273_v19  ;;  %v5946_v12 = vmul.f32 %v5845_v8, %v10191_v10  ;;  %v5947_v62 = vmul.f32 %v5849_v17, %v10193_v11  ;;  %v5948_v1 = vmul.f32 %v5853_v57, %v10195_v3 }
 0x4e1   : > { %v5922_v34 = vcombine.low %v5914_v26, %v5921_v28  ;;  %v10347_v29 = vsub.s32 %v6148_v35, %v10270_v9 }
 0x4e2   : > { %v5932_v46 = vsub.f32 %v6923_v38, %v5905_v32 }
 0x4e3   : > { %v5929_v52 = vrot.slane %v5922_v34, %v10273_v19  ;;  %v5949_v19 = vmul.f32 %v5857_v18, %v10205_v15 }
 0x4e4   : > { %v5955_v55 = vrot.slane %v5932_v46, %v10282_v45  ;;  %v5959_v50 = vrot.slane %v5932_v46, %v10285_v48  ;;  %v5963_v58 = vrot.slane %v5932_v46, %v10288_v49  ;;  %v5967_v61 = vrot.slane %v5932_v46, %v10291_v42 }
 0x4e5   : > { %v5933_v59 = vsub.f32 %v6923_v38, %v5929_v52  ;;  %v6057_v52 = vld [vmem:[%s9525_s29 + $0x8] sm:$0xff] }
 0x4e6   : > { %v5992_v2 = vadd.f32 %v5955_v55, %v5934_v33  ;;  %v5993_v6 = vadd.f32 %v5959_v50, %v5935_v39  ;;  %v5994_v5 = vadd.f32 %v5963_v58, %v5936_v40  ;;  %v5995_v7 = vadd.f32 %v5967_v61, %v5937_v37 }
 0x4e7   : > { %v5971_v10 = vrot.slane %v5933_v59, %v10282_v45  ;;  %v5975_v4 = vrot.slane %v5933_v59, %v10285_v48  ;;  %v5979_v51 = vrot.slane %v5933_v59, %v10288_v49  ;;  %v5983_v0 = vrot.slane %v5933_v59, %v10291_v42 }
 0x4e8   : > { %v5996_v16 = vadd.f32 %v5955_v55, %v5938_v36  ;;  %v5997_v56 = vadd.f32 %v5959_v50, %v5939_v41  ;;  %v5998_v8 = vadd.f32 %v5963_v58, %v5940_v43  ;;  %v5999_v11 = vadd.f32 %v5967_v61, %v5941_v44  ;;  %v6059_v55 = vld [vmem:[%s9525_s29 + $0x18] sm:$0xff]  ;;  %v6060_v50 = vld [vmem:[%s9525_s29 + $0x20] sm:$0xff]  ;;  %v6061_v58 = vld [vmem:[%s9525_s29 + $0x28] sm:$0xff] }
 0x4e9   : > { %v6000_v17 = vadd.f32 %v5971_v10, %v5942_v47  ;;  %v6001_v3 = vadd.f32 %v5975_v4, %v5943_v63  ;;  %v6002_v57 = vadd.f32 %v5979_v51, %v5944_v53  ;;  %v6003_v15 = vadd.f32 %v5983_v0, %v5945_v54  ;;  %v6056_v63 = vld [vmem:[%s9525_s29] sm:$0xff]  ;;  %v6058_v53 = vld [vmem:[%s9525_s29 + $0x10] sm:$0xff] }
 0x4ea   : > { %v6004_v18 = vadd.f32 %v5971_v10, %v5946_v12  ;;  %v6005_v60 = vadd.f32 %v5975_v4, %v5947_v62  ;;  %v6006_v13 = vadd.f32 %v5979_v51, %v5948_v1  ;;  %v6007_v14 = vadd.f32 %v5983_v0, %v5949_v19  ;;  %v6062_v62 = vld [vmem:[%s9525_s29 + $0x30] sm:$0xff]  ;;  %v6063_v1 = vld [vmem:[%s9525_s29 + $0x38] sm:$0xff] }
 0x4eb   : > { %vm6008_vm0 = vcmp.ge.f32.partialorder %v5992_v2, 0.0  ;;  %vm6009_vm1 = vcmp.ge.f32.partialorder %v5993_v6, 0.0  ;;  %vm6010_vm2 = vcmp.ge.f32.partialorder %v5994_v5, 0.0  ;;  %vm6011_vm3 = vcmp.ge.f32.partialorder %v5995_v7, 0.0 }
 0x4ec   : > { %vm6012_vm4 = vcmp.ge.f32.partialorder %v5996_v16, 0.0  ;;  %vm6013_vm5 = vcmp.ge.f32.partialorder %v5997_v56, 0.0  ;;  %vm6014_vm6 = vcmp.ge.f32.partialorder %v5998_v8, 0.0  ;;  %vm6015_vm7 = vcmp.ge.f32.partialorder %v5999_v11, 0.0 }
 0x4ed   : > { %vm6016_vm8 = vcmp.ge.f32.partialorder %v6000_v17, 0.0  ;;  %vm6017_vm9 = vcmp.ge.f32.partialorder %v6001_v3, 0.0  ;;  %vm6018_vm10 = vcmp.ge.f32.partialorder %v6002_v57, 0.0  ;;  %vm6019_vm11 = vcmp.ge.f32.partialorder %v6003_v15, 0.0 }
 0x4ee   : > { %vm6020_vm12 = vcmp.ge.f32.partialorder %v6004_v18, 0.0  ;;  %vm6021_vm13 = vcmp.ge.f32.partialorder %v6005_v60, 0.0  ;;  %vm6022_vm14 = vcmp.ge.f32.partialorder %v6006_v13, 0.0  ;;  %vm6023_vm15 = vcmp.ge.f32.partialorder %v6007_v14, 0.0 }
 0x4ef   : > { %v6024_v45 = vmul.f32 0.2, %v5992_v2  ;;  %v6025_v48 = vmul.f32 0.2, %v5993_v6  ;;  %v6026_v49 = vmul.f32 0.2, %v5994_v5 }
 0x4f0   : > { %v6027_v42 = vmul.f32 0.2, %v5995_v7  ;;  %v6028_v23 = vmul.f32 0.2, %v5996_v16  ;;  %v6029_v24 = vmul.f32 0.2, %v5997_v56 }
 0x4f1   : > { %v6030_v30 = vmul.f32 0.2, %v5998_v8  ;;  %v6031_v21 = vmul.f32 0.2, %v5999_v11  ;;  %v6032_v22 = vmul.f32 0.2, %v6000_v17  ;;  %v6040_v25 = vsel %vm6008_vm0, %v5992_v2, %v6024_v45 }
 0x4f2   : > { %v6033_v27 = vmul.f32 0.2, %v6001_v3  ;;  %v6034_v31 = vmul.f32 0.2, %v6002_v57  ;;  %v6035_v26 = vmul.f32 0.2, %v6003_v15  ;;  %v6041_v28 = vsel %vm6009_vm1, %v5993_v6, %v6025_v48 }
 0x4f3   : > { %v6036_v33 = vmul.f32 0.2, %v6004_v18  ;;  %v6037_v32 = vmul.f32 0.2, %v6005_v60  ;;  %v6038_v39 = vmul.f32 0.2, %v6006_v13  ;;  %v6042_v20 = vsel %vm6010_vm2, %v5994_v5, %v6026_v49 }
 0x4f4   : > { %v6039_v9 = vmul.f32 0.2, %v6007_v14  ;;  %v6043_v35 = vsel %vm6011_vm3, %v5995_v7, %v6027_v42  ;;  %v6044_v40 = vsel %vm6012_vm4, %v5996_v16, %v6028_v23  ;;  %v6045_v37 = vsel %vm6013_vm5, %v5997_v56, %v6029_v24 }
 0x4f5   : > { %v6046_v38 = vsel %vm6014_vm6, %v5998_v8, %v6030_v30  ;;  %v6047_v34 = vsel %vm6015_vm7, %v5999_v11, %v6031_v21  ;;  %v6048_v36 = vsel %vm6016_vm8, %v6000_v17, %v6032_v22  ;;  %v6049_v41 = vsel %vm6017_vm9, %v6001_v3, %v6033_v27 }
 0x4f6   : > { %v6050_v43 = vsel %vm6018_vm10, %v6002_v57, %v6034_v31  ;;  %v6051_v46 = vsel %vm6019_vm11, %v6003_v15, %v6035_v26  ;;  %v6052_v44 = vsel %vm6020_vm12, %v6004_v18, %v6036_v33  ;;  %v6053_v47 = vsel %vm6021_vm13, %v6005_v60, %v6037_v32 }
 0x4f7   : > { %v6054_v54 = vsel %vm6022_vm14, %v6006_v13, %v6038_v39  ;;  %v6055_v12 = vsel %vm6023_vm15, %v6007_v14, %v6039_v9  ;;  %v6064_v61 = vmul.f32 %v6056_v63, %v6040_v25  ;;  %v6065_v59 = vmul.f32 %v6057_v52, %v6041_v28 }
 0x4f8   : > { %v6066_v19 = vmul.f32 %v6058_v53, %v6042_v20  ;;  %v6067_v2 = vmul.f32 %v6059_v55, %v6043_v35  ;;  %v6068_v6 = vmul.f32 %v6060_v50, %v6044_v40  ;;  %v6069_v5 = vmul.f32 %v6061_v58, %v6045_v37 }
 0x4f9   : > { %v6070_v7 = vmul.f32 %v6062_v62, %v6046_v38  ;;  %v6071_v10 = vmul.f32 %v6063_v1, %v6047_v34  ;;  %v6072_v4 = vmul.f32 %v6056_v63, %v6048_v36  ;;  %v6073_v51 = vmul.f32 %v6057_v52, %v6049_v41 }
 0x4fa   : > { %v6074_v0 = vmul.f32 %v6058_v53, %v6050_v43  ;;  %v6075_v16 = vmul.f32 %v6059_v55, %v6051_v46  ;;  %v6076_v56 = vmul.f32 %v6060_v50, %v6052_v44  ;;  %v6077_v8 = vmul.f32 %v6061_v58, %v6053_v47 }
 0x4fb   : > { %v6078_v11 = vmul.f32 %v6062_v62, %v6054_v54  ;;  %v6079_v17 = vmul.f32 %v6063_v1, %v6055_v12  ;;  %v6080_v3 = vadd.f32 %v6068_v6, %v6064_v61  ;;  %v6087_v57 = vadd.f32 %v6069_v5, %v6065_v59 }
 0x4fc   : > { %v6094_v15 = vadd.f32 %v6070_v7, %v6066_v19  ;;  %v6101_v18 = vadd.f32 %v6071_v10, %v6067_v2  ;;  %v6108_v60 = vadd.f32 %v6076_v56, %v6072_v4  ;;  %v6115_v13 = vadd.f32 %v6077_v8, %v6073_v51 }
 0x4fd   : > { %v6081_v14 = vrot.slane %v6080_v3, 4  ;;  %v6088_v45 = vrot.slane %v6087_v57, 4  ;;  %v6122_v48 = vadd.f32 %v6078_v11, %v6074_v0  ;;  %v6129_v49 = vadd.f32 %v6079_v17, %v6075_v16 }
 0x4fe   : > { %v6095_v42 = vrot.slane %v6094_v15, 4  ;;  %v6102_v23 = vrot.slane %v6101_v18, 4  ;;  %v6109_v24 = vrot.slane %v6108_v60, 4  ;;  %v6116_v30 = vrot.slane %v6115_v13, 4 }
 0x4ff   : > { %v6082_v21 = vadd.f32 %v6081_v14, %v6080_v3  ;;  %v6089_v22 = vadd.f32 %v6088_v45, %v6087_v57  ;;  %v6123_v25 = vrot.slane %v6122_v48, 4  ;;  %v6130_v27 = vrot.slane %v6129_v49, 4 }
 0x500   : > { %v6096_v31 = vadd.f32 %v6095_v42, %v6094_v15  ;;  %v6103_v26 = vadd.f32 %v6102_v23, %v6101_v18  ;;  %v6110_v28 = vadd.f32 %v6109_v24, %v6108_v60  ;;  %v6117_v33 = vadd.f32 %v6116_v30, %v6115_v13 }
 0x501   : > { %v6083_v32 = vrot.slane %v6082_v21, 2  ;;  %v6090_v39 = vrot.slane %v6089_v22, 2  ;;  %v6124_v20 = vadd.f32 %v6123_v25, %v6122_v48  ;;  %v6131_v9 = vadd.f32 %v6130_v27, %v6129_v49 }
 0x502   : > { %v6097_v35 = vrot.slane %v6096_v31, 2  ;;  %v6104_v40 = vrot.slane %v6103_v26, 2  ;;  %v6111_v37 = vrot.slane %v6110_v28, 2  ;;  %v6118_v38 = vrot.slane %v6117_v33, 2 }
 0x503   : > { %v6084_v34 = vadd.f32 %v6083_v32, %v6082_v21  ;;  %v6091_v36 = vadd.f32 %v6090_v39, %v6089_v22  ;;  %v6125_v41 = vrot.slane %v6124_v20, 2  ;;  %v6132_v43 = vrot.slane %v6131_v9, 2 }
 0x504   : > { %v6098_v46 = vadd.f32 %v6097_v35, %v6096_v31  ;;  %v6105_v44 = vadd.f32 %v6104_v40, %v6103_v26  ;;  %v6112_v47 = vadd.f32 %v6111_v37, %v6110_v28  ;;  %v6119_v63 = vadd.f32 %v6118_v38, %v6117_v33 }
 0x505   : > { %v6085_v52 = vrot.slane %v6084_v34, 1  ;;  %v6092_v53 = vrot.slane %v6091_v36, 1  ;;  %v6126_v54 = vadd.f32 %v6125_v41, %v6124_v20  ;;  %v6133_v12 = vadd.f32 %v6132_v43, %v6131_v9 }
 0x506   : > { %v6099_v55 = vrot.slane %v6098_v46, 1  ;;  %v6106_v50 = vrot.slane %v6105_v44, 1  ;;  %v6113_v58 = vrot.slane %v6112_v47, 1  ;;  %v6120_v61 = vrot.slane %v6119_v63, 1 }
 0x507   : > { %v6086_v59 = vadd.f32 %v6085_v52, %v6084_v34  ;;  %v6093_v62 = vadd.f32 %v6092_v53, %v6091_v36  ;;  %v6127_v1 = vrot.slane %v6126_v54, 1  ;;  %v6134_v19 = vrot.slane %v6133_v12, 1 }
 0x508   : > { %v6100_v2 = vadd.f32 %v6099_v55, %v6098_v46  ;;  %v6107_v6 = vadd.f32 %v6106_v50, %v6105_v44  ;;  %v6114_v5 = vadd.f32 %v6113_v58, %v6112_v47  ;;  %v6121_v7 = vadd.f32 %v6120_v61, %v6119_v63 }
 0x509   : > { %v6128_v10 = vadd.f32 %v6127_v1, %v6126_v54  ;;  %v6135_v4 = vadd.f32 %v6134_v19, %v6133_v12  ;;  %v6144_v51 = vcombine.low %v6086_v59, %v6093_v62  ;;  %vm6183_vm0 = vcmask 1041409  }
 0x50a   : > { %v6145_v0 = vcombine.low %v6100_v2, %v6107_v6  ;;  %v6161_v16 = vcombine.low %v6114_v5, %v6121_v7  ;;  %vm6185_vm1 = vcmask 1043459   ;;  %vm6187_vm2 = vcmask 1045509  }
 0x50b   : > { %v6152_v56 = vrot.slane %v6144_v51, %v10347_v29  ;;  %v6162_v8 = vcombine.low %v6128_v10, %v6135_v4  ;;  %vm6189_vm3 = vcmask 1047559  }
 0x50c   : > { %v6159_v11 = vrot.slane %v6145_v0, %v10347_v29  ;;  %v6169_v17 = vrot.slane %v6161_v16, %v10347_v29 }
 0x50d   : > { %v6176_v3 = vrot.slane %v6162_v8, %v10347_v29 }
 0x50e   : > { %v6160_v57 = vcombine.low %v6152_v56, %v6159_v11 }
 0x50f   : > { %v6177_v15 = vcombine.low %v6169_v17, %v6176_v3 }
 0x511   : > { %v6182_v18 = vrot.slane %v6177_v15, 7 }
 0x513   : > { %v6184_v60 = vsel %vm6183_vm0, %v6182_v18, %v6160_v57 }
 0x514   : > { %v6186_v13 = vsel %vm6185_vm1, %v6182_v18, %v6184_v60 }
 0x515   : > { %v6188_v14 = vsel %vm6187_vm2, %v6182_v18, %v6186_v13 }
 0x516   : > { %v6190_v45 = vsel %vm6189_vm3, %v6182_v18, %v6188_v14 }
 0x517   : > { %6192 = vst [vmem:[%s9527_s18] sm:$0xff] %v6190_v45 }
 0x518 PF: > { %s10500_s13 = sld [smem:[#allocation17_spill]]  ;;  %s10501_s11 = sld [smem:[#allocation24_spill]] }
 0x519   : > { %s10502_s12 = sld [smem:[#allocation27_spill]]  ;;  %s6208_s30 = sshll.u32 %s9527_s18, 4  ;;  %s6209_s30 = int_to_ptr.vmem [resolvable:$true] %s6208_s30 }
 0x51a   : > { %s6194_s14 = scalar_lea.sflag [#allocation5], %s9513_s5  ;;  %s8039_s7 = scalar_lea.vmem %s6209_s30, 128 }
 0x51b   : > { %p8040_p4 = scmp.ne.s32.totalorder %s6209_s30, %s8039_s7  ;;  %s8194_s15 = smov [#allocation10]  }
 0x51c   : > { %s8043_s20 = sshll.u32 %s8194_s15, 4  ;;  %s8044_s20 = int_to_ptr.vmem [resolvable:$false] %s8043_s20 }
 0x51d   : > { %s8045_s8 = scalar_lea.vmem %s8044_s20, 256  ;;  %p8046_p0 = scmp.lt.s32.totalorder %s6209_s30, %s8044_s20 }
 0x51e   : > { %s6933_s22 = sshll.u32 %s10500_s13, 7  ;;  %p10503_p3 = scmp.ne.s32.totalorder %s10501_s11, 0 }
 0x51f   : > { %s10382_s9 = scalar_lea.hbm %s10502_s12, %s6933_s22  ;;  %p8047_p9 = scmp.lt.s32.totalorder %s8045_s8, %s8039_s7 }
 0x520   : > { %p8041_p12 = pnand %p8040_p4, %p10503_p3 }
 0x521   : > { %p8048_p13 = por %p8047_p9, %p8046_p0 }
 0x522   : > { %p8042_p6 = pneg %p8041_p12 }
 0x524   : > { %p8049_p10 = pnand %p8048_p13, %p8042_p6 }
 0x526   : > { %8052 = shalt.err (!%p8049_p10)
}
 0x527   : > { %s8053_s5 = scalar_lea.hbm %s10382_s9, 128  ;;  %s8057_s10 = scalar_lea.hbm %s10502_s12, 256 }
 0x528   : > { %p8054_p5 = scmp.ne.s32.totalorder %s10382_s9, %s8053_s5  ;;  %p8058_p8 = scmp.lt.u32.totalorder %s10382_s9, %s10502_s12 }
 0x529   : > { %p8059_p11 = scmp.lt.u32.totalorder %s8057_s10, %s8053_s5  ;;  %p8061_p4 = scmp.lt.u32.totalorder %s8053_s5, %s10382_s9 }
 0x52a   : > { %p8055_p2 = pnand %p8054_p5, %p10503_p3 }
 0x52b   : > { %p8060_p1 = por %p8059_p11, %p8058_p8 }
 0x52c   : > { %p8056_p7 = pneg %p8055_p2 }
 0x52d   : > { %p8062_p12 = por %p8061_p4, %p8060_p1 }
 0x52f   : > { %p8063_p6 = pnand %p8062_p12, %p8056_p7 }
 0x531   : > { %8066 = shalt.err (!%p8063_p6)
}
 0x532   : > { %7052 = dma.vmem_to_hbm [thread:$0]  (%p10503_p3), %s6209_s30, 128, %s10382_s9, %s6194_s14  }
 0x533 PF: > { %s10504_s28 = sld [smem:[#allocation14_spill]]  ;;  %s10505_s6 = sld [smem:[#allocation25_spill]] }
 0x534   : > { %p7058_p0 = scmp.ge.s32.totalorder %s8181_s27, 2 }
 0x539   : > { %s6220_s13 = sand.u32 1, %s10504_s28   ;;  %p10506_p9 = scmp.ne.s32.totalorder %s10505_s6, 0 }
 0x53a   : > { %s6221_s22 = scalar_lea.sflag [#allocation5], %s6220_s13 }
 0x53b   : > { %p7055_p13 = pnand %p7058_p0, %p10506_p9 }
 0x53d   : > { %8128 = dma.done.wait (!%p7055_p13), %s6221_s22, 128  }
 0x53e   : > { %8130 = vsyncadd (!%p7055_p13), %s6221_s22, 4294967168  ;;  %s23_s27 = sadd.s32 1, %s8181_s27   ;;  %s10508_s11 = sld [smem:[#allocation22_spill]] }
 0x53f   : > { %p10408_p10 = scmp.ge.s32.totalorder %s23_s27, 10   ;;  %s10509_s4 = sld [smem:[#allocation21_spill]] }
 0x540   : > { %s10510_s9 = sld [smem:[#allocation15_spill]]  ;;  %s10511_s22 = sld [smem:[#allocation20_spill]] }
 0x541   : > { %s10512_s30 = sld [smem:[#allocation18_spill]]  ;;  %s10513_s14 = sld [smem:[#allocation19_spill]] }
 0x542   : > { %s10515_s15 = smov %s8137_s16  ;;  %s10516_s16 = smov %s8141_s17 }
 0x543   : > { %s10518_s18 = smov %s8149_s19  ;;  %s10520_s20 = smov %s8157_s21 }
 0x544   : > { %s10517_s17 = smov %s10508_s11  ;;  %s10522_s23 = smov %s8173_s25 }
 0x545   : > { %s10519_s19 = smov %s10509_s4  ;;  %s10523_s24 = smov %s8177_s26 }
 0x546   : > { %s10521_s21 = smov %s10510_s9  ;;  %22 = sbr.rel (!%p10408_p10) target bundleno = 15 (0xf), region = 145 }
 0x547   : > { %s10524_s25 = smov %s10512_s30  ;;  %s10525_s26 = smov %s10513_s14 }
 0x54d   :  { %6226 = vsyncpa [#allocation4], 1 }
 0x54e   :  { %6228 = vsyncpa [#allocation4 + $0x1], 1 }
 0x54f   :  { %6229 = vsyncpa [#allocation8], 1 }
 0x550   :  { %6231 = vsyncpa [#allocation8 + $0x1], 1 }
 0x551   :  { %6232 = vsyncpa [#allocation5], 1 }
 0x552   :  { %6234 = vsyncpa [#allocation5 + $0x1], 1 }

</bundles_post_ra>
